<compile_context>
chip_gen: v7x
topology: tpu7x:2x2x1
jax: 0.10.0
libtpu: 0.0.40
codegen_flags: <defaults>
</compile_context>

<pallas_src>
import math

import numpy as np
import jax
import jax.numpy as jnp
from jax.experimental import pallas as pl
from jax.experimental.pallas import tpu as pltpu

_RED = 8  # CALayer reduction


# ---------------------------------------------------------------------------
# Static slab layout.  Row bands are padded to multiples of 16 so bf16 (16,128)
# tiles stay aligned; `rows`/`cols` stored per layer are the *actual* extents
# used by the in-kernel static slices.
# ---------------------------------------------------------------------------
def _pad16(n):
    return -(-n // 16) * 16


def _weight_layout():
    layers = [("conv1", 5 * 1, 32), ("conv2", 5 * 32, 64)]
    for b in range(3):
        layers += [
            (f"b{b}_f1", 7 * 64, 128),   # Block.conv1 (K=7) + Block.conv4 (1x1) fused
            (f"b{b}_c2", 5 * 64, 64),    # Block.conv2 (K=5)
            (f"b{b}_c3", 3 * 64, 64),    # Block.conv3 (K=3)
            (f"b{b}_ca1", 64, _RED),     # CALayer squeeze 1x1 (effective weight_norm W)
            (f"b{b}_ca2", _RED, 64),     # CALayer excite 1x1
        ]
    layers.append(("fc", 64, 128))       # fc1 @ fc2 folded, lane-padded to 128
    offs, brow, off = {}, {}, 0
    for i, (name, rows, cols) in enumerate(layers):
        offs[name] = (off, rows, cols)
        brow[name] = i
        off += _pad16(rows)
    return layers, offs, brow, off


# ---------------------------------------------------------------------------
# Fused kernel: conv1 -> conv2 -> 3x Block -> AvgPool -> (fc1∘fc2)
# ---------------------------------------------------------------------------
def _make_kernel(tb, L, offs, brow):
    N = tb * L
    SHIFTS = (-3, -2, -1, 1, 2, 3)

    def kernel(x_ref, w_ref, b_ref, o_ref):
        # Hoisted row-in-sample index and per-shift boundary masks (JAX does
        # not CSE broadcast_in_dim; build them once, reuse everywhere).
        row = jax.lax.broadcasted_iota(jnp.int32, (N, 1), 0) % L
        masks = {s: ((row < s) if s > 0 else (row >= L + s)) for s in SHIFTS}

        def shift(x, s):
            # y[l] = x[l - s] within each sample; rows shifted in from outside
            # the sample's [0, L) window are zeroed -> 'same' zero padding.
            if s == 0:
                return x
            return jnp.where(masks[s], 0.0, pltpu.roll(x, shift=s % N, axis=0))

        def im2col(x, K):
            # cols[:, k*Cin + ci] = x[l + k - pad, ci]; pairs with the
            # (K*Cin, Cout) flattened weight.  (64-wide pieces at non-128-lane
            # offsets are a check-the-bundle item per the review.)
            p = (K - 1) // 2
            return jnp.concatenate([shift(x, p - k) for k in range(K)], axis=1)

        def mm(lhs, name):
            off, rows, cols = offs[name]
            w = w_ref[off:off + rows, :cols]                 # bf16, VMEM-resident
            bias = b_ref[brow[name]:brow[name] + 1, :cols]   # f32
            return jnp.dot(lhs.astype(jnp.bfloat16), w,
                           preferred_element_type=jnp.float32) + bias

        def seg_mean(h):     # (N, C) -> (tb, C): per-sample mean over L rows
            return jnp.concatenate(
                [jnp.mean(h[s * L:(s + 1) * L], axis=0, keepdims=True)
                 for s in range(tb)], axis=0)

        def seg_expand(v):   # (tb, C) -> (N, C): repeat each sample's row L times
            return jnp.concatenate(
                [jnp.broadcast_to(v[s:s + 1], (L, v.shape[1]))
                 for s in range(tb)], axis=0)

        x = x_ref[...].astype(jnp.float32)              # (N, 1): tb samples stacked
        a = mm(im2col(x, 5), "conv1")                   # Net.conv1 (no activation)
        a = mm(im2col(a, 5), "conv2")                   # Net.conv2 (no activation)

        for blk in range(3):                            # block1..block3, unrolled
            cat = mm(im2col(a, 7), f"b{blk}_f1")        # (N, 128) = [conv1 | conv4(res)]
            h = jnp.maximum(cat[:, :64], 0.0)           # relu(conv1(x))
            r = cat[:, 64:]                             # conv4(res), held for the add
            h = jnp.maximum(mm(im2col(h, 5), f"b{blk}_c2"), 0.0)
            h = jnp.maximum(mm(im2col(h, 3), f"b{blk}_c3"), 0.0)
            # CALayer: per-sample GAP -> 1x1 -> ReLU -> 1x1 -> sigmoid -> scale
            y = seg_mean(h)                                       # (tb, 64)
            z = jnp.maximum(mm(y, f"b{blk}_ca1"), 0.0)            # (tb, 8)
            sc = jax.nn.sigmoid(mm(z, f"b{blk}_ca2"))             # (tb, 64)
            a = jnp.maximum(h * seg_expand(sc) + r, 0.0)          # (N, 64)

        pooled = seg_mean(a)                            # AvgPool1d(L) per sample
        o_ref[0] = mm(pooled, "fc").astype(o_ref.dtype)  # (tb, 128) lane-dense store

    return kernel


# ---------------------------------------------------------------------------
# Wrapper: one pallas_call for the whole network
# ---------------------------------------------------------------------------
def net_forward(x_ncl, w_slab, b_slab, *, n_out, tb=4):
    """x_ncl: (B, 1, L) f32 (PyTorch NCL layout). Returns torch-style squeezed logits."""
    B, _, L = x_ncl.shape
    assert n_out <= 128
    _, offs, brow, _ = _weight_layout()

    G = -(-B // tb)            # grid steps
    B_pad = G * tb

    x = x_ncl.reshape(B, L, 1)                       # free view: middle dim is 1
    if B_pad != B:
        x = jnp.concatenate([x, jnp.zeros((B_pad - B, L, 1), x.dtype)], axis=0)
    x_flat = x.reshape(B_pad * L, 1)                 # tb*L rows per grid step

    out = pl.pallas_call(
        _make_kernel(tb, L, offs, brow),
        out_shape=jax.ShapeDtypeStruct((G, tb, 128), jnp.float32),
        grid=(G,),
        in_specs=[
            pl.BlockSpec((tb * L, 1), lambda i: (i, 0)),
            # Whole-array blocks with constant index maps: the two slabs are
            # DMA'd once and stay VMEM-resident for all grid steps (2 DMAs
            # instead of 44).  Default double-buffering only costs ~0.8 MiB
            # extra VMEM (far under every generation's limit), so the
            # single-buffer pipeline_mode hint is intentionally omitted.
            pl.BlockSpec(w_slab.shape, lambda i: (0, 0)),
            pl.BlockSpec(b_slab.shape, lambda i: (0, 0)),
        ],
        out_specs=pl.BlockSpec((1, tb, 128), lambda i: (i, 0, 0)),
        compiler_params=pltpu.CompilerParams(
            dimension_semantics=("parallel",)),      # 2 TCs on v7x; no-op v5e/v6e
    )(x_flat, w_slab, b_slab)

    logits = out.reshape(B_pad, 128)[:B, :n_out]
    return jnp.squeeze(logits)                       # matches PyTorch x.squeeze()


# ---------------------------------------------------------------------------
# Synthetic parameters (raw, per-layer flattened layouts) + slab packing.
# A real checkpoint loader would permute torch (Cout,Cin,K) -> (K,Cin,Cout)
# and compute g*v/||v|| for the weight_norm CA convs before packing.
# ---------------------------------------------------------------------------
def init_params(key, n_out=7):
    ctr = [0]

    def nk():
        ctr[0] += 1
        return jax.random.fold_in(key, ctr[0])

    def conv_wb(K, cin, cout):
        s = 1.0 / math.sqrt(cin * K)
        w = s * jax.random.normal(nk(), (K, cin, cout), jnp.float32)
        bias = s * jax.random.normal(nk(), (cout,), jnp.float32)
        return [w.reshape(K * cin, cout), bias]

    def lin_wb(cin, cout):
        s = 1.0 / math.sqrt(cin)
        w = s * jax.random.normal(nk(), (cin, cout), jnp.float32)
        bias = s * jax.random.normal(nk(), (cout,), jnp.float32)
        return [w, bias]

    flat = []
    flat += conv_wb(5, 1, 32)          # Net.conv1
    flat += conv_wb(5, 32, 64)         # Net.conv2
    for _ in range(3):                 # block1..block3
        flat += conv_wb(7, 64, 64)     # Block.conv1
        flat += conv_wb(5, 64, 64)     # Block.conv2
        flat += conv_wb(3, 64, 64)     # Block.conv3
        flat += lin_wb(64, _RED)       # CALayer squeeze (effective weight_norm W)
        flat += lin_wb(_RED, 64)       # CALayer excite
        flat += lin_wb(64, 64)         # Block.conv4 (1x1 conv)
    flat += lin_wb(64, 32)             # fc1
    flat += lin_wb(32, n_out)          # fc2
    return flat                        # 44 raw arrays


def pack_weights(raw):
    """Fuse Block.conv4 into Block.conv1, fold fc1∘fc2 (exact: no activation
    between them), cast weights to bf16, and pack into two DMA slabs."""
    layers, offs, brow, total = _weight_layout()
    w_slab = np.zeros((total, 128), np.float32)
    b_slab = np.zeros((len(layers), 128), np.float32)

    def put(name, w, bias):
        off, _, _ = offs[name]
        w = np.asarray(w, np.float32)
        bias = np.asarray(bias, np.float32).reshape(-1)
        w_slab[off:off + w.shape[0], :w.shape[1]] = w
        b_slab[brow[name], :bias.shape[0]] = bias

    put("conv1", raw[0], raw[1])
    put("conv2", raw[2], raw[3])
    idx = 4
    for blk in range(3):
        (bw1, bb1, bw2, bb2, bw3, bb3,
         cw1, cb1, cw2, cb2, w4, b4) = raw[idx:idx + 12]
        idx += 12
        fused_w = np.zeros((7 * 64, 128), np.float32)
        fused_w[:, :64] = np.asarray(bw1, np.float32)
        fused_w[3 * 64:4 * 64, 64:] = np.asarray(w4, np.float32)  # center tap == res
        fused_b = np.concatenate([np.asarray(bb1, np.float32).reshape(-1),
                                  np.asarray(b4, np.float32).reshape(-1)])
        put(f"b{blk}_f1", fused_w, fused_b)
        put(f"b{blk}_c2", bw2, bb2)
        put(f"b{blk}_c3", bw3, bb3)
        put(f"b{blk}_ca1", cw1, cb1)
        put(f"b{blk}_ca2", cw2, cb2)

    fc1_w, fc1_b, fc2_w, fc2_b = [np.asarray(a, np.float32) for a in raw[-4:]]
    fc_w = fc1_w @ fc2_w
    fc_b = fc1_b.reshape(1, -1) @ fc2_w + fc2_b.reshape(1, -1)
    put("fc", fc_w, fc_b)

    return jnp.asarray(w_slab, jnp.bfloat16), jnp.asarray(b_slab, jnp.float32)


# ---------------------------------------------------------------------------
if __name__ == "__main__":
    SEQ = 32     # Net(input=SEQ): the AvgPool1d kernel spans the full length
    B = 8        # with TB=4 -> grid=(2,): 128 MXU rows per step, 2 parallel steps
    TB = 4
    N_OUT = 7

    key = jax.random.PRNGKey(0)
    raw = init_params(key, n_out=N_OUT)
    w_slab, b_slab = pack_weights(raw)
    x = jax.random.normal(jax.random.fold_in(key, 999),
                          (B, 1, SEQ), jnp.float32)       # PyTorch NCL input

    fwd = jax.jit(net_forward, static_argnames=("n_out", "tb"))
    out = jax.block_until_ready(fwd(x, w_slab, b_slab, n_out=N_OUT, tb=TB))
    assert out.shape == (B, N_OUT), out.shape
    assert bool(jnp.all(jnp.isfinite(out)))
    print("KERNEL_OK")
</pallas_src>

<mosaic_0001>
module attributes {stable_mosaic.version = 11 : i64} {
  func.func @kernel(%arg0: i32, %arg1: memref<128x1xf32, #tpu.memory_space<vmem>>, %arg2: memref<3360x128xbf16, #tpu.memory_space<vmem>>, %arg3: memref<18x128xf32, #tpu.memory_space<vmem>>, %arg4: memref<1x4x128xf32, #tpu.memory_space<vmem>>) attributes {dimension_semantics = [#tpu.dimension_semantics<parallel>], iteration_bounds = array<i64: 2>, scalar_prefetch = 0 : i64, scratch_operands = 0 : i64, tpu.core_type = #tpu.core_type<tc>, window_params = [{transform_indices = @transform_0, window_bounds = array<i64: 128, 1>}, {pipeline_mode = #tpu.pipeline_mode<synchronous>, transform_indices = @transform_1, window_bounds = array<i64: 3360, 128>}, {pipeline_mode = #tpu.pipeline_mode<synchronous>, transform_indices = @transform_2, window_bounds = array<i64: 18, 128>}, {transform_indices = @transform_3, window_bounds = array<i64: 1, 4, 128>}]} {
    %0 = tpu.iota {dimensions = array<i32: 0>} : vector<128x1xi32>
    %c32_i32 = arith.constant 32 : i32
    %c0_i32 = arith.constant 0 : i32
    %1 = arith.cmpi eq, %c32_i32, %c0_i32 : i32
    %c1_i32 = arith.constant 1 : i32
    %2 = arith.select %1, %c1_i32, %c32_i32 : i32
    %3 = vector.broadcast %2 : i32 to vector<128x1xi32>
    %4 = arith.remsi %0, %3 : vector<128x1xi32>
    %c0_i32_0 = arith.constant 0 : i32
    %5 = vector.broadcast %c0_i32_0 : i32 to vector<128x1xi32>
    %6 = arith.cmpi ne, %4, %5 : vector<128x1xi32>
    %c0_i32_1 = arith.constant 0 : i32
    %7 = vector.broadcast %c0_i32_1 : i32 to vector<128x1xi32>
    %8 = arith.cmpi slt, %4, %7 : vector<128x1xi32>
    %c0_i32_2 = arith.constant 0 : i32
    %9 = arith.cmpi slt, %2, %c0_i32_2 : i32
    %10 = vector.broadcast %9 : i1 to vector<128x1xi1>
    %11 = vector.broadcast %10 : vector<128x1xi1> to vector<128x1xi1>
    %12 = arith.xori %8, %11 : vector<128x1xi1>
    %13 = arith.andi %12, %6 : vector<128x1xi1>
    %14 = vector.broadcast %2 : i32 to vector<128x1xi32>
    %15 = arith.addi %4, %14 : vector<128x1xi32>
    %16 = arith.select %13, %15, %4 : vector<128x1xi1>, vector<128x1xi32>
    %c29_i32 = arith.constant 29 : i32
    %17 = vector.broadcast %c29_i32 : i32 to vector<128x1xi32>
    %18 = arith.cmpi sge, %16, %17 : vector<128x1xi32>
    %c30_i32 = arith.constant 30 : i32
    %19 = vector.broadcast %c30_i32 : i32 to vector<128x1xi32>
    %20 = arith.cmpi sge, %16, %19 : vector<128x1xi32>
    %c31_i32 = arith.constant 31 : i32
    %21 = vector.broadcast %c31_i32 : i32 to vector<128x1xi32>
    %22 = arith.cmpi sge, %16, %21 : vector<128x1xi32>
    %c1_i32_3 = arith.constant 1 : i32
    %23 = vector.broadcast %c1_i32_3 : i32 to vector<128x1xi32>
    %24 = arith.cmpi slt, %16, %23 : vector<128x1xi32>
    %c2_i32 = arith.constant 2 : i32
    %25 = vector.broadcast %c2_i32 : i32 to vector<128x1xi32>
    %26 = arith.cmpi slt, %16, %25 : vector<128x1xi32>
    %c3_i32 = arith.constant 3 : i32
    %27 = vector.broadcast %c3_i32 : i32 to vector<128x1xi32>
    %28 = arith.cmpi slt, %16, %27 : vector<128x1xi32>
    %c0 = arith.constant 0 : index
    %c0_4 = arith.constant 0 : index
    %29 = vector.load %arg1[%c0, %c0_4] : memref<128x1xf32, #tpu.memory_space<vmem>>, vector<128x1xf32>
    %c2_i32_5 = arith.constant 2 : i32
    %30 = tpu.dynamic_rotate %29 by %c2_i32_5 dim 0 : vector<128x1xf32>, i32 -> vector<128x1xf32>
    %cst = arith.constant 0.000000e+00 : f32
    %31 = vector.broadcast %cst : f32 to vector<128x1xf32>
    %32 = arith.select %26, %31, %30 : vector<128x1xi1>, vector<128x1xf32>
    %c1_i32_6 = arith.constant 1 : i32
    %33 = tpu.dynamic_rotate %29 by %c1_i32_6 dim 0 : vector<128x1xf32>, i32 -> vector<128x1xf32>
    %cst_7 = arith.constant 0.000000e+00 : f32
    %34 = vector.broadcast %cst_7 : f32 to vector<128x1xf32>
    %35 = arith.select %24, %34, %33 : vector<128x1xi1>, vector<128x1xf32>
    %c127_i32 = arith.constant 127 : i32
    %36 = tpu.dynamic_rotate %29 by %c127_i32 dim 0 : vector<128x1xf32>, i32 -> vector<128x1xf32>
    %cst_8 = arith.constant 0.000000e+00 : f32
    %37 = vector.broadcast %cst_8 : f32 to vector<128x1xf32>
    %38 = arith.select %22, %37, %36 : vector<128x1xi1>, vector<128x1xf32>
    %c126_i32 = arith.constant 126 : i32
    %39 = tpu.dynamic_rotate %29 by %c126_i32 dim 0 : vector<128x1xf32>, i32 -> vector<128x1xf32>
    %cst_9 = arith.constant 0.000000e+00 : f32
    %40 = vector.broadcast %cst_9 : f32 to vector<128x1xf32>
    %41 = arith.select %20, %40, %39 : vector<128x1xi1>, vector<128x1xf32>
    %42 = tpu.concatenate %32, %35, %29, %38, %41 in 1 : vector<128x1xf32>, vector<128x1xf32>, vector<128x1xf32>, vector<128x1xf32>, vector<128x1xf32> -> vector<128x5xf32>
    %c0_10 = arith.constant 0 : index
    %c0_11 = arith.constant 0 : index
    %43 = vector.load %arg2[%c0_10, %c0_11] : memref<3360x128xbf16, #tpu.memory_space<vmem>>, vector<5x32xbf16>
    %c0_12 = arith.constant 0 : index
    %c0_13 = arith.constant 0 : index
    %44 = vector.load %arg3[%c0_12, %c0_13] : memref<18x128xf32, #tpu.memory_space<vmem>>, vector<1x32xf32>
    %45 = arith.truncf %42 : vector<128x5xf32> to vector<128x5xbf16>
    %cst_14 = arith.constant dense<0.000000e+00> : vector<128x32xf32>
    %46 = tpu.matmul %45, %43, %cst_14 {dimension_numbers = #tpu.dot_dimension_numbers<[1], [0], [0], [1], [0, 0, 1, 1], [], []>} : vector<128x5xbf16>, vector<5x32xbf16>, vector<128x32xf32> -> vector<128x32xf32>
    %47 = vector.broadcast %44 : vector<1x32xf32> to vector<128x32xf32>
    %48 = arith.addf %46, %47 : vector<128x32xf32>
    %c2_i32_15 = arith.constant 2 : i32
    %49 = tpu.dynamic_rotate %48 by %c2_i32_15 dim 0 : vector<128x32xf32>, i32 -> vector<128x32xf32>
    %cst_16 = arith.constant 0.000000e+00 : f32
    %50 = vector.shape_cast %26 : vector<128x1xi1> to vector<128x1xi1>
    %51 = vector.broadcast %50 : vector<128x1xi1> to vector<128x32xi1>
    %52 = vector.broadcast %cst_16 : f32 to vector<128x32xf32>
    %53 = arith.select %51, %52, %49 : vector<128x32xi1>, vector<128x32xf32>
    %c1_i32_17 = arith.constant 1 : i32
    %54 = tpu.dynamic_rotate %48 by %c1_i32_17 dim 0 : vector<128x32xf32>, i32 -> vector<128x32xf32>
    %cst_18 = arith.constant 0.000000e+00 : f32
    %55 = vector.shape_cast %24 : vector<128x1xi1> to vector<128x1xi1>
    %56 = vector.broadcast %55 : vector<128x1xi1> to vector<128x32xi1>
    %57 = vector.broadcast %cst_18 : f32 to vector<128x32xf32>
    %58 = arith.select %56, %57, %54 : vector<128x32xi1>, vector<128x32xf32>
    %c127_i32_19 = arith.constant 127 : i32
    %59 = tpu.dynamic_rotate %48 by %c127_i32_19 dim 0 : vector<128x32xf32>, i32 -> vector<128x32xf32>
    %cst_20 = arith.constant 0.000000e+00 : f32
    %60 = vector.shape_cast %22 : vector<128x1xi1> to vector<128x1xi1>
    %61 = vector.broadcast %60 : vector<128x1xi1> to vector<128x32xi1>
    %62 = vector.broadcast %cst_20 : f32 to vector<128x32xf32>
    %63 = arith.select %61, %62, %59 : vector<128x32xi1>, vector<128x32xf32>
    %c126_i32_21 = arith.constant 126 : i32
    %64 = tpu.dynamic_rotate %48 by %c126_i32_21 dim 0 : vector<128x32xf32>, i32 -> vector<128x32xf32>
    %cst_22 = arith.constant 0.000000e+00 : f32
    %65 = vector.shape_cast %20 : vector<128x1xi1> to vector<128x1xi1>
    %66 = vector.broadcast %65 : vector<128x1xi1> to vector<128x32xi1>
    %67 = vector.broadcast %cst_22 : f32 to vector<128x32xf32>
    %68 = arith.select %66, %67, %64 : vector<128x32xi1>, vector<128x32xf32>
    %69 = tpu.concatenate %53, %58, %48, %63, %68 in 1 : vector<128x32xf32>, vector<128x32xf32>, vector<128x32xf32>, vector<128x32xf32>, vector<128x32xf32> -> vector<128x160xf32>
    %c16 = arith.constant 16 : index
    %c0_23 = arith.constant 0 : index
    %70 = vector.load %arg2[%c16, %c0_23] : memref<3360x128xbf16, #tpu.memory_space<vmem>>, vector<160x64xbf16>
    %c1 = arith.constant 1 : index
    %c0_24 = arith.constant 0 : index
    %71 = vector.load %arg3[%c1, %c0_24] : memref<18x128xf32, #tpu.memory_space<vmem>>, vector<1x64xf32>
    %72 = arith.truncf %69 : vector<128x160xf32> to vector<128x160xbf16>
    %cst_25 = arith.constant dense<0.000000e+00> : vector<128x64xf32>
    %73 = tpu.matmul %72, %70, %cst_25 {dimension_numbers = #tpu.dot_dimension_numbers<[1], [0], [0], [1], [0, 0, 1, 1], [], []>} : vector<128x160xbf16>, vector<160x64xbf16>, vector<128x64xf32> -> vector<128x64xf32>
    %74 = vector.broadcast %71 : vector<1x64xf32> to vector<128x64xf32>
    %75 = arith.addf %73, %74 : vector<128x64xf32>
    %c3_i32_26 = arith.constant 3 : i32
    %76 = tpu.dynamic_rotate %75 by %c3_i32_26 dim 0 : vector<128x64xf32>, i32 -> vector<128x64xf32>
    %cst_27 = arith.constant 0.000000e+00 : f32
    %77 = vector.shape_cast %28 : vector<128x1xi1> to vector<128x1xi1>
    %78 = vector.broadcast %77 : vector<128x1xi1> to vector<128x64xi1>
    %79 = vector.broadcast %cst_27 : f32 to vector<128x64xf32>
    %80 = arith.select %78, %79, %76 : vector<128x64xi1>, vector<128x64xf32>
    %c2_i32_28 = arith.constant 2 : i32
    %81 = tpu.dynamic_rotate %75 by %c2_i32_28 dim 0 : vector<128x64xf32>, i32 -> vector<128x64xf32>
    %cst_29 = arith.constant 0.000000e+00 : f32
    %82 = vector.shape_cast %26 : vector<128x1xi1> to vector<128x1xi1>
    %83 = vector.broadcast %82 : vector<128x1xi1> to vector<128x64xi1>
    %84 = vector.broadcast %cst_29 : f32 to vector<128x64xf32>
    %85 = arith.select %83, %84, %81 : vector<128x64xi1>, vector<128x64xf32>
    %c1_i32_30 = arith.constant 1 : i32
    %86 = tpu.dynamic_rotate %75 by %c1_i32_30 dim 0 : vector<128x64xf32>, i32 -> vector<128x64xf32>
    %cst_31 = arith.constant 0.000000e+00 : f32
    %87 = vector.shape_cast %24 : vector<128x1xi1> to vector<128x1xi1>
    %88 = vector.broadcast %87 : vector<128x1xi1> to vector<128x64xi1>
    %89 = vector.broadcast %cst_31 : f32 to vector<128x64xf32>
    %90 = arith.select %88, %89, %86 : vector<128x64xi1>, vector<128x64xf32>
    %c127_i32_32 = arith.constant 127 : i32
    %91 = tpu.dynamic_rotate %75 by %c127_i32_32 dim 0 : vector<128x64xf32>, i32 -> vector<128x64xf32>
    %cst_33 = arith.constant 0.000000e+00 : f32
    %92 = vector.shape_cast %22 : vector<128x1xi1> to vector<128x1xi1>
    %93 = vector.broadcast %92 : vector<128x1xi1> to vector<128x64xi1>
    %94 = vector.broadcast %cst_33 : f32 to vector<128x64xf32>
    %95 = arith.select %93, %94, %91 : vector<128x64xi1>, vector<128x64xf32>
    %c126_i32_34 = arith.constant 126 : i32
    %96 = tpu.dynamic_rotate %75 by %c126_i32_34 dim 0 : vector<128x64xf32>, i32 -> vector<128x64xf32>
    %cst_35 = arith.constant 0.000000e+00 : f32
    %97 = vector.shape_cast %20 : vector<128x1xi1> to vector<128x1xi1>
    %98 = vector.broadcast %97 : vector<128x1xi1> to vector<128x64xi1>
    %99 = vector.broadcast %cst_35 : f32 to vector<128x64xf32>
    %100 = arith.select %98, %99, %96 : vector<128x64xi1>, vector<128x64xf32>
    %c125_i32 = arith.constant 125 : i32
    %101 = tpu.dynamic_rotate %75 by %c125_i32 dim 0 : vector<128x64xf32>, i32 -> vector<128x64xf32>
    %cst_36 = arith.constant 0.000000e+00 : f32
    %102 = vector.shape_cast %18 : vector<128x1xi1> to vector<128x1xi1>
    %103 = vector.broadcast %102 : vector<128x1xi1> to vector<128x64xi1>
    %104 = vector.broadcast %cst_36 : f32 to vector<128x64xf32>
    %105 = arith.select %103, %104, %101 : vector<128x64xi1>, vector<128x64xf32>
    %106 = tpu.concatenate %80, %85, %90, %75, %95, %100, %105 in 1 : vector<128x64xf32>, vector<128x64xf32>, vector<128x64xf32>, vector<128x64xf32>, vector<128x64xf32>, vector<128x64xf32>, vector<128x64xf32> -> vector<128x448xf32>
    %c176 = arith.constant 176 : index
    %c0_37 = arith.constant 0 : index
    %107 = vector.load %arg2[%c176, %c0_37] : memref<3360x128xbf16, #tpu.memory_space<vmem>>, vector<448x128xbf16>
    %c2 = arith.constant 2 : index
    %c0_38 = arith.constant 0 : index
    %108 = vector.load %arg3[%c2, %c0_38] : memref<18x128xf32, #tpu.memory_space<vmem>>, vector<1x128xf32>
    %109 = arith.truncf %106 : vector<128x448xf32> to vector<128x448xbf16>
    %cst_39 = arith.constant dense<0.000000e+00> : vector<128x128xf32>
    %110 = tpu.matmul %109, %107, %cst_39 {dimension_numbers = #tpu.dot_dimension_numbers<[1], [0], [0], [1], [0, 0, 1, 1], [], []>} : vector<128x448xbf16>, vector<448x128xbf16>, vector<128x128xf32> -> vector<128x128xf32>
    %111 = vector.broadcast %108 : vector<1x128xf32> to vector<128x128xf32>
    %112 = arith.addf %110, %111 : vector<128x128xf32>
    %113 = vector.extract_strided_slice %112 {offsets = [0, 0], sizes = [128, 64], strides = [1, 1]} : vector<128x128xf32> to vector<128x64xf32>
    %cst_40 = arith.constant 0.000000e+00 : f32
    %114 = vector.broadcast %cst_40 : f32 to vector<128x64xf32>
    %115 = arith.maximumf %113, %114 : vector<128x64xf32>
    %116 = vector.extract_strided_slice %112 {offsets = [0, 64], sizes = [128, 64], strides = [1, 1]} : vector<128x128xf32> to vector<128x64xf32>
    %c2_i32_41 = arith.constant 2 : i32
    %117 = tpu.dynamic_rotate %115 by %c2_i32_41 dim 0 : vector<128x64xf32>, i32 -> vector<128x64xf32>
    %cst_42 = arith.constant 0.000000e+00 : f32
    %118 = vector.shape_cast %26 : vector<128x1xi1> to vector<128x1xi1>
    %119 = vector.broadcast %118 : vector<128x1xi1> to vector<128x64xi1>
    %120 = vector.broadcast %cst_42 : f32 to vector<128x64xf32>
    %121 = arith.select %119, %120, %117 : vector<128x64xi1>, vector<128x64xf32>
    %c1_i32_43 = arith.constant 1 : i32
    %122 = tpu.dynamic_rotate %115 by %c1_i32_43 dim 0 : vector<128x64xf32>, i32 -> vector<128x64xf32>
    %cst_44 = arith.constant 0.000000e+00 : f32
    %123 = vector.shape_cast %24 : vector<128x1xi1> to vector<128x1xi1>
    %124 = vector.broadcast %123 : vector<128x1xi1> to vector<128x64xi1>
    %125 = vector.broadcast %cst_44 : f32 to vector<128x64xf32>
    %126 = arith.select %124, %125, %122 : vector<128x64xi1>, vector<128x64xf32>
    %c127_i32_45 = arith.constant 127 : i32
    %127 = tpu.dynamic_rotate %115 by %c127_i32_45 dim 0 : vector<128x64xf32>, i32 -> vector<128x64xf32>
    %cst_46 = arith.constant 0.000000e+00 : f32
    %128 = vector.shape_cast %22 : vector<128x1xi1> to vector<128x1xi1>
    %129 = vector.broadcast %128 : vector<128x1xi1> to vector<128x64xi1>
    %130 = vector.broadcast %cst_46 : f32 to vector<128x64xf32>
    %131 = arith.select %129, %130, %127 : vector<128x64xi1>, vector<128x64xf32>
    %c126_i32_47 = arith.constant 126 : i32
    %132 = tpu.dynamic_rotate %115 by %c126_i32_47 dim 0 : vector<128x64xf32>, i32 -> vector<128x64xf32>
    %cst_48 = arith.constant 0.000000e+00 : f32
    %133 = vector.shape_cast %20 : vector<128x1xi1> to vector<128x1xi1>
    %134 = vector.broadcast %133 : vector<128x1xi1> to vector<128x64xi1>
    %135 = vector.broadcast %cst_48 : f32 to vector<128x64xf32>
    %136 = arith.select %134, %135, %132 : vector<128x64xi1>, vector<128x64xf32>
    %137 = tpu.concatenate %121, %126, %115, %131, %136 in 1 : vector<128x64xf32>, vector<128x64xf32>, vector<128x64xf32>, vector<128x64xf32>, vector<128x64xf32> -> vector<128x320xf32>
    %c624 = arith.constant 624 : index
    %c0_49 = arith.constant 0 : index
    %138 = vector.load %arg2[%c624, %c0_49] : memref<3360x128xbf16, #tpu.memory_space<vmem>>, vector<320x64xbf16>
    %c3 = arith.constant 3 : index
    %c0_50 = arith.constant 0 : index
    %139 = vector.load %arg3[%c3, %c0_50] : memref<18x128xf32, #tpu.memory_space<vmem>>, vector<1x64xf32>
    %140 = arith.truncf %137 : vector<128x320xf32> to vector<128x320xbf16>
    %cst_51 = arith.constant dense<0.000000e+00> : vector<128x64xf32>
    %141 = tpu.matmul %140, %138, %cst_51 {dimension_numbers = #tpu.dot_dimension_numbers<[1], [0], [0], [1], [0, 0, 1, 1], [], []>} : vector<128x320xbf16>, vector<320x64xbf16>, vector<128x64xf32> -> vector<128x64xf32>
    %142 = vector.broadcast %139 : vector<1x64xf32> to vector<128x64xf32>
    %143 = arith.addf %141, %142 : vector<128x64xf32>
    %cst_52 = arith.constant 0.000000e+00 : f32
    %144 = vector.broadcast %cst_52 : f32 to vector<128x64xf32>
    %145 = arith.maximumf %143, %144 : vector<128x64xf32>
    %c1_i32_53 = arith.constant 1 : i32
    %146 = tpu.dynamic_rotate %145 by %c1_i32_53 dim 0 : vector<128x64xf32>, i32 -> vector<128x64xf32>
    %cst_54 = arith.constant 0.000000e+00 : f32
    %147 = vector.shape_cast %24 : vector<128x1xi1> to vector<128x1xi1>
    %148 = vector.broadcast %147 : vector<128x1xi1> to vector<128x64xi1>
    %149 = vector.broadcast %cst_54 : f32 to vector<128x64xf32>
    %150 = arith.select %148, %149, %146 : vector<128x64xi1>, vector<128x64xf32>
    %c127_i32_55 = arith.constant 127 : i32
    %151 = tpu.dynamic_rotate %145 by %c127_i32_55 dim 0 : vector<128x64xf32>, i32 -> vector<128x64xf32>
    %cst_56 = arith.constant 0.000000e+00 : f32
    %152 = vector.shape_cast %22 : vector<128x1xi1> to vector<128x1xi1>
    %153 = vector.broadcast %152 : vector<128x1xi1> to vector<128x64xi1>
    %154 = vector.broadcast %cst_56 : f32 to vector<128x64xf32>
    %155 = arith.select %153, %154, %151 : vector<128x64xi1>, vector<128x64xf32>
    %156 = tpu.concatenate %150, %145, %155 in 1 : vector<128x64xf32>, vector<128x64xf32>, vector<128x64xf32> -> vector<128x192xf32>
    %c944 = arith.constant 944 : index
    %c0_57 = arith.constant 0 : index
    %157 = vector.load %arg2[%c944, %c0_57] : memref<3360x128xbf16, #tpu.memory_space<vmem>>, vector<192x64xbf16>
    %c4 = arith.constant 4 : index
    %c0_58 = arith.constant 0 : index
    %158 = vector.load %arg3[%c4, %c0_58] : memref<18x128xf32, #tpu.memory_space<vmem>>, vector<1x64xf32>
    %159 = arith.truncf %156 : vector<128x192xf32> to vector<128x192xbf16>
    %cst_59 = arith.constant dense<0.000000e+00> : vector<128x64xf32>
    %160 = tpu.matmul %159, %157, %cst_59 {dimension_numbers = #tpu.dot_dimension_numbers<[1], [0], [0], [1], [0, 0, 1, 1], [], []>} : vector<128x192xbf16>, vector<192x64xbf16>, vector<128x64xf32> -> vector<128x64xf32>
    %161 = vector.broadcast %158 : vector<1x64xf32> to vector<128x64xf32>
    %162 = arith.addf %160, %161 : vector<128x64xf32>
    %cst_60 = arith.constant 0.000000e+00 : f32
    %163 = vector.broadcast %cst_60 : f32 to vector<128x64xf32>
    %164 = arith.maximumf %162, %163 : vector<128x64xf32>
    %165 = vector.extract_strided_slice %164 {offsets = [0, 0], sizes = [32, 64], strides = [1, 1]} : vector<128x64xf32> to vector<32x64xf32>
    %cst_61 = arith.constant dense<0.000000e+00> : vector<64xf32>
    %166 = vector.multi_reduction <add>, %165, %cst_61 [0] : vector<32x64xf32> to vector<64xf32>
    %167 = vector.shape_cast %166 : vector<64xf32> to vector<1x64xf32>
    %cst_62 = arith.constant 3.200000e+01 : f32
    %168 = vector.broadcast %cst_62 : f32 to vector<1x64xf32>
    %169 = arith.divf %167, %168 : vector<1x64xf32>
    %170 = vector.extract_strided_slice %164 {offsets = [32, 0], sizes = [32, 64], strides = [1, 1]} : vector<128x64xf32> to vector<32x64xf32>
    %cst_63 = arith.constant dense<0.000000e+00> : vector<64xf32>
    %171 = vector.multi_reduction <add>, %170, %cst_63 [0] : vector<32x64xf32> to vector<64xf32>
    %172 = vector.shape_cast %171 : vector<64xf32> to vector<1x64xf32>
    %cst_64 = arith.constant 3.200000e+01 : f32
    %173 = vector.broadcast %cst_64 : f32 to vector<1x64xf32>
    %174 = arith.divf %172, %173 : vector<1x64xf32>
    %175 = vector.extract_strided_slice %164 {offsets = [64, 0], sizes = [32, 64], strides = [1, 1]} : vector<128x64xf32> to vector<32x64xf32>
    %cst_65 = arith.constant dense<0.000000e+00> : vector<64xf32>
    %176 = vector.multi_reduction <add>, %175, %cst_65 [0] : vector<32x64xf32> to vector<64xf32>
    %177 = vector.shape_cast %176 : vector<64xf32> to vector<1x64xf32>
    %cst_66 = arith.constant 3.200000e+01 : f32
    %178 = vector.broadcast %cst_66 : f32 to vector<1x64xf32>
    %179 = arith.divf %177, %178 : vector<1x64xf32>
    %180 = vector.extract_strided_slice %164 {offsets = [96, 0], sizes = [32, 64], strides = [1, 1]} : vector<128x64xf32> to vector<32x64xf32>
    %cst_67 = arith.constant dense<0.000000e+00> : vector<64xf32>
    %181 = vector.multi_reduction <add>, %180, %cst_67 [0] : vector<32x64xf32> to vector<64xf32>
    %182 = vector.shape_cast %181 : vector<64xf32> to vector<1x64xf32>
    %cst_68 = arith.constant 3.200000e+01 : f32
    %183 = vector.broadcast %cst_68 : f32 to vector<1x64xf32>
    %184 = arith.divf %182, %183 : vector<1x64xf32>
    %185 = tpu.concatenate %169, %174, %179, %184 in 0 : vector<1x64xf32>, vector<1x64xf32>, vector<1x64xf32>, vector<1x64xf32> -> vector<4x64xf32>
    %c1136 = arith.constant 1136 : index
    %c0_69 = arith.constant 0 : index
    %186 = vector.load %arg2[%c1136, %c0_69] : memref<3360x128xbf16, #tpu.memory_space<vmem>>, vector<64x8xbf16>
    %c5 = arith.constant 5 : index
    %c0_70 = arith.constant 0 : index
    %187 = vector.load %arg3[%c5, %c0_70] : memref<18x128xf32, #tpu.memory_space<vmem>>, vector<1x8xf32>
    %188 = arith.truncf %185 : vector<4x64xf32> to vector<4x64xbf16>
    %cst_71 = arith.constant dense<0.000000e+00> : vector<4x8xf32>
    %189 = tpu.matmul %188, %186, %cst_71 {dimension_numbers = #tpu.dot_dimension_numbers<[1], [0], [0], [1], [0, 0, 1, 1], [], []>} : vector<4x64xbf16>, vector<64x8xbf16>, vector<4x8xf32> -> vector<4x8xf32>
    %190 = vector.broadcast %187 : vector<1x8xf32> to vector<4x8xf32>
    %191 = arith.addf %189, %190 : vector<4x8xf32>
    %cst_72 = arith.constant 0.000000e+00 : f32
    %192 = vector.broadcast %cst_72 : f32 to vector<4x8xf32>
    %193 = arith.maximumf %191, %192 : vector<4x8xf32>
    %c1200 = arith.constant 1200 : index
    %c0_73 = arith.constant 0 : index
    %194 = vector.load %arg2[%c1200, %c0_73] : memref<3360x128xbf16, #tpu.memory_space<vmem>>, vector<8x64xbf16>
    %c6 = arith.constant 6 : index
    %c0_74 = arith.constant 0 : index
    %195 = vector.load %arg3[%c6, %c0_74] : memref<18x128xf32, #tpu.memory_space<vmem>>, vector<1x64xf32>
    %196 = arith.truncf %193 : vector<4x8xf32> to vector<4x8xbf16>
    %cst_75 = arith.constant dense<0.000000e+00> : vector<4x64xf32>
    %197 = tpu.matmul %196, %194, %cst_75 {dimension_numbers = #tpu.dot_dimension_numbers<[1], [0], [0], [1], [0, 0, 1, 1], [], []>} : vector<4x8xbf16>, vector<8x64xbf16>, vector<4x64xf32> -> vector<4x64xf32>
    %198 = vector.broadcast %195 : vector<1x64xf32> to vector<4x64xf32>
    %199 = arith.addf %197, %198 : vector<4x64xf32>
    %200 = arith.negf %199 : vector<4x64xf32>
    %201 = math.exp %200 : vector<4x64xf32>
    %cst_76 = arith.constant 1.000000e+00 : f32
    %202 = vector.broadcast %cst_76 : f32 to vector<4x64xf32>
    %203 = arith.addf %202, %201 : vector<4x64xf32>
    %204 = arith.divf %202, %203 : vector<4x64xf32>
    %205 = vector.extract_strided_slice %204 {offsets = [0, 0], sizes = [1, 64], strides = [1, 1]} : vector<4x64xf32> to vector<1x64xf32>
    %206 = vector.shape_cast %205 : vector<1x64xf32> to vector<1x64xf32>
    %207 = vector.broadcast %206 : vector<1x64xf32> to vector<32x64xf32>
    %208 = vector.extract_strided_slice %204 {offsets = [1, 0], sizes = [1, 64], strides = [1, 1]} : vector<4x64xf32> to vector<1x64xf32>
    %209 = vector.shape_cast %208 : vector<1x64xf32> to vector<1x64xf32>
    %210 = vector.broadcast %209 : vector<1x64xf32> to vector<32x64xf32>
    %211 = vector.extract_strided_slice %204 {offsets = [2, 0], sizes = [1, 64], strides = [1, 1]} : vector<4x64xf32> to vector<1x64xf32>
    %212 = vector.shape_cast %211 : vector<1x64xf32> to vector<1x64xf32>
    %213 = vector.broadcast %212 : vector<1x64xf32> to vector<32x64xf32>
    %214 = vector.extract_strided_slice %204 {offsets = [3, 0], sizes = [1, 64], strides = [1, 1]} : vector<4x64xf32> to vector<1x64xf32>
    %215 = vector.shape_cast %214 : vector<1x64xf32> to vector<1x64xf32>
    %216 = vector.broadcast %215 : vector<1x64xf32> to vector<32x64xf32>
    %217 = tpu.concatenate %207, %210, %213, %216 in 0 : vector<32x64xf32>, vector<32x64xf32>, vector<32x64xf32>, vector<32x64xf32> -> vector<128x64xf32>
    %218 = arith.mulf %164, %217 : vector<128x64xf32>
    %219 = arith.addf %218, %116 : vector<128x64xf32>
    %cst_77 = arith.constant 0.000000e+00 : f32
    %220 = vector.broadcast %cst_77 : f32 to vector<128x64xf32>
    %221 = arith.maximumf %219, %220 : vector<128x64xf32>
    %c3_i32_78 = arith.constant 3 : i32
    %222 = tpu.dynamic_rotate %221 by %c3_i32_78 dim 0 : vector<128x64xf32>, i32 -> vector<128x64xf32>
    %cst_79 = arith.constant 0.000000e+00 : f32
    %223 = vector.shape_cast %28 : vector<128x1xi1> to vector<128x1xi1>
    %224 = vector.broadcast %223 : vector<128x1xi1> to vector<128x64xi1>
    %225 = vector.broadcast %cst_79 : f32 to vector<128x64xf32>
    %226 = arith.select %224, %225, %222 : vector<128x64xi1>, vector<128x64xf32>
    %c2_i32_80 = arith.constant 2 : i32
    %227 = tpu.dynamic_rotate %221 by %c2_i32_80 dim 0 : vector<128x64xf32>, i32 -> vector<128x64xf32>
    %cst_81 = arith.constant 0.000000e+00 : f32
    %228 = vector.shape_cast %26 : vector<128x1xi1> to vector<128x1xi1>
    %229 = vector.broadcast %228 : vector<128x1xi1> to vector<128x64xi1>
    %230 = vector.broadcast %cst_81 : f32 to vector<128x64xf32>
    %231 = arith.select %229, %230, %227 : vector<128x64xi1>, vector<128x64xf32>
    %c1_i32_82 = arith.constant 1 : i32
    %232 = tpu.dynamic_rotate %221 by %c1_i32_82 dim 0 : vector<128x64xf32>, i32 -> vector<128x64xf32>
    %cst_83 = arith.constant 0.000000e+00 : f32
    %233 = vector.shape_cast %24 : vector<128x1xi1> to vector<128x1xi1>
    %234 = vector.broadcast %233 : vector<128x1xi1> to vector<128x64xi1>
    %235 = vector.broadcast %cst_83 : f32 to vector<128x64xf32>
    %236 = arith.select %234, %235, %232 : vector<128x64xi1>, vector<128x64xf32>
    %c127_i32_84 = arith.constant 127 : i32
    %237 = tpu.dynamic_rotate %221 by %c127_i32_84 dim 0 : vector<128x64xf32>, i32 -> vector<128x64xf32>
    %cst_85 = arith.constant 0.000000e+00 : f32
    %238 = vector.shape_cast %22 : vector<128x1xi1> to vector<128x1xi1>
    %239 = vector.broadcast %238 : vector<128x1xi1> to vector<128x64xi1>
    %240 = vector.broadcast %cst_85 : f32 to vector<128x64xf32>
    %241 = arith.select %239, %240, %237 : vector<128x64xi1>, vector<128x64xf32>
    %c126_i32_86 = arith.constant 126 : i32
    %242 = tpu.dynamic_rotate %221 by %c126_i32_86 dim 0 : vector<128x64xf32>, i32 -> vector<128x64xf32>
    %cst_87 = arith.constant 0.000000e+00 : f32
    %243 = vector.shape_cast %20 : vector<128x1xi1> to vector<128x1xi1>
    %244 = vector.broadcast %243 : vector<128x1xi1> to vector<128x64xi1>
    %245 = vector.broadcast %cst_87 : f32 to vector<128x64xf32>
    %246 = arith.select %244, %245, %242 : vector<128x64xi1>, vector<128x64xf32>
    %c125_i32_88 = arith.constant 125 : i32
    %247 = tpu.dynamic_rotate %221 by %c125_i32_88 dim 0 : vector<128x64xf32>, i32 -> vector<128x64xf32>
    %cst_89 = arith.constant 0.000000e+00 : f32
    %248 = vector.shape_cast %18 : vector<128x1xi1> to vector<128x1xi1>
    %249 = vector.broadcast %248 : vector<128x1xi1> to vector<128x64xi1>
    %250 = vector.broadcast %cst_89 : f32 to vector<128x64xf32>
    %251 = arith.select %249, %250, %247 : vector<128x64xi1>, vector<128x64xf32>
    %252 = tpu.concatenate %226, %231, %236, %221, %241, %246, %251 in 1 : vector<128x64xf32>, vector<128x64xf32>, vector<128x64xf32>, vector<128x64xf32>, vector<128x64xf32>, vector<128x64xf32>, vector<128x64xf32> -> vector<128x448xf32>
    %c1216 = arith.constant 1216 : index
    %c0_90 = arith.constant 0 : index
    %253 = vector.load %arg2[%c1216, %c0_90] : memref<3360x128xbf16, #tpu.memory_space<vmem>>, vector<448x128xbf16>
    %c7 = arith.constant 7 : index
    %c0_91 = arith.constant 0 : index
    %254 = vector.load %arg3[%c7, %c0_91] : memref<18x128xf32, #tpu.memory_space<vmem>>, vector<1x128xf32>
    %255 = arith.truncf %252 : vector<128x448xf32> to vector<128x448xbf16>
    %cst_92 = arith.constant dense<0.000000e+00> : vector<128x128xf32>
    %256 = tpu.matmul %255, %253, %cst_92 {dimension_numbers = #tpu.dot_dimension_numbers<[1], [0], [0], [1], [0, 0, 1, 1], [], []>} : vector<128x448xbf16>, vector<448x128xbf16>, vector<128x128xf32> -> vector<128x128xf32>
    %257 = vector.broadcast %254 : vector<1x128xf32> to vector<128x128xf32>
    %258 = arith.addf %256, %257 : vector<128x128xf32>
    %259 = vector.extract_strided_slice %258 {offsets = [0, 0], sizes = [128, 64], strides = [1, 1]} : vector<128x128xf32> to vector<128x64xf32>
    %cst_93 = arith.constant 0.000000e+00 : f32
    %260 = vector.broadcast %cst_93 : f32 to vector<128x64xf32>
    %261 = arith.maximumf %259, %260 : vector<128x64xf32>
    %262 = vector.extract_strided_slice %258 {offsets = [0, 64], sizes = [128, 64], strides = [1, 1]} : vector<128x128xf32> to vector<128x64xf32>
    %c2_i32_94 = arith.constant 2 : i32
    %263 = tpu.dynamic_rotate %261 by %c2_i32_94 dim 0 : vector<128x64xf32>, i32 -> vector<128x64xf32>
    %cst_95 = arith.constant 0.000000e+00 : f32
    %264 = vector.shape_cast %26 : vector<128x1xi1> to vector<128x1xi1>
    %265 = vector.broadcast %264 : vector<128x1xi1> to vector<128x64xi1>
    %266 = vector.broadcast %cst_95 : f32 to vector<128x64xf32>
    %267 = arith.select %265, %266, %263 : vector<128x64xi1>, vector<128x64xf32>
    %c1_i32_96 = arith.constant 1 : i32
    %268 = tpu.dynamic_rotate %261 by %c1_i32_96 dim 0 : vector<128x64xf32>, i32 -> vector<128x64xf32>
    %cst_97 = arith.constant 0.000000e+00 : f32
    %269 = vector.shape_cast %24 : vector<128x1xi1> to vector<128x1xi1>
    %270 = vector.broadcast %269 : vector<128x1xi1> to vector<128x64xi1>
    %271 = vector.broadcast %cst_97 : f32 to vector<128x64xf32>
    %272 = arith.select %270, %271, %268 : vector<128x64xi1>, vector<128x64xf32>
    %c127_i32_98 = arith.constant 127 : i32
    %273 = tpu.dynamic_rotate %261 by %c127_i32_98 dim 0 : vector<128x64xf32>, i32 -> vector<128x64xf32>
    %cst_99 = arith.constant 0.000000e+00 : f32
    %274 = vector.shape_cast %22 : vector<128x1xi1> to vector<128x1xi1>
    %275 = vector.broadcast %274 : vector<128x1xi1> to vector<128x64xi1>
    %276 = vector.broadcast %cst_99 : f32 to vector<128x64xf32>
    %277 = arith.select %275, %276, %273 : vector<128x64xi1>, vector<128x64xf32>
    %c126_i32_100 = arith.constant 126 : i32
    %278 = tpu.dynamic_rotate %261 by %c126_i32_100 dim 0 : vector<128x64xf32>, i32 -> vector<128x64xf32>
    %cst_101 = arith.constant 0.000000e+00 : f32
    %279 = vector.shape_cast %20 : vector<128x1xi1> to vector<128x1xi1>
    %280 = vector.broadcast %279 : vector<128x1xi1> to vector<128x64xi1>
    %281 = vector.broadcast %cst_101 : f32 to vector<128x64xf32>
    %282 = arith.select %280, %281, %278 : vector<128x64xi1>, vector<128x64xf32>
    %283 = tpu.concatenate %267, %272, %261, %277, %282 in 1 : vector<128x64xf32>, vector<128x64xf32>, vector<128x64xf32>, vector<128x64xf32>, vector<128x64xf32> -> vector<128x320xf32>
    %c1664 = arith.constant 1664 : index
    %c0_102 = arith.constant 0 : index
    %284 = vector.load %arg2[%c1664, %c0_102] : memref<3360x128xbf16, #tpu.memory_space<vmem>>, vector<320x64xbf16>
    %c8 = arith.constant 8 : index
    %c0_103 = arith.constant 0 : index
    %285 = vector.load %arg3[%c8, %c0_103] : memref<18x128xf32, #tpu.memory_space<vmem>>, vector<1x64xf32>
    %286 = arith.truncf %283 : vector<128x320xf32> to vector<128x320xbf16>
    %cst_104 = arith.constant dense<0.000000e+00> : vector<128x64xf32>
    %287 = tpu.matmul %286, %284, %cst_104 {dimension_numbers = #tpu.dot_dimension_numbers<[1], [0], [0], [1], [0, 0, 1, 1], [], []>} : vector<128x320xbf16>, vector<320x64xbf16>, vector<128x64xf32> -> vector<128x64xf32>
    %288 = vector.broadcast %285 : vector<1x64xf32> to vector<128x64xf32>
    %289 = arith.addf %287, %288 : vector<128x64xf32>
    %cst_105 = arith.constant 0.000000e+00 : f32
    %290 = vector.broadcast %cst_105 : f32 to vector<128x64xf32>
    %291 = arith.maximumf %289, %290 : vector<128x64xf32>
    %c1_i32_106 = arith.constant 1 : i32
    %292 = tpu.dynamic_rotate %291 by %c1_i32_106 dim 0 : vector<128x64xf32>, i32 -> vector<128x64xf32>
    %cst_107 = arith.constant 0.000000e+00 : f32
    %293 = vector.shape_cast %24 : vector<128x1xi1> to vector<128x1xi1>
    %294 = vector.broadcast %293 : vector<128x1xi1> to vector<128x64xi1>
    %295 = vector.broadcast %cst_107 : f32 to vector<128x64xf32>
    %296 = arith.select %294, %295, %292 : vector<128x64xi1>, vector<128x64xf32>
    %c127_i32_108 = arith.constant 127 : i32
    %297 = tpu.dynamic_rotate %291 by %c127_i32_108 dim 0 : vector<128x64xf32>, i32 -> vector<128x64xf32>
    %cst_109 = arith.constant 0.000000e+00 : f32
    %298 = vector.shape_cast %22 : vector<128x1xi1> to vector<128x1xi1>
    %299 = vector.broadcast %298 : vector<128x1xi1> to vector<128x64xi1>
    %300 = vector.broadcast %cst_109 : f32 to vector<128x64xf32>
    %301 = arith.select %299, %300, %297 : vector<128x64xi1>, vector<128x64xf32>
    %302 = tpu.concatenate %296, %291, %301 in 1 : vector<128x64xf32>, vector<128x64xf32>, vector<128x64xf32> -> vector<128x192xf32>
    %c1984 = arith.constant 1984 : index
    %c0_110 = arith.constant 0 : index
    %303 = vector.load %arg2[%c1984, %c0_110] : memref<3360x128xbf16, #tpu.memory_space<vmem>>, vector<192x64xbf16>
    %c9 = arith.constant 9 : index
    %c0_111 = arith.constant 0 : index
    %304 = vector.load %arg3[%c9, %c0_111] : memref<18x128xf32, #tpu.memory_space<vmem>>, vector<1x64xf32>
    %305 = arith.truncf %302 : vector<128x192xf32> to vector<128x192xbf16>
    %cst_112 = arith.constant dense<0.000000e+00> : vector<128x64xf32>
    %306 = tpu.matmul %305, %303, %cst_112 {dimension_numbers = #tpu.dot_dimension_numbers<[1], [0], [0], [1], [0, 0, 1, 1], [], []>} : vector<128x192xbf16>, vector<192x64xbf16>, vector<128x64xf32> -> vector<128x64xf32>
    %307 = vector.broadcast %304 : vector<1x64xf32> to vector<128x64xf32>
    %308 = arith.addf %306, %307 : vector<128x64xf32>
    %cst_113 = arith.constant 0.000000e+00 : f32
    %309 = vector.broadcast %cst_113 : f32 to vector<128x64xf32>
    %310 = arith.maximumf %308, %309 : vector<128x64xf32>
    %311 = vector.extract_strided_slice %310 {offsets = [0, 0], sizes = [32, 64], strides = [1, 1]} : vector<128x64xf32> to vector<32x64xf32>
    %cst_114 = arith.constant dense<0.000000e+00> : vector<64xf32>
    %312 = vector.multi_reduction <add>, %311, %cst_114 [0] : vector<32x64xf32> to vector<64xf32>
    %313 = vector.shape_cast %312 : vector<64xf32> to vector<1x64xf32>
    %cst_115 = arith.constant 3.200000e+01 : f32
    %314 = vector.broadcast %cst_115 : f32 to vector<1x64xf32>
    %315 = arith.divf %313, %314 : vector<1x64xf32>
    %316 = vector.extract_strided_slice %310 {offsets = [32, 0], sizes = [32, 64], strides = [1, 1]} : vector<128x64xf32> to vector<32x64xf32>
    %cst_116 = arith.constant dense<0.000000e+00> : vector<64xf32>
    %317 = vector.multi_reduction <add>, %316, %cst_116 [0] : vector<32x64xf32> to vector<64xf32>
    %318 = vector.shape_cast %317 : vector<64xf32> to vector<1x64xf32>
    %cst_117 = arith.constant 3.200000e+01 : f32
    %319 = vector.broadcast %cst_117 : f32 to vector<1x64xf32>
    %320 = arith.divf %318, %319 : vector<1x64xf32>
    %321 = vector.extract_strided_slice %310 {offsets = [64, 0], sizes = [32, 64], strides = [1, 1]} : vector<128x64xf32> to vector<32x64xf32>
    %cst_118 = arith.constant dense<0.000000e+00> : vector<64xf32>
    %322 = vector.multi_reduction <add>, %321, %cst_118 [0] : vector<32x64xf32> to vector<64xf32>
    %323 = vector.shape_cast %322 : vector<64xf32> to vector<1x64xf32>
    %cst_119 = arith.constant 3.200000e+01 : f32
    %324 = vector.broadcast %cst_119 : f32 to vector<1x64xf32>
    %325 = arith.divf %323, %324 : vector<1x64xf32>
    %326 = vector.extract_strided_slice %310 {offsets = [96, 0], sizes = [32, 64], strides = [1, 1]} : vector<128x64xf32> to vector<32x64xf32>
    %cst_120 = arith.constant dense<0.000000e+00> : vector<64xf32>
    %327 = vector.multi_reduction <add>, %326, %cst_120 [0] : vector<32x64xf32> to vector<64xf32>
    %328 = vector.shape_cast %327 : vector<64xf32> to vector<1x64xf32>
    %cst_121 = arith.constant 3.200000e+01 : f32
    %329 = vector.broadcast %cst_121 : f32 to vector<1x64xf32>
    %330 = arith.divf %328, %329 : vector<1x64xf32>
    %331 = tpu.concatenate %315, %320, %325, %330 in 0 : vector<1x64xf32>, vector<1x64xf32>, vector<1x64xf32>, vector<1x64xf32> -> vector<4x64xf32>
    %c2176 = arith.constant 2176 : index
    %c0_122 = arith.constant 0 : index
    %332 = vector.load %arg2[%c2176, %c0_122] : memref<3360x128xbf16, #tpu.memory_space<vmem>>, vector<64x8xbf16>
    %c10 = arith.constant 10 : index
    %c0_123 = arith.constant 0 : index
    %333 = vector.load %arg3[%c10, %c0_123] : memref<18x128xf32, #tpu.memory_space<vmem>>, vector<1x8xf32>
    %334 = arith.truncf %331 : vector<4x64xf32> to vector<4x64xbf16>
    %cst_124 = arith.constant dense<0.000000e+00> : vector<4x8xf32>
    %335 = tpu.matmul %334, %332, %cst_124 {dimension_numbers = #tpu.dot_dimension_numbers<[1], [0], [0], [1], [0, 0, 1, 1], [], []>} : vector<4x64xbf16>, vector<64x8xbf16>, vector<4x8xf32> -> vector<4x8xf32>
    %336 = vector.broadcast %333 : vector<1x8xf32> to vector<4x8xf32>
    %337 = arith.addf %335, %336 : vector<4x8xf32>
    %cst_125 = arith.constant 0.000000e+00 : f32
    %338 = vector.broadcast %cst_125 : f32 to vector<4x8xf32>
    %339 = arith.maximumf %337, %338 : vector<4x8xf32>
    %c2240 = arith.constant 2240 : index
    %c0_126 = arith.constant 0 : index
    %340 = vector.load %arg2[%c2240, %c0_126] : memref<3360x128xbf16, #tpu.memory_space<vmem>>, vector<8x64xbf16>
    %c11 = arith.constant 11 : index
    %c0_127 = arith.constant 0 : index
    %341 = vector.load %arg3[%c11, %c0_127] : memref<18x128xf32, #tpu.memory_space<vmem>>, vector<1x64xf32>
    %342 = arith.truncf %339 : vector<4x8xf32> to vector<4x8xbf16>
    %cst_128 = arith.constant dense<0.000000e+00> : vector<4x64xf32>
    %343 = tpu.matmul %342, %340, %cst_128 {dimension_numbers = #tpu.dot_dimension_numbers<[1], [0], [0], [1], [0, 0, 1, 1], [], []>} : vector<4x8xbf16>, vector<8x64xbf16>, vector<4x64xf32> -> vector<4x64xf32>
    %344 = vector.broadcast %341 : vector<1x64xf32> to vector<4x64xf32>
    %345 = arith.addf %343, %344 : vector<4x64xf32>
    %346 = arith.negf %345 : vector<4x64xf32>
    %347 = math.exp %346 : vector<4x64xf32>
    %cst_129 = arith.constant 1.000000e+00 : f32
    %348 = vector.broadcast %cst_129 : f32 to vector<4x64xf32>
    %349 = arith.addf %348, %347 : vector<4x64xf32>
    %350 = arith.divf %348, %349 : vector<4x64xf32>
    %351 = vector.extract_strided_slice %350 {offsets = [0, 0], sizes = [1, 64], strides = [1, 1]} : vector<4x64xf32> to vector<1x64xf32>
    %352 = vector.shape_cast %351 : vector<1x64xf32> to vector<1x64xf32>
    %353 = vector.broadcast %352 : vector<1x64xf32> to vector<32x64xf32>
    %354 = vector.extract_strided_slice %350 {offsets = [1, 0], sizes = [1, 64], strides = [1, 1]} : vector<4x64xf32> to vector<1x64xf32>
    %355 = vector.shape_cast %354 : vector<1x64xf32> to vector<1x64xf32>
    %356 = vector.broadcast %355 : vector<1x64xf32> to vector<32x64xf32>
    %357 = vector.extract_strided_slice %350 {offsets = [2, 0], sizes = [1, 64], strides = [1, 1]} : vector<4x64xf32> to vector<1x64xf32>
    %358 = vector.shape_cast %357 : vector<1x64xf32> to vector<1x64xf32>
    %359 = vector.broadcast %358 : vector<1x64xf32> to vector<32x64xf32>
    %360 = vector.extract_strided_slice %350 {offsets = [3, 0], sizes = [1, 64], strides = [1, 1]} : vector<4x64xf32> to vector<1x64xf32>
    %361 = vector.shape_cast %360 : vector<1x64xf32> to vector<1x64xf32>
    %362 = vector.broadcast %361 : vector<1x64xf32> to vector<32x64xf32>
    %363 = tpu.concatenate %353, %356, %359, %362 in 0 : vector<32x64xf32>, vector<32x64xf32>, vector<32x64xf32>, vector<32x64xf32> -> vector<128x64xf32>
    %364 = arith.mulf %310, %363 : vector<128x64xf32>
    %365 = arith.addf %364, %262 : vector<128x64xf32>
    %cst_130 = arith.constant 0.000000e+00 : f32
    %366 = vector.broadcast %cst_130 : f32 to vector<128x64xf32>
    %367 = arith.maximumf %365, %366 : vector<128x64xf32>
    %c3_i32_131 = arith.constant 3 : i32
    %368 = tpu.dynamic_rotate %367 by %c3_i32_131 dim 0 : vector<128x64xf32>, i32 -> vector<128x64xf32>
    %cst_132 = arith.constant 0.000000e+00 : f32
    %369 = vector.shape_cast %28 : vector<128x1xi1> to vector<128x1xi1>
    %370 = vector.broadcast %369 : vector<128x1xi1> to vector<128x64xi1>
    %371 = vector.broadcast %cst_132 : f32 to vector<128x64xf32>
    %372 = arith.select %370, %371, %368 : vector<128x64xi1>, vector<128x64xf32>
    %c2_i32_133 = arith.constant 2 : i32
    %373 = tpu.dynamic_rotate %367 by %c2_i32_133 dim 0 : vector<128x64xf32>, i32 -> vector<128x64xf32>
    %cst_134 = arith.constant 0.000000e+00 : f32
    %374 = vector.shape_cast %26 : vector<128x1xi1> to vector<128x1xi1>
    %375 = vector.broadcast %374 : vector<128x1xi1> to vector<128x64xi1>
    %376 = vector.broadcast %cst_134 : f32 to vector<128x64xf32>
    %377 = arith.select %375, %376, %373 : vector<128x64xi1>, vector<128x64xf32>
    %c1_i32_135 = arith.constant 1 : i32
    %378 = tpu.dynamic_rotate %367 by %c1_i32_135 dim 0 : vector<128x64xf32>, i32 -> vector<128x64xf32>
    %cst_136 = arith.constant 0.000000e+00 : f32
    %379 = vector.shape_cast %24 : vector<128x1xi1> to vector<128x1xi1>
    %380 = vector.broadcast %379 : vector<128x1xi1> to vector<128x64xi1>
    %381 = vector.broadcast %cst_136 : f32 to vector<128x64xf32>
    %382 = arith.select %380, %381, %378 : vector<128x64xi1>, vector<128x64xf32>
    %c127_i32_137 = arith.constant 127 : i32
    %383 = tpu.dynamic_rotate %367 by %c127_i32_137 dim 0 : vector<128x64xf32>, i32 -> vector<128x64xf32>
    %cst_138 = arith.constant 0.000000e+00 : f32
    %384 = vector.shape_cast %22 : vector<128x1xi1> to vector<128x1xi1>
    %385 = vector.broadcast %384 : vector<128x1xi1> to vector<128x64xi1>
    %386 = vector.broadcast %cst_138 : f32 to vector<128x64xf32>
    %387 = arith.select %385, %386, %383 : vector<128x64xi1>, vector<128x64xf32>
    %c126_i32_139 = arith.constant 126 : i32
    %388 = tpu.dynamic_rotate %367 by %c126_i32_139 dim 0 : vector<128x64xf32>, i32 -> vector<128x64xf32>
    %cst_140 = arith.constant 0.000000e+00 : f32
    %389 = vector.shape_cast %20 : vector<128x1xi1> to vector<128x1xi1>
    %390 = vector.broadcast %389 : vector<128x1xi1> to vector<128x64xi1>
    %391 = vector.broadcast %cst_140 : f32 to vector<128x64xf32>
    %392 = arith.select %390, %391, %388 : vector<128x64xi1>, vector<128x64xf32>
    %c125_i32_141 = arith.constant 125 : i32
    %393 = tpu.dynamic_rotate %367 by %c125_i32_141 dim 0 : vector<128x64xf32>, i32 -> vector<128x64xf32>
    %cst_142 = arith.constant 0.000000e+00 : f32
    %394 = vector.shape_cast %18 : vector<128x1xi1> to vector<128x1xi1>
    %395 = vector.broadcast %394 : vector<128x1xi1> to vector<128x64xi1>
    %396 = vector.broadcast %cst_142 : f32 to vector<128x64xf32>
    %397 = arith.select %395, %396, %393 : vector<128x64xi1>, vector<128x64xf32>
    %398 = tpu.concatenate %372, %377, %382, %367, %387, %392, %397 in 1 : vector<128x64xf32>, vector<128x64xf32>, vector<128x64xf32>, vector<128x64xf32>, vector<128x64xf32>, vector<128x64xf32>, vector<128x64xf32> -> vector<128x448xf32>
    %c2256 = arith.constant 2256 : index
    %c0_143 = arith.constant 0 : index
    %399 = vector.load %arg2[%c2256, %c0_143] : memref<3360x128xbf16, #tpu.memory_space<vmem>>, vector<448x128xbf16>
    %c12 = arith.constant 12 : index
    %c0_144 = arith.constant 0 : index
    %400 = vector.load %arg3[%c12, %c0_144] : memref<18x128xf32, #tpu.memory_space<vmem>>, vector<1x128xf32>
    %401 = arith.truncf %398 : vector<128x448xf32> to vector<128x448xbf16>
    %cst_145 = arith.constant dense<0.000000e+00> : vector<128x128xf32>
    %402 = tpu.matmul %401, %399, %cst_145 {dimension_numbers = #tpu.dot_dimension_numbers<[1], [0], [0], [1], [0, 0, 1, 1], [], []>} : vector<128x448xbf16>, vector<448x128xbf16>, vector<128x128xf32> -> vector<128x128xf32>
    %403 = vector.broadcast %400 : vector<1x128xf32> to vector<128x128xf32>
    %404 = arith.addf %402, %403 : vector<128x128xf32>
    %405 = vector.extract_strided_slice %404 {offsets = [0, 0], sizes = [128, 64], strides = [1, 1]} : vector<128x128xf32> to vector<128x64xf32>
    %cst_146 = arith.constant 0.000000e+00 : f32
    %406 = vector.broadcast %cst_146 : f32 to vector<128x64xf32>
    %407 = arith.maximumf %405, %406 : vector<128x64xf32>
    %408 = vector.extract_strided_slice %404 {offsets = [0, 64], sizes = [128, 64], strides = [1, 1]} : vector<128x128xf32> to vector<128x64xf32>
    %c2_i32_147 = arith.constant 2 : i32
    %409 = tpu.dynamic_rotate %407 by %c2_i32_147 dim 0 : vector<128x64xf32>, i32 -> vector<128x64xf32>
    %cst_148 = arith.constant 0.000000e+00 : f32
    %410 = vector.shape_cast %26 : vector<128x1xi1> to vector<128x1xi1>
    %411 = vector.broadcast %410 : vector<128x1xi1> to vector<128x64xi1>
    %412 = vector.broadcast %cst_148 : f32 to vector<128x64xf32>
    %413 = arith.select %411, %412, %409 : vector<128x64xi1>, vector<128x64xf32>
    %c1_i32_149 = arith.constant 1 : i32
    %414 = tpu.dynamic_rotate %407 by %c1_i32_149 dim 0 : vector<128x64xf32>, i32 -> vector<128x64xf32>
    %cst_150 = arith.constant 0.000000e+00 : f32
    %415 = vector.shape_cast %24 : vector<128x1xi1> to vector<128x1xi1>
    %416 = vector.broadcast %415 : vector<128x1xi1> to vector<128x64xi1>
    %417 = vector.broadcast %cst_150 : f32 to vector<128x64xf32>
    %418 = arith.select %416, %417, %414 : vector<128x64xi1>, vector<128x64xf32>
    %c127_i32_151 = arith.constant 127 : i32
    %419 = tpu.dynamic_rotate %407 by %c127_i32_151 dim 0 : vector<128x64xf32>, i32 -> vector<128x64xf32>
    %cst_152 = arith.constant 0.000000e+00 : f32
    %420 = vector.shape_cast %22 : vector<128x1xi1> to vector<128x1xi1>
    %421 = vector.broadcast %420 : vector<128x1xi1> to vector<128x64xi1>
    %422 = vector.broadcast %cst_152 : f32 to vector<128x64xf32>
    %423 = arith.select %421, %422, %419 : vector<128x64xi1>, vector<128x64xf32>
    %c126_i32_153 = arith.constant 126 : i32
    %424 = tpu.dynamic_rotate %407 by %c126_i32_153 dim 0 : vector<128x64xf32>, i32 -> vector<128x64xf32>
    %cst_154 = arith.constant 0.000000e+00 : f32
    %425 = vector.shape_cast %20 : vector<128x1xi1> to vector<128x1xi1>
    %426 = vector.broadcast %425 : vector<128x1xi1> to vector<128x64xi1>
    %427 = vector.broadcast %cst_154 : f32 to vector<128x64xf32>
    %428 = arith.select %426, %427, %424 : vector<128x64xi1>, vector<128x64xf32>
    %429 = tpu.concatenate %413, %418, %407, %423, %428 in 1 : vector<128x64xf32>, vector<128x64xf32>, vector<128x64xf32>, vector<128x64xf32>, vector<128x64xf32> -> vector<128x320xf32>
    %c2704 = arith.constant 2704 : index
    %c0_155 = arith.constant 0 : index
    %430 = vector.load %arg2[%c2704, %c0_155] : memref<3360x128xbf16, #tpu.memory_space<vmem>>, vector<320x64xbf16>
    %c13 = arith.constant 13 : index
    %c0_156 = arith.constant 0 : index
    %431 = vector.load %arg3[%c13, %c0_156] : memref<18x128xf32, #tpu.memory_space<vmem>>, vector<1x64xf32>
    %432 = arith.truncf %429 : vector<128x320xf32> to vector<128x320xbf16>
    %cst_157 = arith.constant dense<0.000000e+00> : vector<128x64xf32>
    %433 = tpu.matmul %432, %430, %cst_157 {dimension_numbers = #tpu.dot_dimension_numbers<[1], [0], [0], [1], [0, 0, 1, 1], [], []>} : vector<128x320xbf16>, vector<320x64xbf16>, vector<128x64xf32> -> vector<128x64xf32>
    %434 = vector.broadcast %431 : vector<1x64xf32> to vector<128x64xf32>
    %435 = arith.addf %433, %434 : vector<128x64xf32>
    %cst_158 = arith.constant 0.000000e+00 : f32
    %436 = vector.broadcast %cst_158 : f32 to vector<128x64xf32>
    %437 = arith.maximumf %435, %436 : vector<128x64xf32>
    %c1_i32_159 = arith.constant 1 : i32
    %438 = tpu.dynamic_rotate %437 by %c1_i32_159 dim 0 : vector<128x64xf32>, i32 -> vector<128x64xf32>
    %cst_160 = arith.constant 0.000000e+00 : f32
    %439 = vector.shape_cast %24 : vector<128x1xi1> to vector<128x1xi1>
    %440 = vector.broadcast %439 : vector<128x1xi1> to vector<128x64xi1>
    %441 = vector.broadcast %cst_160 : f32 to vector<128x64xf32>
    %442 = arith.select %440, %441, %438 : vector<128x64xi1>, vector<128x64xf32>
    %c127_i32_161 = arith.constant 127 : i32
    %443 = tpu.dynamic_rotate %437 by %c127_i32_161 dim 0 : vector<128x64xf32>, i32 -> vector<128x64xf32>
    %cst_162 = arith.constant 0.000000e+00 : f32
    %444 = vector.shape_cast %22 : vector<128x1xi1> to vector<128x1xi1>
    %445 = vector.broadcast %444 : vector<128x1xi1> to vector<128x64xi1>
    %446 = vector.broadcast %cst_162 : f32 to vector<128x64xf32>
    %447 = arith.select %445, %446, %443 : vector<128x64xi1>, vector<128x64xf32>
    %448 = tpu.concatenate %442, %437, %447 in 1 : vector<128x64xf32>, vector<128x64xf32>, vector<128x64xf32> -> vector<128x192xf32>
    %c3024 = arith.constant 3024 : index
    %c0_163 = arith.constant 0 : index
    %449 = vector.load %arg2[%c3024, %c0_163] : memref<3360x128xbf16, #tpu.memory_space<vmem>>, vector<192x64xbf16>
    %c14 = arith.constant 14 : index
    %c0_164 = arith.constant 0 : index
    %450 = vector.load %arg3[%c14, %c0_164] : memref<18x128xf32, #tpu.memory_space<vmem>>, vector<1x64xf32>
    %451 = arith.truncf %448 : vector<128x192xf32> to vector<128x192xbf16>
    %cst_165 = arith.constant dense<0.000000e+00> : vector<128x64xf32>
    %452 = tpu.matmul %451, %449, %cst_165 {dimension_numbers = #tpu.dot_dimension_numbers<[1], [0], [0], [1], [0, 0, 1, 1], [], []>} : vector<128x192xbf16>, vector<192x64xbf16>, vector<128x64xf32> -> vector<128x64xf32>
    %453 = vector.broadcast %450 : vector<1x64xf32> to vector<128x64xf32>
    %454 = arith.addf %452, %453 : vector<128x64xf32>
    %cst_166 = arith.constant 0.000000e+00 : f32
    %455 = vector.broadcast %cst_166 : f32 to vector<128x64xf32>
    %456 = arith.maximumf %454, %455 : vector<128x64xf32>
    %457 = vector.extract_strided_slice %456 {offsets = [0, 0], sizes = [32, 64], strides = [1, 1]} : vector<128x64xf32> to vector<32x64xf32>
    %cst_167 = arith.constant dense<0.000000e+00> : vector<64xf32>
    %458 = vector.multi_reduction <add>, %457, %cst_167 [0] : vector<32x64xf32> to vector<64xf32>
    %459 = vector.shape_cast %458 : vector<64xf32> to vector<1x64xf32>
    %cst_168 = arith.constant 3.200000e+01 : f32
    %460 = vector.broadcast %cst_168 : f32 to vector<1x64xf32>
    %461 = arith.divf %459, %460 : vector<1x64xf32>
    %462 = vector.extract_strided_slice %456 {offsets = [32, 0], sizes = [32, 64], strides = [1, 1]} : vector<128x64xf32> to vector<32x64xf32>
    %cst_169 = arith.constant dense<0.000000e+00> : vector<64xf32>
    %463 = vector.multi_reduction <add>, %462, %cst_169 [0] : vector<32x64xf32> to vector<64xf32>
    %464 = vector.shape_cast %463 : vector<64xf32> to vector<1x64xf32>
    %cst_170 = arith.constant 3.200000e+01 : f32
    %465 = vector.broadcast %cst_170 : f32 to vector<1x64xf32>
    %466 = arith.divf %464, %465 : vector<1x64xf32>
    %467 = vector.extract_strided_slice %456 {offsets = [64, 0], sizes = [32, 64], strides = [1, 1]} : vector<128x64xf32> to vector<32x64xf32>
    %cst_171 = arith.constant dense<0.000000e+00> : vector<64xf32>
    %468 = vector.multi_reduction <add>, %467, %cst_171 [0] : vector<32x64xf32> to vector<64xf32>
    %469 = vector.shape_cast %468 : vector<64xf32> to vector<1x64xf32>
    %cst_172 = arith.constant 3.200000e+01 : f32
    %470 = vector.broadcast %cst_172 : f32 to vector<1x64xf32>
    %471 = arith.divf %469, %470 : vector<1x64xf32>
    %472 = vector.extract_strided_slice %456 {offsets = [96, 0], sizes = [32, 64], strides = [1, 1]} : vector<128x64xf32> to vector<32x64xf32>
    %cst_173 = arith.constant dense<0.000000e+00> : vector<64xf32>
    %473 = vector.multi_reduction <add>, %472, %cst_173 [0] : vector<32x64xf32> to vector<64xf32>
    %474 = vector.shape_cast %473 : vector<64xf32> to vector<1x64xf32>
    %cst_174 = arith.constant 3.200000e+01 : f32
    %475 = vector.broadcast %cst_174 : f32 to vector<1x64xf32>
    %476 = arith.divf %474, %475 : vector<1x64xf32>
    %477 = tpu.concatenate %461, %466, %471, %476 in 0 : vector<1x64xf32>, vector<1x64xf32>, vector<1x64xf32>, vector<1x64xf32> -> vector<4x64xf32>
    %c3216 = arith.constant 3216 : index
    %c0_175 = arith.constant 0 : index
    %478 = vector.load %arg2[%c3216, %c0_175] : memref<3360x128xbf16, #tpu.memory_space<vmem>>, vector<64x8xbf16>
    %c15 = arith.constant 15 : index
    %c0_176 = arith.constant 0 : index
    %479 = vector.load %arg3[%c15, %c0_176] : memref<18x128xf32, #tpu.memory_space<vmem>>, vector<1x8xf32>
    %480 = arith.truncf %477 : vector<4x64xf32> to vector<4x64xbf16>
    %cst_177 = arith.constant dense<0.000000e+00> : vector<4x8xf32>
    %481 = tpu.matmul %480, %478, %cst_177 {dimension_numbers = #tpu.dot_dimension_numbers<[1], [0], [0], [1], [0, 0, 1, 1], [], []>} : vector<4x64xbf16>, vector<64x8xbf16>, vector<4x8xf32> -> vector<4x8xf32>
    %482 = vector.broadcast %479 : vector<1x8xf32> to vector<4x8xf32>
    %483 = arith.addf %481, %482 : vector<4x8xf32>
    %cst_178 = arith.constant 0.000000e+00 : f32
    %484 = vector.broadcast %cst_178 : f32 to vector<4x8xf32>
    %485 = arith.maximumf %483, %484 : vector<4x8xf32>
    %c3280 = arith.constant 3280 : index
    %c0_179 = arith.constant 0 : index
    %486 = vector.load %arg2[%c3280, %c0_179] : memref<3360x128xbf16, #tpu.memory_space<vmem>>, vector<8x64xbf16>
    %c16_180 = arith.constant 16 : index
    %c0_181 = arith.constant 0 : index
    %487 = vector.load %arg3[%c16_180, %c0_181] : memref<18x128xf32, #tpu.memory_space<vmem>>, vector<1x64xf32>
    %488 = arith.truncf %485 : vector<4x8xf32> to vector<4x8xbf16>
    %cst_182 = arith.constant dense<0.000000e+00> : vector<4x64xf32>
    %489 = tpu.matmul %488, %486, %cst_182 {dimension_numbers = #tpu.dot_dimension_numbers<[1], [0], [0], [1], [0, 0, 1, 1], [], []>} : vector<4x8xbf16>, vector<8x64xbf16>, vector<4x64xf32> -> vector<4x64xf32>
    %490 = vector.broadcast %487 : vector<1x64xf32> to vector<4x64xf32>
    %491 = arith.addf %489, %490 : vector<4x64xf32>
    %492 = arith.negf %491 : vector<4x64xf32>
    %493 = math.exp %492 : vector<4x64xf32>
    %cst_183 = arith.constant 1.000000e+00 : f32
    %494 = vector.broadcast %cst_183 : f32 to vector<4x64xf32>
    %495 = arith.addf %494, %493 : vector<4x64xf32>
    %496 = arith.divf %494, %495 : vector<4x64xf32>
    %497 = vector.extract_strided_slice %496 {offsets = [0, 0], sizes = [1, 64], strides = [1, 1]} : vector<4x64xf32> to vector<1x64xf32>
    %498 = vector.shape_cast %497 : vector<1x64xf32> to vector<1x64xf32>
    %499 = vector.broadcast %498 : vector<1x64xf32> to vector<32x64xf32>
    %500 = vector.extract_strided_slice %496 {offsets = [1, 0], sizes = [1, 64], strides = [1, 1]} : vector<4x64xf32> to vector<1x64xf32>
    %501 = vector.shape_cast %500 : vector<1x64xf32> to vector<1x64xf32>
    %502 = vector.broadcast %501 : vector<1x64xf32> to vector<32x64xf32>
    %503 = vector.extract_strided_slice %496 {offsets = [2, 0], sizes = [1, 64], strides = [1, 1]} : vector<4x64xf32> to vector<1x64xf32>
    %504 = vector.shape_cast %503 : vector<1x64xf32> to vector<1x64xf32>
    %505 = vector.broadcast %504 : vector<1x64xf32> to vector<32x64xf32>
    %506 = vector.extract_strided_slice %496 {offsets = [3, 0], sizes = [1, 64], strides = [1, 1]} : vector<4x64xf32> to vector<1x64xf32>
    %507 = vector.shape_cast %506 : vector<1x64xf32> to vector<1x64xf32>
    %508 = vector.broadcast %507 : vector<1x64xf32> to vector<32x64xf32>
    %509 = tpu.concatenate %499, %502, %505, %508 in 0 : vector<32x64xf32>, vector<32x64xf32>, vector<32x64xf32>, vector<32x64xf32> -> vector<128x64xf32>
    %510 = arith.mulf %456, %509 : vector<128x64xf32>
    %511 = arith.addf %510, %408 : vector<128x64xf32>
    %cst_184 = arith.constant 0.000000e+00 : f32
    %512 = vector.broadcast %cst_184 : f32 to vector<128x64xf32>
    %513 = arith.maximumf %511, %512 : vector<128x64xf32>
    %514 = vector.extract_strided_slice %513 {offsets = [0, 0], sizes = [32, 64], strides = [1, 1]} : vector<128x64xf32> to vector<32x64xf32>
    %cst_185 = arith.constant dense<0.000000e+00> : vector<64xf32>
    %515 = vector.multi_reduction <add>, %514, %cst_185 [0] : vector<32x64xf32> to vector<64xf32>
    %516 = vector.shape_cast %515 : vector<64xf32> to vector<1x64xf32>
    %cst_186 = arith.constant 3.200000e+01 : f32
    %517 = vector.broadcast %cst_186 : f32 to vector<1x64xf32>
    %518 = arith.divf %516, %517 : vector<1x64xf32>
    %519 = vector.extract_strided_slice %513 {offsets = [32, 0], sizes = [32, 64], strides = [1, 1]} : vector<128x64xf32> to vector<32x64xf32>
    %cst_187 = arith.constant dense<0.000000e+00> : vector<64xf32>
    %520 = vector.multi_reduction <add>, %519, %cst_187 [0] : vector<32x64xf32> to vector<64xf32>
    %521 = vector.shape_cast %520 : vector<64xf32> to vector<1x64xf32>
    %cst_188 = arith.constant 3.200000e+01 : f32
    %522 = vector.broadcast %cst_188 : f32 to vector<1x64xf32>
    %523 = arith.divf %521, %522 : vector<1x64xf32>
    %524 = vector.extract_strided_slice %513 {offsets = [64, 0], sizes = [32, 64], strides = [1, 1]} : vector<128x64xf32> to vector<32x64xf32>
    %cst_189 = arith.constant dense<0.000000e+00> : vector<64xf32>
    %525 = vector.multi_reduction <add>, %524, %cst_189 [0] : vector<32x64xf32> to vector<64xf32>
    %526 = vector.shape_cast %525 : vector<64xf32> to vector<1x64xf32>
    %cst_190 = arith.constant 3.200000e+01 : f32
    %527 = vector.broadcast %cst_190 : f32 to vector<1x64xf32>
    %528 = arith.divf %526, %527 : vector<1x64xf32>
    %529 = vector.extract_strided_slice %513 {offsets = [96, 0], sizes = [32, 64], strides = [1, 1]} : vector<128x64xf32> to vector<32x64xf32>
    %cst_191 = arith.constant dense<0.000000e+00> : vector<64xf32>
    %530 = vector.multi_reduction <add>, %529, %cst_191 [0] : vector<32x64xf32> to vector<64xf32>
    %531 = vector.shape_cast %530 : vector<64xf32> to vector<1x64xf32>
    %cst_192 = arith.constant 3.200000e+01 : f32
    %532 = vector.broadcast %cst_192 : f32 to vector<1x64xf32>
    %533 = arith.divf %531, %532 : vector<1x64xf32>
    %534 = tpu.concatenate %518, %523, %528, %533 in 0 : vector<1x64xf32>, vector<1x64xf32>, vector<1x64xf32>, vector<1x64xf32> -> vector<4x64xf32>
    %c3296 = arith.constant 3296 : index
    %c0_193 = arith.constant 0 : index
    %535 = vector.load %arg2[%c3296, %c0_193] : memref<3360x128xbf16, #tpu.memory_space<vmem>>, vector<64x128xbf16>
    %c17 = arith.constant 17 : index
    %c0_194 = arith.constant 0 : index
    %536 = vector.load %arg3[%c17, %c0_194] : memref<18x128xf32, #tpu.memory_space<vmem>>, vector<1x128xf32>
    %537 = arith.truncf %534 : vector<4x64xf32> to vector<4x64xbf16>
    %cst_195 = arith.constant dense<0.000000e+00> : vector<4x128xf32>
    %538 = tpu.matmul %537, %535, %cst_195 {dimension_numbers = #tpu.dot_dimension_numbers<[1], [0], [0], [1], [0, 0, 1, 1], [], []>} : vector<4x64xbf16>, vector<64x128xbf16>, vector<4x128xf32> -> vector<4x128xf32>
    %539 = vector.broadcast %536 : vector<1x128xf32> to vector<4x128xf32>
    %540 = arith.addf %538, %539 : vector<4x128xf32>
    %c0_196 = arith.constant 0 : index
    %c0_197 = arith.constant 0 : index
    %c0_198 = arith.constant 0 : index
    %541 = vector.load %arg4[%c0_196, %c0_197, %c0_198] : memref<1x4x128xf32, #tpu.memory_space<vmem>>, vector<1x4x128xf32>
    %542 = vector.shape_cast %541 : vector<1x4x128xf32> to vector<4x128xf32>
    %543 = vector.shape_cast %540 : vector<4x128xf32> to vector<1x4x128xf32>
    tpu.vector_store %arg4[%c0_196, %c0_197, %c0_198], %543 {strides = array<i32>} : memref<1x4x128xf32, #tpu.memory_space<vmem>>, vector<1x4x128xf32>,
    return
  }
  func.func @transform_0(%arg0: i32) -> (i32, i32) {
    %c0_i32 = arith.constant 0 : i32
    %c0_i32_0 = arith.constant 0 : i32
    return %arg0, %c0_i32 : i32, i32
  }
  func.func @transform_1(%arg0: i32) -> (i32, i32) {
    %c0_i32 = arith.constant 0 : i32
    %c0_i32_0 = arith.constant 0 : i32
    %c0_i32_1 = arith.constant 0 : i32
    return %c0_i32, %c0_i32_0 : i32, i32
  }
  func.func @transform_2(%arg0: i32) -> (i32, i32) {
    %c0_i32 = arith.constant 0 : i32
    %c0_i32_0 = arith.constant 0 : i32
    %c0_i32_1 = arith.constant 0 : i32
    return %c0_i32, %c0_i32_0 : i32, i32
  }
  func.func @transform_3(%arg0: i32) -> (i32, i32, i32) {
    %c0_i32 = arith.constant 0 : i32
    %c0_i32_0 = arith.constant 0 : i32
    %c0_i32_1 = arith.constant 0 : i32
    return %arg0, %c0_i32, %c0_i32_0 : i32, i32, i32
  }
}

</mosaic_0001>

<bundles_post_ra>
// kernel: net_forward.1
= control target key start
LH: loop header
LB: loop body
LE: loop exit
PB: predicated region body
PF: predicated region fallthrough
CT: control target
= control target key end

     0   :  { %8 = vsyncpa [#allocation3], 0  ;;  %s18922_s0 = inlined_call_operand.vmem [shape: f32[256,1], index: 0, kind: input, shape index: {}]   ;;  %s18923_s1 = inlined_call_operand.hbm [shape: bf16[3360,128], index: 1, kind: input, shape index: {}]   ;;  %s18924_s2 = inlined_call_operand.vmem [shape: f32[18,128], index: 2, kind: input, shape index: {}]   ;;  %s18925_s3 = inlined_call_operand.hbm [shape: f32[2,4,128], index: 3, kind: output, shape index: {}]  }
   0x1   :  { %9 = vsyncpa [#allocation4], 0 }
   0x2   :  { %11 = vsyncpa [#allocation4 + $0x1], 0  ;;  %s12294_s12 = smov 0   ;;  %s12296_s13 = smov 0  }
   0x3   :  { %s12298_s14 = smov 0   ;;  %s12300_s15 = smov 0  }
   0x4 LB: > { %s12315_s16 = sadd.s32 4294967295, %s12257_s15   ;;  %s9920_s17 = sadd.s32 4294967294, %s12257_s15   ;;  %s12257_s15 = sphi %s12300_s15, %s19563_s15   ;;  %s12253_s14 = sphi %s12298_s14, %s19562_s14   ;;  %s12249_s13 = sphi %s12296_s13, %s19561_s13   ;;  %s12245_s12 = sphi %s12294_s12, %s19560_s12  }
   0x5   : > { %s12319_s18 = sadd.s32 1, %s12257_s15   ;;  %s92_s19 = sadd.s32 1, %s12253_s14 }
   0x6   : > { %s89_s20 = ssub.s32 %s12257_s15, %s12319_s18  ;;  %p102_p0 = scmp.ne.s32.totalorder %s12253_s14, %s12249_s13 }
   0x7   : > { %p90_p1 = scmp.eq.s32.totalorder %s89_s20, 0  ;;  %p103_p2 = scmp.eq.s32.totalorder %s12315_s16, 1 }
   0x8   : > { %p108_p3 = scmp.ne.s32.totalorder %s12249_s13, %s12245_s12  ;;  %p109_p4 = scmp.eq.s32.totalorder %s9920_s17, 1 }
   0x9   : > { %s12330_s21 = scalar_select %p90_p1, %s12253_s14, %s92_s19  }
   0xa   : > { %p12332_p5 = por %p103_p2, %p102_p0  ;;  %p12336_p6 = por %p109_p4, %p108_p3 }
   0xb   : > { %p9921_p7 = scmp.ge.s32.totalorder %s12257_s15, 1  ;;  %p116_p8 = scmp.lt.s32.totalorder %s12257_s15, 3 }
   0xc   : > { %s19074_s22 = scalar_select %p12332_p5, 1, 0 }
   0xd   : > { %s19075_s23 = scalar_select %p12336_p6, 1, 0 }
   0xe   : > { %p18926_p9 = scmp.eq.s32.totalorder %s12315_s16, 0  ;;  %p12343_p10 = pnand %p9921_p7, %p116_p8 }
   0xf   : > { %s12259_s25 = smov [#allocation2]   ;;  %s12163_s30 = scalar_lea.hbm %s18923_s1, 26880 }
  0x10   : > { %s19076_s24 = scalar_select %p12343_p10, 1, 0 }
  0x11   : > { %s128_s26 = sshll.u32 %s12259_s25, 4  ;;  %p10888_p11 = pneg %p12343_p10  ;;  %s129_s26 = int_to_ptr.vmem [resolvable:$true] %s128_s26 }
  0x12   : > { %p12164_p13 = scmp.ne.s32.totalorder %s18923_s1, %s12163_s30  ;;  %p12170_p3 = scmp.lt.u32.totalorder %s12163_s30, %s18923_s1 }
  0x13   : > { %p12351_p12 = pnand %p18926_p9, %p10888_p11 }
  0x15   : > { %p12165_p0 = pneg %p12351_p12 }
  0x17   : > { %p12166_p1 = pnand %p12165_p0, %p12164_p13 }
  0x19   : > { %p12167_p2 = pneg %p12166_p1 }
  0x1b   : > { %p12172_p4 = pnand %p12170_p3, %p12167_p2 }
  0x1d   : > { %12175 = shalt.err (!%p12172_p4)
}
  0x1e   : > { %s12176_s8 = scalar_lea.vmem %s129_s26, 26880  ;;  %p12184_p9 = scmp.lt.s32.totalorder %s129_s26, %s129_s26 }
  0x1f   : > { %p12177_p7 = scmp.ne.s32.totalorder %s129_s26, %s12176_s8  ;;  %p12185_p6 = scmp.lt.s32.totalorder %s12176_s8, %s12176_s8 }
  0x21   : > { %p12179_p8 = pnand %p12177_p7, %p12165_p0  ;;  %p12186_p5 = por %p12185_p6, %p12184_p9 }
  0x23   : > { %p12180_p11 = pneg %p12179_p8 }
  0x25   : > { %p12187_p10 = pnand %p12186_p5, %p12180_p11 }
  0x27   : > { %12190 = shalt.err (!%p12187_p10)
}
  0x28   : > { %s12260_s9 = smov 64   ;;  %s12261_s10 = smov 4  }
  0x29   : > { %10891 = dma.hbm_to_vmem [thread:$0]  (!%p12351_p12), %s18923_s1, 26880, %s129_s26, [#allocation3], %s12260_s9, %s12260_s9, %s12261_s10  }
  0x2a   : > { %p19078_p13 = scmp.ne.s32.totalorder %s19076_s24, 0 }
  0x2c   : > { %156 = sbr.rel (%p19078_p13) target bundleno = 6116 (0x17e4), region = 32 }
  0x33   : > { %p19079_p1 = scmp.eq.s32.totalorder %s12315_s16, 0 }
  0x35   : > { %12236 = dma.done.wait (%p19079_p1), [#allocation3], 26880   ;;  %p19080_p0 = pmov %p19079_p1 }
  0x36   : > { %s9927_s19 = sshll.u32 %s12315_s16, 4  ;;  %v187_v0 = vlaneseq  ;;  %s12262_s27 = smov 2  }
  0x37   : > { %12238 = vsyncadd (%p19080_p0), [#allocation3], 4294940416  ;;  %p181_p5 = scmp.lt.s32.totalorder %s9927_s19, 31  ;;  %s12263_s28 = smov 1  }
  0x38   : > { %v12378_v1 = vshrl.u32 %v187_v0, 7  ;;  %s12264_s29 = smov 3   ;;  %s12265_s30 = smov 4  }
  0x39   : > { %s19565_s19 = smov (!%p181_p5, %s9927_s19), 31  ;;  %s12267_s6 = smov 64  }
  0x3a   : > { %19081 = vst [vmem:[#allocation8_spill] sm:$0xff] %v12378_v1  ;;  %v191_v2 = vadd.s32 24, %v12378_v1  ;;  %s9928_s20 = sshll.u32 %s19565_s19, 3  ;;  %v12382_v3 = vand.u32 31, %v12378_v1  ;;  %v192_v4 = vadd.s32 32, %v12378_v1  ;;  %vm573_vm0 = vcmp.lt.s32.totalorder %v12378_v1, 1 }
  0x3b   : > { %s12388_s26 = scalar_lea.vmem %s18922_s0, %s9928_s20  ;;  %vm622_vm1 = vcmp.lt.s32.totalorder %v12378_v1, 7  ;;  %vm671_vm2 = vcmp.lt.s32.totalorder %v12378_v1, 6  ;;  %v195_v9 = vadd.s32 56, %v12378_v1  ;;  %v12406_v10 = vadd.s32 64, %v12378_v1  ;;  %s12268_s7 = smov 32  }
  0x3c   : > { %19082 = vst [vmem:[#allocation9_spill] sm:$0xff] %v12382_v3  ;;  %v12392_v5 = vand.u32 31, %v191_v2  ;;  %v12395_v6 = vld [vmem:[%s12388_s26] sm:$0xff]  ;;  %v12398_v7 = vld [vmem:[%s12388_s26 + $0x8] sm:$0xff]  ;;  %v12401_v8 = vld [vmem:[%s12388_s26 + $0x10] sm:$0xff]  ;;  %vm18938_vm3 = vcmp.lt.s32.totalorder %v12382_v3, 1 }
  0x3d   : > { %v10945_v11 = vpack.i.bf16 %v12398_v7, %v12395_v6  ;;  %v12411_v12 = vld [vmem:[%s12388_s26 + $0x18] sm:$0xff]  ;;  %v558_v13 = vrot.slane %v12398_v7, 7  ;;  %v12415_v14 = vld [vmem:[%s12388_s26 + $0x20] sm:$0xff]  ;;  %v12418_v15 = vand.u32 31, %v192_v4  ;;  %v559_v16 = vrot.slane %v12401_v8, 7  ;;  %v12448_v32 = vld [vmem:[%s12388_s26 + $0x28] sm:$0xff] }
  0x3e   : > { %19083 = vst [vmem:[#allocation10_spill] sm:$0xff] %v12392_v5  ;;  %v560_v17 = vrot.slane %v12411_v12, 7  ;;  %v10950_v18 = vpack.i.bf16 %v12411_v12, %v12401_v8  ;;  %v606_v19 = vrot.slane %v12395_v6, 1  ;;  %v607_v20 = vrot.slane %v12398_v7, 1  ;;  %v12437_v27 = vld [vmem:[%s12388_s26 + $0x78] sm:$0xff]  ;;  %v12451_v33 = vld [vmem:[%s12388_s26 + $0x30] sm:$0xff] }
  0x3f   : > { %19084 = vst [vmem:[#allocation11_spill] sm:$0xff] %v12418_v15  ;;  %10946 = vrot.lane.b32.xlu1 %v10945_v11, %s12262_s27  ;;  %v608_v21 = vrot.slane %v12401_v8, 1  ;;  %vm431_vm4 = vcmp.ge.s32.totalorder %v12392_v5, 31  ;;  %v609_v22 = vrot.slane %v12411_v12, 1  ;;  %v587_v24 = vsel %vm573_vm0, %v558_v13, %v559_v16  ;;  %v12474_v45 = vld [vmem:[%s12388_s26 + $0x38] sm:$0xff]  ;;  %v12499_v58 = vld [vmem:[%s12388_s26 + $0x40] sm:$0xff] }
  0x40   : > { %v586_v23 = vsel %vm573_vm0, %v559_v16, %v560_v17  ;;  %v610_v25 = vrot.slane %v12415_v14, 1  ;;  %v655_v26 = vrot.slane %v12395_v6, 2  ;;  %v637_v30 = vsel %vm622_vm1, %v606_v19, %v607_v20  ;;  %s12270_s8 = smov 96   ;;  %s177_s5 = sand.u32 1, %s12249_s13  }
  0x41   : > { %v10955_v28 = vpack.i.bf16 %v586_v23, %v587_v24  ;;  %v636_v29 = vsel %vm622_vm1, %v607_v20, %v608_v21  ;;  %v635_v31 = vsel %vm622_vm1, %v608_v21, %v609_v22  ;;  %v656_v36 = vrot.slane %v12398_v7, 2  ;;  %s10252_s10 = sshll.u32 %s12315_s16, 6  ;;  %s9836_s25 = scalar_lea.sflag [#allocation4], %s177_s5 }
  0x42   : > { %v10960_v34 = vpack.i.bf16 %v636_v29, %v637_v30  ;;  %v634_v35 = vsel %vm622_vm1, %v609_v22, %v610_v25  ;;  %v657_v37 = vrot.slane %v12401_v8, 2  ;;  %vm415_vm5 = vcmp.ge.s32.totalorder %v12392_v5, 30  ;;  %s18880_s24 = scalar_lea.hbm %s18925_s3, %s10252_s10  ;;  %p19558_p9 = scmp.ne.s32.totalorder %s19074_s22, 0 }
  0x43   : > { %10956 = vrot.lane.b32.xlu0 %v10955_v28, %s12263_s28  ;;  %10951 = vrot.lane.b32.xlu1 %v10950_v18, %s12262_s27  ;;  %v642_v38 = vsel %vm431_vm4, 0.0, %v634_v35  ;;  %v658_v39 = vrot.slane %v12411_v12, 2  ;;  %v659_v40 = vrot.slane %v12415_v14, 2  ;;  %v686_v43 = vsel %vm671_vm2, %v655_v26, %v656_v36  ;;  %v12545_v35 = vld [vmem:[%s12388_s26 + $0x50] sm:$0xff] }
  0x44   : > { %v10975_v41 = vpack.i.bf16 %v642_v38, %v635_v31  ;;  %v685_v42 = vsel %vm671_vm2, %v656_v36, %v657_v37  ;;  %v557_v44 = vrot.slane %v12395_v6, 7  ;;  %v572_v48 = vrot.slane %v12437_v27, 7  ;;  %v12552_v38 = vld [vmem:[%s12388_s26 + $0x58] sm:$0xff] }
  0x45   : > { %v683_v46 = vsel %vm671_vm2, %v658_v39, %v659_v40  ;;  %v684_v47 = vsel %vm671_vm2, %v657_v37, %v658_v39  ;;  %v12483_v49 = vand.u32 31, %v195_v9  ;;  %v10965_v50 = vpack.i.bf16 %v685_v42, %v686_v43 }
  0x46   : > { %v691_v51 = vsel %vm415_vm5, 0.0, %v683_v46  ;;  %v562_v52 = vrot.slane %v12448_v32, 7  ;;  %v563_v53 = vrot.slane %v12451_v33, 7  ;;  %v588_v55 = vsel %vm573_vm0, %v557_v44, %v558_v13 }
  0x47   : > { %19085 = vst [vmem:[#allocation12_spill] sm:$0xff] %v12483_v49  ;;  %10961 = vrot.lane.b32.xlu0 %v10960_v34, %s12264_s29  ;;  %10976 = vrot.lane.b32.xlu1 %v10975_v41, %s12264_s29  ;;  %v10980_v54 = vpack.i.bf16 %v691_v51, %v684_v47  ;;  %v589_v56 = vsel %vm573_vm0, %v572_v48, %v557_v44  ;;  %v564_v57 = vrot.slane %v12474_v45, 7  ;;  %v561_v61 = vrot.slane %v12415_v14, 7  ;;  %v12542_v34 = vld [vmem:[%s12388_s26 + $0x48] sm:$0xff]  ;;  %v12565_v44 = vld [vmem:[%s12388_s26 + $0x60] sm:$0xff] }
  0x48   : > { %v590_v59 = vsel %vm18938_vm3, 0.0, %v589_v56  ;;  %v583_v60 = vsel %vm573_vm0, %v562_v52, %v563_v53  ;;  %vm448_vm6 = vcmp.lt.s32.totalorder %v12418_v15, 1  ;;  %v199_v63 = vadd.s32 88, %v12378_v1 }
  0x49   : > { %v582_v62 = vsel %vm573_vm0, %v563_v53, %v564_v57  ;;  %v10970_v0 = vpack.i.bf16 %v588_v55, %v590_v59  ;;  %v585_v2 = vsel %vm573_vm0, %v560_v17, %v561_v61  ;;  %v12513_v4 = vadd.s32 96, %v12378_v1 }
  0x4a   : > { %v12516_v9 = vadd.s32 120, %v12378_v1  ;;  %v10990_v11 = vpack.i.bf16 %v582_v62, %v583_v60  ;;  %vm19003_vm7 = vcmp.ge.s32.totalorder %v12483_v49, 31  ;;  %v613_v13 = vrot.slane %v12474_v45, 1  ;;  %v12599_v62 = vld [vmem:[%s12388_s26 + $0x70] sm:$0xff] }
  0x4b   : > { %10966 = vrot.lane.b32.xlu0 %v10965_v50, %s12265_s30  ;;  %10981 = vrot.lane.b32.xlu1 %v10980_v54, %s12265_s30  ;;  %v614_v16 = vrot.slane %v12499_v58, 1  ;;  %v584_v17 = vsel %vm573_vm0, %v561_v61, %v562_v52  ;;  %v594_v18 = vsel %vm448_vm6, 0.0, %v585_v2  ;;  %v612_v20 = vrot.slane %v12451_v33, 1 }
  0x4c   : > { %v662_v21 = vrot.slane %v12474_v45, 2  ;;  %v611_v23 = vrot.slane %v12448_v32, 1  ;;  %v663_v24 = vrot.slane %v12499_v58, 2  ;;  %v509_v28 = vrot.slane %v12398_v7, 6 }
  0x4d   : > { %v630_v22 = vsel %vm622_vm1, %v613_v13, %v614_v16  ;;  %v10985_v29 = vpack.i.bf16 %v584_v17, %v594_v18  ;;  %v11000_v30 = vpack.i.bf16 %v12474_v45, %v12451_v33  ;;  %v661_v31 = vrot.slane %v12451_v33, 2 }
  0x4e   : > { %v631_v36 = vsel %vm622_vm1, %v612_v20, %v613_v13  ;;  %v646_v37 = vsel %vm19003_vm7, 0.0, %v630_v22  ;;  %v12555_v39 = vand.u32 31, %v12406_v10  ;;  %v565_v41 = vrot.slane %v12499_v58, 7 }
  0x4f   : > { %10971 = vrot.lane.b32.xlu0 %v10970_v0, %s12263_s28  ;;  %10991 = vrot.lane.b32.xlu1 %v10990_v11, %s12263_s28  ;;  %vm419_vm8 = vcmp.ge.s32.totalorder %v12483_v49, 30  ;;  %v679_v42 = vsel %vm671_vm2, %v662_v21, %v663_v24  ;;  %v660_v43 = vrot.slane %v12448_v32, 2  ;;  %v10995_v46 = vpack.i.bf16 %v12448_v32, %v12415_v14 }
  0x50   : > { %19086 = vst [vmem:[#allocation13_spill] sm:$0xff] %v12555_v39  ;;  %v632_v10 = vsel %vm622_vm1, %v611_v23, %v612_v20  ;;  %v566_v47 = vrot.slane %v12542_v34, 7  ;;  %vm19004_vm9 = vcmp.lt.s32.totalorder %v12555_v39, 1  ;;  %v11010_v50 = vpack.i.bf16 %v646_v37, %v631_v36 }
  0x51   : > { %v567_v51 = vrot.slane %v12545_v35, 7  ;;  %v581_v52 = vsel %vm573_vm0, %v564_v57, %v565_v41  ;;  %v12578_v53 = vand.u32 31, %v199_v63  ;;  %v633_v54 = vsel %vm622_vm1, %v610_v25, %v611_v23 }
  0x52   : > { %v680_v55 = vsel %vm671_vm2, %v661_v31, %v662_v21  ;;  %v695_v56 = vsel %vm419_vm8, 0.0, %v679_v42  ;;  %v568_v59 = vrot.slane %v12552_v38, 7  ;;  %v508_v60 = vrot.slane %v12395_v6, 6 }
  0x53   : > { %10986 = vrot.lane.b32.xlu0 %v10985_v29, %s12263_s28  ;;  %11001 = vrot.lane.b32.xlu1 %v11000_v30, %s12262_s27  ;;  %19087 = vst [vmem:[#allocation14_spill] sm:$0xff] %v12578_v53  ;;  %v681_v57 = vsel %vm671_vm2, %v660_v43, %v661_v31  ;;  %v682_v61 = vsel %vm671_vm2, %v659_v40, %v660_v43  ;;  %v598_v25 = vsel %vm19004_vm9, 0.0, %v581_v52  ;;  %vm18939_vm10 = vcmp.ge.s32.totalorder %v12578_v53, 31  ;;  %v12622_v31 = vld [vmem:[%s12388_s26 + $0x68] sm:$0xff]  ;;  %s12273_s26 = smov [#allocation5]  }
  0x54   : > { %v616_v63 = vrot.slane %v12545_v35, 1  ;;  %v617_v0 = vrot.slane %v12552_v38, 1  ;;  %v618_v2 = vrot.slane %v12565_v44, 1  ;;  %v11005_v11 = vpack.i.bf16 %v632_v10, %v633_v54 }
  0x55   : > { %v11020_v40 = vpack.i.bf16 %v695_v56, %v680_v55  ;;  %v615_v13 = vrot.slane %v12542_v34, 1  ;;  %vm18929_vm11 = vcmp.ge.s32.totalorder %v12578_v53, 30  ;;  %v578_v17 = vsel %vm573_vm0, %v567_v51, %v568_v59 }
  0x56   : > { %v579_v18 = vsel %vm573_vm0, %v566_v47, %v567_v51  ;;  %v666_v20 = vrot.slane %v12552_v38, 2  ;;  %v667_v21 = vrot.slane %v12565_v44, 2  ;;  %v11015_v22 = vpack.i.bf16 %v681_v57, %v682_v61 }
  0x57   : > { %10996 = vrot.lane.b32.xlu0 %v10995_v46, %s12262_s27  ;;  %11011 = vrot.lane.b32.xlu1 %v11010_v50, %s12264_s29  ;;  %v626_v23 = vsel %vm622_vm1, %v617_v0, %v618_v2  ;;  %v665_v29 = vrot.slane %v12545_v35, 2  ;;  %v664_v30 = vrot.slane %v12542_v34, 2  ;;  %v571_v36 = vrot.slane %v12599_v62, 7 }
  0x58   : > { %v11030_v37 = vpack.i.bf16 %v578_v17, %v579_v18  ;;  %v580_v42 = vsel %vm573_vm0, %v565_v41, %v566_v47  ;;  %v12630_v43 = vand.u32 31, %v12513_v4  ;;  %v569_v46 = vrot.slane %v12565_v44, 7 }
  0x59   : > { %v627_v10 = vsel %vm622_vm1, %v616_v63, %v617_v0  ;;  %v675_v50 = vsel %vm671_vm2, %v666_v20, %v667_v21  ;;  %v650_v51 = vsel %vm18939_vm10, 0.0, %v626_v23  ;;  %v628_v52 = vsel %vm622_vm1, %v615_v13, %v616_v63 }
  0x5a   : > { %19088 = vst [vmem:[#allocation15_spill] sm:$0xff] %v12630_v43  ;;  %v629_v4 = vsel %vm622_vm1, %v614_v16, %v615_v13  ;;  %v570_v41 = vrot.slane %v12622_v31, 7  ;;  %v11025_v47 = vpack.i.bf16 %v580_v42, %v598_v25  ;;  %v11040_v54 = vpack.i.bf16 %v12552_v38, %v12545_v35 }
  0x5b   : > { %11006 = vrot.lane.b32.xlu0 %v11005_v11, %s12264_s29  ;;  %11021 = vrot.lane.b32.xlu1 %v11020_v40, %s12265_s30  ;;  %vm18930_vm12 = vcmp.lt.s32.totalorder %v12630_v43, 1  ;;  %v577_v55 = vsel %vm573_vm0, %v568_v59, %v569_v46  ;;  %v676_v56 = vsel %vm671_vm2, %v665_v29, %v666_v20  ;;  %v699_v16 = vsel %vm18929_vm11, 0.0, %v675_v50 }
  0x5c   : > { %v12661_v57 = vsel %vm671_vm2, %v664_v30, %v665_v29  ;;  %v12667_v61 = vsel %vm671_vm2, %v663_v24, %v664_v30  ;;  %v11035_v59 = vpack.i.bf16 %v12542_v34, %v12499_v58  ;;  %v11050_v25 = vpack.i.bf16 %v650_v51, %v627_v10 }
  0x5d   : > { %v11045_v63 = vpack.i.bf16 %v628_v52, %v629_v4  ;;  %v12675_v0 = vsel %vm573_vm0, %v571_v36, %v572_v48  ;;  %v12679_v11 = vsel %vm573_vm0, %v570_v41, %v571_v36  ;;  %v12683_v40 = vsel %vm573_vm0, %v569_v46, %v570_v41  ;;  %v1028_v4 = vld [vmem:[#allocation2] sm:$0x7] }
  0x5e   : > { %v12687_v24 = vsel %vm18930_vm12, 0.0, %v577_v55  ;;  %v12690_v13 = vand.u32 31, %v12516_v9  ;;  %v11060_v17 = vpack.i.bf16 %v699_v16, %v676_v56  ;;  %v11055_v48 = vpack.i.bf16 %v12661_v57, %v12667_v61 }
  0x5f   : > { %11016 = vrot.lane.b32.xlu0 %v11015_v22, %s12265_s30  ;;  %11031 = vrot.lane.b32.xlu1 %v11030_v37, %s12263_s28  ;;  %v11080_v18 = vpack.i.bf16 %v12437_v27, %v12599_v62  ;;  %v621_v20 = vrot.slane %v12437_v27, 1  ;;  %v620_v22 = vrot.slane %v12599_v62, 1  ;;  %v510_v23 = vrot.slane %v12401_v8, 6 }
  0x60   : > { %v511_v9 = vrot.slane %v12411_v12, 6  ;;  %vm524_vm13 = vcmp.lt.s32.totalorder %v12378_v1, 2  ;;  %v11070_v29 = vpack.i.bf16 %v12675_v0, %v12679_v11  ;;  %v11065_v30 = vpack.i.bf16 %v12683_v40, %v12687_v24 }
  0x61   : > { %v619_v36 = vrot.slane %v12622_v31, 1  ;;  %v669_v37 = vrot.slane %v12599_v62, 2  ;;  %vm18931_vm14 = vcmp.ge.s32.totalorder %v12690_v13, 31  ;;  %v670_v42 = vrot.slane %v12437_v27, 2 }
  0x62   : > { %v12713_v8 = vsel %vm524_vm13, %v510_v23, %v511_v9  ;;  %v12719_v12 = vsel %vm524_vm13, %v509_v28, %v510_v23  ;;  %v638_v46 = vsel %vm622_vm1, %v621_v20, %v606_v19  ;;  %v523_v10 = vrot.slane %v12437_v27, 6 }
  0x63   : > { %11026 = vrot.lane.b32.xlu0 %v11025_v47, %s12263_s28  ;;  %11041 = vrot.lane.b32.xlu1 %v11040_v54, %s12262_s27  ;;  %v12734_v50 = vsel %vm524_vm13, %v508_v60, %v509_v28  ;;  %v513_v51 = vrot.slane %v12448_v32, 6  ;;  %vm18937_vm15 = vcmp.ge.s32.totalorder %v12690_v13, 30  ;;  %v514_v19 = vrot.slane %v12451_v33, 6 }
  0x64   : > { %v515_v52 = vrot.slane %v12474_v45, 6  ;;  %v512_v7 = vrot.slane %v12415_v14, 6  ;;  %v540_v28 = vsel %vm524_vm13, %v523_v10, %v508_v60  ;;  %vm18932_vm11 = vcmask 1041408  }
  0x65   : > { %vm18933_vm12 = vcmask 1042432   ;;  %v654_v32 = vsel %vm18931_vm14, 0.0, %v638_v46  ;;  %v12755_v33 = vsel %vm524_vm13, %v513_v51, %v514_v19  ;;  %v687_v45 = vsel %vm671_vm2, %v670_v42, %v655_v26 }
  0x66   : > { %v12751_v41 = vsel %vm524_vm13, %v514_v19, %v515_v52  ;;  %v12759_v14 = vsel %vm524_vm13, %v512_v7, %v513_v51  ;;  %v536_v60 = vsel %vm524_vm13, %v511_v9, %v512_v7  ;;  %v12266_v47 = vmov 65535  }
  0x67   : > { %11036 = vrot.lane.b32.xlu0 %v11035_v59, %s12262_s27  ;;  %11051 = vrot.lane.b32.xlu1 %v11050_v25, %s12264_s29  ;;  %v1069_v54 = vsel %vm18932_vm11, 4294967295, %v12266_v47  ;;  %v517_v55 = vrot.slane %v12542_v34, 6  ;;  %v668_v56 = vrot.slane %v12622_v31, 2  ;;  %v518_v16 = vrot.slane %v12545_v35, 6 }
  0x68   : > { %v1070_v6 = vsel %vm18933_vm12, %v1069_v54, 0  ;;  %v519_v26 = vrot.slane %v12552_v38, 6  ;;  %vm18936_vm14 = vcmp.lt.s32.totalorder %v12382_v3, 2  ;;  %v516_v61 = vrot.slane %v12499_v58, 6 }
  0x69   : > { %v1072_v57 = vand.u32 %v1070_v6, %v1028_v4  ;;  %v521_v59 = vrot.slane %v12622_v31, 6  ;;  %vm18935_vm11 = vcmp.lt.s32.totalorder %v12418_v15, 2  ;;  %v12787_v25 = vsel %vm524_vm13, %v517_v55, %v518_v16 }
  0x6a   : > { %v12783_v34 = vsel %vm524_vm13, %v518_v16, %v519_v26  ;;  %v522_v35 = vrot.slane %v12599_v62, 6  ;;  %vm18934_vm12 = vcmp.lt.s32.totalorder %v12555_v39, 2  ;;  %v12793_v58 = vsel %vm524_vm13, %v516_v61, %v517_v55 }
  0x6b   : > { %11046 = vrot.lane.b32.xlu0 %v11045_v63, %s12264_s29  ;;  %11061 = vrot.lane.b32.xlu1 %v11060_v17, %s12265_s30  ;;  %v532_v38 = vsel %vm524_vm13, %v515_v52, %v516_v61  ;;  %v520_v63 = vrot.slane %v12565_v44, 6  ;;  %v703_v0 = vsel %vm18937_vm15, 0.0, %v687_v45  ;;  %v541_v11 = vsel %vm18936_vm14, 0.0, %v540_v28 }
  0x6c   : > { %10710 = vmatprep.subr.bf16.mxu0 %v1072_v57  ;;  %v12806_v40 = vsel %vm524_vm13, %v522_v35, %v523_v10  ;;  %v12810_v24 = vsel %vm524_vm13, %v521_v59, %v522_v35  ;;  %v623_v17 = vsel %vm622_vm1, %v620_v22, %v621_v20  ;;  %v12828_v9 = vsel %vm18935_vm11, 0.0, %v536_v60 }
  0x6d   : > { %10711 = vmatpush3.bf16.msra.mxu0 %v1072_v57  ;;  %v12824_v23 = vsel %vm524_vm13, %v519_v26, %v520_v63  ;;  %v11075_v20 = vpack.i.bf16 %v12622_v31, %v12565_v44  ;;  %v11090_v46 = vpack.i.bf16 %v654_v32, %v623_v17  ;;  %v624_v10 = vsel %vm622_vm1, %v619_v36, %v620_v22 }
  0x6e   : > { %v673_v31 = vsel %vm671_vm2, %v668_v56, %v669_v37  ;;  %v674_v27 = vsel %vm671_vm2, %v667_v21, %v668_v56  ;;  %vm977_vm11 = vcmask 15360   ;;  %vm994_vm14 = vcmask 23552  }
  0x6f   : > { %11056 = vrot.lane.b32.xlu0 %v11055_v48, %s12265_s30  ;;  %11071 = vrot.lane.b32.xlu1 %v11070_v29, %s12263_s28  ;;  %v12820_v48 = vsel %vm524_vm13, %v520_v63, %v521_v59  ;;  %v12832_v29 = vsel %vm18934_vm12, 0.0, %v532_v38  ;;  %vm960_vm12 = vcmask 7168   ;;  %vm1011_vm15 = vcmask 31744  }
  0x70   : > { %vm1042_vm3 = vcmask 39936   ;;  %vm18988_vm10 = vcmp.lt.s32.totalorder %v12630_v43, 2 }
  0x73   : > { %11066 = vrot.lane.b32.xlu0 %v11065_v30, %s12263_s28  ;;  %11081 = vrot.lane.b32.xlu1 %v11080_v18, %s12262_s27  ;;  %v625_v30 = vsel %vm622_vm1, %v618_v2, %v619_v36  ;;  %v672_v18 = vsel %vm671_vm2, %v669_v37, %v670_v42  ;;  %v11095_v2 = vpack.i.bf16 %v673_v31, %v674_v27 }
  0x74   : > { %v11085_v51 = vpack.i.bf16 %v624_v10, %v625_v30  ;;  %v11100_v22 = vpack.i.bf16 %v703_v0, %v672_v18 }
  0x77   : > { %11076 = vrot.lane.b32.xlu0 %v11075_v20, %s12262_s27  ;;  %11091 = vrot.lane.b32.xlu1 %v11090_v46, %s12264_s29 }
  0x7b   : > { %11086 = vrot.lane.b32.xlu0 %v11085_v51, %s12264_s29  ;;  %11101 = vrot.lane.b32.xlu1 %v11100_v22, %s12265_s30 }
  0x7f   : > { %11096 = vrot.lane.b32.xlu0 %v11095_v2, %s12265_s30 }
  0xb1   : > { %v10947_v36 = vpop.permute.xlu1 %10946 }
  0xb2   : > { %v10949_v63 = vunpack.i.h.bf16 %v10947_v36  ;;  %v10948_v0 = vunpack.i.l.bf16 %v10947_v36 }
  0xb5   : > { %v10957_v62 = vpop.permute.xlu0 %10956  ;;  %v10952_v42 = vpop.permute.xlu1 %10951 }
  0xb6   : > { %v10959_v37 = vunpack.i.h.bf16 %v10957_v62  ;;  %v10958_v19 = vunpack.i.l.bf16 %v10957_v62  ;;  %v10954_v7 = vunpack.i.h.bf16 %v10952_v42  ;;  %v10953_v21 = vunpack.i.l.bf16 %v10952_v42 }
  0xb8   : > { %v964_v4 = vsel %vm960_vm12, %v12713_v8, %v10959_v37  ;;  %v963_v28 = vsel %vm960_vm12, %v12719_v12, %v10958_v19 }
  0xb9   : > { %v10962_v44 = vpop.permute.xlu0 %10961  ;;  %v10977_v52 = vpop.permute.xlu1 %10976  ;;  %v981_v54 = vsel %vm977_vm11, %v964_v4, %v10954_v7  ;;  %v980_v55 = vsel %vm977_vm11, %v963_v28, %v10953_v21 }
  0xba   : > { %v10979_v32 = vunpack.i.h.bf16 %v10977_v52  ;;  %v10978_v45 = vunpack.i.l.bf16 %v10977_v52  ;;  %v10964_v46 = vunpack.i.h.bf16 %v10962_v44  ;;  %v10963_v10 = vunpack.i.l.bf16 %v10962_v44 }
  0xbc   : > { %v997_v16 = vsel %vm994_vm14, %v980_v55, %v10978_v45  ;;  %v998_v26 = vsel %vm994_vm14, %v981_v54, %v10979_v32 }
  0xbd   : > { %v10967_v60 = vpop.permute.xlu0 %10966  ;;  %v10982_v47 = vpop.permute.xlu1 %10981 }
  0xbe   : > { %v10984_v56 = vunpack.i.h.bf16 %v10982_v47  ;;  %v10983_v6 = vunpack.i.l.bf16 %v10982_v47  ;;  %v10969_v2 = vunpack.i.h.bf16 %v10967_v60  ;;  %v10968_v62 = vunpack.i.l.bf16 %v10967_v60 }
  0xc0   : > { %v1014_v57 = vsel %vm1011_vm15, %v997_v16, %v10983_v6  ;;  %v1015_v8 = vsel %vm1011_vm15, %v998_v26, %v10984_v56 }
  0xc1   : > { %v10972_v61 = vpop.permute.xlu0 %10971  ;;  %v10992_v12 = vpop.permute.xlu1 %10991  ;;  %v1031_v59 = vpack.c.bf16 %v1015_v8, %v1014_v57 }
  0xc2   : > { %v10974_v35 = vunpack.i.h.bf16 %v10972_v61  ;;  %v10973_v38 = vunpack.i.l.bf16 %v10972_v61  ;;  %v10994_v31 = vunpack.i.h.bf16 %v10992_v12  ;;  %v10993_v27 = vunpack.i.l.bf16 %v10992_v12 }
  0xc4   : > { %v961_v17 = vsel %vm960_vm12, %v541_v11, %v10973_v38  ;;  %v962_v20 = vsel %vm960_vm12, %v12734_v50, %v10974_v35  ;;  %v968_v7 = vsel %vm960_vm12, %v12751_v41, %v10994_v31  ;;  %v967_v21 = vsel %vm960_vm12, %v12755_v33, %v10993_v27 }
  0xc5   : > { %v10987_v30 = vpop.permute.xlu0 %10986  ;;  %v11002_v18 = vpop.permute.xlu1 %11001  ;;  %v978_v51 = vsel %vm977_vm11, %v961_v17, %v10948_v0  ;;  %v979_v22 = vsel %vm977_vm11, %v962_v20, %v10949_v63 }
  0xc6   : > { %v995_v42 = vsel %vm994_vm14, %v978_v51, %v10963_v10  ;;  %v996_v36 = vsel %vm994_vm14, %v979_v22, %v10964_v46  ;;  %v11004_v11 = vunpack.i.h.bf16 %v11002_v18  ;;  %v11003_v37 = vunpack.i.l.bf16 %v11002_v18 }
  0xc7   : > { %v1012_v44 = vsel %vm1011_vm15, %v995_v42, %v10968_v62  ;;  %v1013_v52 = vsel %vm1011_vm15, %v996_v36, %v10969_v2  ;;  %v10989_v45 = vunpack.i.h.bf16 %v10987_v30  ;;  %v10988_v60 = vunpack.i.l.bf16 %v10987_v30 }
  0xc8   : > { %v1030_v32 = vpack.c.bf16 %v1013_v52, %v1012_v44  ;;  %v984_v47 = vsel %vm977_vm11, %v967_v21, %v11003_v37  ;;  %v985_v54 = vsel %vm977_vm11, %v968_v7, %v11004_v11 }
  0xc9   : > { %v10997_v19 = vpop.permute.xlu0 %10996  ;;  %v11012_v50 = vpop.permute.xlu1 %11011  ;;  %v966_v38 = vsel %vm960_vm12, %v12759_v14, %v10989_v45  ;;  %v965_v63 = vsel %vm960_vm12, %v12828_v9, %v10988_v60 }
  0xca   : > { %v11014_v4 = vunpack.i.h.bf16 %v11012_v50  ;;  %v11013_v28 = vunpack.i.l.bf16 %v11012_v50  ;;  %10712 = vmatprep.mubr.msk.bf16.mxu0 %vm1042_vm3, %v1030_v32  ;;  %v10999_v6 = vunpack.i.h.bf16 %v10997_v19  ;;  %v10998_v16 = vunpack.i.l.bf16 %v10997_v19 }
  0xcb   : > { %10713 = vmatmul.mubr.msk.bf16.vlgmr.msra.gmra.mrb[0].mxu0 %vm1042_vm3, %v1031_v59 }
  0xcc   : > { %v1001_v33 = vsel %vm994_vm14, %v984_v47, %v11013_v28  ;;  %v1002_v57 = vsel %vm994_vm14, %v985_v54, %v11014_v4  ;;  %v982_v20 = vsel %vm977_vm11, %v965_v63, %v10998_v16  ;;  %v983_v46 = vsel %vm977_vm11, %v966_v38, %v10999_v6 }
  0xcd   : > { %v11007_v55 = vpop.permute.xlu0 %11006  ;;  %v11022_v56 = vpop.permute.xlu1 %11021 }
  0xce   : > { %v11024_v41 = vunpack.i.h.bf16 %v11022_v56  ;;  %v11023_v26 = vunpack.i.l.bf16 %v11022_v56  ;;  %v11009_v8 = vunpack.i.h.bf16 %v11007_v55  ;;  %v11008_v61 = vunpack.i.l.bf16 %v11007_v55 }
  0xd0   : > { %v1018_v12 = vsel %vm1011_vm15, %v1001_v33, %v11023_v26  ;;  %v1019_v35 = vsel %vm1011_vm15, %v1002_v57, %v11024_v41  ;;  %v999_v18 = vsel %vm994_vm14, %v982_v20, %v11008_v61  ;;  %v1000_v51 = vsel %vm994_vm14, %v983_v46, %v11009_v8 }
  0xd1   : > { %v11017_v0 = vpop.permute.xlu0 %11016  ;;  %v11032_v59 = vpop.permute.xlu1 %11031  ;;  %v1033_v17 = vpack.c.bf16 %v1019_v35, %v1018_v12 }
  0xd2   : > { %v11019_v10 = vunpack.i.h.bf16 %v11017_v0  ;;  %v11018_v30 = vunpack.i.l.bf16 %v11017_v0  ;;  %v11034_v2 = vunpack.i.h.bf16 %v11032_v59  ;;  %v11033_v62 = vunpack.i.l.bf16 %v11032_v59 }
  0xd4   : > { %v1016_v22 = vsel %vm1011_vm15, %v999_v18, %v11018_v30  ;;  %v1017_v14 = vsel %vm1011_vm15, %v1000_v51, %v11019_v10  ;;  %v972_v19 = vsel %vm960_vm12, %v12783_v34, %v11034_v2  ;;  %v971_v50 = vsel %vm960_vm12, %v12787_v25, %v11033_v62 }
  0xd5   : > { %v11027_v31 = vpop.permute.xlu0 %11026  ;;  %v11042_v27 = vpop.permute.xlu1 %11041  ;;  %v1032_v9 = vpack.c.bf16 %v1017_v14, %v1016_v22  ;;  %v553_v62 = vsel %vm18988_vm10, 0.0, %v12824_v23 }
  0xd6   : > { %v11044_v42 = vunpack.i.h.bf16 %v11042_v27  ;;  %v11043_v36 = vunpack.i.l.bf16 %v11042_v27  ;;  %v11029_v7 = vunpack.i.h.bf16 %v11027_v31  ;;  %v11028_v21 = vunpack.i.l.bf16 %v11027_v31 }
  0xd7   : > { %10716 = vmatprep.mubr.msk.bf16.mxu0 %vm1042_vm3, %v1032_v9 }
  0xd8   : > { %10717 = vmatmul.mubr.msk.bf16.gmra.mrb[4].mxu0 %vm1042_vm3, %v1033_v17  ;;  %v988_v4 = vsel %vm977_vm11, %v971_v50, %v11043_v36  ;;  %v989_v28 = vsel %vm977_vm11, %v972_v19, %v11044_v42  ;;  %v970_v26 = vsel %vm960_vm12, %v12793_v58, %v11029_v7  ;;  %v969_v33 = vsel %vm960_vm12, %v12832_v29, %v11028_v21 }
  0xd9   : > { %v11037_v11 = vpop.permute.xlu0 %11036  ;;  %v11052_v37 = vpop.permute.xlu1 %11051 }
  0xda   : > { %v11054_v44 = vunpack.i.h.bf16 %v11052_v37  ;;  %v11053_v52 = vunpack.i.l.bf16 %v11052_v37  ;;  %v11039_v60 = vunpack.i.h.bf16 %v11037_v11  ;;  %v11038_v47 = vunpack.i.l.bf16 %v11037_v11 }
  0xdc   : > { %v1005_v56 = vsel %vm994_vm14, %v988_v4, %v11053_v52  ;;  %v1006_v34 = vsel %vm994_vm14, %v989_v28, %v11054_v44  ;;  %v986_v12 = vsel %vm977_vm11, %v969_v33, %v11038_v47  ;;  %v987_v35 = vsel %vm977_vm11, %v970_v26, %v11039_v60 }
  0xdd   : > { %v11047_v32 = vpop.permute.xlu0 %11046  ;;  %v11062_v45 = vpop.permute.xlu1 %11061 }
  0xde   : > { %v11064_v54 = vunpack.i.h.bf16 %v11062_v45  ;;  %v11063_v55 = vunpack.i.l.bf16 %v11062_v45  ;;  %v11049_v6 = vunpack.i.h.bf16 %v11047_v32  ;;  %v11048_v25 = vunpack.i.l.bf16 %v11047_v32 }
  0xe0   : > { %v1022_v16 = vsel %vm1011_vm15, %v1005_v56, %v11063_v55  ;;  %v1023_v41 = vsel %vm1011_vm15, %v1006_v34, %v11064_v54  ;;  %v1003_v0 = vsel %vm994_vm14, %v986_v12, %v11048_v25  ;;  %v1004_v59 = vsel %vm994_vm14, %v987_v35, %v11049_v6 }
  0xe1   : > { %v11057_v57 = vpop.permute.xlu0 %11056  ;;  %v11072_v8 = vpop.permute.xlu1 %11071  ;;  %v1035_v61 = vpack.c.bf16 %v1023_v41, %v1022_v16 }
  0xe2   : > { %v11059_v38 = vunpack.i.h.bf16 %v11057_v57  ;;  %v11058_v63 = vunpack.i.l.bf16 %v11057_v57  ;;  %v11074_v10 = vunpack.i.h.bf16 %v11072_v8  ;;  %v11073_v30 = vunpack.i.l.bf16 %v11072_v8 }
  0xe4   : > { %v1020_v17 = vsel %vm1011_vm15, %v1003_v0, %v11058_v63  ;;  %v1021_v58 = vsel %vm1011_vm15, %v1004_v59, %v11059_v38  ;;  %v976_v31 = vsel %vm960_vm12, %v12806_v40, %v11074_v10  ;;  %v975_v27 = vsel %vm960_vm12, %v12810_v24, %v11073_v30 }
  0xe5   : > { %v11067_v20 = vpop.permute.xlu0 %11066  ;;  %v11082_v46 = vpop.permute.xlu1 %11081  ;;  %v1034_v29 = vpack.c.bf16 %v1021_v58, %v1020_v17 }
  0xe6   : > { %v11084_v18 = vunpack.i.h.bf16 %v11082_v46  ;;  %v11083_v51 = vunpack.i.l.bf16 %v11082_v46  ;;  %v11069_v42 = vunpack.i.h.bf16 %v11067_v20  ;;  %v11068_v36 = vunpack.i.l.bf16 %v11067_v20 }
  0xe7   : > { %10720 = vmatprep.mubr.msk.bf16.mxu0 %vm1042_vm3, %v1034_v29 }
  0xe8   : > { %10721 = vmatmul.mubr.msk.bf16.gmra.mrb[8].mxu0 %vm1042_vm3, %v1035_v61  ;;  %v992_v11 = vsel %vm977_vm11, %v975_v27, %v11083_v51  ;;  %v993_v37 = vsel %vm977_vm11, %v976_v31, %v11084_v18  ;;  %v974_v45 = vsel %vm960_vm12, %v12820_v48, %v11069_v42  ;;  %v973_v60 = vsel %vm960_vm12, %v553_v62, %v11068_v36  ;;  %v12965_v48 = vld [vmem:[%s18924_s2] ss:$0 sm:$0xff] }
  0xe9   : > { %v11077_v22 = vpop.permute.xlu0 %11076  ;;  %v11092_v14 = vpop.permute.xlu1 %11091  ;;  %vm19101_vm12 = vcmp.lt.s32.totalorder %v12382_v3, 1 }
  0xea   : > { %v11094_v9 = vunpack.i.h.bf16 %v11092_v14  ;;  %v11093_v2 = vunpack.i.l.bf16 %v11092_v14  ;;  %v11079_v44 = vunpack.i.h.bf16 %v11077_v22  ;;  %v11078_v52 = vunpack.i.l.bf16 %v11077_v22 }
  0xec   : > { %v1010_v24 = vsel %vm994_vm14, %v993_v37, %v11094_v9  ;;  %v1009_v21 = vsel %vm994_vm14, %v992_v11, %v11093_v2  ;;  %v990_v55 = vsel %vm977_vm11, %v973_v60, %v11078_v52  ;;  %v991_v56 = vsel %vm977_vm11, %v974_v45, %v11079_v44 }
  0xed   : > { %v11087_v19 = vpop.permute.xlu0 %11086  ;;  %v11102_v50 = vpop.permute.xlu1 %11101  ;;  %vm1683_vm11 = vcmask 261120  }
  0xee   : > { %v11104_v40 = vunpack.i.h.bf16 %v11102_v50  ;;  %v11103_v7 = vunpack.i.l.bf16 %v11102_v50  ;;  %v11089_v4 = vunpack.i.h.bf16 %v11087_v19  ;;  %v11088_v28 = vunpack.i.l.bf16 %v11087_v19 }
  0xf0   : > { %v1026_v23 = vsel %vm1011_vm15, %v1009_v21, %v11103_v7  ;;  %v1027_v32 = vsel %vm1011_vm15, %v1010_v24, %v11104_v40  ;;  %v1007_v25 = vsel %vm994_vm14, %v990_v55, %v11088_v28  ;;  %v1008_v16 = vsel %vm994_vm14, %v991_v56, %v11089_v4  ;;  %v11945_v7 = vld [vmem:[#allocation2 + $0x8] sm:$0xff]  }
  0xf1   : > { %v11097_v47 = vpop.permute.xlu0 %11096  ;;  %v1037_v54 = vpack.c.bf16 %v1027_v32, %v1026_v23  ;;  %v18954_v55 = vmov 0   ;;  %vm19103_vm14 = vcmp.ge.s32.totalorder %v12690_v13, 31 }
  0xf2   : > { %v11099_v34 = vunpack.i.h.bf16 %v11097_v47  ;;  %v11098_v6 = vunpack.i.l.bf16 %v11097_v47  ;;  %1859 = vmatprep.subr.bf16.mxu1 %v18954_v55 }
  0xf3   : > { %1860 = vmatpush1.bf16.msra.mxu1 %v11945_v7 }
  0xf4   : > { %v1024_v41 = vsel %vm1011_vm15, %v1007_v25, %v11098_v6  ;;  %v1025_v26 = vsel %vm1011_vm15, %v1008_v16, %v11099_v34  ;;  %1861 = vmatprep.subr.bf16.mxu1 %v18954_v55  ;;  %vm19105_vm15 = vcmp.lt.s32.totalorder %v12630_v43, 1 }
  0xf5   : > { %v1036_v33 = vpack.c.bf16 %v1025_v26, %v1024_v41  ;;  %v11946_v26 = vld [vmem:[#allocation2 + $0x10] sm:$0xff]  }
  0xf7   : > { %10724 = vmatprep.mubr.msk.bf16.mxu0 %vm1042_vm3, %v1036_v33  ;;  %1862 = vmatpush1.bf16.msra.mxu1 %v11946_v26 }
  0xf8   : > { %10725 = vmatmul.mubr.msk.bf16.gmra.mrb[12].mxu0 %vm1042_vm3, %v1037_v54  ;;  %1863 = vmatprep.subr.bf16.mxu1 %v18954_v55  ;;  %vm19099_vm3 = vcmp.ge.s32.totalorder %v12578_v53, 31 }
 0x19e   : > { %v10714_v57 = vpop.f32.mrb[0].mxu0 }
 0x19f   : > { %v12968_v8 = vadd.f32 %v10714_v57, %v12965_v48  ;;  %v1108_v61 = vpop.f32.mrb[1].mxu0 }
 0x1a0   : > { %v12971_v12 = vadd.f32 %v12965_v48, %v1108_v61  ;;  %v10715_v35 = vpop.f32.mrb[2].mxu0 }
 0x1a1   : > { %v1173_v38 = vrot.slane %v12968_v8, 6  ;;  %v12975_v63 = vadd.f32 %v10715_v35, %v12965_v48  ;;  %v1111_v0 = vpop.f32.mrb[3].mxu0  ;;  %v1413_v59 = vrot.slane %v12968_v8, 2  ;;  %v1253_v17 = vrot.slane %v12968_v8, 7 }
 0x1a2   : > { %v18941_v58 = vrot.slane %v12971_v12, 6  ;;  %v1112_v20 = vadd.f32 %v12965_v48, %v1111_v0  ;;  %v18940_v46 = vrot.slane %v12971_v12, 2  ;;  %v1333_v29 = vrot.slane %v12968_v8, 1 }
 0x1a3   : > { %v1174_v10 = vrot.slane %v12975_v63, 6  ;;  %v1254_v30 = vrot.slane %v12975_v63, 7  ;;  %v1334_v18 = vrot.slane %v12975_v63, 1  ;;  %v18944_v51 = vrot.slane %v12971_v12, 7 }
 0x1a4   : > { %v1172_v22 = vrot.slane %v1112_v20, 6  ;;  %v11105_v14 = vpack.i.bf16 %v1112_v20, %v12971_v12  ;;  %v1412_v31 = vrot.slane %v1112_v20, 2  ;;  %v1252_v27 = vrot.slane %v1112_v20, 7 }
 0x1a5   : > { %v1279_v9 = vsel %vm573_vm0, %v1253_v17, %v1254_v30  ;;  %v12992_v2 = vsel %vm622_vm1, %v1333_v29, %v1334_v18  ;;  %v18942_v62 = vrot.slane %v12971_v12, 1  ;;  %v1332_v42 = vrot.slane %v1112_v20, 1 }
 0x1a6   : > { %11106 = vrot.lane.b32.xlu1 %v11105_v14, %s12267_s6  ;;  %v1440_v36 = vsel %vm671_vm2, %v1412_v31, %v1413_v59  ;;  %v1441_v11 = vsel %vm671_vm2, %v18940_v46, %v1412_v31  ;;  %v1280_v37 = vsel %vm573_vm0, %v1252_v27, %v1253_v17  ;;  %v13010_v19 = vsel %vm573_vm0, %v18944_v51, %v1252_v27 }
 0x1a7   : > { %v1756_v50 = vpack.c.bf16 %v1440_v36, %v1441_v11  ;;  %v11120_v44 = vpack.i.bf16 %v1279_v9, %v1280_v37  ;;  %v13014_v52 = vsel %vm622_vm1, %v1332_v42, %v1333_v29  ;;  %v13020_v40 = vsel %vm622_vm1, %v18942_v62, %v1332_v42 }
 0x1a8   : > { %v13030_v28 = vsel %vm524_vm13, %v1173_v38, %v1174_v10  ;;  %v13034_v23 = vsel %vm524_vm13, %v1172_v22, %v1173_v38  ;;  %v13044_v60 = vsel %vm524_vm13, %v18941_v58, %v1172_v22  ;;  %v1414_v56 = vrot.slane %v12975_v63, 2 }
 0x1a9   : > { %9949 = vmatprep.mubr.msk.bf16.mxu1 %vm1683_vm11, %v1756_v50  ;;  %v19102_v39 = vrot.slane %v12971_v12, 1 }
 0x1aa   : > { %11121 = vrot.lane.b32.xlu1 %v11120_v44, %s12268_s7 }
 0x1ab   : > { %v10718_v24 = vpop.f32.mrb[4].mxu0 }
 0x1ac   : > { %v13038_v32 = vadd.f32 %v10718_v24, %v12965_v48  ;;  %v1124_v45 = vpop.f32.mrb[5].mxu0 }
 0x1ad   : > { %v1125_v47 = vadd.f32 %v12965_v48, %v1124_v45  ;;  %v10719_v54 = vpop.f32.mrb[6].mxu0 }
 0x1ae   : > { %v1177_v34 = vrot.slane %v13038_v32, 6  ;;  %v13052_v6 = vadd.f32 %v10719_v54, %v12965_v48  ;;  %v1127_v25 = vpop.f32.mrb[7].mxu0  ;;  %v1257_v16 = vrot.slane %v13038_v32, 7  ;;  %v1337_v41 = vrot.slane %v13038_v32, 1 }
 0x1af   : > { %v1175_v33 = vrot.slane %v1125_v47, 6  ;;  %v1415_v57 = vrot.slane %v1125_v47, 2  ;;  %v1128_v61 = vadd.f32 %v12965_v48, %v1127_v25  ;;  %v1335_v35 = vrot.slane %v1125_v47, 1 }
 0x1b0   : > { %v1178_v38 = vrot.slane %v13052_v6, 6  ;;  %v1258_v0 = vrot.slane %v13052_v6, 7  ;;  %v1338_v17 = vrot.slane %v13052_v6, 1  ;;  %v1255_v20 = vrot.slane %v1125_v47, 7 }
 0x1b1   : > { %v1176_v29 = vrot.slane %v1128_v61, 6  ;;  %v1358_v22 = vsel %vm622_vm1, %v1334_v18, %v1335_v35  ;;  %v11140_v14 = vpack.i.bf16 %v1128_v61, %v1125_v47  ;;  %v1256_v31 = vrot.slane %v1128_v61, 7  ;;  %v11947_v18 = vld [vmem:[#allocation2 + $0x18] sm:$0xff]  }
 0x1b2   : > { %v1398_v27 = vsel %vm431_vm4, 0.0, %v1358_v22  ;;  %v1275_v9 = vsel %vm573_vm0, %v1257_v16, %v1258_v0  ;;  %v13073_v42 = vsel %vm622_vm1, %v1337_v41, %v1338_v17  ;;  %v1278_v36 = vsel %vm573_vm0, %v1254_v30, %v1255_v20  ;;  %1864 = vmatpush1.bf16.msra.mxu1 %v11947_v18 }
 0x1b3   : > { %v11130_v11 = vpack.i.bf16 %v1398_v27, %v12992_v2  ;;  %v1276_v37 = vsel %vm573_vm0, %v1256_v31, %v1257_v16  ;;  %v13082_v50 = vsel %vm573_vm0, %v1255_v20, %v1256_v31  ;;  %v13086_v44 = vsel %vm448_vm6, 0.0, %v1278_v36  ;;  %1865 = vmatprep.subr.bf16.mxu1 %v18954_v55 }
 0x1b4   : > { %v11150_v7 = vpack.i.bf16 %v1275_v9, %v1276_v37  ;;  %v1336_v24 = vrot.slane %v1128_v61, 1  ;;  %v13098_v45 = vsel %vm524_vm13, %v1177_v34, %v1178_v38  ;;  %v13102_v47 = vsel %vm524_vm13, %v1176_v29, %v1177_v34  ;;  %v11948_v34 = vld [vmem:[#allocation2 + $0x20] sm:$0xff]   ;;  %v11949_v9 = vld [vmem:[#allocation2 + $0x28] sm:$0xff]  }
 0x1b5   : > { %11131 = vrot.lane.b32.xlu1 %v11130_v11, %s12270_s8  ;;  %19089 = vst [vmem:[#allocation16_spill] sm:$0xff] %v13102_v47  ;;  %v1438_v54 = vsel %vm671_vm2, %v1414_v56, %v1415_v57  ;;  %v13110_v25 = vsel %vm671_vm2, %v1413_v59, %v1414_v56  ;;  %v13126_v22 = vsel %vm524_vm13, %v1175_v33, %v1176_v29  ;;  %v1417_v31 = vrot.slane %v13038_v32, 2 }
 0x1b6   : > { %v13114_v16 = vsel %vm622_vm1, %v1336_v24, %v1337_v41  ;;  %v13118_v26 = vsel %vm622_vm1, %v1335_v35, %v1336_v24  ;;  %v13122_v20 = vsel %vm415_vm5, 0.0, %v1438_v54  ;;  %v13137_v41 = vsel %vm524_vm13, %v1174_v10, %v1175_v33  ;;  %1866 = vmatpush1.bf16.msra.mxu1 %v11948_v34 }
 0x1b7   : > { %v1416_v35 = vrot.slane %v1128_v61, 2  ;;  %v1418_v29 = vrot.slane %v13052_v6, 2  ;;  %1867 = vmatprep.subr.bf16.mxu1 %v18954_v55 }
 0x1b9   : > { %11141 = vrot.lane.b32.xlu1 %v11140_v14, %s12267_s6  ;;  %v13144_v27 = vsel %vm671_vm2, %v1415_v57, %v1416_v35  ;;  %v13148_v36 = vsel %vm671_vm2, %v1416_v35, %v1417_v31  ;;  %v13152_v10 = vsel %vm671_vm2, %v1417_v31, %v1418_v29  ;;  %v11950_v31 = vld [vmem:[#allocation2 + $0x30] sm:$0xff]  }
 0x1ba   : > { %19090 = vst [vmem:[#allocation17_spill] sm:$0xff] %v13152_v10  ;;  %1868 = vmatpush1.bf16.msra.mxu1 %v11949_v9 }
 0x1bb   : > { %v10722_v33 = vpop.f32.mrb[8].mxu0  ;;  %1869 = vmatprep.subr.bf16.mxu1 %v18954_v55 }
 0x1bc   : > { %v13158_v14 = vadd.f32 %v10722_v33, %v12965_v48  ;;  %v1140_v57 = vpop.f32.mrb[9].mxu0 }
 0x1bd   : > { %v1141_v18 = vadd.f32 %v12965_v48, %v1140_v57  ;;  %v10723_v11 = vpop.f32.mrb[10].mxu0  ;;  %11151 = vrot.lane.b32.xlu1 %v11150_v7, %s12268_s7 }
 0x1be   : > { %v1181_v37 = vrot.slane %v13158_v14, 6  ;;  %v13164_v24 = vadd.f32 %v10723_v11, %v12965_v48  ;;  %v1143_v54 = vpop.f32.mrb[11].mxu0  ;;  %v1261_v34 = vrot.slane %v13158_v14, 7  ;;  %v1341_v35 = vrot.slane %v13158_v14, 1  ;;  %1870 = vmatpush1.bf16.msra.mxu1 %v11950_v31 }
 0x1bf   : > { %v1179_v33 = vrot.slane %v1141_v18, 6  ;;  %v1419_v61 = vrot.slane %v1141_v18, 2  ;;  %v1144_v56 = vadd.f32 %v12965_v48, %v1143_v54  ;;  %v1339_v57 = vrot.slane %v1141_v18, 1  ;;  %1871 = vmatprep.subr.bf16.mxu1 %v18954_v55 }
 0x1c0   : > { %v18947_v7 = vrot.slane %v13164_v24, 6  ;;  %v18943_v2 = vrot.slane %v13164_v24, 7  ;;  %v18945_v11 = vrot.slane %v13164_v24, 1  ;;  %v1259_v59 = vrot.slane %v1141_v18, 7 }
 0x1c1   : > { %v1180_v30 = vrot.slane %v1144_v56, 6  ;;  %v1354_v9 = vsel %vm622_vm1, %v1338_v17, %v1339_v57  ;;  %v11170_v4 = vpack.i.bf16 %v1144_v56, %v1141_v18  ;;  %v1260_v46 = vrot.slane %v1144_v56, 7  ;;  %v11951_v18 = vld [vmem:[#allocation2 + $0x38] sm:$0xff]  }
 0x1c2   : > { %v1402_v54 = vsel %vm19003_vm7, 0.0, %v1354_v9  ;;  %v1271_v21 = vsel %vm573_vm0, %v1261_v34, %v18943_v2  ;;  %v13187_v58 = vsel %vm622_vm1, %v1341_v35, %v18945_v11  ;;  %v1274_v17 = vsel %vm573_vm0, %v1258_v0, %v1259_v59  ;;  %1872 = vmatpush1.bf16.msra.mxu1 %v11951_v18 }
 0x1c3   : > { %v11160_v9 = vpack.i.bf16 %v1402_v54, %v13073_v42  ;;  %v1272_v62 = vsel %vm573_vm0, %v1260_v46, %v1261_v34  ;;  %v13198_v2 = vsel %vm573_vm0, %v1259_v59, %v1260_v46  ;;  %v13202_v51 = vsel %vm19004_vm9, 0.0, %v1274_v17  ;;  %1873 = vmatprep.subr.bf16.mxu1 %v18954_v55 }
 0x1c4   : > { %v11180_v11 = vpack.i.bf16 %v1271_v21, %v1272_v62  ;;  %v1340_v31 = vrot.slane %v1144_v56, 1  ;;  %v13214_v46 = vsel %vm524_vm13, %v1181_v37, %v18947_v7  ;;  %v13218_v59 = vsel %vm524_vm13, %v1180_v30, %v1181_v37  ;;  %v11952_v37 = vld [vmem:[#allocation2 + $0x40] sm:$0xff]  }
 0x1c5   : > { %11161 = vrot.lane.b32.xlu1 %v11160_v9, %s12270_s8  ;;  %19091 = vst [vmem:[#allocation18_spill] sm:$0xff] %v13214_v46  ;;  %19092 = vst [vmem:[#allocation19_spill] sm:$0xff] %v13218_v59  ;;  %v13222_v62 = vsel %vm524_vm13, %v1179_v33, %v1180_v30  ;;  %v13228_v21 = vsel %vm524_vm13, %v1178_v38, %v1179_v33  ;;  %v1434_v30 = vsel %vm671_vm2, %v1418_v29, %v1419_v61 }
 0x1c6   : > { %19093 = vst [vmem:[#allocation20_spill] sm:$0xff] %v13222_v62  ;;  %19094 = vst [vmem:[#allocation21_spill] sm:$0xff] %v13228_v21  ;;  %v13232_v34 = vsel %vm622_vm1, %v1340_v31, %v1341_v35  ;;  %v13236_v54 = vsel %vm622_vm1, %v1339_v57, %v1340_v31  ;;  %v13245_v38 = vsel %vm419_vm8, 0.0, %v1434_v30  ;;  %v1420_v35 = vrot.slane %v1144_v56, 2  ;;  %1874 = vmatpush1.bf16.msra.mxu1 %v11952_v37 }
 0x1c7   : > { %19095 = vst [vmem:[#allocation22_spill] sm:$0xff] %v13245_v38  ;;  %v1421_v33 = vrot.slane %v13158_v14, 2  ;;  %v18946_v18 = vrot.slane %v13164_v24, 2  ;;  %1875 = vmatprep.subr.bf16.mxu1 %v18954_v55  ;;  %v19100_v46 = vrot.slane %v12971_v12, 7 }
 0x1c8   : > { %v13258_v9 = vsel %vm671_vm2, %v1419_v61, %v1420_v35 }
 0x1c9   : > { %11171 = vrot.lane.b32.xlu1 %v11170_v4, %s12267_s6  ;;  %v13254_v29 = vsel %vm671_vm2, %v1420_v35, %v1421_v33  ;;  %19097 = vst [vmem:[#allocation24_spill] sm:$0xff] %v13258_v9  ;;  %v13266_v31 = vsel %vm671_vm2, %v1421_v33, %v18946_v18  ;;  %v11953_v4 = vld [vmem:[#allocation2 + $0x48] sm:$0xff]  }
 0x1ca   : > { %19096 = vst [vmem:[#allocation23_spill] sm:$0xff] %v13254_v29  ;;  %1876 = vmatpush1.bf16.msra.mxu1 %v11953_v4  ;;  %v19098_v29 = vrot.slane %v13164_v24, 1 }
 0x1cb   : > { %v10726_v30 = vpop.f32.mrb[12].mxu0  ;;  %1877 = vmatprep.subr.bf16.mxu1 %v18954_v55 }
 0x1cc   : > { %v13270_v57 = vadd.f32 %v10726_v30, %v12965_v48  ;;  %v1156_v42 = vpop.f32.mrb[13].mxu0  ;;  %v11954_v30 = vld [vmem:[#allocation2 + $0x50] sm:$0xff]  }
 0x1cd   : > { %v13273_v61 = vadd.f32 %v12965_v48, %v1156_v42  ;;  %v10727_v37 = vpop.f32.mrb[14].mxu0  ;;  %11181 = vrot.lane.b32.xlu1 %v11180_v11, %s12268_s7 }
 0x1ce   : > { %v1185_v35 = vrot.slane %v13270_v57, 6  ;;  %v13278_v56 = vadd.f32 %v10727_v37, %v12965_v48  ;;  %v1159_v33 = vpop.f32.mrb[15].mxu0  ;;  %v1265_v17 = vrot.slane %v13270_v57, 7  ;;  %v1345_v0 = vrot.slane %v13270_v57, 1  ;;  %1878 = vmatpush1.bf16.msra.mxu1 %v11954_v30 }
 0x1cf   : > { %v1183_v18 = vrot.slane %v13273_v61, 6  ;;  %v1423_v42 = vrot.slane %v13273_v61, 2  ;;  %v1160_v7 = vadd.f32 %v12965_v48, %v1159_v33  ;;  %v1343_v11 = vrot.slane %v13273_v61, 1 }
 0x1d0   : > { %v1186_v37 = vrot.slane %v13278_v56, 6  ;;  %v1266_v49 = vrot.slane %v13278_v56, 7  ;;  %v1346_v5 = vrot.slane %v13278_v56, 1  ;;  %v1263_v9 = vrot.slane %v13273_v61, 7 }
 0x1d1   : > { %v1184_v4 = vrot.slane %v1160_v7, 6  ;;  %v1350_v59 = vsel %vm622_vm1, %v19098_v29, %v1343_v11  ;;  %v11195_v48 = vpack.i.bf16 %v1160_v7, %v13273_v61  ;;  %v1264_v33 = vrot.slane %v1160_v7, 7 }
 0x1d2   : > { %v1406_v55 = vsel %vm19099_vm3, 0.0, %v1350_v59  ;;  %v1282_v10 = vsel %vm573_vm0, %v1266_v49, %v19100_v46  ;;  %v1267_v38 = vsel %vm573_vm0, %v1265_v17, %v1266_v49  ;;  %v1347_v62 = vsel %vm622_vm1, %v1345_v0, %v1346_v5 }
 0x1d3   : > { %v11190_v29 = vpack.i.bf16 %v1406_v55, %v13187_v58  ;;  %v1315_v61 = vsel %vm19101_vm12, 0.0, %v1282_v10  ;;  %v1268_v59 = vsel %vm573_vm0, %v1264_v33, %v1265_v17  ;;  %v1362_v46 = vsel %vm622_vm1, %v1346_v5, %v19102_v39 }
 0x1d4   : > { %v11110_v21 = vpack.i.bf16 %v13010_v19, %v1315_v61  ;;  %v11215_v49 = vpack.i.bf16 %v1267_v38, %v1268_v59  ;;  %v1410_v47 = vsel %vm19103_vm14, 0.0, %v1362_v46  ;;  %v1269_v58 = vsel %vm573_vm0, %v1263_v9, %v1264_v33 }
 0x1d5   : > { %11191 = vrot.lane.b32.xlu1 %v11190_v29, %s12270_s8  ;;  %v11220_v55 = vpack.i.bf16 %v1410_v47, %v1347_v62  ;;  %v19104_v10 = vrot.slane %v13164_v24, 7  ;;  %v1344_v30 = vrot.slane %v1160_v7, 1  ;;  %v11210_v5 = vpack.i.bf16 %v13278_v56, %v13270_v57 }
 0x1d6   : > { %11111 = vrot.lane.b32.xlu0 %v11110_v21, %s12268_s7  ;;  %v19106_v19 = vrot.slane %v12971_v12, 6  ;;  %v13336_v47 = vsel %vm524_vm13, %v1185_v35, %v1186_v37  ;;  %v13340_v62 = vsel %vm524_vm13, %v1184_v4, %v1185_v35  ;;  %v13348_v61 = vsel %vm524_vm13, %v1183_v18, %v1184_v4 }
 0x1d7   : > { %v1270_v17 = vsel %vm573_vm0, %v19104_v10, %v1263_v9  ;;  %v1348_v21 = vsel %vm622_vm1, %v1344_v30, %v1345_v0  ;;  %v1349_v33 = vsel %vm622_vm1, %v1343_v11, %v1344_v30  ;;  %v19108_v59 = vrot.slane %v13164_v24, 2 }
 0x1d8   : > { %v1327_v39 = vsel %vm19105_vm15, 0.0, %v1270_v17  ;;  %v1202_v38 = vsel %vm524_vm13, %v1186_v37, %v19106_v19  ;;  %v11205_v29 = vpack.i.bf16 %v1348_v21, %v1349_v33  ;;  %v19107_v37 = vrot.slane %v13164_v24, 6 }
 0x1d9   : > { %v11200_v9 = vpack.i.bf16 %v1269_v58, %v1327_v39  ;;  %11196 = vrot.lane.b32.xlu1 %v11195_v48, %s12267_s6  ;;  %v1430_v0 = vsel %vm671_vm2, %v19108_v59, %v1423_v42  ;;  %v1424_v46 = vrot.slane %v1160_v7, 2  ;;  %v1425_v11 = vrot.slane %v13270_v57, 2 }
 0x1da   : > { %v13355_v35 = vsel %vm524_vm13, %v19107_v37, %v1183_v18  ;;  %v19109_v4 = vpack.i.bf16 %v13014_v52, %v13020_v40  ;;  %vm19110_vm3 = vcmp.ge.s32.totalorder %v12578_v53, 30  ;;  %v1426_v18 = vrot.slane %v13278_v56, 2 }
 0x1db   : > { %v13368_v48 = vsel %vm19110_vm3, 0.0, %v1430_v0  ;;  %v13375_v10 = vsel %vm671_vm2, %v1424_v46, %v1425_v11  ;;  %v13379_v7 = vsel %vm671_vm2, %v1423_v42, %v1424_v46  ;;  %v19111_v57 = vrot.slane %v12971_v12, 2 }
 0x1dc   : > { %11116 = vrot.lane.b32.xlu0 %v19109_v4, %s12270_s8  ;;  %v1766_v58 = vpack.c.bf16 %v13368_v48, %v13266_v31  ;;  %v1768_v52 = vpack.c.bf16 %v13375_v10, %v13379_v7  ;;  %v13385_v40 = vsel %vm671_vm2, %v1425_v11, %v1426_v18  ;;  %vm19112_vm12 = vcmp.ge.s32.totalorder %v12690_v13, 30 }
 0x1dd   : > { %v1442_v56 = vsel %vm671_vm2, %v1426_v18, %v19111_v57  ;;  %11216 = vrot.lane.b32.xlu1 %v11215_v49, %s12268_s7  ;;  %v19113_v42 = vpack.i.bf16 %v12975_v63, %v12968_v8  ;;  %v19114_v12 = vpack.i.bf16 %v13082_v50, %v13086_v44  ;;  %v19115_v49 = vpack.i.bf16 %v13114_v16, %v13118_v26 }
 0x1de   : > { %v13394_v17 = vsel %vm19112_vm12, 0.0, %v1442_v56  ;;  %v19116_v8 = vpack.i.bf16 %v13052_v6, %v13038_v32  ;;  %v19117_v63 = vpack.i.bf16 %v13198_v2, %v13202_v51  ;;  %v19118_v50 = vpack.i.bf16 %v13232_v34, %v13236_v54 }
 0x1df   : > { %v1770_v30 = vpack.c.bf16 %v13394_v17, %v13385_v40  ;;  %v19119_v44 = vpack.i.bf16 %v13164_v24, %v13158_v14  ;;  %vm19120_vm14 = vcmp.lt.s32.totalorder %v12382_v3, 2  ;;  %vm1700_vm15 = vcmask 523264  }
 0x1e0   : > { %11126 = vrot.lane.b32.xlu0 %v19113_v42, %s12267_s6  ;;  %v1235_v34 = vsel %vm19120_vm14, 0.0, %v1202_v38  ;;  %vm1717_vm3 = vcmask 785408   ;;  %vm19122_vm12 = vcmp.lt.s32.totalorder %v12418_v15, 2 }
 0x1e1   : > { %11221 = vrot.lane.b32.xlu1 %v11220_v55, %s12270_s8 }
 0x1e4   : > { %11136 = vrot.lane.b32.xlu0 %v19114_v12, %s12268_s7 }
 0x1e8   : > { %11146 = vrot.lane.b32.xlu0 %v19115_v49, %s12270_s8  ;;  %v19121_v49 = vpack.c.bf16 %v13122_v20, %v13110_v25 }
 0x1ec   : > { %11156 = vrot.lane.b32.xlu0 %v19116_v8, %s12267_s6 }
 0x1f0   : > { %11166 = vrot.lane.b32.xlu0 %v19117_v63, %s12268_s7 }
 0x1f4   : > { %11176 = vrot.lane.b32.xlu0 %v19118_v50, %s12270_s8 }
 0x1f8   : > { %11186 = vrot.lane.b32.xlu0 %v19119_v44, %s12267_s6 }
 0x1fc   : > { %11201 = vrot.lane.b32.xlu0 %v11200_v9, %s12268_s7  ;;  %s9926_s7 = sshll.u32 %s177_s5, 2 }
 0x1fd   : > { %s179_s11 = scalar_lea.vmem [#allocation5], %s9926_s7 }
 0x1fe   : > { %s9849_s17 = sshll.u32 %s179_s11, 4  ;;  %s18882_s17 = int_to_ptr.vmem [resolvable:$true] %s9849_s17 }
 0x1ff   : > { %s12191_s16 = scalar_lea.vmem %s18882_s17, 64 }
 0x200   : > { %11206 = vrot.lane.b32.xlu0 %v11205_v29, %s12270_s8  ;;  %p12192_p6 = scmp.ne.s32.totalorder %s18882_s17, %s12191_s16 }
 0x202   : > { %p12193_p10 = pnand %p12192_p6, %p19558_p9 }
 0x204   : > { %11211 = vrot.lane.b32.xlu0 %v11210_v5, %s12267_s6  ;;  %p12194_p12 = pneg %p12193_p10 }
 0x218   : > { %v11107_v32 = vpop.permute.xlu1 %11106 }
 0x219   : > { %v11109_v24 = vunpack.i.h.bf16 %v11107_v32  ;;  %v11108_v39 = vunpack.i.l.bf16 %v11107_v32 }
 0x21c   : > { %v11122_v6 = vpop.permute.xlu1 %11121 }
 0x21d   : > { %v11124_v33 = vunpack.i.h.bf16 %v11122_v6  ;;  %v11123_v29 = vunpack.i.l.bf16 %v11122_v6 }
 0x21f   : > { %v1687_v57 = vsel %vm1683_vm11, %v13030_v28, %v11124_v33  ;;  %v1686_v56 = vsel %vm1683_vm11, %v13034_v23, %v11123_v29 }
 0x227   : > { %v11132_v51 = vpop.permute.xlu1 %11131 }
 0x228   : > { %v11134_v42 = vunpack.i.h.bf16 %v11132_v51  ;;  %v11133_v12 = vunpack.i.l.bf16 %v11132_v51  ;;  %v1239_v51 = vsel %vm19122_vm12, 0.0, %v13137_v41  ;;  %v19123_v41 = vpack.c.bf16 %v13148_v36, %v13144_v27 }
 0x22b   : > { %v11142_v2 = vpop.permute.xlu1 %11141 }
 0x22f   : > { %v11152_v5 = vpop.permute.xlu1 %11151 }
 0x237   : > { %v11162_v11 = vpop.permute.xlu1 %11161 }
 0x248   : > { %v11112_v16 = vpop.permute.xlu0 %11111 }
 0x249   : > { %v11114_v26 = vunpack.i.h.bf16 %v11112_v16  ;;  %v11113_v55 = vunpack.i.l.bf16 %v11112_v16  ;;  %v11172_v16 = vpop.permute.xlu1 %11171 }
 0x24b   : > { %v1684_v54 = vsel %vm1683_vm11, %v1235_v34, %v11113_v55  ;;  %v1685_v14 = vsel %vm1683_vm11, %v13044_v60, %v11114_v26  ;;  %v11144_v26 = vunpack.i.h.bf16 %v11142_v2  ;;  %v11143_v55 = vunpack.i.l.bf16 %v11142_v2 }
 0x24c   : > { %v1701_v37 = vsel %vm1700_vm15, %v1684_v54, %v11108_v39  ;;  %v1702_v59 = vsel %vm1700_vm15, %v1685_v14, %v11109_v24  ;;  %v11154_v24 = vunpack.i.h.bf16 %v11152_v5  ;;  %v11153_v39 = vunpack.i.l.bf16 %v11152_v5 }
 0x24d   : > { %v11182_v29 = vpop.permute.xlu1 %11181 }
 0x24e   : > { %v11117_v19 = vpop.permute.xlu0 %11116  ;;  %v1691_v5 = vsel %vm1683_vm11, %v13098_v45, %v11154_v24  ;;  %v19126_v45 = vld [vmem:[#allocation13_spill] sm:$0xff] }
 0x24f   : > { %v11119_v9 = vunpack.i.h.bf16 %v11117_v19  ;;  %v11118_v21 = vunpack.i.l.bf16 %v11117_v19  ;;  %vm19127_vm14 = vcmp.lt.s32.totalorder %v19126_v45, 2 }
 0x251   : > { %v1718_v38 = vsel %vm1717_vm3, %v1701_v37, %v11118_v21  ;;  %v1719_v0 = vsel %vm1717_vm3, %v1702_v59, %v11119_v9 }
 0x252   : > { %v11127_v46 = vpop.permute.xlu0 %11126  ;;  %v1755_v60 = vpack.c.bf16 %v1719_v0, %v1718_v38  ;;  %v19124_v38 = vld [vmem:[#allocation16_spill] sm:$0xff] }
 0x253   : > { %v11129_v4 = vunpack.i.h.bf16 %v11127_v46  ;;  %v11128_v18 = vunpack.i.l.bf16 %v11127_v46  ;;  %v1690_v0 = vsel %vm1683_vm11, %v19124_v38, %v11153_v39  ;;  %v11164_v46 = vunpack.i.h.bf16 %v11162_v11  ;;  %v19135_v38 = vld [vmem:[#allocation24_spill] sm:$0xff] }
 0x254   : > { %1892 = vmatmul.mubr.bf16.vlgmr.msra.gmra.mrb[0].mxu1 %v1755_v60  ;;  %v11163_v60 = vunpack.i.l.bf16 %v11162_v11 }
 0x255   : > { %9950 = vmatprep.mubr.msk.bf16.mxu1 %vm1683_vm11, %v19121_v49  ;;  %v1703_v8 = vsel %vm1700_vm15, %v1686_v56, %v11128_v18  ;;  %v1704_v63 = vsel %vm1700_vm15, %v1687_v57, %v11129_v4  ;;  %v11192_v56 = vpop.permute.xlu1 %11191 }
 0x256   : > { %v11137_v50 = vpop.permute.xlu0 %11136  ;;  %v1720_v44 = vsel %vm1717_vm3, %v1703_v8, %v11133_v12  ;;  %v1721_v28 = vsel %vm1717_vm3, %v1704_v63, %v11134_v42  ;;  %v19125_v8 = vld [vmem:[#allocation21_spill] sm:$0xff] }
 0x257   : > { %v11139_v32 = vunpack.i.h.bf16 %v11137_v50  ;;  %v11138_v6 = vunpack.i.l.bf16 %v11137_v50  ;;  %v1757_v23 = vpack.c.bf16 %v1721_v28, %v1720_v44  ;;  %v1243_v63 = vsel %vm19127_vm14, 0.0, %v19125_v8  ;;  %v19128_v50 = vld [vmem:[#allocation20_spill] sm:$0xff]  ;;  %v19129_v28 = vld [vmem:[#allocation22_spill] sm:$0xff] }
 0x259   : > { %v1689_v25 = vsel %vm1683_vm11, %v13126_v22, %v11139_v32  ;;  %v1688_v20 = vsel %vm1683_vm11, %v1239_v51, %v11138_v6  ;;  %v19130_v32 = vld [vmem:[#allocation17_spill] sm:$0xff]  ;;  %v11173_v51 = vunpack.i.l.bf16 %v11172_v16  ;;  %v11197_v24 = vpop.permute.xlu1 %11196 }
 0x25a   : > { %v11147_v34 = vpop.permute.xlu0 %11146  ;;  %v1705_v19 = vsel %vm1700_vm15, %v1688_v20, %v11143_v55  ;;  %v1706_v9 = vsel %vm1700_vm15, %v1689_v25, %v11144_v26  ;;  %v19131_v6 = vpack.c.bf16 %v19129_v28, %v19130_v32  ;;  %v11184_v55 = vunpack.i.h.bf16 %v11182_v29 }
 0x25b   : > { %v11149_v54 = vunpack.i.h.bf16 %v11147_v34  ;;  %v11148_v14 = vunpack.i.l.bf16 %v11147_v34  ;;  %v11183_v34 = vunpack.i.l.bf16 %v11182_v29  ;;  %v11194_v29 = vunpack.i.h.bf16 %v11192_v56 }
 0x25c   : > { %1900 = vmatmul.mubr.bf16.gmra.mrb[4].mxu1 %v1757_v23  ;;  %v11174_v23 = vunpack.i.h.bf16 %v11172_v16 }
 0x25d   : > { %9951 = vmatprep.mubr.msk.bf16.mxu1 %vm1683_vm11, %v19123_v41  ;;  %v1722_v22 = vsel %vm1717_vm3, %v1705_v19, %v11148_v14  ;;  %v1723_v21 = vsel %vm1717_vm3, %v1706_v9, %v11149_v54 }
 0x25e   : > { %v11157_v2 = vpop.permute.xlu0 %11156  ;;  %v1759_v33 = vpack.c.bf16 %v1723_v21, %v1722_v22 }
 0x25f   : > { %v11159_v37 = vunpack.i.h.bf16 %v11157_v2  ;;  %v11158_v59 = vunpack.i.l.bf16 %v11157_v2  ;;  %v19132_v2 = vld [vmem:[#allocation18_spill] sm:$0xff] }
 0x260   : > { %v1695_v16 = vsel %vm1683_vm11, %v19132_v2, %v11184_v55 }
 0x261   : > { %v1707_v27 = vsel %vm1700_vm15, %v1690_v0, %v11158_v59  ;;  %v1708_v36 = vsel %vm1700_vm15, %v1691_v5, %v11159_v37  ;;  %v11193_v59 = vunpack.i.l.bf16 %v11192_v56  ;;  %v19134_v5 = vld [vmem:[#allocation23_spill] sm:$0xff]  ;;  %v1247_v56 = vsel %vm18988_vm10, 0.0, %v13355_v35 }
 0x262   : > { %v11167_v4 = vpop.permute.xlu0 %11166  ;;  %v1724_v18 = vsel %vm1717_vm3, %v1707_v27, %v11163_v60  ;;  %v1725_v57 = vsel %vm1717_vm3, %v1708_v36, %v11164_v46  ;;  %v19136_v0 = vpack.c.bf16 %v19134_v5, %v19135_v38 }
 0x263   : > { %v11169_v42 = vunpack.i.h.bf16 %v11167_v4  ;;  %v11168_v12 = vunpack.i.l.bf16 %v11167_v4  ;;  %v1761_v49 = vpack.c.bf16 %v1725_v57, %v1724_v18  ;;  %v11217_v18 = vpop.permute.xlu1 %11216 }
 0x264   : > { %1908 = vmatmul.mubr.bf16.gmra.mrb[8].mxu1 %v1759_v33  ;;  %v19133_v33 = vld [vmem:[#allocation19_spill] sm:$0xff]  ;;  %v11219_v32 = vunpack.i.h.bf16 %v11217_v18 }
 0x265   : > { %v1693_v11 = vsel %vm1683_vm11, %v19128_v50, %v11169_v42  ;;  %v1692_v44 = vsel %vm1683_vm11, %v1243_v63, %v11168_v12  ;;  %9952 = vmatprep.mubr.msk.bf16.mxu1 %vm1683_vm11, %v19131_v6  ;;  %v1694_v37 = vsel %vm1683_vm11, %v19133_v33, %v11183_v34  ;;  %v11199_v63 = vunpack.i.h.bf16 %v11197_v24 }
 0x266   : > { %v11177_v25 = vpop.permute.xlu0 %11176  ;;  %v1709_v54 = vsel %vm1700_vm15, %v1692_v44, %v11173_v51  ;;  %v1710_v14 = vsel %vm1700_vm15, %v1693_v11, %v11174_v23  ;;  %v11198_v50 = vunpack.i.l.bf16 %v11197_v24  ;;  %v11218_v6 = vunpack.i.l.bf16 %v11217_v18 }
 0x267   : > { %v11179_v20 = vunpack.i.h.bf16 %v11177_v25  ;;  %v11178_v26 = vunpack.i.l.bf16 %v11177_v25  ;;  %v11222_v25 = vpop.permute.xlu1 %11221 }
 0x268   : > { %v11224_v24 = vunpack.i.h.bf16 %v11222_v25 }
 0x269   : > { %v1726_v39 = vsel %vm1717_vm3, %v1709_v54, %v11178_v26  ;;  %v1727_v19 = vsel %vm1717_vm3, %v1710_v14, %v11179_v20  ;;  %v1699_v54 = vsel %vm1683_vm11, %v13336_v47, %v11219_v32  ;;  %v1698_v14 = vsel %vm1683_vm11, %v13340_v62, %v11218_v6  ;;  %v13532_v47 = vld [vmem:[%s18924_s2 + $0x1] ss:$0 sm:$0xff] }
 0x26a   : > { %v11187_v9 = vpop.permute.xlu0 %11186  ;;  %v1763_v41 = vpack.c.bf16 %v1727_v19, %v1726_v39  ;;  %v11223_v39 = vunpack.i.l.bf16 %v11222_v25 }
 0x26b   : > { %v11189_v22 = vunpack.i.h.bf16 %v11187_v9  ;;  %v11188_v21 = vunpack.i.l.bf16 %v11187_v9 }
 0x26c   : > { %1916 = vmatmul.mubr.bf16.gmra.mrb[12].mxu1 %v1761_v49 }
 0x26d   : > { %9953 = vmatprep.mubr.msk.bf16.mxu1 %vm1683_vm11, %v19136_v0  ;;  %v1711_v46 = vsel %vm1700_vm15, %v1694_v37, %v11188_v21  ;;  %v1712_v60 = vsel %vm1700_vm15, %v1695_v16, %v11189_v22 }
 0x26e   : > { %v11202_v27 = vpop.permute.xlu0 %11201  ;;  %v1728_v36 = vsel %vm1717_vm3, %v1711_v46, %v11193_v59  ;;  %v1729_v4 = vsel %vm1717_vm3, %v1712_v60, %v11194_v29 }
 0x26f   : > { %v11204_v57 = vunpack.i.h.bf16 %v11202_v27  ;;  %v11203_v42 = vunpack.i.l.bf16 %v11202_v27  ;;  %v1765_v12 = vpack.c.bf16 %v1729_v4, %v1728_v36 }
 0x271   : > { %v1697_v49 = vsel %vm1683_vm11, %v13348_v61, %v11204_v57  ;;  %v1696_v8 = vsel %vm1683_vm11, %v1247_v56, %v11203_v42 }
 0x272   : > { %v11207_v11 = vpop.permute.xlu0 %11206  ;;  %v1713_v23 = vsel %vm1700_vm15, %v1696_v8, %v11198_v50  ;;  %v1714_v51 = vsel %vm1700_vm15, %v1697_v49, %v11199_v63 }
 0x273   : > { %v11209_v44 = vunpack.i.h.bf16 %v11207_v11  ;;  %v11208_v28 = vunpack.i.l.bf16 %v11207_v11 }
 0x274   : > { %1924 = vmatmul.mubr.bf16.gmra.mrb[16].mxu1 %v1763_v41 }
 0x275   : > { %9954 = vmatprep.mubr.msk.bf16.mxu1 %vm1683_vm11, %v1766_v58  ;;  %v1730_v61 = vsel %vm1717_vm3, %v1713_v23, %v11208_v28  ;;  %v1731_v35 = vsel %vm1717_vm3, %v1714_v51, %v11209_v44 }
 0x276   : > { %v11212_v20 = vpop.permute.xlu0 %11211  ;;  %v1767_v26 = vpack.c.bf16 %v1731_v35, %v1730_v61 }
 0x277   : > { %v11214_v55 = vunpack.i.h.bf16 %v11212_v20  ;;  %v11213_v34 = vunpack.i.l.bf16 %v11212_v20 }
 0x279   : > { %v1715_v31 = vsel %vm1700_vm15, %v1698_v14, %v11213_v34  ;;  %v1716_v48 = vsel %vm1700_vm15, %v1699_v54, %v11214_v55 }
 0x27a   : > { %v1732_v58 = vsel %vm1717_vm3, %v1715_v31, %v11223_v39  ;;  %v1733_v19 = vsel %vm1717_vm3, %v1716_v48, %v11224_v24  ;;  %vm19035_vm3 = vcmp.lt.s32.totalorder %v12378_v1, 3 }
 0x27b   : > { %v1769_v9 = vpack.c.bf16 %v1733_v19, %v1732_v58 }
 0x27c   : > { %1932 = vmatmul.mubr.bf16.gmra.mrb[20].mxu1 %v1765_v12 }
 0x27d   : > { %9955 = vmatprep.mubr.msk.bf16.mxu1 %vm1683_vm11, %v1768_v52 }
 0x284   : > { %1940 = vmatmul.mubr.bf16.gmra.mrb[24].mxu1 %v1767_v26 }
 0x285   : > { %9956 = vmatprep.mubr.msk.bf16.mxu1 %vm1683_vm11, %v1770_v30  ;;  %vm2245_vm11 = vcmp.lt.s32.totalorder %v12378_v1, 5 }
 0x28c   : > { %1948 = vmatmul.mubr.bf16.gmra.mrb[28].mxu1 %v1769_v9 }
 0x327   : > { %v1893_v62 = vpop.f32.mrb[0].mxu1 }
 0x328   : > { %v13535_v41 = vadd.f32 %v13532_v47, %v1893_v62  ;;  %v1895_v22 = vpop.f32.mrb[1].mxu1 }
 0x329   : > { %v1896_v10 = vpop.f32.mrb[2].mxu1 }
 0x32a   : > { %v1897_v7 = vadd.f32 %v13532_v47, %v1896_v10  ;;  %v1898_v52 = vpop.f32.mrb[3].mxu1  ;;  %v18964_v21 = vrot.slane %v13535_v41, 2  ;;  %v18965_v40 = vrot.slane %v13535_v41, 6  ;;  %v18963_v17 = vrot.slane %v13535_v41, 7 }
 0x32b   : > { %v18960_v30 = vrot.slane %v13535_v41, 1  ;;  %v18962_v2 = vrot.slane %v13535_v41, 5  ;;  %v18961_v38 = vrot.slane %v13535_v41, 3 }
 0x32c   : > { %v11225_v16 = vpack.i.bf16 %v1897_v7, %v13535_v41  ;;  %v2182_v33 = vrot.slane %v1897_v7, 2  ;;  %v2038_v37 = vrot.slane %v1897_v7, 6  ;;  %v2086_v29 = vrot.slane %v1897_v7, 7 }
 0x32d   : > { %v2134_v59 = vrot.slane %v1897_v7, 1  ;;  %v1957_v5 = vrot.slane %v1897_v7, 5  ;;  %v2230_v0 = vrot.slane %v1897_v7, 3 }
 0x32e   : > { %11226 = vrot.lane.b32.xlu0 %v11225_v16, %s12267_s6  ;;  %v13552_v46 = vsel %vm671_vm2, %v18964_v21, %v2182_v33  ;;  %v13558_v60 = vsel %vm524_vm13, %v18965_v40, %v2038_v37  ;;  %v13564_v27 = vsel %vm573_vm0, %v18963_v17, %v2086_v29 }
 0x32f   : > { %v1901_v36 = vpop.f32.mrb[4].mxu1  ;;  %v13570_v4 = vsel %vm622_vm1, %v18960_v30, %v2134_v59  ;;  %v13576_v18 = vsel %vm19035_vm3, %v18962_v2, %v1957_v5  ;;  %v13582_v57 = vsel %vm2245_vm11, %v18961_v38, %v2230_v0 }
 0x330   : > { %19137 = vst [vmem:[#allocation16_spill] sm:$0xff] %v13570_v4  ;;  %19138 = vst [vmem:[#allocation21_spill] sm:$0xff] %v13576_v18  ;;  %v13585_v42 = vadd.f32 %v13532_v47, %v1901_v36  ;;  %v1903_v12 = vpop.f32.mrb[5].mxu1  ;;  %v11966_v18 = vld [vmem:[#allocation2 + $0x80] sm:$0xff]  }
 0x331   : > { %19139 = vst [vmem:[#allocation20_spill] sm:$0xff] %v13582_v57  ;;  %v1904_v56 = vpop.f32.mrb[6].mxu1  ;;  %v11959_v57 = vld [vmem:[#allocation2 + $0xa8] sm:$0xff]  }
 0x332   : > { %v13588_v49 = vadd.f32 %v13532_v47, %v1904_v56  ;;  %v1906_v8 = vpop.f32.mrb[7].mxu1  ;;  %v2183_v63 = vrot.slane %v13585_v42, 2  ;;  %v2039_v50 = vrot.slane %v13585_v42, 6  ;;  %v2135_v11 = vrot.slane %v13585_v42, 1 }
 0x333   : > { %v2087_v44 = vrot.slane %v13585_v42, 7  ;;  %v1958_v28 = vrot.slane %v13585_v42, 5  ;;  %v2231_v32 = vrot.slane %v13585_v42, 3 }
 0x334   : > { %v11235_v6 = vpack.i.bf16 %v13588_v49, %v13585_v42  ;;  %v13600_v23 = vsel %vm671_vm2, %v2182_v33, %v2183_v63  ;;  %v2040_v51 = vrot.slane %v13588_v49, 6  ;;  %v13605_v25 = vsel %vm524_vm13, %v2038_v37, %v2039_v50 }
 0x335   : > { %v2184_v35 = vrot.slane %v13588_v49, 2  ;;  %v13614_v20 = vsel %vm622_vm1, %v2134_v59, %v2135_v11  ;;  %v2088_v26 = vrot.slane %v13588_v49, 7  ;;  %v13624_v34 = vsel %vm573_vm0, %v2086_v29, %v2087_v44 }
 0x336   : > { %19140 = vst [vmem:[#allocation22_spill] sm:$0xff] %v13614_v20  ;;  %11236 = vrot.lane.b32.xlu0 %v11235_v6, %s12267_s6  ;;  %v13620_v55 = vsel %vm524_vm13, %v2039_v50, %v2040_v51  ;;  %v1959_v54 = vrot.slane %v13588_v49, 5  ;;  %v13629_v14 = vsel %vm19035_vm3, %v1957_v5, %v1958_v28  ;;  %v13643_v58 = vsel %vm2245_vm11, %v2230_v0, %v2231_v32  ;;  %v11968_v20 = vld [vmem:[#allocation2 + $0x88] sm:$0xff]  }
 0x337   : > { %19141 = vst [vmem:[#allocation17_spill] sm:$0xff] %v13629_v14  ;;  %v1909_v24 = vpop.f32.mrb[8].mxu1  ;;  %v13635_v31 = vsel %vm671_vm2, %v2183_v63, %v2184_v35  ;;  %v13639_v48 = vsel %vm573_vm0, %v2087_v44, %v2088_v26  ;;  %19142 = vst [vmem:[#allocation18_spill] sm:$0xff] %v13643_v58  ;;  %v2232_v10 = vrot.slane %v13588_v49, 3  ;;  %v2136_v52 = vrot.slane %v13588_v49, 1  ;;  %v11960_v58 = vld [vmem:[#allocation2 + $0x68] sm:$0xff]  }
 0x338   : > { %v13646_v19 = vadd.f32 %v13532_v47, %v1909_v24  ;;  %v1911_v9 = vpop.f32.mrb[9].mxu1  ;;  %v13650_v62 = vsel %vm19035_vm3, %v1958_v28, %v1959_v54  ;;  %v19145_v24 = vld [vmem:[#allocation10_spill] sm:$0xff] }
 0x339   : > { %19143 = vst [vmem:[#allocation19_spill] sm:$0xff] %v13650_v62  ;;  %v1912_v7 = vpop.f32.mrb[10].mxu1  ;;  %v13666_v36 = vsel %vm2245_vm11, %v2231_v32, %v2232_v10  ;;  %vm18987_vm14 = vcmp.ge.s32.totalorder %v19145_v24, 29  ;;  %v11964_v62 = vld [vmem:[#allocation2 + $0x78] sm:$0xff]  }
 0x33a   : > { %v13657_v16 = vadd.f32 %v13532_v47, %v1912_v7  ;;  %v1914_v33 = vpop.f32.mrb[11].mxu1  ;;  %v2185_v37 = vrot.slane %v13646_v19, 2  ;;  %v2041_v29 = vrot.slane %v13646_v19, 6  ;;  %v2089_v59 = vrot.slane %v13646_v19, 7  ;;  %19144 = vst [vmem:[#allocation23_spill] sm:$0xff] %v13666_v36  ;;  %v11955_v7 = vld [vmem:[#allocation2 + $0x98] sm:$0xff]  }
 0x33b   : > { %v1960_v5 = vrot.slane %v13646_v19, 5  ;;  %v2233_v0 = vrot.slane %v13646_v19, 3  ;;  %v18966_v12 = vrot.slane %v13646_v19, 1  ;;  %10264 = vmatprep.subr.bf16.mxu0 %v11955_v7  ;;  %v11958_v7 = vld [vmem:[#allocation2 + $0x60] sm:$0xff]  }
 0x33c   : > { %v11245_v56 = vpack.i.bf16 %v13657_v16, %v13646_v19  ;;  %v2186_v49 = vrot.slane %v13657_v16, 2  ;;  %v2042_v8 = vrot.slane %v13657_v16, 6  ;;  %v2064_v63 = vsel %vm524_vm13, %v2040_v51, %v2041_v29 }
 0x33d   : > { %v13677_v50 = vsel %vm19122_vm12, 0.0, %v2064_v63  ;;  %v2208_v44 = vsel %vm671_vm2, %v2184_v35, %v2185_v37  ;;  %v2090_v28 = vrot.slane %v13657_v16, 7  ;;  %v13684_v32 = vsel %vm573_vm0, %v2088_v26, %v2089_v59  ;;  %v11957_v26 = vld [vmem:[#allocation2 + $0xa0] sm:$0xff]  }
 0x33e   : > { %11246 = vrot.lane.b32.xlu0 %v11245_v56, %s12267_s6  ;;  %v13689_v6 = vsel %vm671_vm2, %v2185_v37, %v2186_v49  ;;  %v13693_v51 = vsel %vm524_vm13, %v2041_v29, %v2042_v8  ;;  %v13697_v9 = vsel %vm415_vm5, 0.0, %v2208_v44  ;;  %v1961_v37 = vrot.slane %v13657_v16, 5 }
 0x33f   : > { %v1917_v35 = vpop.f32.mrb[12].mxu1  ;;  %v13706_v33 = vsel %vm573_vm0, %v2089_v59, %v2090_v28  ;;  %v13714_v63 = vsel %vm19035_vm3, %v1959_v54, %v1960_v5  ;;  %v2257_v44 = vsel %vm2245_vm11, %v2232_v10, %v2233_v0  ;;  %v13724_v59 = vsel %vm622_vm1, %v2136_v52, %v18966_v12 }
 0x340   : > { %19146 = vst [vmem:[#allocation24_spill] sm:$0xff] %v13706_v33  ;;  %v13710_v29 = vadd.f32 %v13532_v47, %v1917_v35  ;;  %v1919_v56 = vpop.f32.mrb[13].mxu1  ;;  %19147 = vst [vmem:[#allocation25_spill] sm:$0xff] %v13714_v63  ;;  %v11956_v35 = vld [vmem:[#allocation2 + $0x58] sm:$0xff]   ;;  %v13732_v54 = vsel %vm18987_vm14, 0.0, %v2257_v44  ;;  %v13738_v10 = vsel %vm622_vm1, %v2135_v11, %v2136_v52  ;;  %v2234_v2 = vrot.slane %v13657_v16, 3 }
 0x341   : > { %19148 = vst [vmem:[#allocation26_spill] sm:$0xff] %v13724_v59  ;;  %v1920_v22 = vpop.f32.mrb[14].mxu1  ;;  %v13728_v56 = vsel %vm19035_vm3, %v1960_v5, %v1961_v37  ;;  %19150 = vst [vmem:[#allocation28_spill] sm:$0xff] %v13732_v54  ;;  %10265 = vmatpush3.bf16.msra.mxu0 %v11956_v35  ;;  %vm19161_vm12 = vcmp.lt.s32.totalorder %v19126_v45, 2  ;;  %vm19192_vm14 = vcmp.lt.s32.totalorder %v12382_v3, 2 }
 0x342   : > { %19149 = vst [vmem:[#allocation27_spill] sm:$0xff] %v13728_v56  ;;  %19151 = vst [vmem:[#allocation29_spill] sm:$0xff] %v13738_v10  ;;  %v13741_v30 = vadd.f32 %v13532_v47, %v1920_v22  ;;  %v1922_v38 = vpop.f32.mrb[15].mxu1  ;;  %v2187_v39 = vrot.slane %v13710_v29, 2  ;;  %v2043_v61 = vrot.slane %v13710_v29, 6  ;;  %v2091_v5 = vrot.slane %v13710_v29, 7  ;;  %10266 = vmatprep.subr.bf16.mxu0 %v11957_v26 }
 0x343   : > { %v1962_v44 = vrot.slane %v13710_v29, 5  ;;  %v2235_v26 = vrot.slane %v13710_v29, 3 }
 0x344   : > { %v11255_v11 = vpack.i.bf16 %v13741_v30, %v13710_v29  ;;  %v13754_v38 = vsel %vm671_vm2, %v2186_v49, %v2187_v39  ;;  %v2044_v22 = vrot.slane %v13741_v30, 6  ;;  %v13759_v52 = vsel %vm524_vm13, %v2042_v8, %v2043_v61 }
 0x345   : > { %v2188_v17 = vrot.slane %v13741_v30, 2  ;;  %v2092_v21 = vrot.slane %v13741_v30, 7  ;;  %v13767_v49 = vsel %vm573_vm0, %v2090_v28, %v2091_v5  ;;  %v1963_v35 = vrot.slane %v13741_v30, 5  ;;  %10267 = vmatpush3.bf16.msra.mxu0 %v11958_v7 }
 0x346   : > { %19152 = vst [vmem:[#allocation30_spill] sm:$0xff] %v13767_v49  ;;  %11256 = vrot.lane.b32.xlu0 %v11255_v11, %s12267_s6  ;;  %v13772_v8 = vsel %vm524_vm13, %v2043_v61, %v2044_v22  ;;  %v13777_v42 = vsel %vm19035_vm3, %v1961_v37, %v1962_v44  ;;  %v13794_v37 = vsel %vm2245_vm11, %v2233_v0, %v2234_v2  ;;  %v11961_v0 = vld [vmem:[#allocation2 + $0xb0] sm:$0xff]   ;;  %v2236_v7 = vrot.slane %v13741_v30, 3 }
 0x347   : > { %19153 = vst [vmem:[#allocation31_spill] sm:$0xff] %v13777_v42  ;;  %v1925_v40 = vpop.f32.mrb[16].mxu1  ;;  %v13784_v28 = vsel %vm671_vm2, %v2187_v39, %v2188_v17  ;;  %v13788_v61 = vsel %vm573_vm0, %v2091_v5, %v2092_v21  ;;  %19155 = vst [vmem:[#allocation33_spill] sm:$0xff] %v13794_v37  ;;  %v13801_v12 = vsel %vm19035_vm3, %v1962_v44, %v1963_v35  ;;  %v2138_v5 = vrot.slane %v13657_v16, 1 }
 0x348   : > { %19154 = vst [vmem:[#allocation32_spill] sm:$0xff] %v13788_v61  ;;  %v13797_v11 = vadd.f32 %v13532_v47, %v1925_v40  ;;  %v1927_v36 = vpop.f32.mrb[17].mxu1  ;;  %19156 = vst [vmem:[#allocation34_spill] sm:$0xff] %v13801_v12  ;;  %v13805_v39 = vsel %vm2245_vm11, %v2234_v2, %v2235_v26  ;;  %10268 = vmatprep.subr.bf16.mxu0 %v11959_v57  ;;  %v19159_v37 = vrot.slane %v13646_v19, 1 }
 0x349   : > { %19157 = vst [vmem:[#allocation35_spill] sm:$0xff] %v13805_v39  ;;  %v1928_v54 = vpop.f32.mrb[18].mxu1  ;;  %v18974_v36 = vrot.slane %v13710_v29, 1  ;;  %10269 = vmatpush3.bf16.msra.mxu0 %v11960_v58 }
 0x34a   : > { %v13813_v44 = vadd.f32 %v13532_v47, %v1928_v54  ;;  %v1930_v10 = vpop.f32.mrb[19].mxu1  ;;  %v2189_v2 = vrot.slane %v13797_v11, 2  ;;  %v2045_v24 = vrot.slane %v13797_v11, 6  ;;  %v2093_v16 = vrot.slane %v13797_v11, 7  ;;  %10270 = vmatprep.subr.bf16.mxu0 %v11961_v0 }
 0x34b   : > { %v1964_v59 = vrot.slane %v13797_v11, 5  ;;  %v13823_v40 = vsel %vm622_vm1, %v2138_v5, %v18974_v36  ;;  %v13829_v54 = vsel %vm622_vm1, %v19159_v37, %v2138_v5  ;;  %v11962_v36 = vld [vmem:[#allocation2 + $0x70] sm:$0xff]  }
 0x34c   : > { %19158 = vst [vmem:[#allocation36_spill] sm:$0xff] %v13823_v40  ;;  %19160 = vst [vmem:[#allocation37_spill] sm:$0xff] %v13829_v54  ;;  %v11265_v39 = vpack.i.bf16 %v13813_v44, %v13797_v11  ;;  %v2190_v57 = vrot.slane %v13813_v44, 2  ;;  %v2046_v12 = vrot.slane %v13813_v44, 6  ;;  %v2060_v42 = vsel %vm524_vm13, %v2044_v22, %v2045_v24  ;;  %v19163_v22 = vld [vmem:[#allocation12_spill] sm:$0xff] }
 0x34d   : > { %v13840_v19 = vsel %vm19161_vm12, 0.0, %v2060_v42  ;;  %v2204_v37 = vsel %vm671_vm2, %v2188_v17, %v2189_v2  ;;  %v2094_v5 = vrot.slane %v13813_v44, 7  ;;  %v13847_v10 = vsel %vm573_vm0, %v2092_v21, %v2093_v16  ;;  %10271 = vmatpush3.bf16.msra.mxu0 %v11962_v36  ;;  %v11963_v54 = vld [vmem:[#allocation2 + $0xb8] sm:$0xff]  }
 0x34e   : > { %19162 = vst [vmem:[#allocation38_spill] sm:$0xff] %v13847_v10  ;;  %11266 = vrot.lane.b32.xlu0 %v11265_v39, %s12267_s6  ;;  %v13852_v58 = vsel %vm671_vm2, %v2189_v2, %v2190_v57  ;;  %v13856_v42 = vsel %vm524_vm13, %v2045_v24, %v2046_v12  ;;  %v13860_v17 = vsel %vm419_vm8, 0.0, %v2204_v37  ;;  %vm18980_vm12 = vcmp.ge.s32.totalorder %v19163_v22, 29  ;;  %10272 = vmatprep.subr.bf16.mxu0 %v11963_v54 }
 0x34f   : > { %v1933_v0 = vpop.f32.mrb[20].mxu1  ;;  %v13869_v2 = vsel %vm573_vm0, %v2093_v16, %v2094_v5  ;;  %v1965_v24 = vrot.slane %v13813_v44, 5  ;;  %v13877_v63 = vsel %vm19035_vm3, %v1963_v35, %v1964_v59  ;;  %v19166_v21 = vrot.slane %v13797_v11, 3 }
 0x350   : > { %19164 = vst [vmem:[#allocation39_spill] sm:$0xff] %v13869_v2  ;;  %v13873_v56 = vadd.f32 %v13532_v47, %v1933_v0  ;;  %v1935_v37 = vpop.f32.mrb[21].mxu1  ;;  %19165 = vst [vmem:[#allocation40_spill] sm:$0xff] %v13877_v63  ;;  %v13885_v16 = vsel %vm2245_vm11, %v2235_v26, %v2236_v7  ;;  %v11965_v0 = vld [vmem:[#allocation2 + $0xc0] sm:$0xff]   ;;  %v2140_v22 = vrot.slane %v13741_v30, 1 }
 0x351   : > { %v2253_v39 = vsel %vm2245_vm11, %v2236_v7, %v19166_v21  ;;  %19167 = vst [vmem:[#allocation41_spill] sm:$0xff] %v13885_v16  ;;  %v1936_v40 = vpop.f32.mrb[22].mxu1  ;;  %v13889_v36 = vsel %vm19035_vm3, %v1964_v59, %v1965_v24  ;;  %10273 = vmatpush3.bf16.msra.mxu0 %v11964_v62 }
 0x352   : > { %19168 = vst [vmem:[#allocation42_spill] sm:$0xff] %v13889_v36  ;;  %v13893_v35 = vsel %vm18980_vm12, 0.0, %v2253_v39  ;;  %v13896_v37 = vadd.f32 %v13532_v47, %v1936_v40  ;;  %v1938_v21 = vpop.f32.mrb[23].mxu1  ;;  %v2191_v63 = vrot.slane %v13873_v56, 2  ;;  %v2047_v26 = vrot.slane %v13873_v56, 6  ;;  %10274 = vmatprep.subr.bf16.mxu0 %v11965_v0 }
 0x353   : > { %19169 = vst [vmem:[#allocation43_spill] sm:$0xff] %v13893_v35  ;;  %v2095_v7 = vrot.slane %v13873_v56, 7  ;;  %v1966_v14 = vrot.slane %v13873_v56, 5  ;;  %v19172_v0 = vrot.slane %v13797_v11, 1  ;;  %vm19183_vm12 = vcmp.ge.s32.totalorder %v12578_v53, 30 }
 0x354   : > { %v11275_v40 = vpack.i.bf16 %v13896_v37, %v13873_v56  ;;  %v13910_v21 = vsel %vm671_vm2, %v2190_v57, %v2191_v63  ;;  %v2048_v36 = vrot.slane %v13896_v37, 6  ;;  %v13915_v54 = vsel %vm524_vm13, %v2046_v12, %v2047_v26 }
 0x355   : > { %v2192_v59 = vrot.slane %v13896_v37, 2  ;;  %v2096_v39 = vrot.slane %v13896_v37, 7  ;;  %v13923_v57 = vsel %vm573_vm0, %v2094_v5, %v2095_v7  ;;  %v1967_v62 = vrot.slane %v13896_v37, 5  ;;  %10275 = vmatpush3.bf16.msra.mxu0 %v11966_v18 }
 0x356   : > { %19170 = vst [vmem:[#allocation44_spill] sm:$0xff] %v13923_v57  ;;  %11276 = vrot.lane.b32.xlu0 %v11275_v40, %s12267_s6  ;;  %v13928_v12 = vsel %vm524_vm13, %v2047_v26, %v2048_v36  ;;  %v13933_v30 = vsel %vm19035_vm3, %v1965_v24, %v1966_v14  ;;  %v13939_v16 = vsel %vm622_vm1, %v2140_v22, %v19172_v0  ;;  %v19175_v24 = vrot.slane %v13710_v29, 1 }
 0x357   : > { %19171 = vst [vmem:[#allocation45_spill] sm:$0xff] %v13933_v30  ;;  %19173 = vst [vmem:[#allocation46_spill] sm:$0xff] %v13939_v16  ;;  %v1941_v5 = vpop.f32.mrb[24].mxu1  ;;  %v13945_v26 = vsel %vm671_vm2, %v2191_v63, %v2192_v59  ;;  %v13949_v35 = vsel %vm573_vm0, %v2095_v7, %v2096_v39  ;;  %v13962_v40 = vsel %vm19035_vm3, %v1966_v14, %v1967_v62  ;;  %v2238_v63 = vrot.slane %v13813_v44, 3  ;;  %v11967_v7 = vld [vmem:[#allocation2 + $0xc8] sm:$0xff]  }
 0x358   : > { %19174 = vst [vmem:[#allocation47_spill] sm:$0xff] %v13949_v35  ;;  %v13955_v30 = vsel %vm622_vm1, %v19175_v24, %v2140_v22  ;;  %v13958_v0 = vadd.f32 %v13532_v47, %v1941_v5  ;;  %v1943_v16 = vpop.f32.mrb[25].mxu1  ;;  %19177 = vst [vmem:[#allocation49_spill] sm:$0xff] %v13962_v40  ;;  %v2239_v29 = vrot.slane %v13873_v56, 3  ;;  %v2142_v35 = vrot.slane %v13813_v44, 1  ;;  %10276 = vmatprep.subr.bf16.mxu0 %v11967_v7 }
 0x359   : > { %19176 = vst [vmem:[#allocation48_spill] sm:$0xff] %v13955_v30  ;;  %v1944_v4 = vpop.f32.mrb[26].mxu1  ;;  %v18979_v22 = vrot.slane %v13873_v56, 1  ;;  %v19179_v44 = vrot.slane %v13797_v11, 3  ;;  %10277 = vmatpush3.bf16.msra.mxu0 %v11968_v20 }
 0x35a   : > { %v13969_v5 = vadd.f32 %v13532_v47, %v1944_v4  ;;  %v1946_v16 = vpop.f32.mrb[27].mxu1  ;;  %v2193_v18 = vrot.slane %v13958_v0, 2  ;;  %v2049_v14 = vrot.slane %v13958_v0, 6  ;;  %v2097_v24 = vrot.slane %v13958_v0, 7 }
 0x35b   : > { %v1968_v30 = vrot.slane %v13958_v0, 5  ;;  %v13977_v40 = vsel %vm2245_vm11, %v2238_v63, %v2239_v29  ;;  %v13983_v4 = vsel %vm2245_vm11, %v19179_v44, %v2238_v63  ;;  %v13989_v16 = vsel %vm622_vm1, %v2142_v35, %v18979_v22 }
 0x35c   : > { %19178 = vst [vmem:[#allocation50_spill] sm:$0xff] %v13977_v40  ;;  %19180 = vst [vmem:[#allocation51_spill] sm:$0xff] %v13983_v4  ;;  %v11285_v7 = vpack.i.bf16 %v13969_v5, %v13958_v0  ;;  %v2194_v57 = vrot.slane %v13969_v5, 2  ;;  %v2050_v2 = vrot.slane %v13969_v5, 6  ;;  %v2056_v45 = vsel %vm524_vm13, %v2048_v36, %v2049_v14 }
 0x35d   : > { %19181 = vst [vmem:[#allocation52_spill] sm:$0xff] %v13989_v16  ;;  %v13999_v63 = vsel %vm18988_vm10, 0.0, %v2056_v45  ;;  %v2200_v44 = vsel %vm671_vm2, %v2192_v59, %v2193_v18  ;;  %v2098_v22 = vrot.slane %v13969_v5, 7  ;;  %v14006_v16 = vsel %vm573_vm0, %v2096_v39, %v2097_v24 }
 0x35e   : > { %19182 = vst [vmem:[#allocation53_spill] sm:$0xff] %v14006_v16  ;;  %11286 = vrot.lane.b32.xlu0 %v11285_v7, %s12267_s6  ;;  %v14011_v10 = vsel %vm671_vm2, %v2193_v18, %v2194_v57  ;;  %v14015_v20 = vsel %vm524_vm13, %v2049_v14, %v2050_v2  ;;  %v14019_v45 = vsel %vm19183_vm12, 0.0, %v2200_v44  ;;  %v1969_v18 = vrot.slane %v13969_v5, 5  ;;  %v11969_v16 = vld [vmem:[#allocation2 + $0xd0] sm:$0xff]  }
 0x35f   : > { %v1949_v36 = vpop.f32.mrb[28].mxu1  ;;  %v14027_v7 = vsel %vm573_vm0, %v2097_v24, %v2098_v22  ;;  %v11970_v44 = vld [vmem:[#allocation2 + $0x90] sm:$0xff]   ;;  %v14035_v61 = vsel %vm19035_vm3, %v1967_v62, %v1968_v30  ;;  %v19186_v39 = vrot.slane %v13797_v11, 1  ;;  %vm18994_vm12 = vcmp.ge.s32.totalorder %v12578_v53, 29  ;;  %10278 = vmatprep.subr.bf16.mxu0 %v11969_v16 }
 0x360   : > { %19184 = vst [vmem:[#allocation54_spill] sm:$0xff] %v14027_v7  ;;  %v14031_v14 = vadd.f32 %v13532_v47, %v1949_v36  ;;  %v1951_v43 = vpop.f32.mrb[29].mxu1  ;;  %19185 = vst [vmem:[#allocation55_spill] sm:$0xff] %v14035_v61  ;;  %v14047_v36 = vsel %vm19035_vm3, %v1968_v30, %v1969_v18  ;;  %v2241_v62 = vrot.slane %v13958_v0, 3  ;;  %10279 = vmatpush3.bf16.msra.mxu0 %v11970_v44  ;;  %vm19194_vm10 = vcmp.ge.s32.totalorder %v12690_v13, 30 }
 0x361   : > { %v14043_v24 = vsel %vm622_vm1, %v19186_v39, %v2142_v35  ;;  %v1952_v7 = vpop.f32.mrb[30].mxu1  ;;  %19188 = vst [vmem:[#allocation57_spill] sm:$0xff] %v14047_v36  ;;  %v2240_v43 = vrot.slane %v13896_v37, 3  ;;  %v19189_v36 = vmov 0  }
 0x362   : > { %19187 = vst [vmem:[#allocation56_spill] sm:$0xff] %v14043_v24  ;;  %v1953_v61 = vadd.f32 %v13532_v47, %v1952_v7  ;;  %v1954_v59 = vpop.f32.mrb[31].mxu1  ;;  %v2195_v11 = vrot.slane %v14031_v14, 2  ;;  %v2051_v4 = vrot.slane %v14031_v14, 6  ;;  %v2099_v35 = vrot.slane %v14031_v14, 7  ;;  %2932 = vmatprep.subr.bf16.mxu0 %v19189_v36 }
 0x363   : > { %v1970_v30 = vrot.slane %v14031_v14, 5  ;;  %v2249_v39 = vsel %vm2245_vm11, %v2240_v43, %v2241_v62  ;;  %v14061_v40 = vsel %vm2245_vm11, %v2239_v29, %v2240_v43  ;;  %v2144_v47 = vrot.slane %v13896_v37, 1 }
 0x364   : > { %v11295_v59 = vpack.i.bf16 %v1953_v61, %v14031_v14  ;;  %v2052_v7 = vrot.slane %v1953_v61, 6  ;;  %v2198_v16 = vsel %vm671_vm2, %v2194_v57, %v2195_v11  ;;  %v2054_v44 = vsel %vm524_vm13, %v2050_v2, %v2051_v4 }
 0x365   : > { %v11335_v24 = vpack.i.bf16 %v2198_v16, %v14011_v10  ;;  %v2196_v49 = vrot.slane %v1953_v61, 2  ;;  %v2100_v33 = vrot.slane %v1953_v61, 7  ;;  %v1971_v15 = vrot.slane %v1953_v61, 5 }
 0x366   : > { %11296 = vrot.lane.b32.xlu0 %v11295_v59, %s12267_s6  ;;  %v19190_v37 = vrot.slane %v13535_v41, 6  ;;  %v2053_v57 = vsel %vm524_vm13, %v2051_v4, %v2052_v7  ;;  %v14080_v2 = vsel %vm573_vm0, %v2098_v22, %v2099_v35  ;;  %v14084_v10 = vsel %vm19035_vm3, %v1969_v18, %v1970_v30 }
 0x367   : > { %19191 = vst [vmem:[#allocation58_spill] sm:$0xff] %v14084_v10  ;;  %v11300_v59 = vpack.i.bf16 %v2053_v57, %v2054_v44  ;;  %v2197_v16 = vsel %vm671_vm2, %v2195_v11, %v2196_v49  ;;  %v19195_v18 = vrot.slane %v13535_v41, 7  ;;  %v19196_v44 = vrot.slane %v13535_v41, 5 }
 0x368   : > { %v2068_v29 = vsel %vm524_vm13, %v2052_v7, %v19190_v37  ;;  %v19193_v37 = vrot.slane %v13535_v41, 2  ;;  %v14118_v57 = vsel %vm19035_vm3, %v1970_v30, %v1971_v15  ;;  %v2146_v30 = vrot.slane %v13969_v5, 1 }
 0x369   : > { %v2069_v43 = vsel %vm19192_vm14, 0.0, %v2068_v29  ;;  %v2116_v10 = vsel %vm573_vm0, %v2100_v33, %v19195_v18  ;;  %v14105_v11 = vsel %vm19035_vm3, %v1971_v15, %v19196_v44  ;;  %v2243_v15 = vrot.slane %v14031_v14, 3 }
 0x36a   : > { %v2212_v4 = vsel %vm671_vm2, %v2196_v49, %v19193_v37  ;;  %v11230_v7 = vpack.i.bf16 %v13558_v60, %v2069_v43  ;;  %v14109_v49 = vsel %vm573_vm0, %v2099_v35, %v2100_v33  ;;  %v19197_v60 = vpack.i.bf16 %v13600_v23, %v13552_v46 }
 0x36b   : > { %v2228_v22 = vsel %vm19194_vm10, 0.0, %v2212_v4  ;;  %v14122_v43 = vsel %vm18994_vm12, 0.0, %v2249_v39  ;;  %v19198_v33 = vrot.slane %v13873_v56, 1  ;;  %v2242_v23 = vrot.slane %v13969_v5, 3 }
 0x36c   : > { %v11340_v29 = vpack.i.bf16 %v2228_v22, %v2197_v16  ;;  %11306 = vrot.lane.b32.xlu0 %v19197_v60, %s12267_s6  ;;  %11231 = vrot.lane.b32.xlu1 %v11230_v7, %s12267_s6  ;;  %v2145_v16 = vrot.slane %v13958_v0, 1  ;;  %v2147_v0 = vrot.slane %v14031_v14, 1  ;;  %v2244_v56 = vrot.slane %v1953_v61, 3 }
 0x36d   : > { %v14129_v35 = vsel %vm622_vm1, %v19198_v33, %v2144_v47  ;;  %v2148_v37 = vrot.slane %v1953_v61, 1  ;;  %v14143_v4 = vsel %vm2245_vm11, %v2242_v23, %v2243_v15  ;;  %v14147_v7 = vsel %vm2245_vm11, %v2241_v62, %v2242_v23 }
 0x36e   : > { %v14138_v39 = vsel %vm622_vm1, %v2144_v47, %v2145_v16  ;;  %v14151_v22 = vsel %vm622_vm1, %v2145_v16, %v2146_v30  ;;  %vm18989_vm10 = vcmp.ge.s32.totalorder %v12690_v13, 29  ;;  %v19199_v5 = vpack.i.bf16 %v13754_v38, %v13689_v6 }
 0x36f   : > { %v19200_v61 = vpack.i.bf16 %v13620_v55, %v13605_v25  ;;  %v14166_v62 = vsel %vm622_vm1, %v2146_v30, %v2147_v0  ;;  %v14170_v47 = vsel %vm2245_vm11, %v2243_v15, %v2244_v56  ;;  %v19201_v18 = vrot.slane %v13535_v41, 3  ;;  %v19214_v30 = vld [vmem:[#allocation24_spill] sm:$0xff] }
 0x370   : > { %11316 = vrot.lane.b32.xlu0 %v19199_v5, %s12267_s6  ;;  %v14178_v25 = vsel %vm622_vm1, %v2147_v0, %v2148_v37  ;;  %v19202_v55 = vrot.slane %v13535_v41, 1  ;;  %v19203_v16 = vpack.i.bf16 %v13910_v21, %v13852_v58  ;;  %v19204_v41 = vpack.i.bf16 %v13693_v51, %v13677_v50  ;;  %v19215_v5 = vld [vmem:[#allocation30_spill] sm:$0xff] }
 0x371   : > { %11241 = vrot.lane.b32.xlu1 %v19200_v61, %s12267_s6  ;;  %v2261_v6 = vsel %vm2245_vm11, %v2244_v56, %v19201_v18  ;;  %v19205_v33 = vpack.i.bf16 %v13772_v8, %v13759_v52  ;;  %v19206_v23 = vpack.i.bf16 %v13856_v42, %v13840_v19  ;;  %v19207_v58 = vpack.i.bf16 %v13928_v12, %v13915_v54  ;;  %v19216_v18 = vld [vmem:[#allocation32_spill] sm:$0xff] }
 0x372   : > { %v14184_v38 = vsel %vm622_vm1, %v2148_v37, %v19202_v55  ;;  %v14188_v44 = vsel %vm18989_vm10, 0.0, %v2261_v6  ;;  %v19208_v50 = vpack.i.bf16 %v14015_v20, %v13999_v63  ;;  %v19209_v51 = vpack.i.bf16 %v13697_v9, %v13635_v31 }
 0x373   : > { %v19210_v52 = vpack.i.bf16 %v13860_v17, %v13784_v28  ;;  %v19211_v8 = vpack.i.bf16 %v14019_v45, %v13945_v26  ;;  %vm19212_vm14 = vcmp.lt.s32.totalorder %v12382_v3, 1  ;;  %vm18993_vm10 = vcmp.lt.s32.totalorder %v12382_v3, 3 }
 0x374   : > { %11326 = vrot.lane.b32.xlu0 %v19203_v16, %s12267_s6  ;;  %v2117_v54 = vsel %vm19212_vm14, 0.0, %v2116_v10  ;;  %vm19275_vm12 = vcmp.ge.s32.totalorder %v12690_v13, 31 }
 0x375   : > { %11251 = vrot.lane.b32.xlu1 %v19204_v41, %s12267_s6 }
 0x378   : > { %11336 = vrot.lane.b32.xlu0 %v11335_v24, %s12267_s6 }
 0x379   : > { %11261 = vrot.lane.b32.xlu1 %v19205_v33, %s12267_s6  ;;  %v19217_v33 = vld [vmem:[#allocation38_spill] sm:$0xff] }
 0x37d   : > { %11271 = vrot.lane.b32.xlu1 %v19206_v23, %s12267_s6  ;;  %v19218_v23 = vld [vmem:[#allocation13_spill] sm:$0xff] }
 0x381   : > { %11281 = vrot.lane.b32.xlu1 %v19207_v58, %s12267_s6  ;;  %v2125_v58 = vsel %vm19004_vm9, 0.0, %v19217_v33 }
 0x385   : > { %11291 = vrot.lane.b32.xlu1 %v19208_v50, %s12267_s6 }
 0x389   : > { %11301 = vrot.lane.b32.xlu1 %v11300_v59, %s12267_s6 }
 0x38d   : > { %11311 = vrot.lane.b32.xlu1 %v19209_v51, %s12267_s6  ;;  %v19219_v51 = vld [vmem:[#allocation39_spill] sm:$0xff] }
 0x391   : > { %11321 = vrot.lane.b32.xlu1 %v19210_v52, %s12267_s6 }
 0x395   : > { %11331 = vrot.lane.b32.xlu1 %v19211_v8, %s12267_s6 }
 0x399   : > { %11341 = vrot.lane.b32.xlu1 %v11340_v29, %s12267_s6  ;;  %v2121_v29 = vsel %vm448_vm6, 0.0, %v13684_v32 }
 0x3a0   : > { %v11227_v19 = vpop.permute.xlu0 %11226 }
 0x3a1   : > { %v11229_v42 = vunpack.i.h.bf16 %v11227_v19  ;;  %v11228_v21 = vunpack.i.l.bf16 %v11227_v19 }
 0x3a3   : > { %v2518_v31 = vsel %vm1700_vm15, %v2117_v54, %v11228_v21  ;;  %v2519_v9 = vsel %vm1700_vm15, %v13564_v27, %v11229_v42  ;;  %v19213_v27 = vld [vmem:[#allocation11_spill] sm:$0xff]  ;;  %v19220_v54 = vld [vmem:[#allocation44_spill] sm:$0xff] }
 0x3a4   : > { %v2608_v28 = vpack.c.bf16 %v2519_v9, %v2518_v31  ;;  %v19221_v9 = vld [vmem:[#allocation47_spill] sm:$0xff] }
 0x3a6   : > { %2867 = vmatprep.mubr.bf16.mxu0 %v2608_v28 }
 0x3a8   : > { %v11237_v17 = vpop.permute.xlu0 %11236 }
 0x3a9   : > { %v11239_v12 = vunpack.i.h.bf16 %v11237_v17  ;;  %v11238_v63 = vunpack.i.l.bf16 %v11237_v17 }
 0x3ab   : > { %v14238_v26 = vsel %vm1700_vm15, %v13624_v34, %v11238_v63  ;;  %v14242_v20 = vsel %vm1700_vm15, %v13639_v48, %v11239_v12 }
 0x3ac   : > { %v2612_v45 = vpack.c.bf16 %v14242_v20, %v14238_v26  ;;  %v19222_v20 = vld [vmem:[#allocation53_spill] sm:$0xff] }
 0x3b0   : > { %v11247_v24 = vpop.permute.xlu0 %11246 }
 0x3b1   : > { %v11249_v10 = vunpack.i.h.bf16 %v11247_v24  ;;  %v11248_v59 = vunpack.i.l.bf16 %v11247_v24  ;;  %v19223_v24 = vld [vmem:[#allocation15_spill] sm:$0xff] }
 0x3b2   : > { %vm19224_vm14 = vcmp.lt.s32.totalorder %v19223_v24, 1 }
 0x3b3   : > { %v14250_v15 = vsel %vm1700_vm15, %v2121_v29, %v11248_v59  ;;  %v14254_v34 = vsel %vm1700_vm15, %v19214_v30, %v11249_v10  ;;  %v2129_v10 = vsel %vm19224_vm14, 0.0, %v19222_v20  ;;  %v19225_v29 = vld [vmem:[#allocation54_spill] sm:$0xff]  ;;  %v11971_v20 = vld [vmem:[#allocation2 + $0xd8] sm:$0xff]   ;;  %vm18990_vm14 = vcmp.lt.s32.totalorder %v19213_v27, 3 }
 0x3b4   : > { %v2616_v48 = vpack.c.bf16 %v14254_v34, %v14250_v15 }
 0x3b8   : > { %v11257_v0 = vpop.permute.xlu0 %11256 }
 0x3b9   : > { %v11259_v56 = vunpack.i.h.bf16 %v11257_v0  ;;  %v11258_v37 = vunpack.i.l.bf16 %v11257_v0 }
 0x3bb   : > { %v14260_v61 = vsel %vm1700_vm15, %v19215_v5, %v11258_v37  ;;  %v14264_v32 = vsel %vm1700_vm15, %v19216_v18, %v11259_v56 }
 0x3bc   : > { %v2620_v6 = vpack.c.bf16 %v14264_v32, %v14260_v61  ;;  %v11977_v32 = vld [vmem:[#allocation2 + $0x108] sm:$0xff]  }
 0x3c0   : > { %v11267_v55 = vpop.permute.xlu0 %11266 }
 0x3c1   : > { %v11269_v16 = vunpack.i.h.bf16 %v11267_v55  ;;  %v11268_v41 = vunpack.i.l.bf16 %v11267_v55 }
 0x3c3   : > { %v14272_v50 = vsel %vm1700_vm15, %v2125_v58, %v11268_v41  ;;  %v14276_v52 = vsel %vm1700_vm15, %v19219_v51, %v11269_v16 }
 0x3c4   : > { %v2624_v8 = vpack.c.bf16 %v14276_v52, %v14272_v50  ;;  %v11979_v50 = vld [vmem:[#allocation2 + $0x118] sm:$0xff]   ;;  %v19248_v52 = vld [vmem:[#allocation29_spill] sm:$0xff] }
 0x3c8   : > { %v11277_v19 = vpop.permute.xlu0 %11276 }
 0x3c9   : > { %v11279_v42 = vunpack.i.h.bf16 %v11277_v19  ;;  %v11278_v21 = vunpack.i.l.bf16 %v11277_v19 }
 0x3cb   : > { %v14282_v31 = vsel %vm1700_vm15, %v19220_v54, %v11278_v21  ;;  %v14286_v28 = vsel %vm1700_vm15, %v19221_v9, %v11279_v42  ;;  %v2021_v21 = vsel %vm18993_vm10, 0.0, %v14105_v11  ;;  %v19226_v54 = vld [vmem:[#allocation22_spill] sm:$0xff]  ;;  %v19227_v9 = vld [vmem:[#allocation16_spill] sm:$0xff]  ;;  %vm19253_vm10 = vcmp.ge.s32.totalorder %v12690_v13, 31 }
 0x3cc   : > { %v2628_v17 = vpack.c.bf16 %v14286_v28, %v14282_v31  ;;  %v11981_v31 = vld [vmem:[#allocation2 + $0x128] sm:$0xff]  }
 0x3d0   : > { %v11287_v12 = vpop.permute.xlu0 %11286 }
 0x3d1   : > { %v11289_v63 = vunpack.i.h.bf16 %v11287_v12  ;;  %v11288_v26 = vunpack.i.l.bf16 %v11287_v12 }
 0x3d3   : > { %v14294_v59 = vsel %vm1700_vm15, %v2129_v10, %v11288_v26  ;;  %v14298_v30 = vsel %vm1700_vm15, %v19225_v29, %v11289_v63  ;;  %v19228_v63 = vld [vmem:[#allocation21_spill] sm:$0xff] }
 0x3d4   : > { %v2632_v0 = vpack.c.bf16 %v14298_v30, %v14294_v59  ;;  %v19255_v59 = vld [vmem:[#allocation20_spill] sm:$0xff] }
 0x3d8   : > { %v11297_v56 = vpop.permute.xlu0 %11296 }
 0x3d9   : > { %v11299_v37 = vunpack.i.h.bf16 %v11297_v56  ;;  %v11298_v5 = vunpack.i.l.bf16 %v11297_v56 }
 0x3db   : > { %v14305_v18 = vsel %vm1700_vm15, %v14080_v2, %v11298_v5  ;;  %v14309_v55 = vsel %vm1700_vm15, %v14109_v49, %v11299_v37 }
 0x3dc   : > { %v2636_v33 = vpack.c.bf16 %v14309_v55, %v14305_v18  ;;  %v19263_v55 = vld [vmem:[#allocation43_spill] sm:$0xff] }
 0x3de   : > { %v11307_v16 = vpop.permute.xlu0 %11306  ;;  %v11232_v41 = vpop.permute.xlu1 %11231 }
 0x3df   : > { %v11309_v58 = vunpack.i.h.bf16 %v11307_v16  ;;  %v11308_v51 = vunpack.i.l.bf16 %v11307_v16  ;;  %v11234_v19 = vunpack.i.h.bf16 %v11232_v41  ;;  %v11233_v42 = vunpack.i.l.bf16 %v11232_v41 }
 0x3e1   : > { %v14318_v2 = vsel %vm1700_vm15, %v19226_v54, %v11309_v58  ;;  %v14322_v49 = vsel %vm1700_vm15, %v19227_v9, %v11308_v51  ;;  %v2502_v12 = vsel %vm1700_vm15, %v2021_v21, %v11233_v42  ;;  %v2503_v26 = vsel %vm1700_vm15, %v19228_v63, %v11234_v19  ;;  %v11972_v58 = vld [vmem:[#allocation2 + $0xe0] sm:$0xff]   ;;  %v19230_v21 = vld [vmem:[#allocation19_spill] sm:$0xff] }
 0x3e2   : > { %v2609_v10 = vpack.c.bf16 %v14318_v2, %v14322_v49  ;;  %v2607_v29 = vpack.c.bf16 %v2503_v26, %v2502_v12  ;;  %v11317_v56 = vpop.permute.xlu0 %11316  ;;  %v19229_v51 = vld [vmem:[#allocation17_spill] sm:$0xff]  ;;  %v19266_v2 = vld [vmem:[#allocation50_spill] sm:$0xff]  ;;  %v19267_v49 = vld [vmem:[#allocation51_spill] sm:$0xff] }
 0x3e3   : > { %v11242_v11 = vpop.permute.xlu1 %11241  ;;  %v11319_v37 = vunpack.i.h.bf16 %v11317_v56  ;;  %v11318_v5 = vunpack.i.l.bf16 %v11317_v56  ;;  %v19231_v54 = vld [vmem:[#allocation37_spill] sm:$0xff] }
 0x3e4   : > { %v11244_v16 = vunpack.i.h.bf16 %v11242_v11  ;;  %v11243_v41 = vunpack.i.l.bf16 %v11242_v11  ;;  %2868 = vmatmul.mubr.bf16.vlgmr.msra.gmra.mrb[16].mxu0 %v2607_v29 }
 0x3e5   : > { %2933 = vmatpush1.bf16.msra.mxu0 %v11971_v20  ;;  %2875 = vmatprep.mubr.bf16.mxu0 %v2612_v45  ;;  %v14336_v9 = vsel %vm1700_vm15, %v19231_v54, %v11318_v5  ;;  %v19232_v20 = vld [vmem:[#allocation36_spill] sm:$0xff] }
 0x3e6   : > { %v2504_v42 = vsel %vm1700_vm15, %v19229_v51, %v11243_v41  ;;  %v2505_v19 = vsel %vm1700_vm15, %v19230_v21, %v11244_v16  ;;  %v11327_v12 = vpop.permute.xlu0 %11326  ;;  %2934 = vmatprep.subr.bf16.mxu0 %v19189_v36  ;;  %v14341_v45 = vsel %vm1700_vm15, %v19232_v20, %v11319_v37  ;;  %v19233_v16 = vld [vmem:[#allocation25_spill] sm:$0xff]  ;;  %v11973_v21 = vld [vmem:[#allocation2 + $0xe8] sm:$0xff]   ;;  %v19235_v37 = vld [vmem:[#allocation56_spill] sm:$0xff] }
 0x3e7   : > { %v11252_v63 = vpop.permute.xlu1 %11251  ;;  %v2611_v26 = vpack.c.bf16 %v2505_v19, %v2504_v42  ;;  %v11329_v29 = vunpack.i.h.bf16 %v11327_v12  ;;  %v11328_v56 = vunpack.i.l.bf16 %v11327_v12  ;;  %v2025_v51 = vsel %vm18990_vm14, 0.0, %v19233_v16  ;;  %v19234_v42 = vld [vmem:[#allocation27_spill] sm:$0xff]  ;;  %v19236_v12 = vld [vmem:[#allocation52_spill] sm:$0xff] }
 0x3e8   : > { %v11254_v11 = vunpack.i.h.bf16 %v11252_v63  ;;  %v11253_v41 = vunpack.i.l.bf16 %v11252_v63  ;;  %v2617_v5 = vpack.c.bf16 %v14341_v45, %v14336_v9  ;;  %vm18991_vm14 = vcmp.lt.s32.totalorder %v19218_v23, 3 }
 0x3e9   : > { %2935 = vmatpush1.bf16.msra.mxu0 %v11972_v58  ;;  %v14353_v20 = vsel %vm1700_vm15, %v19235_v37, %v11328_v56  ;;  %v14357_v63 = vsel %vm1700_vm15, %v19236_v12, %v11329_v29  ;;  %v11974_v29 = vld [vmem:[#allocation2 + $0xf0] sm:$0xff]   ;;  %v19238_v37 = vld [vmem:[#allocation34_spill] sm:$0xff]  ;;  %v19270_v9 = vpack.c.bf16 %v14143_v4, %v14147_v7  ;;  %v19271_v45 = vpack.c.bf16 %v14188_v44, %v14170_v47 }
 0x3ea   : > { %v2506_v54 = vsel %vm1700_vm15, %v2025_v51, %v11253_v41  ;;  %v2507_v19 = vsel %vm1700_vm15, %v19234_v42, %v11254_v11  ;;  %v11337_v60 = vpop.permute.xlu0 %11336  ;;  %2936 = vmatprep.subr.bf16.mxu0 %v19189_v36  ;;  %v2625_v58 = vpack.c.bf16 %v14357_v63, %v14353_v20  ;;  %v19237_v56 = vld [vmem:[#allocation31_spill] sm:$0xff] }
 0x3eb   : > { %v11262_v16 = vpop.permute.xlu1 %11261  ;;  %v2615_v14 = vpack.c.bf16 %v2507_v19, %v2506_v54  ;;  %v11339_v41 = vunpack.i.h.bf16 %v11337_v60  ;;  %v11338_v51 = vunpack.i.l.bf16 %v11337_v60  ;;  %v11986_v4 = vld [vmem:[#allocation2 + $0x1d0] sm:$0xff]  }
 0x3ec   : > { %v11264_v46 = vunpack.i.h.bf16 %v11262_v16  ;;  %v11263_v11 = vunpack.i.l.bf16 %v11262_v16  ;;  %2876 = vmatmul.mubr.bf16.gmra.mrb[20].mxu0 %v2611_v26 }
 0x3ed   : > { %2883 = vmatprep.mubr.bf16.mxu0 %v2616_v48  ;;  %2937 = vmatpush1.bf16.msra.mxu0 %v11973_v21  ;;  %v14372_v60 = vsel %vm1700_vm15, %v14151_v22, %v11338_v51  ;;  %v14377_v15 = vsel %vm1700_vm15, %v14166_v62, %v11339_v41  ;;  %v11975_v22 = vld [vmem:[#allocation2 + $0xf8] sm:$0xff]   ;;  %v19240_v51 = vld [vmem:[#allocation42_spill] sm:$0xff] }
 0x3ee   : > { %v2508_v42 = vsel %vm1700_vm15, %v19237_v56, %v11263_v11  ;;  %v2509_v54 = vsel %vm1700_vm15, %v19238_v37, %v11264_v46  ;;  %2938 = vmatprep.subr.bf16.mxu0 %v19189_v36  ;;  %v2633_v21 = vpack.c.bf16 %v14377_v15, %v14372_v60  ;;  %v19239_v46 = vld [vmem:[#allocation40_spill] sm:$0xff]  ;;  %v11976_v37 = vld [vmem:[#allocation2 + $0x100] sm:$0xff]  }
 0x3ef   : > { %v11272_v19 = vpop.permute.xlu1 %11271  ;;  %v2619_v26 = vpack.c.bf16 %v2509_v54, %v2508_v42  ;;  %v2029_v12 = vsel %vm18991_vm14, 0.0, %v19239_v46  ;;  %vm18992_vm14 = vcmp.lt.s32.totalorder %v19223_v24, 3 }
 0x3f0   : > { %v11274_v34 = vunpack.i.h.bf16 %v11272_v19  ;;  %v11273_v48 = vunpack.i.l.bf16 %v11272_v19  ;;  %v19242_v19 = vld [vmem:[#allocation49_spill] sm:$0xff] }
 0x3f1   : > { %2939 = vmatpush1.bf16.msra.mxu0 %v11974_v29  ;;  %v19241_v29 = vld [vmem:[#allocation45_spill] sm:$0xff] }
 0x3f2   : > { %v2510_v16 = vsel %vm1700_vm15, %v2029_v12, %v11273_v48  ;;  %v2511_v11 = vsel %vm1700_vm15, %v19240_v51, %v11274_v34  ;;  %2940 = vmatprep.subr.bf16.mxu0 %v19189_v36 }
 0x3f3   : > { %v11282_v56 = vpop.permute.xlu1 %11281  ;;  %v2623_v62 = vpack.c.bf16 %v2511_v11, %v2510_v16  ;;  %v19243_v16 = vld [vmem:[#allocation55_spill] sm:$0xff] }
 0x3f4   : > { %v11284_v41 = vunpack.i.h.bf16 %v11282_v56  ;;  %v11283_v42 = vunpack.i.l.bf16 %v11282_v56  ;;  %2884 = vmatmul.mubr.bf16.gmra.mrb[24].mxu0 %v2615_v14  ;;  %v2033_v61 = vsel %vm18992_vm14, 0.0, %v19243_v16  ;;  %v19246_v16 = vld [vmem:[#allocation26_spill] sm:$0xff]  ;;  %vm19252_vm14 = vcmp.ge.s32.totalorder %v12578_v53, 31 }
 0x3f5   : > { %2891 = vmatprep.mubr.bf16.mxu0 %v2620_v6  ;;  %2941 = vmatpush1.bf16.msra.mxu0 %v11975_v22  ;;  %v19244_v22 = vld [vmem:[#allocation57_spill] sm:$0xff] }
 0x3f6   : > { %v2512_v54 = vsel %vm1700_vm15, %v19241_v29, %v11283_v42  ;;  %v2513_v48 = vsel %vm1700_vm15, %v19242_v19, %v11284_v41  ;;  %2942 = vmatprep.subr.bf16.mxu0 %v19189_v36  ;;  %v11978_v29 = vld [vmem:[#allocation2 + $0x110] sm:$0xff]  }
 0x3f7   : > { %v11292_v34 = vpop.permute.xlu1 %11291  ;;  %v2627_v46 = vpack.c.bf16 %v2513_v48, %v2512_v54 }
 0x3f8   : > { %v11294_v12 = vunpack.i.h.bf16 %v11292_v34  ;;  %v11293_v14 = vunpack.i.l.bf16 %v11292_v34 }
 0x3f9   : > { %2943 = vmatpush1.bf16.msra.mxu0 %v11976_v37  ;;  %v19245_v37 = vld [vmem:[#allocation58_spill] sm:$0xff] }
 0x3fa   : > { %v2514_v6 = vsel %vm1700_vm15, %v2033_v61, %v11293_v14  ;;  %v2515_v51 = vsel %vm1700_vm15, %v19244_v22, %v11294_v12  ;;  %2944 = vmatprep.subr.bf16.mxu0 %v19189_v36  ;;  %v2168_v61 = vsel %vm431_vm4, 0.0, %v19246_v16  ;;  %v2176_v16 = vsel %vm19252_vm14, 0.0, %v14138_v39  ;;  %v11982_v39 = vld [vmem:[#allocation2 + $0x130] sm:$0xff]  }
 0x3fb   : > { %v11302_v11 = vpop.permute.xlu1 %11301  ;;  %v2631_v56 = vpack.c.bf16 %v2515_v51, %v2514_v6 }
 0x3fc   : > { %v11304_v41 = vunpack.i.h.bf16 %v11302_v11  ;;  %v11303_v42 = vunpack.i.l.bf16 %v11302_v11  ;;  %2892 = vmatmul.mubr.bf16.gmra.mrb[28].mxu0 %v2619_v26  ;;  %v19249_v11 = vld [vmem:[#allocation46_spill] sm:$0xff] }
 0x3fd   : > { %2899 = vmatprep.mubr.bf16.mxu0 %v2624_v8  ;;  %2945 = vmatpush1.bf16.msra.mxu0 %v11977_v32 }
 0x3fe   : > { %v2516_v54 = vsel %vm1700_vm15, %v19245_v37, %v11303_v42  ;;  %v2517_v19 = vsel %vm1700_vm15, %v14118_v57, %v11304_v41  ;;  %2946 = vmatprep.subr.bf16.mxu0 %v19189_v36  ;;  %v2172_v42 = vsel %vm19003_vm7, 0.0, %v19249_v11  ;;  %v19251_v37 = vld [vmem:[#allocation48_spill] sm:$0xff] }
 0x3ff   : > { %v11312_v48 = vpop.permute.xlu1 %11311  ;;  %v2635_v34 = vpack.c.bf16 %v2517_v19, %v2516_v54 }
 0x400   : > { %v11314_v12 = vunpack.i.h.bf16 %v11312_v48  ;;  %v11313_v14 = vunpack.i.l.bf16 %v11312_v48 }
 0x401   : > { %2947 = vmatpush1.bf16.msra.mxu0 %v11978_v29  ;;  %v11980_v29 = vld [vmem:[#allocation2 + $0x120] sm:$0xff]  }
 0x402   : > { %v2536_v8 = vsel %vm1700_vm15, %v19248_v52, %v11313_v14  ;;  %v2537_v32 = vsel %vm1700_vm15, %v2168_v61, %v11314_v12  ;;  %2948 = vmatprep.subr.bf16.mxu0 %v19189_v36 }
 0x403   : > { %v11322_v6 = vpop.permute.xlu1 %11321  ;;  %v2613_v57 = vpack.c.bf16 %v2537_v32, %v2536_v8  ;;  %v2180_v32 = vsel %vm19253_vm10, 0.0, %v14184_v38  ;;  %v19254_v38 = vld [vmem:[#allocation18_spill] sm:$0xff]  ;;  %vm19272_vm10 = vcmp.ge.s32.totalorder %v12578_v53, 30 }
 0x404   : > { %v11324_v22 = vunpack.i.h.bf16 %v11322_v6  ;;  %v11323_v51 = vunpack.i.l.bf16 %v11322_v6  ;;  %2900 = vmatmul.mubr.bf16.gmra.mrb[32].mxu0 %v2623_v62  ;;  %v19256_v30 = vpack.c.bf16 %v19254_v38, %v19255_v59 }
 0x405   : > { %2907 = vmatprep.mubr.bf16.mxu0 %v2628_v17  ;;  %2949 = vmatpush1.bf16.msra.mxu0 %v11979_v50 }
 0x406   : > { %v2540_v54 = vsel %vm1700_vm15, %v19251_v37, %v11323_v51  ;;  %v2541_v19 = vsel %vm1700_vm15, %v2172_v42, %v11324_v22  ;;  %2950 = vmatprep.subr.bf16.mxu0 %v19189_v36  ;;  %v19261_v51 = vld [vmem:[#allocation33_spill] sm:$0xff] }
 0x407   : > { %v11332_v48 = vpop.permute.xlu1 %11331  ;;  %v2621_v12 = vpack.c.bf16 %v2541_v19, %v2540_v54 }
 0x408   : > { %v11334_v62 = vunpack.i.h.bf16 %v11332_v48  ;;  %v11333_v14 = vunpack.i.l.bf16 %v11332_v48 }
 0x409   : > { %2951 = vmatpush1.bf16.msra.mxu0 %v11980_v29 }
 0x40a   : > { %v2544_v28 = vsel %vm1700_vm15, %v14129_v35, %v11333_v14  ;;  %v2545_v17 = vsel %vm1700_vm15, %v2176_v16, %v11334_v62  ;;  %2952 = vmatprep.subr.bf16.mxu0 %v19189_v36 }
 0x40b   : > { %v11342_v61 = vpop.permute.xlu1 %11341  ;;  %v2629_v50 = vpack.c.bf16 %v2545_v17, %v2544_v28 }
 0x40c   : > { %v11344_v52 = vunpack.i.h.bf16 %v11342_v61  ;;  %v11343_v8 = vunpack.i.l.bf16 %v11342_v61  ;;  %2908 = vmatmul.mubr.bf16.gmra.mrb[36].mxu0 %v2627_v46 }
 0x40d   : > { %2915 = vmatprep.mubr.bf16.mxu0 %v2632_v0  ;;  %2953 = vmatpush1.bf16.msra.mxu0 %v11981_v31  ;;  %v19258_v0 = vld [vmem:[#allocation23_spill] sm:$0xff] }
 0x40e   : > { %v2548_v35 = vsel %vm1700_vm15, %v14178_v25, %v11343_v8  ;;  %v2549_v6 = vsel %vm1700_vm15, %v2180_v32, %v11344_v52  ;;  %2954 = vmatprep.subr.bf16.mxu0 %v19189_v36  ;;  %v19257_v25 = vld [vmem:[#allocation28_spill] sm:$0xff] }
 0x40f   : > { %v2637_v22 = vpack.c.bf16 %v2549_v6, %v2548_v35  ;;  %v19259_v46 = vpack.c.bf16 %v19257_v25, %v19258_v0  ;;  %v11988_v35 = vld [vmem:[#allocation2 + $0x138] sm:$0xff]   ;;  %v11989_v6 = vld [vmem:[#allocation2 + $0x180] sm:$0xff]  }
 0x411   : > { %2955 = vmatpush1.bf16.msra.mxu0 %v11982_v39  ;;  %v11987_v39 = vld [vmem:[#allocation2 + $0x178] sm:$0xff]  }
 0x412   : > { %10328 = vmatprep.subr.bf16.mxu1 %v11987_v39 }
 0x413   : > { %10329 = vmatpush3.bf16.msra.mxu1 %v11988_v35 }
 0x414   : > { %2916 = vmatmul.mubr.bf16.gmra.mrb[40].mxu0 %v2631_v56  ;;  %v19260_v56 = vld [vmem:[#allocation35_spill] sm:$0xff]  ;;  %10330 = vmatprep.subr.bf16.mxu1 %v11989_v6 }
 0x415   : > { %2923 = vmatprep.mubr.bf16.mxu0 %v2636_v33  ;;  %v19262_v18 = vpack.c.bf16 %v19260_v56, %v19261_v51  ;;  %v19264_v33 = vld [vmem:[#allocation41_spill] sm:$0xff] }
 0x41c   : > { %2924 = vmatmul.mubr.bf16.gmra.mrb[44].mxu0 %v2635_v34  ;;  %v19265_v34 = vpack.c.bf16 %v19263_v55, %v19264_v33 }
 0x41d   : > { %9986 = vmatprep.mubr.msk.bf16.mxu0 %vm1700_vm15, %v19256_v30 }
 0x424   : > { %2965 = vmatmul.mubr.bf16.vlgmr.msra.gmra.mrb[48].mxu0 %v2609_v10  ;;  %v19268_v10 = vpack.c.bf16 %v19266_v2, %v19267_v49 }
 0x425   : > { %9987 = vmatprep.mubr.msk.bf16.mxu0 %vm1700_vm15, %v19259_v46 }
 0x42c   : > { %2973 = vmatmul.mubr.bf16.gmra.mrb[52].mxu0 %v2613_v57  ;;  %v19269_v57 = vpack.c.bf16 %v14122_v43, %v14061_v40  ;;  %v11984_v40 = vld [vmem:[#allocation2 + $0x1c0] sm:$0xff]   ;;  %v11985_v43 = vld [vmem:[#allocation2 + $0x1c8] sm:$0xff]  }
 0x42d   : > { %9988 = vmatprep.mubr.msk.bf16.mxu0 %vm1700_vm15, %v19262_v18 }
 0x434   : > { %2981 = vmatmul.mubr.bf16.gmra.mrb[56].mxu0 %v2617_v5  ;;  %v11983_v5 = vld [vmem:[#allocation2 + $0x1b8] sm:$0xff]  }
 0x435   : > { %9989 = vmatprep.mubr.msk.bf16.mxu0 %vm1700_vm15, %v19265_v34  ;;  %10728 = vmatprep.subr.bf16.mxu0 %v11983_v5 }
 0x436   : > { %10729 = vmatpush3.bf16.msra.mxu0 %v11983_v5 }
 0x437   : > { %10730 = vmatprep.subr.bf16.mxu0 %v11984_v40 }
 0x43a   : > { %10731 = vmatpush3.bf16.msra.mxu0 %v11984_v40  ;;  %v14520_v40 = vld [vmem:[%s18924_s2 + $0x2] ss:$0 sm:$0xff] }
 0x43b   : > { %10732 = vmatprep.subr.bf16.mxu0 %v11985_v43 }
 0x43c   : > { %2989 = vmatmul.mubr.bf16.gmra.mrb[60].mxu0 %v2621_v12 }
 0x43d   : > { %9990 = vmatprep.mubr.msk.bf16.mxu0 %vm1700_vm15, %v19268_v10 }
 0x43e   : > { %10733 = vmatpush3.bf16.msra.mxu0 %v11985_v43 }
 0x43f   : > { %10734 = vmatprep.subr.bf16.mxu0 %v11986_v4 }
 0x442   : > { %10735 = vmatpush3.bf16.msra.mxu0 %v11986_v4 }
 0x444   : > { %2997 = vmatmul.mubr.bf16.gmra.mrb[64].mxu0 %v2625_v58 }
 0x445   : > { %9991 = vmatprep.mubr.msk.bf16.mxu0 %vm1700_vm15, %v19269_v57 }
 0x44c   : > { %3005 = vmatmul.mubr.bf16.gmra.mrb[68].mxu0 %v2629_v50 }
 0x44d   : > { %9992 = vmatprep.mubr.msk.bf16.mxu0 %vm1700_vm15, %v19270_v9 }
 0x454   : > { %3013 = vmatmul.mubr.bf16.gmra.mrb[72].mxu0 %v2633_v21 }
 0x455   : > { %9993 = vmatprep.mubr.msk.bf16.mxu0 %vm1700_vm15, %v19271_v45 }
 0x45c   : > { %3021 = vmatmul.mubr.bf16.gmra.mrb[76].mxu0 %v2637_v22 }
 0x4b7   : > { %v10280_v7 = vpop.f32.mrb[16].mxu0 }
 0x4b8   : > { %v10281_v20 = vpop.f32.mrb[17].mxu0 }
 0x4b9   : > { %v10282_v63 = vadd.f32 %v10281_v20, %v10280_v7  ;;  %v10283_v58 = vpop.f32.mrb[18].mxu0 }
 0x4ba   : > { %v10284_v47 = vpop.f32.mrb[19].mxu0 }
 0x4bb   : > { %v10285_v44 = vadd.f32 %v10284_v47, %v10283_v58  ;;  %v2870_v43 = vadd.f32 %v10282_v63, %v14520_v40 }
 0x4bd   : > { %v2873_v58 = vadd.f32 %v10285_v44, %v14520_v40 }
 0x4bf   : > { %v10286_v60 = vpop.f32.mrb[20].mxu0 }
 0x4c0   : > { %v10287_v15 = vpop.f32.mrb[21].mxu0 }
 0x4c1   : > { %v10288_v21 = vadd.f32 %v10287_v15, %v10286_v60  ;;  %v10289_v11 = vpop.f32.mrb[22].mxu0 }
 0x4c2   : > { %v10290_v42 = vpop.f32.mrb[23].mxu0 }
 0x4c3   : > { %v10291_v29 = vadd.f32 %v10290_v42, %v10289_v11  ;;  %v11990_v11 = vld [vmem:[#allocation2 + $0x140] sm:$0xff]  }
 0x4c4   : > { %10331 = vmatpush3.bf16.msra.mxu1 %v11990_v11 }
 0x4c5   : > { %v2881_v44 = vadd.f32 %v10291_v29, %v14520_v40 }
 0x4c7   : > { %v10292_v37 = vpop.f32.mrb[24].mxu0 }
 0x4c8   : > { %v10293_v54 = vpop.f32.mrb[25].mxu0 }
 0x4c9   : > { %v14493_v19 = vadd.f32 %v10293_v54, %v10292_v37  ;;  %v10295_v48 = vpop.f32.mrb[26].mxu0  ;;  %v2878_v37 = vadd.f32 %v10288_v21, %v14520_v40 }
 0x4ca   : > { %v10296_v12 = vpop.f32.mrb[27].mxu0 }
 0x4cb   : > { %v14495_v62 = vadd.f32 %v10296_v12, %v10295_v48 }
 0x4cf   : > { %v10298_v14 = vpop.f32.mrb[28].mxu0 }
 0x4d0   : > { %v10299_v16 = vpop.f32.mrb[29].mxu0 }
 0x4d1   : > { %v14497_v31 = vadd.f32 %v10299_v16, %v10298_v14  ;;  %v10301_v28 = vpop.f32.mrb[30].mxu0  ;;  %v11991_v16 = vld [vmem:[#allocation2 + $0x188] sm:$0xff]  }
 0x4d2   : > { %v10302_v17 = vpop.f32.mrb[31].mxu0  ;;  %10332 = vmatprep.subr.bf16.mxu1 %v11991_v16 }
 0x4d3   : > { %v14499_v61 = vadd.f32 %v10302_v17, %v10301_v28  ;;  %v11992_v28 = vld [vmem:[#allocation2 + $0x148] sm:$0xff]  }
 0x4d4   : > { %10333 = vmatpush3.bf16.msra.mxu1 %v11992_v28 }
 0x4d7   : > { %v10304_v50 = vpop.f32.mrb[32].mxu0 }
 0x4d8   : > { %v10305_v52 = vpop.f32.mrb[33].mxu0 }
 0x4d9   : > { %v14501_v8 = vadd.f32 %v10305_v52, %v10304_v50  ;;  %v10307_v32 = vpop.f32.mrb[34].mxu0 }
 0x4da   : > { %v10308_v22 = vpop.f32.mrb[35].mxu0 }
 0x4db   : > { %v14503_v38 = vadd.f32 %v10308_v22, %v10307_v32  ;;  %v2886_v22 = vadd.f32 %v14493_v19, %v14520_v40 }
 0x4df   : > { %v10310_v59 = vpop.f32.mrb[36].mxu0 }
 0x4e0   : > { %v10311_v30 = vpop.f32.mrb[37].mxu0 }
 0x4e1   : > { %v14505_v25 = vadd.f32 %v10311_v30, %v10310_v59  ;;  %v10313_v0 = vpop.f32.mrb[38].mxu0  ;;  %v11993_v59 = vld [vmem:[#allocation2 + $0x190] sm:$0xff]  }
 0x4e2   : > { %v10314_v46 = vpop.f32.mrb[39].mxu0  ;;  %10334 = vmatprep.subr.bf16.mxu1 %v11993_v59 }
 0x4e3   : > { %v14507_v56 = vadd.f32 %v10314_v46, %v10313_v0 }
 0x4e7   : > { %v10316_v51 = vpop.f32.mrb[40].mxu0 }
 0x4e8   : > { %v10317_v18 = vpop.f32.mrb[41].mxu0 }
 0x4e9   : > { %v14509_v55 = vadd.f32 %v10317_v18, %v10316_v51  ;;  %v10319_v33 = vpop.f32.mrb[42].mxu0 }
 0x4ea   : > { %v10320_v34 = vpop.f32.mrb[43].mxu0 }
 0x4eb   : > { %v14511_v2 = vadd.f32 %v10320_v34, %v10319_v33 }
 0x4ef   : > { %v10322_v49 = vpop.f32.mrb[44].mxu0 }
 0x4f0   : > { %v10323_v10 = vpop.f32.mrb[45].mxu0 }
 0x4f1   : > { %v14513_v57 = vadd.f32 %v10323_v10, %v10322_v49  ;;  %v10325_v9 = vpop.f32.mrb[46].mxu0 }
 0x4f2   : > { %v10326_v45 = vpop.f32.mrb[47].mxu0 }
 0x4f3   : > { %v14515_v5 = vadd.f32 %v10326_v45, %v10325_v9  ;;  %v2889_v9 = vadd.f32 %v14495_v62, %v14520_v40  ;;  %v11994_v62 = vld [vmem:[#allocation2 + $0x150] sm:$0xff]  }
 0x4f4   : > { %10335 = vmatpush3.bf16.msra.mxu1 %v11994_v62 }
 0x4f7   : > { %v2966_v4 = vpop.f32.mrb[48].mxu0 }
 0x4f8   : > { %v14523_v7 = vadd.f32 %v2966_v4, %v2870_v43  ;;  %v2968_v20 = vpop.f32.mrb[49].mxu0 }
 0x4f9   : > { %v2969_v47 = vpop.f32.mrb[50].mxu0 }
 0x4fa   : > { %v14526_v60 = vadd.f32 %v2969_v47, %v2873_v58  ;;  %v2971_v15 = vpop.f32.mrb[51].mxu0  ;;  %v14533_v63 = vmax.f32 %v14523_v7, 0.0 }
 0x4fc   : > { %v14529_v42 = vmax.f32 %v14526_v60, 0.0  ;;  %v3189_v39 = vrot.slane %v14533_v63, 2  ;;  %v3141_v29 = vrot.slane %v14533_v63, 1 }
 0x4fe   : > { %v3190_v21 = vrot.slane %v14529_v42, 2  ;;  %v3142_v32 = vrot.slane %v14529_v42, 1 }
 0x4ff   : > { %v2974_v54 = vpop.f32.mrb[52].mxu0 }
 0x500   : > { %v14535_v48 = vadd.f32 %v2974_v54, %v2878_v37  ;;  %v2976_v12 = vpop.f32.mrb[53].mxu0  ;;  %v3219_v0 = vsel %vm671_vm2, %v3189_v39, %v3190_v21  ;;  %v3171_v51 = vsel %vm622_vm1, %v3141_v29, %v3142_v32  ;;  %v11995_v37 = vld [vmem:[#allocation2 + $0x198] sm:$0xff]  }
 0x501   : > { %v2977_v14 = vpop.f32.mrb[54].mxu0  ;;  %v2894_v12 = vadd.f32 %v14497_v31, %v14520_v40  ;;  %10336 = vmatprep.subr.bf16.mxu1 %v11995_v37 }
 0x502   : > { %v14539_v17 = vmax.f32 %v14535_v48, 0.0  ;;  %v14541_v50 = vadd.f32 %v2977_v14, %v2881_v44  ;;  %v2979_v52 = vpop.f32.mrb[55].mxu0 }
 0x504   : > { %v3191_v35 = vrot.slane %v14539_v17, 2  ;;  %v3143_v6 = vrot.slane %v14539_v17, 1  ;;  %v14564_v18 = vmax.f32 %v14541_v50, 0.0 }
 0x506   : > { %v3218_v30 = vsel %vm671_vm2, %v3190_v21, %v3191_v35  ;;  %v3170_v46 = vsel %vm622_vm1, %v3142_v32, %v3143_v6  ;;  %v3192_v58 = vrot.slane %v14564_v18, 2  ;;  %v3144_v47 = vrot.slane %v14564_v18, 1  ;;  %v11996_v32 = vld [vmem:[#allocation2 + $0x158] sm:$0xff]  }
 0x507   : > { %v2982_v19 = vpop.f32.mrb[56].mxu0  ;;  %v3440_v33 = vpack.c.bf16 %v3218_v30, %v3219_v0  ;;  %v11345_v34 = vpack.i.bf16 %v3170_v46, %v3171_v51  ;;  %v2897_v30 = vadd.f32 %v14499_v61, %v14520_v40  ;;  %10337 = vmatpush3.bf16.msra.mxu1 %v11996_v32 }
 0x508   : > { %v14566_v49 = vadd.f32 %v2982_v19, %v2886_v22  ;;  %v2984_v10 = vpop.f32.mrb[57].mxu0  ;;  %v3217_v16 = vsel %vm671_vm2, %v3191_v35, %v3192_v58  ;;  %v3169_v21 = vsel %vm622_vm1, %v3143_v6, %v3144_v47 }
 0x509   : > { %v2985_v45 = vpop.f32.mrb[58].mxu0  ;;  %10736 = vmatprep.mubr.msk.bf16.mxu0 %vm1700_vm15, %v3440_v33  ;;  %11346 = vrot.lane.b32.xlu0 %v11345_v34, %s12267_s6 }
 0x50a   : > { %v14573_v43 = vmax.f32 %v14566_v49, 0.0  ;;  %v14575_v4 = vadd.f32 %v2985_v45, %v2889_v9  ;;  %v2987_v20 = vpop.f32.mrb[59].mxu0  ;;  %v2902_v9 = vadd.f32 %v14501_v8, %v14520_v40  ;;  %v11997_v45 = vld [vmem:[#allocation2 + $0x1a0] sm:$0xff]  }
 0x50b   : > { %10338 = vmatprep.subr.bf16.mxu1 %v11997_v45 }
 0x50c   : > { %v3193_v15 = vrot.slane %v14573_v43, 2  ;;  %v3145_v11 = vrot.slane %v14573_v43, 1  ;;  %v14582_v54 = vmax.f32 %v14575_v4, 0.0 }
 0x50e   : > { %v3216_v44 = vsel %vm671_vm2, %v3192_v58, %v3193_v15  ;;  %v3168_v14 = vsel %vm622_vm1, %v3144_v47, %v3145_v11  ;;  %v3194_v33 = vrot.slane %v14582_v54, 2  ;;  %v3146_v34 = vrot.slane %v14582_v54, 1 }
 0x50f   : > { %v2990_v28 = vpop.f32.mrb[60].mxu0  ;;  %v3224_v52 = vsel %vm415_vm5, 0.0, %v3216_v44  ;;  %v3176_v31 = vsel %vm431_vm4, 0.0, %v3168_v14 }
 0x510   : > { %v14598_v22 = vadd.f32 %v2990_v28, %v2894_v12  ;;  %v2992_v59 = vpop.f32.mrb[61].mxu0  ;;  %v3443_v0 = vpack.c.bf16 %v3224_v52, %v3217_v16  ;;  %v11355_v35 = vpack.i.bf16 %v3176_v31, %v3169_v21  ;;  %v3215_v58 = vsel %vm671_vm2, %v3193_v15, %v3194_v33 }
 0x511   : > { %v2993_v46 = vpop.f32.mrb[62].mxu0  ;;  %v3167_v62 = vsel %vm622_vm1, %v3145_v11, %v3146_v34  ;;  %v2905_v28 = vadd.f32 %v14503_v38, %v14520_v40  ;;  %v11998_v38 = vld [vmem:[#allocation2 + $0x160] sm:$0xff]  }
 0x512   : > { %v14603_v51 = vmax.f32 %v14598_v22, 0.0  ;;  %v14605_v19 = vadd.f32 %v2993_v46, %v2897_v30  ;;  %v2995_v6 = vpop.f32.mrb[63].mxu0  ;;  %10737 = vmatmul.mubr.msk.bf16.vlgmr.msra.gmra.mrb[80].mxu0 %vm1700_vm15, %v3443_v0  ;;  %11356 = vrot.lane.b32.xlu0 %v11355_v35, %s12267_s6  ;;  %v11999_v0 = vld [vmem:[#allocation2 + $0x1a8] sm:$0xff]   ;;  %v2910_v46 = vadd.f32 %v14505_v25, %v14520_v40 }
 0x513   : > { %10339 = vmatpush3.bf16.msra.mxu1 %v11998_v38  ;;  %v12001_v38 = vld [vmem:[#allocation2 + $0x1b0] sm:$0xff]  }
 0x514   : > { %v3195_v61 = vrot.slane %v14603_v51, 2  ;;  %v3147_v10 = vrot.slane %v14603_v51, 1  ;;  %v14624_v37 = vmax.f32 %v14605_v19, 0.0  ;;  %10340 = vmatprep.subr.bf16.mxu1 %v11999_v0 }
 0x516   : > { %v3214_v20 = vsel %vm671_vm2, %v3194_v33, %v3195_v61  ;;  %v3166_v47 = vsel %vm622_vm1, %v3146_v34, %v3147_v10  ;;  %v3196_v31 = vrot.slane %v14624_v37, 2  ;;  %v3148_v32 = vrot.slane %v14624_v37, 1 }
 0x517   : > { %v2998_v12 = vpop.f32.mrb[64].mxu0  ;;  %v3446_v44 = vpack.c.bf16 %v3214_v20, %v3215_v58  ;;  %v11365_v14 = vpack.i.bf16 %v3166_v47, %v3167_v62  ;;  %v12000_v58 = vld [vmem:[#allocation2 + $0x168] sm:$0xff]  }
 0x518   : > { %v14626_v8 = vadd.f32 %v2998_v12, %v2902_v9  ;;  %v3000_v16 = vpop.f32.mrb[65].mxu0  ;;  %v3213_v9 = vsel %vm671_vm2, %v3195_v61, %v3196_v31  ;;  %v3165_v20 = vsel %vm622_vm1, %v3147_v10, %v3148_v32  ;;  %v2913_v12 = vadd.f32 %v14507_v56, %v14520_v40  ;;  %10341 = vmatpush3.bf16.msra.mxu1 %v12000_v58 }
 0x519   : > { %v3001_v15 = vpop.f32.mrb[66].mxu0  ;;  %10740 = vmatprep.mubr.msk.bf16.mxu0 %vm1700_vm15, %v3446_v44  ;;  %11366 = vrot.lane.b32.xlu0 %v11365_v14, %s12267_s6  ;;  %v2921_v58 = vadd.f32 %v14511_v2, %v14520_v40  ;;  %v12002_v2 = vld [vmem:[#allocation2 + $0x170] sm:$0xff]  }
 0x51a   : > { %v14633_v11 = vmax.f32 %v14626_v8, 0.0  ;;  %v14635_v52 = vadd.f32 %v3001_v15, %v2905_v28  ;;  %v3003_v21 = vpop.f32.mrb[67].mxu0  ;;  %10342 = vmatprep.subr.bf16.mxu1 %v12001_v38 }
 0x51c   : > { %v3197_v59 = vrot.slane %v14633_v11, 2  ;;  %v3149_v30 = vrot.slane %v14633_v11, 1  ;;  %v14642_v35 = vmax.f32 %v14635_v52, 0.0  ;;  %10343 = vmatpush3.bf16.msra.mxu1 %v12002_v2 }
 0x51d   : > { %4137 = vmatprep.subr.bf16.mxu1 %v19189_v36 }
 0x51e   : > { %v3212_v6 = vsel %vm671_vm2, %v3196_v31, %v3197_v59  ;;  %v3164_v33 = vsel %vm622_vm1, %v3148_v32, %v3149_v30  ;;  %v3198_v15 = vrot.slane %v14642_v35, 2  ;;  %v3150_v21 = vrot.slane %v14642_v35, 1 }
 0x51f   : > { %v3006_v34 = vpop.f32.mrb[68].mxu0  ;;  %v3228_v45 = vsel %vm419_vm8, 0.0, %v3212_v6  ;;  %v3180_v25 = vsel %vm19003_vm7, 0.0, %v3164_v33  ;;  %v2918_v32 = vadd.f32 %v14509_v55, %v14520_v40 }
 0x520   : > { %v14658_v47 = vadd.f32 %v3006_v34, %v2910_v46  ;;  %v3008_v62 = vpop.f32.mrb[69].mxu0  ;;  %v3449_v44 = vpack.c.bf16 %v3228_v45, %v3213_v9  ;;  %v11375_v14 = vpack.i.bf16 %v3180_v25, %v3165_v20  ;;  %v3211_v46 = vsel %vm671_vm2, %v3197_v59, %v3198_v15 }
 0x521   : > { %v3009_v61 = vpop.f32.mrb[70].mxu0  ;;  %v3163_v33 = vsel %vm622_vm1, %v3149_v30, %v3150_v21 }
 0x522   : > { %v14663_v16 = vmax.f32 %v14658_v47, 0.0  ;;  %v14665_v28 = vadd.f32 %v3009_v61, %v2913_v12  ;;  %v3011_v10 = vpop.f32.mrb[71].mxu0  ;;  %10741 = vmatmul.mubr.msk.bf16.gmra.mrb[84].mxu0 %vm1700_vm15, %v3449_v44  ;;  %11376 = vrot.lane.b32.xlu0 %v11375_v14, %s12267_s6 }
 0x524   : > { %v3199_v56 = vrot.slane %v14663_v16, 2  ;;  %v3151_v31 = vrot.slane %v14663_v16, 1  ;;  %v14684_v34 = vmax.f32 %v14665_v28, 0.0 }
 0x526   : > { %v3210_v0 = vsel %vm671_vm2, %v3198_v15, %v3199_v56  ;;  %v3162_v6 = vsel %vm622_vm1, %v3150_v21, %v3151_v31  ;;  %v3200_v44 = vrot.slane %v14684_v34, 2  ;;  %v3152_v14 = vrot.slane %v14684_v34, 1 }
 0x527   : > { %v3014_v9 = vpop.f32.mrb[72].mxu0  ;;  %v3452_v45 = vpack.c.bf16 %v3210_v0, %v3211_v46  ;;  %v11385_v20 = vpack.i.bf16 %v3162_v6, %v3163_v33  ;;  %v2926_v21 = vadd.f32 %v14513_v57, %v14520_v40 }
 0x528   : > { %v14686_v55 = vadd.f32 %v3014_v9, %v2918_v32  ;;  %v3016_v25 = vpop.f32.mrb[73].mxu0  ;;  %v3209_v46 = vsel %vm671_vm2, %v3199_v56, %v3200_v44  ;;  %v3161_v33 = vsel %vm622_vm1, %v3151_v31, %v3152_v14 }
 0x529   : > { %v3017_v59 = vpop.f32.mrb[74].mxu0  ;;  %10744 = vmatprep.mubr.msk.bf16.mxu0 %vm1700_vm15, %v3452_v45  ;;  %11386 = vrot.lane.b32.xlu0 %v11385_v20, %s12267_s6  ;;  %v2929_v20 = vadd.f32 %v14515_v5, %v14520_v40  ;;  %v3093_v5 = vrot.slane %v14533_v63, 7 }
 0x52a   : > { %v14693_v30 = vmax.f32 %v14686_v55, 0.0  ;;  %v14695_v62 = vadd.f32 %v3017_v59, %v2921_v58  ;;  %v3019_v12 = vpop.f32.mrb[75].mxu0 }
 0x52b   : > { %v3094_v12 = vrot.slane %v14529_v42, 7 }
 0x52c   : > { %v3201_v61 = vrot.slane %v14693_v30, 2  ;;  %v3153_v10 = vrot.slane %v14693_v30, 1  ;;  %v14702_v15 = vmax.f32 %v14695_v62, 0.0 }
 0x52e   : > { %v3208_v32 = vsel %vm671_vm2, %v3200_v44, %v3201_v61  ;;  %v3160_v38 = vsel %vm622_vm1, %v3152_v14, %v3153_v10  ;;  %v3202_v59 = vrot.slane %v14702_v15, 2  ;;  %v3154_v2 = vrot.slane %v14702_v15, 1 }
 0x52f   : > { %v3022_v0 = vpop.f32.mrb[76].mxu0  ;;  %v3232_v6 = vsel %vm19272_vm10, 0.0, %v3208_v32  ;;  %v3184_v57 = vsel %vm19252_vm14, 0.0, %v3160_v38  ;;  %vm19273_vm10 = vcmp.ge.s32.totalorder %v12690_v13, 30  ;;  %vm19274_vm14 = vcmp.lt.s32.totalorder %v12382_v3, 1 }
 0x530   : > { %v14719_v9 = vadd.f32 %v3022_v0, %v2926_v21  ;;  %v3024_v45 = vpop.f32.mrb[77].mxu0  ;;  %v3455_v25 = vpack.c.bf16 %v3232_v6, %v3209_v46  ;;  %v11395_v58 = vpack.i.bf16 %v3184_v57, %v3161_v33  ;;  %v3207_v38 = vsel %vm671_vm2, %v3201_v61, %v3202_v59 }
 0x531   : > { %v3025_v56 = vpop.f32.mrb[78].mxu0  ;;  %v3123_v0 = vsel %vm573_vm0, %v3093_v5, %v3094_v12  ;;  %v3159_v33 = vsel %vm622_vm1, %v3153_v10, %v3154_v2  ;;  %v3097_v10 = vrot.slane %v14573_v43, 7 }
 0x532   : > { %v14726_v31 = vmax.f32 %v14719_v9, 0.0  ;;  %v14728_v44 = vadd.f32 %v3025_v56, %v2929_v20  ;;  %v3027_v14 = vpop.f32.mrb[79].mxu0  ;;  %10745 = vmatmul.mubr.msk.bf16.gmra.mrb[88].mxu0 %vm1700_vm15, %v3455_v25  ;;  %11396 = vrot.lane.b32.xlu0 %v11395_v58, %s12267_s6 }
 0x534   : > { %v14735_v40 = vmax.f32 %v14728_v44, 0.0  ;;  %v3203_v21 = vrot.slane %v14726_v31, 2  ;;  %v3155_v32 = vrot.slane %v14726_v31, 1 }
 0x536   : > { %v3206_v46 = vsel %vm671_vm2, %v3202_v59, %v3203_v21  ;;  %v3158_v6 = vsel %vm622_vm1, %v3154_v2, %v3155_v32  ;;  %v3204_v57 = vrot.slane %v14735_v40, 2  ;;  %v3108_v25 = vrot.slane %v14735_v40, 7 }
 0x537   : > { %v3458_v45 = vpack.c.bf16 %v3206_v46, %v3207_v38  ;;  %v11405_v20 = vpack.i.bf16 %v3158_v6, %v3159_v33  ;;  %v3156_v61 = vrot.slane %v14735_v40, 1  ;;  %v3096_v59 = vrot.slane %v14564_v18, 7 }
 0x538   : > { %v3205_v58 = vsel %vm671_vm2, %v3203_v21, %v3204_v57  ;;  %v3220_v56 = vsel %vm671_vm2, %v3204_v57, %v3189_v39  ;;  %v3124_v2 = vsel %vm573_vm0, %v3108_v25, %v3093_v5  ;;  %v3095_v33 = vrot.slane %v14539_v17, 7 }
 0x539   : > { %10748 = vmatprep.mubr.msk.bf16.mxu0 %vm1700_vm15, %v3458_v45  ;;  %11406 = vrot.lane.b32.xlu0 %v11405_v20, %s12267_s6  ;;  %v3236_v14 = vsel %vm19273_vm10, 0.0, %v3220_v56  ;;  %v3157_v21 = vsel %vm622_vm1, %v3155_v32, %v3156_v61  ;;  %v3172_v39 = vsel %vm622_vm1, %v3156_v61, %v3141_v29  ;;  %v3125_v46 = vsel %vm19274_vm14, 0.0, %v3124_v2 }
 0x53a   : > { %v3461_v38 = vpack.c.bf16 %v3236_v14, %v3205_v58  ;;  %v3188_v6 = vsel %vm19275_vm12, 0.0, %v3172_v39  ;;  %v11350_v57 = vpack.i.bf16 %v3123_v0, %v3125_v46  ;;  %v3121_v5 = vsel %vm573_vm0, %v3095_v33, %v3096_v59 }
 0x53b   : > { %v11415_v45 = vpack.i.bf16 %v3188_v6, %v3157_v21  ;;  %v3098_v32 = vrot.slane %v14582_v54, 7  ;;  %v3120_v29 = vsel %vm573_vm0, %v3096_v59, %v3097_v10  ;;  %v3122_v20 = vsel %vm573_vm0, %v3094_v12, %v3095_v33 }
 0x53c   : > { %10749 = vmatmul.mubr.msk.bf16.gmra.mrb[92].mxu0 %vm1700_vm15, %v3461_v38  ;;  %11351 = vrot.lane.b32.xlu1 %v11350_v57, %s12267_s6  ;;  %v11360_v61 = vpack.i.bf16 %v3121_v5, %v3122_v20  ;;  %v3129_v58 = vsel %vm448_vm6, 0.0, %v3120_v29  ;;  %v3100_v56 = vrot.slane %v14624_v37, 7  ;;  %v3101_v14 = vrot.slane %v14633_v11, 7 }
 0x53d   : > { %11416 = vrot.lane.b32.xlu0 %v11415_v45, %s12267_s6  ;;  %v3119_v0 = vsel %vm573_vm0, %v3097_v10, %v3098_v32  ;;  %v3099_v2 = vrot.slane %v14603_v51, 7  ;;  %v3102_v12 = vrot.slane %v14642_v35, 7  ;;  %v3104_v33 = vrot.slane %v14684_v34, 7 }
 0x53e   : > { %v11370_v21 = vpack.i.bf16 %v3119_v0, %v3129_v58  ;;  %v3116_v10 = vsel %vm573_vm0, %v3100_v56, %v3101_v14  ;;  %v3105_v57 = vrot.slane %v14693_v30, 7  ;;  %v3103_v45 = vrot.slane %v14663_v16, 7 }
 0x53f   : > { %v3117_v59 = vsel %vm573_vm0, %v3099_v2, %v3100_v56  ;;  %v3118_v39 = vsel %vm573_vm0, %v3098_v32, %v3099_v2  ;;  %v3115_v46 = vsel %vm573_vm0, %v3101_v14, %v3102_v12  ;;  %v3133_v6 = vsel %vm19004_vm9, 0.0, %v3116_v10 }
 0x540   : > { %11361 = vrot.lane.b32.xlu1 %v11360_v61, %s12267_s6  ;;  %v11380_v38 = vpack.i.bf16 %v3117_v59, %v3118_v39  ;;  %v11390_v5 = vpack.i.bf16 %v3115_v46, %v3133_v6  ;;  %v3113_v29 = vsel %vm573_vm0, %v3103_v45, %v3104_v33  ;;  %v3106_v32 = vrot.slane %v14702_v15, 7 }
 0x541   : > { %v3112_v20 = vsel %vm573_vm0, %v3104_v33, %v3105_v57  ;;  %v3114_v61 = vsel %vm573_vm0, %v3102_v12, %v3103_v45  ;;  %vm19276_vm12 = vcmp.lt.s32.totalorder %v19223_v24, 1  ;;  %v3107_v14 = vrot.slane %v14726_v31, 7 }
 0x542   : > { %v11400_v0 = vpack.i.bf16 %v3113_v29, %v3114_v61  ;;  %v3111_v58 = vsel %vm573_vm0, %v3105_v57, %v3106_v32  ;;  %v3137_v56 = vsel %vm19276_vm12, 0.0, %v3112_v20  ;;  %v3045_v45 = vrot.slane %v14533_v63, 6 }
 0x543   : > { %v11410_v2 = vpack.i.bf16 %v3111_v58, %v3137_v56  ;;  %v3110_v59 = vsel %vm573_vm0, %v3106_v32, %v3107_v14  ;;  %v3046_v32 = vrot.slane %v14529_v42, 6  ;;  %vm19277_vm10 = vcmp.lt.s32.totalorder %v12382_v3, 2 }
 0x544   : > { %11371 = vrot.lane.b32.xlu1 %v11370_v21, %s12267_s6  ;;  %v3109_v21 = vsel %vm573_vm0, %v3107_v14, %v3108_v25  ;;  %v3060_v25 = vrot.slane %v14735_v40, 6  ;;  %vm19278_vm14 = vcmp.lt.s32.totalorder %v19213_v27, 2  ;;  %vm19279_vm12 = vcmp.lt.s32.totalorder %v19218_v23, 2 }
 0x545   : > { %v11420_v12 = vpack.i.bf16 %v3109_v21, %v3110_v59  ;;  %v3075_v56 = vsel %vm524_vm13, %v3045_v45, %v3046_v32 }
 0x546   : > { %v3076_v20 = vsel %vm524_vm13, %v3060_v25, %v3045_v45 }
 0x547   : > { %v3077_v14 = vsel %vm19277_vm10, 0.0, %v3076_v20  ;;  %vm19280_vm10 = vcmp.lt.s32.totalorder %v19223_v24, 2 }
 0x548   : > { %11381 = vrot.lane.b32.xlu1 %v11380_v38, %s12267_s6 }
 0x54c   : > { %11391 = vrot.lane.b32.xlu1 %v11390_v5, %s12267_s6 }
 0x550   : > { %11401 = vrot.lane.b32.xlu1 %v11400_v0, %s12267_s6 }
 0x554   : > { %11411 = vrot.lane.b32.xlu1 %v11410_v2, %s12267_s6 }
 0x558   : > { %11421 = vrot.lane.b32.xlu1 %v11420_v12, %s12267_s6 }
 0x57b   : > { %v11347_v10 = vpop.permute.xlu0 %11346 }
 0x57c   : > { %v11349_v39 = vunpack.i.h.bf16 %v11347_v10  ;;  %v11348_v38 = vunpack.i.l.bf16 %v11347_v10 }
 0x57e   : > { %v3381_v46 = vsel %vm1700_vm15, %v14533_v63, %v11348_v38  ;;  %v3382_v6 = vsel %vm1700_vm15, %v14529_v42, %v11349_v39  ;;  %v3047_v39 = vrot.slane %v14539_v17, 6  ;;  %v3048_v38 = vrot.slane %v14564_v18, 6 }
 0x57f   : > { %v3439_v33 = vpack.c.bf16 %v3382_v6, %v3381_v46 }
 0x581   : > { %3642 = vmatprep.mubr.bf16.mxu1 %v3439_v33 }
 0x584   : > { %v11357_v57 = vpop.permute.xlu0 %11356 }
 0x585   : > { %v11359_v5 = vunpack.i.h.bf16 %v11357_v57  ;;  %v11358_v29 = vunpack.i.l.bf16 %v11357_v57 }
 0x587   : > { %v3383_v63 = vsel %vm1700_vm15, %v14539_v17, %v11358_v29  ;;  %v3384_v42 = vsel %vm1700_vm15, %v14564_v18, %v11359_v5  ;;  %v3073_v5 = vsel %vm524_vm13, %v3047_v39, %v3048_v38  ;;  %v3074_v29 = vsel %vm524_vm13, %v3046_v32, %v3047_v39 }
 0x588   : > { %v3442_v33 = vpack.c.bf16 %v3384_v42, %v3383_v63  ;;  %v3049_v17 = vrot.slane %v14573_v43, 6  ;;  %v3050_v63 = vrot.slane %v14582_v54, 6 }
 0x58b   : > { %v11367_v2 = vpop.permute.xlu0 %11366 }
 0x58c   : > { %v11369_v57 = vunpack.i.h.bf16 %v11367_v2  ;;  %v11368_v45 = vunpack.i.l.bf16 %v11367_v2 }
 0x5ae   : > { %v11352_v61 = vpop.permute.xlu1 %11351 }
 0x5af   : > { %v11354_v0 = vunpack.i.h.bf16 %v11352_v61  ;;  %v11353_v58 = vunpack.i.l.bf16 %v11352_v61 }
 0x5b1   : > { %v3365_v21 = vsel %vm1700_vm15, %v3077_v14, %v11353_v58  ;;  %v3366_v59 = vsel %vm1700_vm15, %v3075_v56, %v11354_v0  ;;  %v3385_v0 = vsel %vm1700_vm15, %v14573_v43, %v11368_v45  ;;  %v3386_v58 = vsel %vm1700_vm15, %v14582_v54, %v11369_v57  ;;  %v11377_v56 = vpop.permute.xlu0 %11376 }
 0x5b2   : > { %v3438_v12 = vpack.c.bf16 %v3366_v59, %v3365_v21  ;;  %v11362_v10 = vpop.permute.xlu1 %11361  ;;  %v3445_v32 = vpack.c.bf16 %v3386_v58, %v3385_v0  ;;  %v3072_v21 = vsel %vm524_vm13, %v3048_v38, %v3049_v17  ;;  %v11379_v59 = vunpack.i.h.bf16 %v11377_v56 }
 0x5b3   : > { %v11364_v46 = vunpack.i.h.bf16 %v11362_v10  ;;  %v11363_v6 = vunpack.i.l.bf16 %v11362_v10  ;;  %v3071_v43 = vsel %vm524_vm13, %v3049_v17, %v3050_v63  ;;  %v3081_v10 = vsel %vm19278_vm14, 0.0, %v3072_v21 }
 0x5b4   : > { %3643 = vmatmul.mubr.bf16.vlgmr.msra.gmra.mrb[32].mxu1 %v3438_v12  ;;  %v11378_v12 = vunpack.i.l.bf16 %v11377_v56  ;;  %v3388_v38 = vsel %vm1700_vm15, %v14624_v37, %v11379_v59  ;;  %v3051_v45 = vrot.slane %v14603_v51, 6  ;;  %v3054_v59 = vrot.slane %v14642_v35, 6 }
 0x5b5   : > { %3650 = vmatprep.mubr.bf16.mxu1 %v3442_v33  ;;  %v3367_v20 = vsel %vm1700_vm15, %v3074_v29, %v11363_v6  ;;  %v3368_v61 = vsel %vm1700_vm15, %v3073_v5, %v11364_v46  ;;  %v11387_v33 = vpop.permute.xlu0 %11386  ;;  %v3052_v5 = vrot.slane %v14624_v37, 6  ;;  %vm19283_vm14 = vcmp.ge.s32.totalorder %v12578_v53, 31 }
 0x5b6   : > { %v11372_v18 = vpop.permute.xlu1 %11371  ;;  %v3441_v14 = vpack.c.bf16 %v3368_v61, %v3367_v20  ;;  %v3387_v6 = vsel %vm1700_vm15, %v14603_v51, %v11378_v12  ;;  %v11389_v17 = vunpack.i.h.bf16 %v11387_v33  ;;  %v3070_v58 = vsel %vm524_vm13, %v3050_v63, %v3051_v45 }
 0x5b7   : > { %v11374_v42 = vunpack.i.h.bf16 %v11372_v18  ;;  %v11373_v2 = vunpack.i.l.bf16 %v11372_v18  ;;  %v3448_v61 = vpack.c.bf16 %v3388_v38, %v3387_v6  ;;  %v11388_v18 = vunpack.i.l.bf16 %v11387_v33 }
 0x5b8   : > { %v3069_v0 = vsel %vm524_vm13, %v3051_v45, %v3052_v5  ;;  %v3053_v51 = vrot.slane %v14633_v11, 6 }
 0x5b9   : > { %v3369_v39 = vsel %vm1700_vm15, %v3081_v10, %v11373_v2  ;;  %v3370_v54 = vsel %vm1700_vm15, %v3071_v43, %v11374_v42  ;;  %v3389_v42 = vsel %vm1700_vm15, %v14633_v11, %v11388_v18  ;;  %v3390_v2 = vsel %vm1700_vm15, %v14642_v35, %v11389_v17 }
 0x5ba   : > { %v11382_v46 = vpop.permute.xlu1 %11381  ;;  %v3444_v57 = vpack.c.bf16 %v3370_v54, %v3369_v39  ;;  %v3451_v63 = vpack.c.bf16 %v3390_v2, %v3389_v42  ;;  %v3068_v10 = vsel %vm524_vm13, %v3052_v5, %v3053_v51  ;;  %v3067_v11 = vsel %vm524_vm13, %v3053_v51, %v3054_v59 }
 0x5bb   : > { %v11384_v29 = vunpack.i.h.bf16 %v11382_v46  ;;  %v11383_v20 = vunpack.i.l.bf16 %v11382_v46  ;;  %v3085_v46 = vsel %vm19279_vm12, 0.0, %v3068_v10  ;;  %vm19286_vm12 = vcmp.ge.s32.totalorder %v12690_v13, 31 }
 0x5bc   : > { %3651 = vmatmul.mubr.bf16.gmra.mrb[36].mxu1 %v3441_v14 }
 0x5bd   : > { %3658 = vmatprep.mubr.bf16.mxu1 %v3445_v32  ;;  %v3371_v56 = vsel %vm1700_vm15, %v3070_v58, %v11383_v20  ;;  %v3372_v14 = vsel %vm1700_vm15, %v3069_v0, %v11384_v29  ;;  %v11397_v32 = vpop.permute.xlu0 %11396  ;;  %v3055_v29 = vrot.slane %v14663_v16, 6  ;;  %v3056_v20 = vrot.slane %v14684_v34, 6 }
 0x5be   : > { %v11392_v37 = vpop.permute.xlu1 %11391  ;;  %v3447_v21 = vpack.c.bf16 %v3372_v14, %v3371_v56  ;;  %v11399_v39 = vunpack.i.h.bf16 %v11397_v32  ;;  %v11398_v54 = vunpack.i.l.bf16 %v11397_v32 }
 0x5bf   : > { %v11394_v12 = vunpack.i.h.bf16 %v11392_v37  ;;  %v11393_v43 = vunpack.i.l.bf16 %v11392_v37  ;;  %v3065_v56 = vsel %vm524_vm13, %v3055_v29, %v3056_v20  ;;  %v3066_v14 = vsel %vm524_vm13, %v3054_v59, %v3055_v29 }
 0x5c0   : > { %v3391_v33 = vsel %vm1700_vm15, %v14663_v16, %v11398_v54  ;;  %v3057_v16 = vrot.slane %v14693_v30, 6 }
 0x5c1   : > { %v3373_v6 = vsel %vm1700_vm15, %v3085_v46, %v11393_v43  ;;  %v3374_v35 = vsel %vm1700_vm15, %v3067_v11, %v11394_v12  ;;  %v11407_v45 = vpop.permute.xlu0 %11406  ;;  %v3058_v12 = vrot.slane %v14702_v15, 6 }
 0x5c2   : > { %v11402_v38 = vpop.permute.xlu1 %11401  ;;  %v3450_v5 = vpack.c.bf16 %v3374_v35, %v3373_v6  ;;  %v11409_v0 = vunpack.i.h.bf16 %v11407_v45  ;;  %v11408_v58 = vunpack.i.l.bf16 %v11407_v45  ;;  %v3064_v10 = vsel %vm524_vm13, %v3056_v20, %v3057_v16 }
 0x5c3   : > { %v11403_v17 = vunpack.i.l.bf16 %v11402_v38  ;;  %v3089_v11 = vsel %vm19280_vm10, 0.0, %v3064_v10  ;;  %v12005_v10 = vld [vmem:[#allocation2 + $0x1e8] sm:$0xff]   ;;  %vm19287_vm10 = vcmp.lt.s32.totalorder %v12382_v3, 1 }
 0x5c4   : > { %3659 = vmatmul.mubr.bf16.gmra.mrb[40].mxu1 %v3444_v57  ;;  %v3392_v57 = vsel %vm1700_vm15, %v14684_v34, %v11399_v39  ;;  %v3393_v42 = vsel %vm1700_vm15, %v14693_v30, %v11408_v58  ;;  %v3394_v2 = vsel %vm1700_vm15, %v14702_v15, %v11409_v0  ;;  %v3063_v30 = vsel %vm524_vm13, %v3057_v16, %v3058_v12 }
 0x5c5   : > { %3666 = vmatprep.mubr.bf16.mxu1 %v3448_v61  ;;  %v11404_v61 = vunpack.i.h.bf16 %v11402_v38  ;;  %v3454_v18 = vpack.c.bf16 %v3392_v57, %v3391_v33  ;;  %v3375_v51 = vsel %vm1700_vm15, %v3066_v14, %v11403_v17  ;;  %v11417_v32 = vpop.permute.xlu0 %11416  ;;  %v3457_v59 = vpack.c.bf16 %v3394_v2, %v3393_v42 }
 0x5c6   : > { %v11412_v34 = vpop.permute.xlu1 %11411  ;;  %v11419_v39 = vunpack.i.h.bf16 %v11417_v32  ;;  %v11418_v54 = vunpack.i.l.bf16 %v11417_v32  ;;  %v3059_v57 = vrot.slane %v14726_v31, 6 }
 0x5c7   : > { %v3376_v37 = vsel %vm1700_vm15, %v3065_v56, %v11404_v61  ;;  %v11414_v43 = vunpack.i.h.bf16 %v11412_v34 }
 0x5c8   : > { %v3395_v35 = vsel %vm1700_vm15, %v14726_v31, %v11418_v54  ;;  %v3396_v38 = vsel %vm1700_vm15, %v14735_v40, %v11419_v39  ;;  %v3062_v0 = vsel %vm524_vm13, %v3058_v12, %v3059_v57  ;;  %v12006_v39 = vld [vmem:[#allocation2 + $0x1f0] sm:$0xff]   ;;  %v12007_v54 = vld [vmem:[#allocation2 + $0x1f8] sm:$0xff]  }
 0x5c9   : > { %v3378_v15 = vsel %vm1700_vm15, %v3063_v30, %v11414_v43  ;;  %v3460_v29 = vpack.c.bf16 %v3396_v38, %v3395_v35  ;;  %v12008_v30 = vld [vmem:[#allocation2 + $0x200] sm:$0xff]   ;;  %v12013_v35 = vld [vmem:[#allocation2 + $0x228] sm:$0xff]  }
 0x5ca   : > { %v11422_v6 = vpop.permute.xlu1 %11421 }
 0x5cb   : > { %v11424_v45 = vunpack.i.h.bf16 %v11422_v6 }
 0x5cc   : > { %3667 = vmatmul.mubr.bf16.gmra.mrb[44].mxu1 %v3447_v21  ;;  %v3453_v21 = vpack.c.bf16 %v3376_v37, %v3375_v51 }
 0x5cd   : > { %3674 = vmatprep.mubr.bf16.mxu1 %v3451_v63  ;;  %v11413_v63 = vunpack.i.l.bf16 %v11412_v34 }
 0x5cf   : > { %v3377_v46 = vsel %vm1700_vm15, %v3089_v11, %v11413_v63  ;;  %v12003_v63 = vld [vmem:[#allocation2 + $0x1d8] sm:$0xff]   ;;  %v12009_v11 = vld [vmem:[#allocation2 + $0x208] sm:$0xff]  }
 0x5d0   : > { %v3456_v33 = vpack.c.bf16 %v3378_v15, %v3377_v46  ;;  %4138 = vmatpush1.bf16.msra.mxu1 %v12003_v63  ;;  %v12010_v46 = vld [vmem:[#allocation2 + $0x210] sm:$0xff]   ;;  %v12011_v15 = vld [vmem:[#allocation2 + $0x218] sm:$0xff]  }
 0x5d1   : > { %4139 = vmatprep.subr.bf16.mxu1 %v19189_v36 }
 0x5d4   : > { %3675 = vmatmul.mubr.bf16.gmra.mrb[48].mxu1 %v3450_v5  ;;  %v11423_v5 = vunpack.i.l.bf16 %v11422_v6  ;;  %v12012_v6 = vld [vmem:[#allocation2 + $0x220] sm:$0xff]  }
 0x5d5   : > { %3682 = vmatprep.mubr.bf16.mxu1 %v3454_v18  ;;  %v3061_v18 = vsel %vm524_vm13, %v3059_v57, %v3060_v25 }
 0x5d6   : > { %v3379_v58 = vsel %vm1700_vm15, %v3062_v0, %v11423_v5  ;;  %v3380_v56 = vsel %vm1700_vm15, %v3061_v18, %v11424_v45 }
 0x5d7   : > { %v3459_v14 = vpack.c.bf16 %v3380_v56, %v3379_v58  ;;  %v12014_v58 = vld [vmem:[#allocation2 + $0x230] sm:$0xff]  }
 0x5dc   : > { %3683 = vmatmul.mubr.bf16.gmra.mrb[52].mxu1 %v3453_v21 }
 0x5dd   : > { %3690 = vmatprep.mubr.bf16.mxu1 %v3457_v59  ;;  %v12004_v59 = vld [vmem:[#allocation2 + $0x1e0] sm:$0xff]  }
 0x5de   : > { %4140 = vmatpush1.bf16.msra.mxu1 %v12004_v59 }
 0x5df   : > { %4141 = vmatprep.subr.bf16.mxu1 %v19189_v36 }
 0x5e2   : > { %4142 = vmatpush1.bf16.msra.mxu1 %v12005_v10 }
 0x5e3   : > { %4143 = vmatprep.subr.bf16.mxu1 %v19189_v36 }
 0x5e4   : > { %3691 = vmatmul.mubr.bf16.gmra.mrb[56].mxu1 %v3456_v33  ;;  %v14985_v33 = vld [vmem:[%s18924_s2 + $0x3] ss:$0 sm:$0xff] }
 0x5e5   : > { %v14931_v20 = vpop.f32.mrb[80].mxu0  ;;  %3698 = vmatprep.mubr.bf16.mxu1 %v3460_v29 }
 0x5e6   : > { %v14933_v61 = vpop.f32.mrb[81].mxu0  ;;  %4144 = vmatpush1.bf16.msra.mxu1 %v12006_v39 }
 0x5e7   : > { %v14935_v17 = vpop.f32.mrb[82].mxu0  ;;  %4145 = vmatprep.subr.bf16.mxu1 %v19189_v36 }
 0x5e8   : > { %v14943_v31 = vpop.f32.mrb[83].mxu0 }
 0x5ea   : > { %4146 = vmatpush1.bf16.msra.mxu1 %v12007_v54 }
 0x5eb   : > { %4147 = vmatprep.subr.bf16.mxu1 %v19189_v36 }
 0x5ec   : > { %3699 = vmatmul.mubr.bf16.gmra.mrb[60].mxu1 %v3459_v14 }
 0x5ee   : > { %4148 = vmatpush1.bf16.msra.mxu1 %v12008_v30 }
 0x5ef   : > { %4149 = vmatprep.subr.bf16.mxu1 %v19189_v36 }
 0x5f2   : > { %4150 = vmatpush1.bf16.msra.mxu1 %v12009_v11 }
 0x5f3   : > { %4151 = vmatprep.subr.bf16.mxu1 %v19189_v36 }
 0x5f5   : > { %v14947_v51 = vpop.f32.mrb[84].mxu0 }
 0x5f6   : > { %v14949_v37 = vpop.f32.mrb[85].mxu0  ;;  %4152 = vmatpush1.bf16.msra.mxu1 %v12010_v46 }
 0x5f7   : > { %v14951_v16 = vpop.f32.mrb[86].mxu0  ;;  %4153 = vmatprep.subr.bf16.mxu1 %v19189_v36 }
 0x5f8   : > { %v14953_v40 = vpop.f32.mrb[87].mxu0 }
 0x5fa   : > { %4154 = vmatpush1.bf16.msra.mxu1 %v12011_v15 }
 0x5fb   : > { %4155 = vmatprep.subr.bf16.mxu1 %v19189_v36 }
 0x5fe   : > { %4156 = vmatpush1.bf16.msra.mxu1 %v12012_v6 }
 0x5ff   : > { %4157 = vmatprep.subr.bf16.mxu1 %v19189_v36 }
 0x602   : > { %4158 = vmatpush1.bf16.msra.mxu1 %v12013_v35 }
 0x603   : > { %4159 = vmatprep.subr.bf16.mxu1 %v19189_v36 }
 0x605   : > { %v14955_v25 = vpop.f32.mrb[88].mxu0 }
 0x606   : > { %v14957_v34 = vpop.f32.mrb[89].mxu0  ;;  %4160 = vmatpush1.bf16.msra.mxu1 %v12014_v58 }
 0x607   : > { %v14959_v42 = vpop.f32.mrb[90].mxu0 }
 0x608   : > { %v14961_v2 = vpop.f32.mrb[91].mxu0 }
 0x60f   : > { %v14963_v32 = vpop.f32.mrb[92].mxu0 }
 0x610   : > { %v14965_v21 = vpop.f32.mrb[93].mxu0 }
 0x611   : > { %v14967_v12 = vpop.f32.mrb[94].mxu0 }
 0x612   : > { %v14969_v43 = vpop.f32.mrb[95].mxu0 }
 0x687   : > { %v10344_v38 = vpop.f32.mrb[32].mxu1 }
 0x688   : > { %v10345_v57 = vpop.f32.mrb[33].mxu1 }
 0x689   : > { %v10346_v45 = vadd.f32 %v10345_v57, %v10344_v38  ;;  %v10347_v5 = vpop.f32.mrb[34].mxu1 }
 0x68a   : > { %v10348_v29 = vpop.f32.mrb[35].mxu1 }
 0x68b   : > { %v3645_v18 = vadd.f32 %v10346_v45, %v14985_v33  ;;  %v10349_v0 = vadd.f32 %v10348_v29, %v10347_v5 }
 0x68d   : > { %v3742_v56 = vadd.f32 %v14933_v61, %v3645_v18  ;;  %v3648_v14 = vadd.f32 %v10349_v0, %v14985_v33 }
 0x68f   : > { %v14990_v63 = vmax.f32 %v3742_v56, 0.0  ;;  %v3745_v59 = vadd.f32 %v14943_v31, %v3648_v14  ;;  %v10350_v10 = vpop.f32.mrb[36].mxu1 }
 0x690   : > { %v10351_v39 = vpop.f32.mrb[37].mxu1 }
 0x691   : > { %v3805_v54 = vmax.f32 %v3745_v59, 0.0  ;;  %v10352_v30 = vadd.f32 %v10351_v39, %v10350_v10  ;;  %v10353_v11 = vpop.f32.mrb[38].mxu1  ;;  %v18996_v46 = vrot.slane %v14990_v63, 7  ;;  %v18995_v15 = vrot.slane %v14990_v63, 1 }
 0x692   : > { %v10354_v6 = vpop.f32.mrb[39].mxu1 }
 0x693   : > { %v3821_v35 = vrot.slane %v3805_v54, 7  ;;  %v3869_v38 = vrot.slane %v3805_v54, 1  ;;  %v3653_v61 = vadd.f32 %v10352_v30, %v14985_v33  ;;  %v10355_v57 = vadd.f32 %v10354_v6, %v10353_v11 }
 0x694   : > { %v11425_v45 = vpack.i.bf16 %v3805_v54, %v14990_v63 }
 0x695   : > { %v3750_v5 = vadd.f32 %v14931_v20, %v3653_v61  ;;  %v3656_v31 = vadd.f32 %v10355_v57, %v14985_v33  ;;  %v3898_v29 = vsel %vm622_vm1, %v18995_v15, %v3869_v38  ;;  %v15007_v18 = vsel %vm573_vm0, %v18996_v46, %v3821_v35 }
 0x696   : > { %11426 = vrot.lane.b32.xlu0 %v11425_v45, %s12267_s6 }
 0x697   : > { %v3806_v0 = vmax.f32 %v3750_v5, 0.0  ;;  %v3753_v58 = vadd.f32 %v14935_v17, %v3656_v31  ;;  %v10356_v56 = vpop.f32.mrb[40].mxu1 }
 0x698   : > { %v10357_v20 = vpop.f32.mrb[41].mxu1 }
 0x699   : > { %v3822_v14 = vrot.slane %v3806_v0, 7  ;;  %v3870_v59 = vrot.slane %v3806_v0, 1  ;;  %v3807_v10 = vmax.f32 %v3753_v58, 0.0  ;;  %v10358_v39 = vadd.f32 %v10357_v20, %v10356_v56  ;;  %v10359_v54 = vpop.f32.mrb[42].mxu1 }
 0x69a   : > { %v10360_v30 = vpop.f32.mrb[43].mxu1 }
 0x69b   : > { %v3823_v11 = vrot.slane %v3807_v10, 7  ;;  %v3871_v6 = vrot.slane %v3807_v10, 1  ;;  %v3661_v61 = vadd.f32 %v10358_v39, %v14985_v33  ;;  %v10361_v57 = vadd.f32 %v10360_v30, %v10359_v54 }
 0x69c   : > { %v11430_v15 = vpack.i.bf16 %v3807_v10, %v3806_v0  ;;  %v3897_v45 = vsel %vm622_vm1, %v3869_v38, %v3870_v59  ;;  %v15016_v17 = vsel %vm573_vm0, %v3821_v35, %v3822_v14 }
 0x69d   : > { %v3758_v5 = vadd.f32 %v14949_v37, %v3661_v61  ;;  %v3664_v31 = vadd.f32 %v10361_v57, %v14985_v33  ;;  %v4022_v58 = vpack.c.bf16 %v3897_v45, %v3898_v29  ;;  %v15022_v56 = vsel %vm622_vm1, %v3870_v59, %v3871_v6 }
 0x69e   : > { %11431 = vrot.lane.b32.xlu1 %v11430_v15, %s12267_s6  ;;  %v15027_v0 = vsel %vm573_vm0, %v3822_v14, %v3823_v11 }
 0x69f   : > { %v3808_v38 = vmax.f32 %v3758_v5, 0.0  ;;  %v3761_v20 = vadd.f32 %v14953_v40, %v3664_v31  ;;  %10036 = vmatprep.mubr.msk.bf16.mxu1 %vm1700_vm15, %v4022_v58  ;;  %v10362_v35 = vpop.f32.mrb[44].mxu1 }
 0x6a0   : > { %v10363_v37 = vpop.f32.mrb[45].mxu1 }
 0x6a1   : > { %v3824_v10 = vrot.slane %v3808_v38, 7  ;;  %v3872_v39 = vrot.slane %v3808_v38, 1  ;;  %v3809_v29 = vmax.f32 %v3761_v20, 0.0  ;;  %v10364_v54 = vadd.f32 %v10363_v37, %v10362_v35  ;;  %v10365_v30 = vpop.f32.mrb[46].mxu1 }
 0x6a2   : > { %v10366_v59 = vpop.f32.mrb[47].mxu1 }
 0x6a3   : > { %v3825_v61 = vrot.slane %v3809_v29, 7  ;;  %v3873_v57 = vrot.slane %v3809_v29, 1  ;;  %v3669_v15 = vadd.f32 %v10364_v54, %v14985_v33  ;;  %v10367_v45 = vadd.f32 %v10366_v59, %v10365_v30 }
 0x6a4   : > { %v11435_v14 = vpack.i.bf16 %v3809_v29, %v3808_v38  ;;  %v3895_v5 = vsel %vm622_vm1, %v3871_v6, %v3872_v39  ;;  %v15036_v40 = vsel %vm573_vm0, %v3823_v11, %v3824_v10 }
 0x6a5   : > { %v3766_v31 = vadd.f32 %v14947_v51, %v3669_v15  ;;  %v3672_v58 = vadd.f32 %v10367_v45, %v14985_v33  ;;  %v15042_v20 = vsel %vm431_vm4, 0.0, %v3895_v5  ;;  %v15046_v35 = vsel %vm622_vm1, %v3872_v39, %v3873_v57 }
 0x6a6   : > { %11436 = vrot.lane.b32.xlu0 %v11435_v14, %s12267_s6  ;;  %v15053_v11 = vsel %vm573_vm0, %v3824_v10, %v3825_v61 }
 0x6a7   : > { %v3810_v51 = vmax.f32 %v3766_v31, 0.0  ;;  %v3769_v38 = vadd.f32 %v14951_v16, %v3672_v58  ;;  %v10368_v37 = vpop.f32.mrb[48].mxu1 }
 0x6a8   : > { %v10369_v29 = vpop.f32.mrb[49].mxu1 }
 0x6a9   : > { %v3826_v54 = vrot.slane %v3810_v51, 7  ;;  %v3874_v30 = vrot.slane %v3810_v51, 1  ;;  %v3811_v59 = vmax.f32 %v3769_v38, 0.0  ;;  %v10370_v15 = vadd.f32 %v10369_v29, %v10368_v37  ;;  %v10371_v39 = vpop.f32.mrb[50].mxu1 }
 0x6aa   : > { %v10372_v45 = vpop.f32.mrb[51].mxu1 }
 0x6ab   : > { %v3827_v5 = vrot.slane %v3811_v59, 7  ;;  %v3875_v14 = vrot.slane %v3811_v59, 1  ;;  %v3677_v46 = vadd.f32 %v10370_v15, %v14985_v33  ;;  %v10373_v6 = vadd.f32 %v10372_v45, %v10371_v39 }
 0x6ac   : > { %v11440_v26 = vpack.i.bf16 %v3811_v59, %v3810_v51  ;;  %v15059_v10 = vsel %vm622_vm1, %v3873_v57, %v3874_v30  ;;  %v15063_v16 = vsel %vm573_vm0, %v3825_v61, %v3826_v54 }
 0x6ad   : > { %v3774_v31 = vadd.f32 %v14957_v34, %v3677_v46  ;;  %v3680_v58 = vadd.f32 %v10373_v6, %v14985_v33  ;;  %v15071_v37 = vsel %vm622_vm1, %v3874_v30, %v3875_v14  ;;  %v15076_v57 = vsel %vm573_vm0, %v3826_v54, %v3827_v5 }
 0x6ae   : > { %11441 = vrot.lane.b32.xlu1 %v11440_v26, %s12267_s6 }
 0x6af   : > { %v3812_v51 = vmax.f32 %v3774_v31, 0.0  ;;  %v3777_v61 = vadd.f32 %v14961_v2, %v3680_v58  ;;  %v10374_v29 = vpop.f32.mrb[52].mxu1 }
 0x6b0   : > { %v10375_v34 = vpop.f32.mrb[53].mxu1 }
 0x6b1   : > { %v3828_v46 = vrot.slane %v3812_v51, 7  ;;  %v3876_v6 = vrot.slane %v3812_v51, 1  ;;  %v3813_v59 = vmax.f32 %v3777_v61, 0.0  ;;  %v10376_v15 = vadd.f32 %v10375_v34, %v10374_v29  ;;  %v10377_v39 = vpop.f32.mrb[54].mxu1 }
 0x6b2   : > { %v10378_v45 = vpop.f32.mrb[55].mxu1 }
 0x6b3   : > { %v3829_v38 = vrot.slane %v3813_v59, 7  ;;  %v3877_v30 = vrot.slane %v3813_v59, 1  ;;  %v3685_v36 = vadd.f32 %v10376_v15, %v14985_v33  ;;  %v10379_v26 = vadd.f32 %v10378_v45, %v10377_v39 }
 0x6b4   : > { %v11445_v24 = vpack.i.bf16 %v3813_v59, %v3812_v51  ;;  %v3891_v54 = vsel %vm622_vm1, %v3875_v14, %v3876_v6  ;;  %v15084_v2 = vsel %vm573_vm0, %v3827_v5, %v3828_v46 }
 0x6b5   : > { %v3782_v31 = vadd.f32 %v14955_v25, %v3685_v36  ;;  %v3688_v58 = vadd.f32 %v10379_v26, %v14985_v33  ;;  %v15090_v61 = vsel %vm19003_vm7, 0.0, %v3891_v54  ;;  %v15094_v29 = vsel %vm622_vm1, %v3876_v6, %v3877_v30 }
 0x6b6   : > { %11446 = vrot.lane.b32.xlu0 %v11445_v24, %s12267_s6  ;;  %v15101_v5 = vsel %vm573_vm0, %v3828_v46, %v3829_v38  ;;  %vm19297_vm7 = vcmask 1041408  }
 0x6b7   : > { %19281 = vst [vmem:[#allocation11_spill] sm:$0xff] %v15101_v5  ;;  %v3814_v36 = vmax.f32 %v3782_v31, 0.0  ;;  %v3785_v25 = vadd.f32 %v14959_v42, %v3688_v58  ;;  %v10380_v51 = vpop.f32.mrb[56].mxu1 }
 0x6b8   : > { %v10381_v34 = vpop.f32.mrb[57].mxu1 }
 0x6b9   : > { %v3830_v59 = vrot.slane %v3814_v36, 7  ;;  %v3878_v15 = vrot.slane %v3814_v36, 1  ;;  %v3815_v39 = vmax.f32 %v3785_v25, 0.0  ;;  %v10382_v45 = vadd.f32 %v10381_v34, %v10380_v51  ;;  %v10383_v6 = vpop.f32.mrb[58].mxu1 }
 0x6ba   : > { %v10384_v26 = vpop.f32.mrb[59].mxu1 }
 0x6bb   : > { %v3831_v54 = vrot.slane %v3815_v39, 7  ;;  %v3879_v24 = vrot.slane %v3815_v39, 1  ;;  %v3693_v41 = vadd.f32 %v10382_v45, %v14985_v33  ;;  %v10385_v14 = vadd.f32 %v10384_v26, %v10383_v6 }
 0x6bc   : > { %v11450_v23 = vpack.i.bf16 %v3815_v39, %v3814_v36  ;;  %v15107_v46 = vsel %vm622_vm1, %v3877_v30, %v3878_v15  ;;  %v15111_v42 = vsel %vm573_vm0, %v3829_v38, %v3830_v59 }
 0x6bd   : > { %19282 = vst [vmem:[#allocation24_spill] sm:$0xff] %v15111_v42  ;;  %v3790_v31 = vadd.f32 %v14965_v21, %v3693_v41  ;;  %v3696_v58 = vadd.f32 %v10385_v14, %v14985_v33  ;;  %v15119_v51 = vsel %vm622_vm1, %v3878_v15, %v3879_v24  ;;  %v15124_v30 = vsel %vm573_vm0, %v3830_v59, %v3831_v54 }
 0x6be   : > { %11451 = vrot.lane.b32.xlu1 %v11450_v23, %s12267_s6 }
 0x6bf   : > { %v3816_v36 = vmax.f32 %v3790_v31, 0.0  ;;  %v3793_v38 = vadd.f32 %v14969_v43, %v3696_v58  ;;  %v10386_v34 = vpop.f32.mrb[60].mxu1 }
 0x6c0   : > { %v10387_v41 = vpop.f32.mrb[61].mxu1 }
 0x6c1   : > { %v3832_v21 = vrot.slane %v3816_v36, 7  ;;  %v3880_v14 = vrot.slane %v3816_v36, 1  ;;  %v3817_v39 = vmax.f32 %v3793_v38, 0.0  ;;  %v10388_v45 = vadd.f32 %v10387_v41, %v10386_v34  ;;  %v10389_v6 = vpop.f32.mrb[62].mxu1 }
 0x6c2   : > { %v10390_v26 = vpop.f32.mrb[63].mxu1 }
 0x6c3   : > { %v3833_v25 = vrot.slane %v3817_v39, 7  ;;  %v3881_v15 = vrot.slane %v3817_v39, 1  ;;  %v3701_v42 = vadd.f32 %v10388_v45, %v14985_v33  ;;  %v10391_v23 = vadd.f32 %v10390_v26, %v10389_v6 }
 0x6c4   : > { %v11455_v5 = vpack.i.bf16 %v3817_v39, %v3816_v36  ;;  %v3887_v59 = vsel %vm622_vm1, %v3879_v24, %v3880_v14  ;;  %v15132_v43 = vsel %vm573_vm0, %v3831_v54, %v3832_v21 }
 0x6c5   : > { %v3798_v31 = vadd.f32 %v14963_v32, %v3701_v42  ;;  %v3704_v58 = vadd.f32 %v10391_v23, %v14985_v33  ;;  %v15138_v38 = vsel %vm19283_vm14, 0.0, %v3887_v59  ;;  %v15142_v34 = vsel %vm622_vm1, %v3880_v14, %v3881_v15 }
 0x6c6   : > { %11456 = vrot.lane.b32.xlu0 %v11455_v5, %s12267_s6  ;;  %v4032_v24 = vpack.c.bf16 %v15138_v38, %v15119_v51  ;;  %v15149_v54 = vsel %vm573_vm0, %v3832_v21, %v3833_v25 }
 0x6c7   : > { %v3818_v32 = vmax.f32 %v3798_v31, 0.0  ;;  %v3801_v33 = vadd.f32 %v14967_v12, %v3704_v58  ;;  %v19284_v12 = vrot.slane %v14990_v63, 7 }
 0x6c9   : > { %v3834_v42 = vrot.slane %v3818_v32, 7  ;;  %v3882_v36 = vrot.slane %v3818_v32, 1  ;;  %v3819_v41 = vmax.f32 %v3801_v33, 0.0 }
 0x6ca   : > { %4502 = vrot.lane.b32.xlu0 %v14523_v7, %s12267_s6 }
 0x6cb   : > { %v3835_v14 = vrot.slane %v3819_v41, 7  ;;  %v3883_v39 = vrot.slane %v3819_v41, 1  ;;  %v11460_v45 = vpack.i.bf16 %v3819_v41, %v3818_v32  ;;  %v15156_v5 = vsel %vm622_vm1, %v3881_v15, %v3882_v36 }
 0x6cc   : > { %v4034_v21 = vpack.c.bf16 %v15156_v5, %v15142_v34  ;;  %v15162_v6 = vsel %vm573_vm0, %v3833_v25, %v3834_v42  ;;  %v19285_v15 = vrot.slane %v14990_v63, 1  ;;  %v19290_v32 = vpack.c.bf16 %v15090_v61, %v15071_v37 }
 0x6cd   : > { %11461 = vrot.lane.b32.xlu1 %v11460_v45, %s12267_s6  ;;  %v3851_v7 = vsel %vm573_vm0, %v3835_v14, %v19284_v12  ;;  %v15171_v26 = vsel %vm622_vm1, %v3882_v36, %v3883_v39  ;;  %v15179_v25 = vsel %vm573_vm0, %v3834_v42, %v3835_v14  ;;  %v19292_v14 = vld [vmem:[#allocation13_spill] sm:$0xff] }
 0x6ce   : > { %v3899_v23 = vsel %vm622_vm1, %v3883_v39, %v19285_v15  ;;  %4504 = vrot.lane.b32.xlu0 %v14526_v60, %s12267_s6  ;;  %v3860_v39 = vsel %vm19004_vm9, 0.0, %v15084_v2  ;;  %v19294_v15 = vld [vmem:[#allocation24_spill] sm:$0xff]  ;;  %vm19298_vm9 = vcmask 1042432  }
 0x6cf   : > { %v15185_v59 = vsel %vm19286_vm12, 0.0, %v3899_v23  ;;  %vm12272_vm12 = vmmov 0  }
 0x6d0   : > { %v4036_v31 = vpack.c.bf16 %v15185_v59, %v15171_v26  ;;  %v12016_v26 = vld [vmem:[#allocation2 + $0x240] sm:$0xff]   ;;  %v12017_v59 = vld [vmem:[#allocation2 + $0x248] sm:$0xff]  }
 0x6d1   : > { %4532 = vrot.lane.b32.xlu1 %v14728_v44, %s12267_s6  ;;  %v19289_v44 = vpack.c.bf16 %v15059_v10, %v15046_v35 }
 0x6d2   : > { %4508 = vrot.lane.b32.xlu0 %v14541_v50, %s12267_s6 }
 0x6d5   : > { %4506 = vrot.lane.b32.xlu1 %v14535_v48, %s12267_s6 }
 0x6d6   : > { %4512 = vrot.lane.b32.xlu0 %v14575_v4, %s12267_s6 }
 0x6d9   : > { %4510 = vrot.lane.b32.xlu1 %v14566_v49, %s12267_s6  ;;  %v3852_v49 = vsel %vm19287_vm10, 0.0, %v3851_v7  ;;  %vm4307_vm10 = vcmask 1040384  }
 0x6da   : > { %4516 = vrot.lane.b32.xlu0 %v14605_v19, %s12267_s6 }
 0x6dd   : > { %4514 = vrot.lane.b32.xlu1 %v14598_v22, %s12267_s6 }
 0x6de   : > { %4520 = vrot.lane.b32.xlu0 %v14635_v52, %s12267_s6 }
 0x6e1   : > { %4518 = vrot.lane.b32.xlu1 %v14626_v8, %s12267_s6  ;;  %v19288_v8 = vpack.c.bf16 %v15042_v20, %v15022_v56  ;;  %v3856_v20 = vsel %vm448_vm6, 0.0, %v15036_v40 }
 0x6e2   : > { %4524 = vrot.lane.b32.xlu0 %v14665_v28, %s12267_s6 }
 0x6e5   : > { %4522 = vrot.lane.b32.xlu1 %v14658_v47, %s12267_s6 }
 0x6e6   : > { %4528 = vrot.lane.b32.xlu0 %v14695_v62, %s12267_s6 }
 0x6e9   : > { %4526 = vrot.lane.b32.xlu1 %v14686_v55, %s12267_s6 }
 0x6ed   : > { %4530 = vrot.lane.b32.xlu1 %v14719_v9, %s12267_s6 }
 0x708   : > { %v11427_v60 = vpop.permute.xlu0 %11426 }
 0x709   : > { %v11429_v48 = vunpack.i.h.bf16 %v11427_v60  ;;  %v11428_v50 = vunpack.i.l.bf16 %v11427_v60 }
 0x70b   : > { %v3980_v4 = vsel %vm1700_vm15, %v3852_v49, %v11428_v50  ;;  %v3981_v22 = vsel %vm1700_vm15, %v15007_v18, %v11429_v48 }
 0x70c   : > { %v4021_v19 = vpack.c.bf16 %v3981_v22, %v3980_v4 }
 0x70e   : > { %4170 = vmatmul.mubr.bf16.vlgmr.msra.gmra.mrb[64].mxu1 %v4021_v19 }
 0x70f   : > { %10037 = vmatprep.mubr.msk.bf16.mxu1 %vm1700_vm15, %v19288_v8  ;;  %v12015_v8 = vld [vmem:[#allocation2 + $0x238] sm:$0xff]  }
 0x710   : > { %v11432_v52 = vpop.permute.xlu1 %11431 }
 0x711   : > { %v11434_v47 = vunpack.i.h.bf16 %v11432_v52  ;;  %v11433_v28 = vunpack.i.l.bf16 %v11432_v52 }
 0x713   : > { %v3982_v55 = vsel %vm1700_vm15, %v15016_v17, %v11433_v28  ;;  %v3983_v62 = vsel %vm1700_vm15, %v15027_v0, %v11434_v47 }
 0x714   : > { %v4023_v9 = vpack.c.bf16 %v3983_v62, %v3982_v55 }
 0x716   : > { %4178 = vmatmul.mubr.bf16.gmra.mrb[68].mxu1 %v4023_v9 }
 0x717   : > { %10038 = vmatprep.mubr.msk.bf16.mxu1 %vm1700_vm15, %v19289_v44 }
 0x718   : > { %v11437_v63 = vpop.permute.xlu0 %11436 }
 0x719   : > { %v11439_v18 = vunpack.i.h.bf16 %v11437_v63  ;;  %v11438_v56 = vunpack.i.l.bf16 %v11437_v63 }
 0x71b   : > { %v3984_v58 = vsel %vm1700_vm15, %v3856_v20, %v11438_v56  ;;  %v3985_v17 = vsel %vm1700_vm15, %v15053_v11, %v11439_v18  ;;  %v19291_v11 = vpack.c.bf16 %v15107_v46, %v15094_v29 }
 0x71c   : > { %v4025_v0 = vpack.c.bf16 %v3985_v17, %v3984_v58 }
 0x71e   : > { %4186 = vmatmul.mubr.bf16.gmra.mrb[72].mxu1 %v4025_v0 }
 0x71f   : > { %10039 = vmatprep.mubr.msk.bf16.mxu1 %vm1700_vm15, %v19290_v32  ;;  %v15294_v32 = vld [vmem:[%s18924_s2 + $0x4] ss:$0 sm:$0xff] }
 0x720   : > { %v11442_v35 = vpop.permute.xlu1 %11441 }
 0x721   : > { %v11444_v10 = vunpack.i.h.bf16 %v11442_v35  ;;  %v11443_v33 = vunpack.i.l.bf16 %v11442_v35 }
 0x723   : > { %v3986_v42 = vsel %vm1700_vm15, %v15063_v16, %v11443_v33  ;;  %v3987_v40 = vsel %vm1700_vm15, %v15076_v57, %v11444_v10  ;;  %v19293_v16 = vld [vmem:[#allocation11_spill] sm:$0xff] }
 0x724   : > { %v4027_v36 = vpack.c.bf16 %v3987_v40, %v3986_v42 }
 0x726   : > { %4194 = vmatmul.mubr.bf16.gmra.mrb[76].mxu1 %v4027_v36 }
 0x727   : > { %10040 = vmatprep.mubr.msk.bf16.mxu1 %vm1700_vm15, %v19291_v11 }
 0x728   : > { %v11447_v41 = vpop.permute.xlu0 %11446 }
 0x729   : > { %v11449_v37 = vunpack.i.h.bf16 %v11447_v41  ;;  %v11448_v61 = vunpack.i.l.bf16 %v11447_v41 }
 0x72b   : > { %v3988_v45 = vsel %vm1700_vm15, %v3860_v39, %v11448_v61  ;;  %v3989_v12 = vsel %vm1700_vm15, %v19293_v16, %v11449_v37 }
 0x72c   : > { %v4029_v57 = vpack.c.bf16 %v3989_v12, %v3988_v45 }
 0x72e   : > { %4202 = vmatmul.mubr.bf16.gmra.mrb[80].mxu1 %v4029_v57 }
 0x72f   : > { %10041 = vmatprep.mubr.msk.bf16.mxu1 %vm1700_vm15, %v4032_v24  ;;  %v19295_v24 = vld [vmem:[#allocation15_spill] sm:$0xff] }
 0x730   : > { %v11452_v29 = vpop.permute.xlu1 %11451  ;;  %vm19296_vm14 = vcmp.lt.s32.totalorder %v19295_v24, 1 }
 0x731   : > { %v11454_v46 = vunpack.i.h.bf16 %v11452_v29  ;;  %v11453_v7 = vunpack.i.l.bf16 %v11452_v29  ;;  %v3864_v50 = vsel %vm19296_vm14, 0.0, %v15132_v43  ;;  %vm4404_vm14 = vcmask 1043456  }
 0x733   : > { %v3990_v23 = vsel %vm1700_vm15, %v19294_v15, %v11453_v7  ;;  %v3991_v2 = vsel %vm1700_vm15, %v15124_v30, %v11454_v46 }
 0x734   : > { %v4031_v60 = vpack.c.bf16 %v3991_v2, %v3990_v23 }
 0x736   : > { %4210 = vmatmul.mubr.bf16.gmra.mrb[84].mxu1 %v4031_v60 }
 0x737   : > { %10042 = vmatprep.mubr.msk.bf16.mxu1 %vm1700_vm15, %v4034_v21 }
 0x738   : > { %v11457_v48 = vpop.permute.xlu0 %11456 }
 0x739   : > { %v11459_v51 = vunpack.i.h.bf16 %v11457_v48  ;;  %v11458_v38 = vunpack.i.l.bf16 %v11457_v48 }
 0x73b   : > { %v3992_v49 = vsel %vm1700_vm15, %v3864_v50, %v11458_v38  ;;  %v3993_v4 = vsel %vm1700_vm15, %v15149_v54, %v11459_v51  ;;  %v19005_v54 = vmov 0.0  }
 0x73c   : > { %v4033_v30 = vpack.c.bf16 %v3993_v4, %v3992_v49  ;;  %10752 = vmatprep.subr.bf16.mxu0 %v19005_v54  ;;  %10760 = vmatprep.mubr.msk.bf16.mxu0 %vm12272_vm12, %v19005_v54 }
 0x73d   : > { %10753 = vmatpush3.bf16.msra.mxu0 %v12015_v8 }
 0x73e   : > { %4218 = vmatmul.mubr.bf16.gmra.mrb[88].mxu1 %v4033_v30  ;;  %10754 = vmatprep.subr.bf16.mxu0 %v19005_v54 }
 0x73f   : > { %10043 = vmatprep.mubr.msk.bf16.mxu1 %vm1700_vm15, %v4036_v31  ;;  %v11462_v34 = vpop.permute.xlu1 %11461 }
 0x740   : > { %v11464_v5 = vunpack.i.h.bf16 %v11462_v34  ;;  %v11463_v21 = vunpack.i.l.bf16 %v11462_v34 }
 0x741   : > { %10755 = vmatpush3.bf16.msra.mxu0 %v12016_v26 }
 0x742   : > { %v3994_v22 = vsel %vm1700_vm15, %v15162_v6, %v11463_v21  ;;  %v3995_v43 = vsel %vm1700_vm15, %v15179_v25, %v11464_v5  ;;  %10756 = vmatprep.subr.bf16.mxu0 %v19005_v54  ;;  %v12018_v6 = vld [vmem:[#allocation2 + $0x250] sm:$0xff]  }
 0x743   : > { %v4035_v19 = vpack.c.bf16 %v3995_v43, %v3994_v22 }
 0x745   : > { %10757 = vmatpush3.bf16.msra.mxu0 %v12017_v59 }
 0x746   : > { %4226 = vmatmul.mubr.bf16.gmra.mrb[92].mxu1 %v4035_v19  ;;  %10758 = vmatprep.subr.bf16.mxu0 %v19005_v54 }
 0x749   : > { %10759 = vmatpush3.bf16.msra.mxu0 %v12018_v6 }
 0x74a   : > { %10764 = vmatprep.subr.bf16.mxu0 %v19005_v54 }
 0x7e1   : > { %v4171_v25 = vpop.f32.mrb[64].mxu1 }
 0x7e2   : > { %v4173_v31 = vpop.f32.mrb[65].mxu1  ;;  %v15309_v40 = vadd.f32 %v15294_v32, %v4171_v25 }
 0x7e3   : > { %v4174_v52 = vpop.f32.mrb[66].mxu1 }
 0x7e4   : > { %v4176_v47 = vpop.f32.mrb[67].mxu1  ;;  %v15300_v10 = vadd.f32 %v15294_v32, %v4174_v52  ;;  %v4234_v7 = vmax.f32 %v15309_v40, 0.0 }
 0x7e6   : > { %v4235_v61 = vmax.f32 %v15300_v10, 0.0  ;;  %v4250_v4 = vsel %vm1700_vm15, %v4234_v7, 0.0 }
 0x7e8   : > { %v4251_v48 = vsel %vm1700_vm15, %v4235_v61, 0.0 }
 0x7e9   : > { %v4179_v28 = vpop.f32.mrb[68].mxu1  ;;  %v4252_v8 = vadd.f32 %v4251_v48, %v4250_v4 }
 0x7ea   : > { %v4181_v55 = vpop.f32.mrb[69].mxu1  ;;  %v15312_v11 = vadd.f32 %v15294_v32, %v4179_v28 }
 0x7eb   : > { %v4182_v62 = vpop.f32.mrb[70].mxu1 }
 0x7ec   : > { %v4184_v9 = vpop.f32.mrb[71].mxu1  ;;  %v4236_v15 = vmax.f32 %v15312_v11, 0.0  ;;  %v15330_v23 = vadd.f32 %v15294_v32, %v4182_v62 }
 0x7ee   : > { %v4253_v5 = vsel %vm1700_vm15, %v4236_v15, 0.0  ;;  %v4237_v21 = vmax.f32 %v15330_v23, 0.0 }
 0x7ef   : > { %v4254_v28 = vadd.f32 %v4253_v5, %v4252_v8 }
 0x7f0   : > { %v4255_v62 = vsel %vm1700_vm15, %v4237_v21, 0.0 }
 0x7f1   : > { %v4187_v44 = vpop.f32.mrb[72].mxu1 }
 0x7f2   : > { %v4189_v63 = vpop.f32.mrb[73].mxu1  ;;  %v15303_v33 = vadd.f32 %v15294_v32, %v4187_v44 }
 0x7f3   : > { %v4190_v18 = vpop.f32.mrb[74].mxu1 }
 0x7f4   : > { %v4192_v56 = vpop.f32.mrb[75].mxu1  ;;  %v15297_v35 = vadd.f32 %v15294_v32, %v4190_v18  ;;  %v4238_v39 = vmax.f32 %v15303_v33, 0.0 }
 0x7f6   : > { %v4239_v41 = vmax.f32 %v15297_v35, 0.0  ;;  %v4265_v51 = vsel %vm1700_vm15, %v4238_v39, 0.0 }
 0x7f8   : > { %v4266_v2 = vsel %vm1700_vm15, %v4239_v41, 0.0 }
 0x7f9   : > { %v4195_v20 = vpop.f32.mrb[76].mxu1  ;;  %v4267_v30 = vadd.f32 %v4266_v2, %v4265_v51 }
 0x7fa   : > { %v4197_v58 = vpop.f32.mrb[77].mxu1  ;;  %v15306_v42 = vadd.f32 %v15294_v32, %v4195_v20  ;;  %v4256_v20 = vadd.f32 %v4255_v62, %v4254_v28 }
 0x7fb   : > { %v4198_v17 = vpop.f32.mrb[78].mxu1 }
 0x7fc   : > { %v4200_v0 = vpop.f32.mrb[79].mxu1  ;;  %v4240_v16 = vmax.f32 %v15306_v42, 0.0  ;;  %v15319_v12 = vadd.f32 %v15294_v32, %v4198_v17  ;;  %v4257_v51 = vrot.slane %v4256_v20, 4  ;;  %v12046_v42 = vld [vmem:[#allocation2 + $0x338] sm:$0xff]  }
 0x7fe   : > { %v4268_v38 = vsel %vm1700_vm15, %v4240_v16, 0.0  ;;  %v4241_v50 = vmax.f32 %v15319_v12, 0.0  ;;  %v4258_v5 = vadd.f32 %v4257_v51, %v4256_v20 }
 0x7ff   : > { %v4269_v26 = vadd.f32 %v4268_v38, %v4267_v30 }
 0x800   : > { %v4270_v6 = vsel %vm1700_vm15, %v4241_v50, 0.0 }
 0x801   : > { %v4203_v36 = vpop.f32.mrb[80].mxu1  ;;  %v4271_v63 = vadd.f32 %v4270_v6, %v4269_v26 }
 0x802   : > { %v4205_v37 = vpop.f32.mrb[81].mxu1  ;;  %v15322_v57 = vadd.f32 %v15294_v32, %v4203_v36 }
 0x803   : > { %v4206_v45 = vpop.f32.mrb[82].mxu1  ;;  %v4272_v36 = vrot.slane %v4271_v63, 4 }
 0x804   : > { %v15325_v29 = vadd.f32 %v15294_v32, %v4206_v45  ;;  %v4208_v46 = vpop.f32.mrb[83].mxu1  ;;  %v4242_v49 = vmax.f32 %v15322_v57, 0.0 }
 0x805   : > { %v4273_v4 = vadd.f32 %v4272_v36, %v4271_v63 }
 0x806   : > { %v4243_v60 = vmax.f32 %v15325_v29, 0.0  ;;  %v4279_v25 = vsel %vm1700_vm15, %v4242_v49, 0.0 }
 0x808   : > { %v4280_v22 = vsel %vm1700_vm15, %v4243_v60, 0.0 }
 0x809   : > { %v4211_v34 = vpop.f32.mrb[84].mxu1  ;;  %v4281_v55 = vadd.f32 %v4280_v22, %v4279_v25 }
 0x80a   : > { %v15358_v43 = vadd.f32 %v15294_v32, %v4211_v34  ;;  %v4213_v19 = vpop.f32.mrb[85].mxu1 }
 0x80b   : > { %v4214_v59 = vpop.f32.mrb[86].mxu1 }
 0x80c   : > { %v4244_v31 = vmax.f32 %v15358_v43, 0.0  ;;  %v15368_v52 = vadd.f32 %v15294_v32, %v4214_v59  ;;  %v4216_v47 = vpop.f32.mrb[87].mxu1  ;;  %v4274_v59 = vrot.slane %v4273_v4, 2 }
 0x80e   : > { %v4282_v9 = vsel %vm1700_vm15, %v4244_v31, 0.0  ;;  %v4245_v44 = vmax.f32 %v15368_v52, 0.0  ;;  %v4275_v20 = vadd.f32 %v4274_v59, %v4273_v4 }
 0x80f   : > { %v4283_v18 = vadd.f32 %v4282_v9, %v4281_v55  ;;  %v4259_v9 = vrot.slane %v4258_v5, 2 }
 0x810   : > { %v4284_v56 = vsel %vm1700_vm15, %v4245_v44, 0.0 }
 0x811   : > { %v4285_v58 = vadd.f32 %v4284_v56, %v4283_v18  ;;  %v4219_v17 = vpop.f32.mrb[88].mxu1  ;;  %v4260_v36 = vadd.f32 %v4259_v9, %v4258_v5  ;;  %v4393_v9 = vld [vmem:[#allocation2 + $0x258] sm:$0xf] }
 0x812   : > { %v4221_v0 = vpop.f32.mrb[89].mxu1  ;;  %v15381_v46 = vadd.f32 %v15294_v32, %v4219_v17 }
 0x813   : > { %v4222_v37 = vpop.f32.mrb[90].mxu1  ;;  %v4286_v45 = vrot.slane %v4285_v58, 4  ;;  %v4261_v51 = vrot.slane %v4260_v36, 1 }
 0x814   : > { %v15384_v2 = vadd.f32 %v15294_v32, %v4222_v37  ;;  %v4224_v48 = vpop.f32.mrb[91].mxu1  ;;  %v4246_v34 = vmax.f32 %v15381_v46, 0.0 }
 0x815   : > { %v4287_v30 = vadd.f32 %v4286_v45, %v4285_v58 }
 0x816   : > { %v4247_v38 = vmax.f32 %v15384_v2, 0.0  ;;  %v4293_v47 = vsel %vm1700_vm15, %v4246_v34, 0.0 }
 0x817   : > { %v4288_v25 = vrot.slane %v4287_v30, 2 }
 0x818   : > { %v4294_v19 = vsel %vm1700_vm15, %v4247_v38, 0.0 }
 0x819   : > { %v4227_v22 = vpop.f32.mrb[92].mxu1  ;;  %v4295_v63 = vadd.f32 %v4294_v19, %v4293_v47  ;;  %v4289_v17 = vadd.f32 %v4288_v25, %v4287_v30  ;;  %v4262_v47 = vadd.f32 %v4261_v51, %v4260_v36 }
 0x81a   : > { %v15392_v8 = vadd.f32 %v15294_v32, %v4227_v22  ;;  %v4229_v26 = vpop.f32.mrb[93].mxu1 }
 0x81b   : > { %v4230_v6 = vpop.f32.mrb[94].mxu1  ;;  %v4290_v48 = vrot.slane %v4289_v17, 1  ;;  %v4264_v59 = vmul.f32 0.03125, %v4262_v47  ;;  %v12025_v47 = vld [vmem:[#allocation2 + $0x2e0] sm:$0xff]  }
 0x81c   : > { %v19002_v28 = vmax.f32 %v15392_v8, 0.0  ;;  %v15399_v55 = vadd.f32 %v15294_v32, %v4230_v6  ;;  %v4232_v62 = vpop.f32.mrb[95].mxu1  ;;  %v4276_v32 = vrot.slane %v4275_v20, 1 }
 0x81d   : > { %v4291_v6 = vadd.f32 %v4290_v48, %v4289_v17  ;;  %v4406_v17 = vsel %vm4404_vm14, %v4393_v9, 0  ;;  %v12030_v9 = vld [vmem:[#allocation2 + $0x2f8] sm:$0xff]  }
 0x81e   : > { %v4296_v18 = vsel %vm1700_vm15, %v19002_v28, 0.0  ;;  %v4249_v56 = vmax.f32 %v15399_v55, 0.0  ;;  %v4277_v19 = vadd.f32 %v4276_v32, %v4275_v20 }
 0x81f   : > { %v4297_v58 = vadd.f32 %v4296_v18, %v4295_v63  ;;  %v4292_v30 = vmul.f32 0.03125, %v4291_v6  ;;  %v12021_v6 = vld [vmem:[#allocation2 + $0x2a8] sm:$0xff]  }
 0x820   : > { %v4298_v0 = vsel %vm1700_vm15, %v4249_v56, 0.0  ;;  %v4278_v28 = vmul.f32 0.03125, %v4277_v19  ;;  %v12019_v19 = vld [vmem:[#allocation2 + $0x2a0] sm:$0xff]  }
 0x821   : > { %v4299_v37 = vadd.f32 %v4298_v0, %v4297_v58  ;;  %v19299_v0 = vmov 0   ;;  %10411 = vmatprep.subr.bf16.mxu1 %v12019_v19  ;;  %v10050_v19 = vld [vmem:[%s18924_s2 + $0x6] ss:$0 sm:$0xff] }
 0x822   : > { %v4308_v63 = vsel %vm4307_vm10, %v4264_v59, %v4278_v28  ;;  %v10044_v28 = vld [vmem:[%s18924_s2 + $0x5] ss:$0 sm:$0xff]  ;;  %v12024_v59 = vld [vmem:[#allocation2 + $0x270] sm:$0xff]  }
 0x823   : > { %v4300_v45 = vrot.slane %v4299_v37, 4  ;;  %v4309_v18 = vsel %vm19297_vm7, %v4308_v63, %v4292_v30  ;;  %vm19007_vm7 = vcmask 64512   ;;  %v12026_v30 = vld [vmem:[#allocation2 + $0x2e8] sm:$0xff]   ;;  %v12029_v63 = vld [vmem:[#allocation2 + $0x2f0] sm:$0xff]  }
 0x825   : > { %v4301_v22 = vadd.f32 %v4300_v45, %v4299_v37 }
 0x827   : > { %v4302_v26 = vrot.slane %v4301_v22, 2 }
 0x829   : > { %v4303_v62 = vadd.f32 %v4302_v26, %v4301_v22  ;;  %v12020_v26 = vld [vmem:[#allocation2 + $0x260] sm:$0xff]  }
 0x82a   : > { %10412 = vmatpush3.bf16.msra.mxu1 %v12020_v26 }
 0x82b   : > { %v4304_v4 = vrot.slane %v4303_v62, 1  ;;  %10413 = vmatprep.subr.bf16.mxu1 %v12021_v6 }
 0x82d   : > { %v4305_v25 = vadd.f32 %v4304_v4, %v4303_v62  ;;  %v12022_v62 = vld [vmem:[#allocation2 + $0x268] sm:$0xff]   ;;  %v12023_v4 = vld [vmem:[#allocation2 + $0x2b0] sm:$0xff]  }
 0x82e   : > { %10414 = vmatpush3.bf16.msra.mxu1 %v12022_v62 }
 0x82f   : > { %v4306_v5 = vmul.f32 0.03125, %v4305_v25  ;;  %10415 = vmatprep.subr.bf16.mxu1 %v12023_v4  ;;  %v12027_v25 = vld [vmem:[#allocation2 + $0x2b8] sm:$0xff]  }
 0x831   : > { %v4310_v58 = vsel %vm19298_vm9, %v4309_v18, %v4306_v5  ;;  %v12028_v5 = vld [vmem:[#allocation2 + $0x278] sm:$0xff]   ;;  %v12031_v18 = vld [vmem:[#allocation2 + $0x2c0] sm:$0xff]   ;;  %vm19304_vm9 = vcmp.lt.s32.totalorder %v12382_v3, 2 }
 0x832   : > { %v4320_v20 = vpack.c.bf16 %v4310_v58, %v4310_v58  ;;  %10416 = vmatpush3.bf16.msra.mxu1 %v12024_v59  ;;  %v12032_v58 = vld [vmem:[#allocation2 + $0x280] sm:$0xff]   ;;  %v4503_v59 = vpop.permute.xlu0 %4502 }
 0x833   : > { %10417 = vmatprep.subr.bf16.mxu1 %v12027_v25 }
 0x834   : > { %10761 = vmatmul.mubr.msk.bf16.vlgmr.msra.gmra.mrb[96].mxu0 %vm1700_vm15, %v4320_v20  ;;  %v12033_v20 = vld [vmem:[#allocation2 + $0x300] sm:$0xff]  }
 0x835   : > { %10765 = vmatpush3.bf16.msra.mxu0 %v4406_v17  ;;  %10766 = vmatprep.mubr.msk.bf16.mxu0 %vm12272_vm12, %v19005_v54  ;;  %v12035_v17 = vld [vmem:[#allocation2 + $0x2c8] sm:$0xff]  }
 0x836   : > { %5492 = vmatprep.subr.bf16.mxu0 %v19299_v0  ;;  %10418 = vmatpush3.bf16.msra.mxu1 %v12028_v5 }
 0x837   : > { %10419 = vmatprep.subr.bf16.mxu1 %v12031_v18 }
 0x83a   : > { %10420 = vmatpush3.bf16.msra.mxu1 %v12032_v58 }
 0x83b   : > { %10421 = vmatprep.subr.bf16.mxu1 %v12035_v17  ;;  %v15437_v17 = vsub.s32 0, %v12378_v1 }
 0x83d   : > { %19301 = vst [vmem:[#allocation32_spill] sm:$0xff] %v15437_v17 }
 0x907   : > { %v4386_v36 = vpop.f32.mrb[96].mxu0 }
 0x908   : > { %v4387_v37 = vadd.f32 %v10044_v28, %v4386_v36  ;;  %v10762_v32 = vpop.f32.mrb[97].mxu0  ;;  %v12036_v28 = vld [vmem:[#allocation2 + $0x288] sm:$0xff]  }
 0x909   : > { %v4389_v45 = vpop.f32.mrb[98].mxu0  ;;  %v12034_v36 = vld [vmem:[#allocation2 + $0x308] sm:$0xff]   ;;  %10422 = vmatpush3.bf16.msra.mxu1 %v12036_v28  ;;  %v12040_v32 = vld [vmem:[#allocation2 + $0x290] sm:$0xff]   ;;  %v15440_v28 = vsub.s32 1, %v12378_v1 }
 0x90a   : > { %v4392_v48 = vmax.f32 %v4387_v37, 0.0  ;;  %v10763_v51 = vpop.f32.mrb[99].mxu0  ;;  %v12039_v37 = vld [vmem:[#allocation2 + $0x2d0] sm:$0xff]  }
 0x90b   : > { %v12037_v45 = vld [vmem:[#allocation2 + $0x310] sm:$0xff]   ;;  %10423 = vmatprep.subr.bf16.mxu1 %v12039_v37  ;;  %v12041_v51 = vld [vmem:[#allocation2 + $0x320] sm:$0xff]   ;;  %19302 = vst [vmem:[#allocation38_spill] sm:$0xff] %v15440_v28  ;;  %v12044_v37 = vld [vmem:[#allocation2 + $0x298] sm:$0xff]  }
 0x90c   : > { %v4395_v22 = vpack.c.bf16 %v4392_v48, %v4392_v48  ;;  %v12038_v48 = vld [vmem:[#allocation2 + $0x318] sm:$0xff]  }
 0x90d   : > { %10424 = vmatpush3.bf16.msra.mxu1 %v12040_v32  ;;  %v12045_v32 = vld [vmem:[#allocation2 + $0x330] sm:$0xff]  }
 0x90e   : > { %10767 = vmatmul.mubr.msk.bf16.vlgmr.msra.gmra.mrb[100].mxu0 %vm19007_vm7, %v4395_v22  ;;  %v12042_v22 = vld [vmem:[#allocation2 + $0x328] sm:$0xff]   ;;  %vm19311_vm7 = vcmp.lt.s32.totalorder %v19295_v24, 2 }
 0x90f   : > { %5493 = vmatpush1.bf16.msra.mxu0 %v12025_v47 }
 0x910   : > { %5494 = vmatprep.subr.bf16.mxu0 %v19299_v0 }
 0x913   : > { %5495 = vmatpush1.bf16.msra.mxu0 %v12026_v30 }
 0x914   : > { %5496 = vmatprep.subr.bf16.mxu0 %v19299_v0 }
 0x917   : > { %5497 = vmatpush1.bf16.msra.mxu0 %v12029_v63  ;;  %v4533_v63 = vpop.permute.xlu1 %4532 }
 0x918   : > { %5498 = vmatprep.subr.bf16.mxu0 %v19299_v0 }
 0x91b   : > { %5499 = vmatpush1.bf16.msra.mxu0 %v12030_v9  ;;  %v4505_v9 = vpop.permute.xlu0 %4504  ;;  %v4507_v18 = vpop.permute.xlu1 %4506 }
 0x91c   : > { %5500 = vmatprep.subr.bf16.mxu0 %v19299_v0 }
 0x91f   : > { %5501 = vmatpush1.bf16.msra.mxu0 %v12033_v20  ;;  %v4509_v58 = vpop.permute.xlu0 %4508  ;;  %v15434_v20 = vsub.s32 3, %v12378_v1 }
 0x920   : > { %5502 = vmatprep.subr.bf16.mxu0 %v19299_v0 }
 0x921   : > { %19300 = vst [vmem:[#allocation30_spill] sm:$0xff] %v15434_v20 }
 0x923   : > { %5503 = vmatpush1.bf16.msra.mxu0 %v12034_v36  ;;  %v12043_v36 = vld [vmem:[#allocation2 + $0x2d8] sm:$0xff]  }
 0x924   : > { %5504 = vmatprep.subr.bf16.mxu0 %v19299_v0  ;;  %10425 = vmatprep.subr.bf16.mxu1 %v12043_v36 }
 0x925   : > { %10426 = vmatpush3.bf16.msra.mxu1 %v12044_v37 }
 0x927   : > { %5505 = vmatpush1.bf16.msra.mxu0 %v12037_v45  ;;  %v4511_v45 = vpop.permute.xlu1 %4510 }
 0x928   : > { %5506 = vmatprep.subr.bf16.mxu0 %v19299_v0 }
 0x92b   : > { %5507 = vmatpush1.bf16.msra.mxu0 %v12038_v48  ;;  %v4515_v11 = vpop.permute.xlu1 %4514 }
 0x92c   : > { %5508 = vmatprep.subr.bf16.mxu0 %v19299_v0 }
 0x92f   : > { %5509 = vmatpush1.bf16.msra.mxu0 %v12041_v51 }
 0x930   : > { %5510 = vmatprep.subr.bf16.mxu0 %v19299_v0 }
 0x933   : > { %5511 = vmatpush1.bf16.msra.mxu0 %v12042_v22 }
 0x934   : > { %5512 = vmatprep.subr.bf16.mxu0 %v19299_v0 }
 0x937   : > { %5513 = vmatpush1.bf16.msra.mxu0 %v12045_v32 }
 0x938   : > { %5514 = vmatprep.subr.bf16.mxu0 %v19299_v0 }
 0x93b   : > { %5515 = vmatpush1.bf16.msra.mxu0 %v12046_v42 }
 0x9e1   : > { %v4442_v26 = vpop.f32.mrb[100].mxu0 }
 0x9e2   : > { %v4443_v6 = vadd.f32 %v10050_v19, %v4442_v26  ;;  %v10768_v47 = vpop.f32.mrb[101].mxu0  ;;  %v4513_v26 = vpop.permute.xlu0 %4512 }
 0x9e3   : > { %v4445_v62 = vpop.f32.mrb[102].mxu0 }
 0x9e4   : > { %v10052_v4 = vmul.f32 -1.442695, %v4443_v6  ;;  %v10769_v30 = vpop.f32.mrb[103].mxu0  ;;  %v15455_v6 = vsub.s32 2, %v12378_v1 }
 0x9e6   : > { %12151 = vpow2.f32 %v10052_v4  ;;  %19303 = vst [vmem:[#allocation39_spill] sm:$0xff] %v15455_v6  ;;  %v4517_v37 = vpop.permute.xlu0 %4516 }
 0x9f0   : > { %v12152_v25 = vpop.eup %12151 }
 0x9f1   : > { %v4451_v5 = vadd.f32 1.0, %v12152_v25 }
 0x9f3   : > { %12153 = vrcp.f32 %v4451_v5 }
 0x9fd   : > { %v15442_v48 = vpop.eup %12153 }
 0x9fe   : > { %v15446_v51 = vrot.slane %v15442_v48, %v15434_v20  ;;  %v4457_v22 = vrot.slane %v15442_v48, %v15437_v17  ;;  %v15452_v19 = vrot.slane %v15442_v48, %v15440_v28 }
 0xa00   : > { %v4470_v47 = vmul.f32 %v4457_v22, %v4234_v7  ;;  %v4471_v62 = vmul.f32 %v4457_v22, %v4235_v61  ;;  %v4472_v4 = vmul.f32 %v4457_v22, %v4236_v15  ;;  %v4485_v30 = vmul.f32 %v15446_v51, %v4249_v56 }
 0xa01   : > { %v4473_v25 = vmul.f32 %v4457_v22, %v4237_v21  ;;  %v4474_v5 = vmul.f32 %v15452_v19, %v4238_v39  ;;  %v4475_v40 = vmul.f32 %v15452_v19, %v4239_v41  ;;  %v4476_v10 = vmul.f32 %v15452_v19, %v4240_v16 }
 0xa02   : > { %v4550_v61 = vadd.f32 %v4503_v59, %v4470_v47  ;;  %v4551_v7 = vadd.f32 %v4505_v9, %v4471_v62  ;;  %v4552_v15 = vadd.f32 %v4507_v18, %v4472_v4  ;;  %v4565_v55 = vadd.f32 %v4533_v63, %v4485_v30 }
 0xa03   : > { %v4553_v56 = vadd.f32 %v4509_v58, %v4473_v25  ;;  %v4554_v23 = vadd.f32 %v4511_v45, %v4474_v5  ;;  %v4555_v21 = vadd.f32 %v4513_v26, %v4475_v40  ;;  %v4556_v36 = vadd.f32 %v4515_v11, %v4476_v10 }
 0xa04   : > { %v15478_v33 = vmax.f32 %v4550_v61, 0.0  ;;  %v15480_v39 = vmax.f32 %v4551_v7, 0.0  ;;  %v15482_v35 = vmax.f32 %v4552_v15, 0.0  ;;  %v15484_v41 = vmax.f32 %v4565_v55, 0.0 }
 0xa05   : > { %v15486_v16 = vmax.f32 %v4553_v56, 0.0  ;;  %v15488_v59 = vmax.f32 %v4554_v23, 0.0  ;;  %v15490_v9 = vmax.f32 %v4555_v21, 0.0  ;;  %v15492_v63 = vmax.f32 %v4556_v36, 0.0  ;;  %v4521_v23 = vpop.permute.xlu0 %4520  ;;  %v4519_v21 = vpop.permute.xlu1 %4518 }
 0xa06   : > { %v11465_v18 = vpack.i.bf16 %v15480_v39, %v15478_v33  ;;  %v19010_v58 = vrot.slane %v15478_v33, 3  ;;  %v4823_v32 = vrot.slane %v15480_v39, 3  ;;  %v4824_v45 = vrot.slane %v15482_v35, 3 }
 0xa07   : > { %v4774_v22 = vrot.slane %v15478_v33, 2  ;;  %v4775_v26 = vrot.slane %v15480_v39, 2  ;;  %v4776_v47 = vrot.slane %v15482_v35, 2  ;;  %v4630_v62 = vrot.slane %v15478_v33, 6 }
 0xa08   : > { %11466 = vrot.lane.b32.xlu0 %v11465_v18, %s12267_s6  ;;  %v4851_v4 = vsel %vm2245_vm11, %v4823_v32, %v4824_v45  ;;  %v4852_v30 = vsel %vm2245_vm11, %v19010_v58, %v4823_v32  ;;  %v4631_v25 = vrot.slane %v15480_v39, 6  ;;  %v4645_v5 = vrot.slane %v15484_v41, 6 }
 0xa09   : > { %v5170_v40 = vpack.c.bf16 %v4851_v4, %v4852_v30  ;;  %v4803_v10 = vsel %vm671_vm2, %v4775_v26, %v4776_v47  ;;  %v4804_v11 = vsel %vm671_vm2, %v4774_v22, %v4775_v26  ;;  %v4632_v61 = vrot.slane %v15482_v35, 6 }
 0xa0a   : > { %v11475_v7 = vpack.i.bf16 %v4803_v10, %v4804_v11  ;;  %v4660_v15 = vsel %vm524_vm13, %v4630_v62, %v4631_v25  ;;  %v4661_v55 = vsel %vm524_vm13, %v4645_v5, %v4630_v62  ;;  %v4633_v56 = vrot.slane %v15486_v16, 6 }
 0xa0b   : > { %10082 = vmatprep.mubr.msk.bf16.mxu0 %vm1700_vm15, %v5170_v40  ;;  %v4662_v36 = vsel %vm19304_vm9, 0.0, %v4661_v55  ;;  %v4659_v42 = vsel %vm524_vm13, %v4631_v25, %v4632_v61  ;;  %v4465_v18 = vrot.slane %v15442_v48, %v15455_v6  ;;  %v4777_v62 = vrot.slane %v15486_v16, 2  ;;  %v19305_v55 = vld [vmem:[#allocation10_spill] sm:$0xff] }
 0xa0c   : > { %11476 = vrot.lane.b32.xlu0 %v11475_v7, %s12267_s6  ;;  %v11470_v32 = vpack.i.bf16 %v4660_v15, %v4662_v36  ;;  %v4658_v26 = vsel %vm524_vm13, %v4632_v61, %v4633_v56  ;;  %v4778_v4 = vrot.slane %v15488_v59, 2  ;;  %v4779_v40 = vrot.slane %v15490_v9, 2 }
 0xa0d   : > { %v11485_v30 = vpack.i.bf16 %v4658_v26, %v4659_v42  ;;  %v4780_v10 = vrot.slane %v15492_v63, 2  ;;  %v4634_v25 = vrot.slane %v15488_v59, 6  ;;  %v4802_v11 = vsel %vm671_vm2, %v4776_v47, %v4777_v62 }
 0xa0e   : > { %11471 = vrot.lane.b32.xlu1 %v11470_v32, %s12267_s6  ;;  %v4801_v48 = vsel %vm671_vm2, %v4777_v62, %v4778_v4  ;;  %v4635_v61 = vrot.slane %v15490_v9, 6  ;;  %v4477_v7 = vmul.f32 %v15452_v19, %v4241_v50  ;;  %v11480_v15 = vpack.i.bf16 %v15486_v16, %v15482_v35  ;;  %v4525_v50 = vpop.permute.xlu0 %4524  ;;  %v4523_v19 = vpop.permute.xlu1 %4522 }
 0xa0f   : > { %v4809_v36 = vsel %vm415_vm5, 0.0, %v4801_v48  ;;  %v11490_v42 = vpack.i.bf16 %v15490_v9, %v15488_v59  ;;  %v4799_v47 = vsel %vm671_vm2, %v4779_v40, %v4780_v10  ;;  %v4800_v32 = vsel %vm671_vm2, %v4778_v4, %v4779_v40 }
 0xa10   : > { %11486 = vrot.lane.b32.xlu0 %v11485_v30, %s12267_s6  ;;  %v4657_v12 = vsel %vm524_vm13, %v4633_v56, %v4634_v25  ;;  %v11495_v26 = vpack.i.bf16 %v4809_v36, %v4802_v11  ;;  %v4656_v62 = vsel %vm524_vm13, %v4634_v25, %v4635_v61  ;;  %v4557_v48 = vadd.f32 %v4517_v37, %v4477_v7 }
 0xa11   : > { %v4478_v30 = vmul.f32 %v4465_v18, %v4242_v49  ;;  %v4636_v54 = vrot.slane %v15492_v63, 6  ;;  %v4479_v4 = vmul.f32 %v4465_v18, %v4243_v60  ;;  %v4480_v56 = vmul.f32 %v4465_v18, %v4244_v31 }
 0xa12   : > { %11481 = vrot.lane.b32.xlu1 %v11480_v15, %s12267_s6  ;;  %v4481_v40 = vmul.f32 %v4465_v18, %v4245_v44  ;;  %vm19306_vm9 = vcmp.lt.s32.totalorder %v19213_v27, 2  ;;  %v15579_v37 = vmax.f32 %v4557_v48, 0.0  ;;  %v4482_v49 = vmul.f32 %v15446_v51, %v4246_v34  ;;  %v4529_v2 = vpop.permute.xlu0 %4528  ;;  %v4527_v7 = vpop.permute.xlu1 %4526 }
 0xa13   : > { %v4666_v25 = vsel %vm19306_vm9, 0.0, %v4657_v12  ;;  %v4558_v57 = vadd.f32 %v4519_v21, %v4478_v30  ;;  %v4559_v29 = vadd.f32 %v4521_v23, %v4479_v4  ;;  %v4560_v60 = vadd.f32 %v4523_v19, %v4480_v56  ;;  %v19307_v56 = vld [vmem:[#allocation12_spill] sm:$0xff] }
 0xa14   : > { %11491 = vrot.lane.b32.xlu0 %v11490_v42, %s12267_s6  ;;  %v4561_v11 = vadd.f32 %v4525_v50, %v4481_v40  ;;  %v4483_v43 = vmul.f32 %v15446_v51, %v4247_v38  ;;  %v11505_v31 = vpack.i.bf16 %v4799_v47, %v4800_v32  ;;  %v4637_v52 = vrot.slane %v15579_v37, 6 }
 0xa15   : > { %v15589_v44 = vmax.f32 %v4558_v57, 0.0  ;;  %v4781_v21 = vrot.slane %v15579_v37, 2  ;;  %v11500_v46 = vpack.i.bf16 %v4656_v62, %v4666_v25  ;;  %v4655_v34 = vsel %vm524_vm13, %v4635_v61, %v4636_v54 }
 0xa16   : > { %11496 = vrot.lane.b32.xlu1 %v11495_v26, %s12267_s6  ;;  %v15595_v23 = vmax.f32 %v4559_v29, 0.0  ;;  %v15597_v18 = vmax.f32 %v4560_v60, 0.0  ;;  %v4654_v38 = vsel %vm524_vm13, %v4636_v54, %v4637_v52  ;;  %v15603_v42 = vmax.f32 %v4561_v11, 0.0 }
 0xa17   : > { %v4782_v15 = vrot.slane %v15589_v44, 2  ;;  %v4638_v36 = vrot.slane %v15589_v44, 6  ;;  %v4562_v32 = vadd.f32 %v4527_v7, %v4482_v49  ;;  %v4563_v12 = vadd.f32 %v4529_v2, %v4483_v43 }
 0xa18   : > { %11506 = vrot.lane.b32.xlu0 %v11505_v31, %s12267_s6  ;;  %v4783_v47 = vrot.slane %v15595_v23, 2  ;;  %v4784_v61 = vrot.slane %v15597_v18, 2  ;;  %v4639_v19 = vrot.slane %v15595_v23, 6  ;;  %v4640_v26 = vrot.slane %v15597_v18, 6 }
 0xa19   : > { %v4797_v50 = vsel %vm671_vm2, %v4781_v21, %v4782_v15  ;;  %v4653_v54 = vsel %vm524_vm13, %v4637_v52, %v4638_v36  ;;  %v11515_v62 = vpack.i.bf16 %v4654_v38, %v4655_v34  ;;  %v11510_v48 = vpack.i.bf16 %v15579_v37, %v15492_v63 }
 0xa1a   : > { %11501 = vrot.lane.b32.xlu1 %v11500_v46, %s12267_s6  ;;  %v4798_v30 = vsel %vm671_vm2, %v4780_v10, %v4781_v21  ;;  %v11520_v4 = vpack.i.bf16 %v15595_v23, %v15589_v44  ;;  %v4813_v40 = vsel %vm419_vm8, 0.0, %v4797_v50  ;;  %v4795_v25 = vsel %vm671_vm2, %v4783_v47, %v4784_v61  ;;  %v4531_v46 = vpop.permute.xlu1 %4530 }
 0xa1b   : > { %v4641_v57 = vrot.slane %v15603_v42, 6  ;;  %v4796_v49 = vsel %vm671_vm2, %v4782_v15, %v4783_v47  ;;  %v4652_v29 = vsel %vm524_vm13, %v4638_v36, %v4639_v19  ;;  %vm19308_vm9 = vcmp.lt.s32.totalorder %v19292_v14, 2 }
 0xa1c   : > { %11516 = vrot.lane.b32.xlu0 %v11515_v62, %s12267_s6  ;;  %v4670_v10 = vsel %vm19308_vm9, 0.0, %v4653_v54  ;;  %v15633_v60 = vmax.f32 %v4562_v32, 0.0  ;;  %v4651_v11 = vsel %vm524_vm13, %v4639_v19, %v4640_v26  ;;  %v15637_v43 = vmax.f32 %v4563_v12, 0.0 }
 0xa1d   : > { %v4785_v31 = vrot.slane %v15603_v42, 2  ;;  %v19309_v52 = vmax.f32 %v15392_v8, 0.0  ;;  %v4650_v34 = vsel %vm524_vm13, %v4640_v26, %v4641_v57  ;;  %v4789_v38 = vrot.slane %v15484_v41, 2 }
 0xa1e   : > { %11511 = vrot.lane.b32.xlu1 %v11510_v48, %s12267_s6  ;;  %v4786_v2 = vrot.slane %v15633_v60, 2  ;;  %v4642_v7 = vrot.slane %v15633_v60, 6  ;;  %v11525_v15 = vpack.i.bf16 %v4813_v40, %v4798_v30  ;;  %v11535_v36 = vpack.i.bf16 %v4795_v25, %v4796_v49 }
 0xa1f   : > { %v4484_v21 = vmul.f32 %v15446_v51, %v19309_v52  ;;  %v4787_v51 = vrot.slane %v15637_v43, 2  ;;  %v4643_v32 = vrot.slane %v15637_v43, 6  ;;  %v11530_v50 = vpack.i.bf16 %v4652_v29, %v4670_v10 }
 0xa20   : > { %11521 = vrot.lane.b32.xlu0 %v11520_v4, %s12267_s6  ;;  %v4793_v8 = vsel %vm671_vm2, %v4785_v31, %v4786_v2  ;;  %v4649_v12 = vsel %vm524_vm13, %v4641_v57, %v4642_v7  ;;  %v11545_v19 = vpack.i.bf16 %v4650_v34, %v4651_v11  ;;  %v11540_v54 = vpack.i.bf16 %v15603_v42, %v15597_v18 }
 0xa21   : > { %v4564_v47 = vadd.f32 %v4531_v46, %v4484_v21  ;;  %v4794_v62 = vsel %vm671_vm2, %v4784_v61, %v4785_v31  ;;  %vm19310_vm9 = vcmp.ge.s32.totalorder %v12578_v53, 30  ;;  %v4805_v30 = vsel %vm671_vm2, %v4789_v38, %v4774_v22 }
 0xa22   : > { %11526 = vrot.lane.b32.xlu1 %v11525_v15, %s12267_s6  ;;  %v4817_v48 = vsel %vm19310_vm9, 0.0, %v4793_v8  ;;  %v4727_v4 = vrot.slane %v15480_v39, 1  ;;  %v15675_v25 = vsel %vm524_vm13, %v4642_v7, %v4643_v32  ;;  %v15679_v61 = vsel %vm19311_vm7, 0.0, %v4649_v12 }
 0xa23   : > { %v15658_v26 = vmax.f32 %v4564_v47, 0.0  ;;  %v11550_v49 = vpack.i.bf16 %v15637_v43, %v15633_v60  ;;  %v4792_v22 = vsel %vm671_vm2, %v4786_v2, %v4787_v51  ;;  %v4728_v29 = vrot.slane %v15482_v35, 1 }
 0xa24   : > { %11536 = vrot.lane.b32.xlu0 %v11535_v36, %s12267_s6  ;;  %v19008_v10 = vrot.slane %v15478_v33, 1  ;;  %v11555_v11 = vpack.i.bf16 %v4817_v48, %v4794_v62  ;;  %vm19312_vm9 = vcmp.ge.s32.totalorder %v12690_v13, 30  ;;  %v4583_v52 = vrot.slane %v15480_v39, 5 }
 0xa25   : > { %v4788_v40 = vrot.slane %v15658_v26, 2  ;;  %v4644_v57 = vrot.slane %v15658_v26, 6  ;;  %v15691_v31 = vsel %vm19312_vm9, 0.0, %v4805_v30  ;;  %v19009_v21 = vrot.slane %v15484_v41, 5 }
 0xa26   : > { %11531 = vrot.lane.b32.xlu1 %v11530_v50, %s12267_s6  ;;  %v11560_v34 = vpack.i.bf16 %v15675_v25, %v15679_v61  ;;  %v15708_v7 = vsel %vm622_vm1, %v4727_v4, %v4728_v29  ;;  %v15714_v15 = vsel %vm622_vm1, %v19008_v10, %v4727_v4  ;;  %v4582_v36 = vrot.slane %v15478_v33, 5 }
 0xa27   : > { %v4791_v46 = vsel %vm671_vm2, %v4787_v51, %v4788_v40  ;;  %v4646_v2 = vsel %vm524_vm13, %v4644_v57, %v4645_v5  ;;  %v4678_v47 = vrot.slane %v15478_v33, 7  ;;  %v4679_v8 = vrot.slane %v15480_v39, 7 }
 0xa28   : > { %11546 = vrot.lane.b32.xlu0 %v11545_v19, %s12267_s6  ;;  %v19011_v5 = vrot.slane %v15484_v41, 7  ;;  %v4825_v51 = vrot.slane %v15486_v16, 3  ;;  %v4826_v12 = vrot.slane %v15488_v59, 3  ;;  %v4680_v50 = vrot.slane %v15482_v35, 7 }
 0xa29   : > { %v15726_v62 = vsel %vm19035_vm3, %v4582_v36, %v4583_v52  ;;  %v15732_v48 = vsel %vm19035_vm3, %v19009_v21, %v4582_v36  ;;  %v15736_v39 = vsel %vm573_vm0, %v4678_v47, %v4679_v8  ;;  %v4681_v19 = vrot.slane %v15486_v16, 7 }
 0xa2a   : > { %11541 = vrot.lane.b32.xlu1 %v11540_v54, %s12267_s6  ;;  %v4647_v30 = vsel %vm524_vm13, %v4643_v32, %v4644_v57  ;;  %v15746_v4 = vsel %vm573_vm0, %v19011_v5, %v4678_v47  ;;  %v4849_v25 = vsel %vm2245_vm11, %v4825_v51, %v4826_v12  ;;  %v15754_v61 = vsel %vm2245_vm11, %v4824_v45, %v4825_v51 }
 0xa2b   : > { %v11565_v36 = vpack.i.bf16 %v4791_v46, %v4792_v22  ;;  %vm19313_vm7 = vcmp.ge.s32.totalorder %v19305_v55, 29  ;;  %v15762_v32 = vsel %vm573_vm0, %v4680_v50, %v4681_v19  ;;  %v15766_v57 = vsel %vm573_vm0, %v4679_v8, %v4680_v50 }
 0xa2c   : > { %v15758_v54 = vsel %vm19313_vm7, 0.0, %v4849_v25  ;;  %11551 = vrot.lane.b32.xlu0 %v11550_v49, %s12267_s6  ;;  %v4584_v45 = vrot.slane %v15482_v35, 5  ;;  %v4585_v22 = vrot.slane %v15486_v16, 5  ;;  %v4729_v46 = vrot.slane %v15486_v16, 1 }
 0xa2d   : > { %v4730_v51 = vrot.slane %v15488_v59, 1  ;;  %v4682_v25 = vrot.slane %v15488_v59, 7  ;;  %v4683_v10 = vrot.slane %v15490_v9, 7  ;;  %v4827_v8 = vrot.slane %v15490_v9, 3 }
 0xa2e   : > { %11556 = vrot.lane.b32.xlu1 %v11555_v11, %s12267_s6  ;;  %v15781_v49 = vsel %vm19035_vm3, %v4584_v45, %v4585_v22  ;;  %v15785_v35 = vsel %vm19035_vm3, %v4583_v52, %v4584_v45  ;;  %v15789_v16 = vsel %vm622_vm1, %v4728_v29, %v4729_v46  ;;  %v4828_v50 = vrot.slane %v15492_v63, 3 }
 0xa2f   : > { %v15794_v47 = vsel %vm622_vm1, %v4729_v46, %v4730_v51  ;;  %v15798_v11 = vsel %vm573_vm0, %v4682_v25, %v4683_v10  ;;  %v15802_v21 = vsel %vm573_vm0, %v4681_v19, %v4682_v25  ;;  %v15806_v52 = vsel %vm2245_vm11, %v4826_v12, %v4827_v8 }
 0xa30   : > { %11566 = vrot.lane.b32.xlu0 %v11565_v36, %s12267_s6  ;;  %v11575_v29 = vpack.i.bf16 %v4646_v2, %v4647_v30  ;;  %v11570_v45 = vpack.i.bf16 %v15484_v41, %v15658_v26  ;;  %v15813_v46 = vsel %vm2245_vm11, %v4827_v8, %v4828_v50  ;;  %v4586_v58 = vrot.slane %v15488_v59, 5 }
 0xa31   : > { %v4587_v25 = vrot.slane %v15490_v9, 5  ;;  %v4731_v12 = vrot.slane %v15490_v9, 1  ;;  %v4732_v5 = vrot.slane %v15492_v63, 1  ;;  %v4684_v30 = vrot.slane %v15492_v63, 7 }
 0xa32   : > { %11561 = vrot.lane.b32.xlu1 %v11560_v34, %s12267_s6  ;;  %v15824_v2 = vsel %vm19035_vm3, %v4585_v22, %v4586_v58  ;;  %v4685_v36 = vrot.slane %v15579_v37, 7  ;;  %v4829_v59 = vrot.slane %v15579_v37, 3  ;;  %v4790_v9 = vsel %vm671_vm2, %v4788_v40, %v4789_v38 }
 0xa33   : > { %v15837_v34 = vsel %vm19035_vm3, %v4586_v58, %v4587_v25  ;;  %v15841_v22 = vsel %vm622_vm1, %v4731_v12, %v4732_v5  ;;  %v15845_v8 = vsel %vm622_vm1, %v4730_v51, %v4731_v12  ;;  %v15854_v38 = vsel %vm573_vm0, %v4683_v10, %v4684_v30 }
 0xa34   : > { %11576 = vrot.lane.b32.xlu0 %v11575_v29, %s12267_s6  ;;  %v15850_v19 = vsel %vm573_vm0, %v4684_v30, %v4685_v36  ;;  %v4830_v58 = vrot.slane %v15589_v44, 3  ;;  %v15859_v40 = vsel %vm2245_vm11, %v4828_v50, %v4829_v59  ;;  %v4588_v6 = vrot.slane %v15492_v63, 5 }
 0xa35   : > { %v4589_v51 = vrot.slane %v15579_v37, 5  ;;  %v4733_v29 = vrot.slane %v15579_v37, 1  ;;  %v4734_v12 = vrot.slane %v15589_v44, 1  ;;  %v4686_v30 = vrot.slane %v15589_v44, 7 }
 0xa36   : > { %11571 = vrot.lane.b32.xlu1 %v11570_v45, %s12267_s6  ;;  %v4845_v10 = vsel %vm2245_vm11, %v4829_v59, %v4830_v58  ;;  %v4687_v28 = vrot.slane %v15595_v23, 7  ;;  %v4831_v50 = vrot.slane %v15595_v23, 3  ;;  %vm19314_vm9 = vcmp.ge.s32.totalorder %v19307_v56, 29 }
 0xa37   : > { %v15873_v63 = vsel %vm19314_vm9, 0.0, %v4845_v10  ;;  %v15877_v37 = vsel %vm19035_vm3, %v4588_v6, %v4589_v51  ;;  %v15881_v45 = vsel %vm19035_vm3, %v4587_v25, %v4588_v6  ;;  %v15885_v59 = vsel %vm622_vm1, %v4733_v29, %v4734_v12 }
 0xa38   : > { %v11580_v17 = vpack.i.bf16 %v15691_v31, %v4790_v9  ;;  %v15892_v10 = vsel %vm622_vm1, %v4732_v5, %v4733_v29  ;;  %v15896_v0 = vsel %vm573_vm0, %v4686_v30, %v4687_v28  ;;  %v15900_v6 = vsel %vm573_vm0, %v4685_v36, %v4686_v30 }
 0xa39   : > { %v4832_v25 = vrot.slane %v15597_v18, 3  ;;  %v15905_v31 = vsel %vm2245_vm11, %v4830_v58, %v4831_v50  ;;  %v4590_v9 = vrot.slane %v15589_v44, 5  ;;  %v4591_v5 = vrot.slane %v15595_v23, 5 }
 0xa3a   : > { %19315 = vst [vmem:[#allocation44_spill] sm:$0xff] %v15905_v31  ;;  %11581 = vrot.lane.b32.xlu1 %v11580_v17, %s12267_s6  ;;  %v4735_v29 = vrot.slane %v15595_v23, 1  ;;  %v4736_v20 = vrot.slane %v15597_v18, 1  ;;  %v4688_v58 = vrot.slane %v15597_v18, 7  ;;  %v4689_v44 = vrot.slane %v15603_v42, 7 }
 0xa3b   : > { %v15914_v36 = vsel %vm2245_vm11, %v4831_v50, %v4832_v25  ;;  %v15918_v30 = vsel %vm19035_vm3, %v4589_v51, %v4590_v9  ;;  %v15926_v23 = vsel %vm19035_vm3, %v4590_v9, %v4591_v5  ;;  %v4833_v17 = vrot.slane %v15603_v42, 3 }
 0xa3c   : > { %19316 = vst [vmem:[#allocation47_spill] sm:$0xff] %v15914_v36  ;;  %19317 = vst [vmem:[#allocation53_spill] sm:$0xff] %v15918_v30  ;;  %v15930_v24 = vsel %vm622_vm1, %v4735_v29, %v4736_v20  ;;  %v15934_v50 = vsel %vm622_vm1, %v4734_v12, %v4735_v29  ;;  %v15938_v51 = vsel %vm573_vm0, %v4688_v58, %v4689_v44  ;;  %v4834_v9 = vrot.slane %v15633_v60, 3 }
 0xa3d   : > { %19318 = vst [vmem:[#allocation54_spill] sm:$0xff] %v15926_v23  ;;  %19319 = vst [vmem:[#allocation22_spill] sm:$0xff] %v15930_v24  ;;  %v15942_v30 = vsel %vm573_vm0, %v4687_v28, %v4688_v58  ;;  %v4592_v31 = vrot.slane %v15597_v18, 5  ;;  %v4593_v36 = vrot.slane %v15603_v42, 5  ;;  %v4737_v23 = vrot.slane %v15603_v42, 1 }
 0xa3e   : > { %19320 = vst [vmem:[#allocation16_spill] sm:$0xff] %v15938_v51  ;;  %19321 = vst [vmem:[#allocation21_spill] sm:$0xff] %v15942_v30  ;;  %v15951_v12 = vsel %vm2245_vm11, %v4832_v25, %v4833_v17  ;;  %v4738_v29 = vrot.slane %v15633_v60, 1  ;;  %v4690_v51 = vrot.slane %v15633_v60, 7  ;;  %v4691_v28 = vrot.slane %v15637_v43, 7 }
 0xa3f   : > { %19322 = vst [vmem:[#allocation17_spill] sm:$0xff] %v15951_v12  ;;  %v4841_v58 = vsel %vm2245_vm11, %v4833_v17, %v4834_v9  ;;  %v15960_v18 = vsel %vm19035_vm3, %v4592_v31, %v4593_v36  ;;  %v15964_v42 = vsel %vm19035_vm3, %v4591_v5, %v4592_v31  ;;  %v15968_v25 = vsel %vm622_vm1, %v4736_v20, %v4737_v23 }
 0xa40   : > { %19323 = vst [vmem:[#allocation19_spill] sm:$0xff] %v15968_v25  ;;  %vm19324_vm7 = vcmp.ge.s32.totalorder %v12578_v53, 29  ;;  %v15976_v24 = vsel %vm622_vm1, %v4737_v23, %v4738_v29  ;;  %v15980_v17 = vsel %vm573_vm0, %v4690_v51, %v4691_v28  ;;  %v15984_v31 = vsel %vm573_vm0, %v4689_v44, %v4690_v51 }
 0xa41   : > { %v15972_v30 = vsel %vm19324_vm7, 0.0, %v4841_v58  ;;  %19326 = vst [vmem:[#allocation36_spill] sm:$0xff] %v15976_v24  ;;  %19327 = vst [vmem:[#allocation25_spill] sm:$0xff] %v15980_v17  ;;  %v4835_v5 = vrot.slane %v15637_v43, 3  ;;  %v4836_v58 = vrot.slane %v15658_v26, 3  ;;  %v4594_v25 = vrot.slane %v15633_v60, 5 }
 0xa42   : > { %19325 = vst [vmem:[#allocation37_spill] sm:$0xff] %v15972_v30  ;;  %v4595_v23 = vrot.slane %v15637_v43, 5  ;;  %v4739_v53 = vrot.slane %v15637_v43, 1  ;;  %v4740_v44 = vrot.slane %v15658_v26, 1  ;;  %v4692_v51 = vrot.slane %v15658_v26, 7 }
 0xa43   : > { %v15995_v24 = vsel %vm2245_vm11, %v4834_v9, %v4835_v5  ;;  %v4837_v20 = vrot.slane %v15484_v41, 3  ;;  %v16002_v12 = vsel %vm2245_vm11, %v4835_v5, %v4836_v58  ;;  %v16010_v43 = vsel %vm19035_vm3, %v4593_v36, %v4594_v25 }
 0xa44   : > { %19328 = vst [vmem:[#allocation27_spill] sm:$0xff] %v15995_v24  ;;  %19329 = vst [vmem:[#allocation56_spill] sm:$0xff] %v16002_v12  ;;  %v16006_v60 = vsel %vm19035_vm3, %v4594_v25, %v4595_v23  ;;  %v16014_v9 = vsel %vm622_vm1, %v4738_v29, %v4739_v53  ;;  %v16020_v17 = vsel %vm622_vm1, %v4739_v53, %v4740_v44  ;;  %v19331_v5 = vrot.slane %v15484_v41, 7 }
 0xa45   : > { %19330 = vst [vmem:[#allocation52_spill] sm:$0xff] %v16006_v60  ;;  %v16030_v36 = vsel %vm573_vm0, %v4691_v28, %v4692_v51  ;;  %v16034_v29 = vsel %vm2245_vm11, %v4836_v58, %v4837_v20  ;;  %v19333_v25 = vrot.slane %v15478_v33, 3  ;;  %v4596_v30 = vrot.slane %v15658_v26, 5 }
 0xa46   : > { %v16026_v60 = vsel %vm573_vm0, %v4692_v51, %v19331_v5  ;;  %19332 = vst [vmem:[#allocation31_spill] sm:$0xff] %v16034_v29  ;;  %vm19334_vm9 = vcmp.ge.s32.totalorder %v12690_v13, 29  ;;  %v4741_v5 = vrot.slane %v15484_v41, 1  ;;  %v19336_v51 = vrot.slane %v15484_v41, 5 }
 0xa47   : > { %v4853_v53 = vsel %vm2245_vm11, %v4837_v20, %v19333_v25  ;;  %v16056_v20 = vsel %vm19035_vm3, %v4595_v23, %v4596_v30  ;;  %v19338_v25 = vrot.slane %v15478_v33, 1  ;;  %vm19339_vm7 = vcmp.lt.s32.totalorder %v12382_v3, 1 }
 0xa48   : > { %v16043_v24 = vsel %vm19334_vm9, 0.0, %v4853_v53  ;;  %v16052_v58 = vsel %vm19035_vm3, %v4596_v30, %v19336_v51  ;;  %v16060_v26 = vsel %vm622_vm1, %v4740_v44, %v4741_v5  ;;  %v4710_v51 = vsel %vm19339_vm7, 0.0, %v15746_v4 }
 0xa49   : > { %19335 = vst [vmem:[#allocation34_spill] sm:$0xff] %v16043_v24  ;;  %19337 = vst [vmem:[#allocation40_spill] sm:$0xff] %v16060_v26  ;;  %v16066_v53 = vsel %vm622_vm1, %v4741_v5, %v19338_v25  ;;  %vm19340_vm9 = vcmp.lt.s32.totalorder %v12382_v3, 3  ;;  %vm19342_vm7 = vcmp.lt.s32.totalorder %v19213_v27, 3  ;;  %vm19385_vm3 = vcmp.ge.s32.totalorder %v12690_v13, 31 }
 0xa4a   : > { %v4614_v4 = vsel %vm19340_vm9, 0.0, %v15732_v48  ;;  %vm19344_vm9 = vcmp.lt.s32.totalorder %v19292_v14, 1 }
 0xa7a   : > { %v11467_v28 = vpop.permute.xlu0 %11466 }
 0xa7b   : > { %v11469_v41 = vunpack.i.h.bf16 %v11467_v28  ;;  %v11468_v29 = vunpack.i.l.bf16 %v11467_v28 }
 0xa7d   : > { %v5078_v30 = vsel %vm1700_vm15, %v4710_v51, %v11468_v29  ;;  %v5079_v23 = vsel %vm1700_vm15, %v15736_v39, %v11469_v41 }
 0xa7e   : > { %v11477_v44 = vpop.permute.xlu0 %11476  ;;  %v5168_v24 = vpack.c.bf16 %v5079_v23, %v5078_v30 }
 0xa7f   : > { %v11479_v26 = vunpack.i.h.bf16 %v11477_v44  ;;  %v11478_v33 = vunpack.i.l.bf16 %v11477_v44 }
 0xa80   : > { %v11472_v12 = vpop.permute.xlu1 %11471  ;;  %5427 = vmatprep.mubr.bf16.mxu1 %v5168_v24 }
 0xa81   : > { %v5095_v5 = vsel %vm1700_vm15, %v15708_v7, %v11479_v26  ;;  %v5094_v28 = vsel %vm1700_vm15, %v15714_v15, %v11478_v33  ;;  %v11474_v25 = vunpack.i.h.bf16 %v11472_v12  ;;  %v11473_v1 = vunpack.i.l.bf16 %v11472_v12 }
 0xa82   : > { %v11487_v29 = vpop.permute.xlu0 %11486  ;;  %v5169_v39 = vpack.c.bf16 %v5095_v5, %v5094_v28  ;;  %v19341_v12 = vpack.c.bf16 %v15758_v54, %v15754_v61 }
 0xa83   : > { %v5062_v41 = vsel %vm1700_vm15, %v4614_v4, %v11473_v1  ;;  %v5063_v51 = vsel %vm1700_vm15, %v15726_v62, %v11474_v25  ;;  %v11489_v24 = vunpack.i.h.bf16 %v11487_v29  ;;  %v11488_v30 = vunpack.i.l.bf16 %v11487_v29 }
 0xa84   : > { %v5167_v23 = vpack.c.bf16 %v5063_v51, %v5062_v41  ;;  %v11482_v7 = vpop.permute.xlu1 %11481  ;;  %5525 = vmatmul.mubr.bf16.vlgmr.msra.gmra.mrb[104].mxu0 %v5169_v39 }
 0xa85   : > { %v11484_v26 = vunpack.i.h.bf16 %v11482_v7  ;;  %v11483_v15 = vunpack.i.l.bf16 %v11482_v7  ;;  %10083 = vmatprep.mubr.msk.bf16.mxu0 %vm1700_vm15, %v19341_v12  ;;  %v5064_v48 = vsel %vm1700_vm15, %v15785_v35, %v11488_v30  ;;  %v5065_v1 = vsel %vm1700_vm15, %v15781_v49, %v11489_v24 }
 0xa86   : > { %5428 = vmatmul.mubr.bf16.vlgmr.msra.gmra.mrb[96].mxu1 %v5167_v23  ;;  %v11492_v62 = vpop.permute.xlu0 %11491  ;;  %v5171_v44 = vpack.c.bf16 %v5065_v1, %v5064_v48  ;;  %v4714_v35 = vsel %vm448_vm6, 0.0, %v15802_v21  ;;  %v4618_v48 = vsel %vm19342_vm7, 0.0, %v15824_v2  ;;  %v19343_v1 = vpack.c.bf16 %v15813_v46, %v15806_v52 }
 0xa87   : > { %v11494_v33 = vunpack.i.h.bf16 %v11492_v62  ;;  %v11493_v5 = vunpack.i.l.bf16 %v11492_v62  ;;  %v5080_v28 = vsel %vm1700_vm15, %v15766_v57, %v11483_v15  ;;  %v5081_v25 = vsel %vm1700_vm15, %v15762_v32, %v11484_v26 }
 0xa88   : > { %v11497_v61 = vpop.permute.xlu1 %11496  ;;  %v5172_v54 = vpack.c.bf16 %v5081_v25, %v5080_v28  ;;  %v4761_v57 = vsel %vm431_vm4, 0.0, %v15794_v47  ;;  %vm19345_vm7 = vcmp.ge.s32.totalorder %v19307_v56, 31 }
 0xa89   : > { %v11499_v4 = vunpack.i.h.bf16 %v11497_v61  ;;  %v11498_v29 = vunpack.i.l.bf16 %v11497_v61  ;;  %v5082_v49 = vsel %vm1700_vm15, %v4714_v35, %v11493_v5  ;;  %v5083_v39 = vsel %vm1700_vm15, %v15798_v11, %v11494_v33 }
 0xa8a   : > { %5435 = vmatprep.mubr.bf16.mxu1 %v5172_v54  ;;  %v11507_v41 = vpop.permute.xlu0 %11506  ;;  %v5176_v32 = vpack.c.bf16 %v5083_v39, %v5082_v49  ;;  %v4718_v39 = vsel %vm19344_vm9, 0.0, %v15900_v6  ;;  %vm19349_vm9 = vcmp.lt.s32.totalorder %v19292_v14, 3 }
 0xa8b   : > { %v11509_v51 = vunpack.i.h.bf16 %v11507_v41  ;;  %v11508_v24 = vunpack.i.l.bf16 %v11507_v41  ;;  %v5096_v30 = vsel %vm1700_vm15, %v15789_v16, %v11498_v29  ;;  %v5097_v21 = vsel %vm1700_vm15, %v4761_v57, %v11499_v4 }
 0xa8c   : > { %v11502_v23 = vpop.permute.xlu1 %11501  ;;  %v5173_v7 = vpack.c.bf16 %v5097_v21, %v5096_v30 }
 0xa8d   : > { %v11504_v26 = vunpack.i.h.bf16 %v11502_v23  ;;  %v11503_v15 = vunpack.i.l.bf16 %v11502_v23  ;;  %v5098_v11 = vsel %vm1700_vm15, %v15845_v8, %v11508_v24  ;;  %v5099_v12 = vsel %vm1700_vm15, %v15841_v22, %v11509_v51 }
 0xa8e   : > { %5436 = vmatmul.mubr.bf16.gmra.mrb[100].mxu1 %v5171_v44  ;;  %5533 = vmatmul.mubr.bf16.gmra.mrb[108].mxu0 %v5173_v7  ;;  %v11517_v47 = vpop.permute.xlu0 %11516  ;;  %v5177_v16 = vpack.c.bf16 %v5099_v12, %v5098_v11  ;;  %v19346_v51 = vpack.c.bf16 %v15873_v63, %v15859_v40  ;;  %v19348_v63 = vld [vmem:[#allocation53_spill] sm:$0xff] }
 0xa8f   : > { %5443 = vmatprep.mubr.bf16.mxu1 %v5176_v32  ;;  %10084 = vmatprep.mubr.msk.bf16.mxu0 %vm1700_vm15, %v19343_v1  ;;  %v11519_v62 = vunpack.i.h.bf16 %v11517_v47  ;;  %v11518_v33 = vunpack.i.l.bf16 %v11517_v47  ;;  %v5066_v8 = vsel %vm1700_vm15, %v4618_v48, %v11503_v15  ;;  %v5067_v22 = vsel %vm1700_vm15, %v15837_v34, %v11504_v26  ;;  %v19347_v15 = vld [vmem:[#allocation22_spill] sm:$0xff] }
 0xa90   : > { %v11512_v44 = vpop.permute.xlu1 %11511  ;;  %v5175_v5 = vpack.c.bf16 %v5067_v22, %v5066_v8  ;;  %v4622_v12 = vsel %vm19349_vm9, 0.0, %v19348_v63  ;;  %v19350_v1 = vld [vmem:[#allocation54_spill] sm:$0xff] }
 0xa91   : > { %v11514_v28 = vunpack.i.h.bf16 %v11512_v44  ;;  %v11513_v25 = vunpack.i.l.bf16 %v11512_v44  ;;  %v5068_v2 = vsel %vm1700_vm15, %v15881_v45, %v11518_v33  ;;  %v5069_v61 = vsel %vm1700_vm15, %v15877_v37, %v11519_v62 }
 0xa92   : > { %v11522_v52 = vpop.permute.xlu0 %11521  ;;  %v5179_v46 = vpack.c.bf16 %v5069_v61, %v5068_v2  ;;  %v19351_v2 = vld [vmem:[#allocation47_spill] sm:$0xff]  ;;  %v19352_v61 = vld [vmem:[#allocation44_spill] sm:$0xff] }
 0xa93   : > { %v11524_v54 = vunpack.i.h.bf16 %v11522_v52  ;;  %v11523_v35 = vunpack.i.l.bf16 %v11522_v52  ;;  %v5084_v4 = vsel %vm1700_vm15, %v15854_v38, %v11513_v25  ;;  %v5085_v34 = vsel %vm1700_vm15, %v15850_v19, %v11514_v28 }
 0xa94   : > { %v11527_v29 = vpop.permute.xlu1 %11526  ;;  %v5180_v49 = vpack.c.bf16 %v5085_v34, %v5084_v4  ;;  %v4765_v19 = vsel %vm19345_vm7, 0.0, %v15885_v59  ;;  %v19353_v52 = vpack.c.bf16 %v19351_v2, %v19352_v61  ;;  %v19354_v4 = vld [vmem:[#allocation21_spill] sm:$0xff] }
 0xa95   : > { %v11529_v45 = vunpack.i.h.bf16 %v11527_v29  ;;  %v11528_v41 = vunpack.i.l.bf16 %v11527_v29  ;;  %v5086_v37 = vsel %vm1700_vm15, %v4718_v39, %v11523_v35  ;;  %v5087_v57 = vsel %vm1700_vm15, %v15896_v0, %v11524_v54  ;;  %v19355_v29 = vld [vmem:[#allocation16_spill] sm:$0xff] }
 0xa96   : > { %5444 = vmatmul.mubr.bf16.gmra.mrb[104].mxu1 %v5175_v5  ;;  %5541 = vmatmul.mubr.bf16.gmra.mrb[112].mxu0 %v5177_v16  ;;  %v11537_v32 = vpop.permute.xlu0 %11536  ;;  %v5184_v38 = vpack.c.bf16 %v5087_v57, %v5086_v37  ;;  %v19358_v57 = vld [vmem:[#allocation25_spill] sm:$0xff] }
 0xa97   : > { %5451 = vmatprep.mubr.bf16.mxu1 %v5180_v49  ;;  %10085 = vmatprep.mubr.msk.bf16.mxu0 %vm1700_vm15, %v19346_v51  ;;  %v11539_v6 = vunpack.i.h.bf16 %v11537_v32  ;;  %v11538_v24 = vunpack.i.l.bf16 %v11537_v32  ;;  %v5100_v30 = vsel %vm1700_vm15, %v15892_v10, %v11528_v41  ;;  %v5101_v0 = vsel %vm1700_vm15, %v4765_v19, %v11529_v45  ;;  %v19360_v51 = vld [vmem:[#allocation14_spill] sm:$0xff] }
 0xa98   : > { %v11532_v21 = vpop.permute.xlu1 %11531  ;;  %v5181_v23 = vpack.c.bf16 %v5101_v0, %v5100_v30  ;;  %vm19361_vm9 = vcmp.ge.s32.totalorder %v19360_v51, 31 }
 0xa99   : > { %v11534_v7 = vunpack.i.h.bf16 %v11532_v21  ;;  %v11533_v26 = vunpack.i.l.bf16 %v11532_v21  ;;  %v5102_v59 = vsel %vm1700_vm15, %v15934_v50, %v11538_v24  ;;  %v5103_v11 = vsel %vm1700_vm15, %v19347_v15, %v11539_v6  ;;  %v19362_v21 = vld [vmem:[#allocation19_spill] sm:$0xff] }
 0xa9a   : > { %v11547_v40 = vpop.permute.xlu0 %11546  ;;  %v5185_v47 = vpack.c.bf16 %v5103_v11, %v5102_v59 }
 0xa9b   : > { %v11549_v48 = vunpack.i.h.bf16 %v11547_v40  ;;  %v11548_v10 = vunpack.i.l.bf16 %v11547_v40  ;;  %v5070_v16 = vsel %vm1700_vm15, %v4622_v12, %v11533_v26  ;;  %v5071_v62 = vsel %vm1700_vm15, %v19350_v1, %v11534_v7 }
 0xa9c   : > { %v11542_v33 = vpop.permute.xlu1 %11541  ;;  %v5183_v8 = vpack.c.bf16 %v5071_v62, %v5070_v16  ;;  %v19365_v16 = vld [vmem:[#allocation17_spill] sm:$0xff] }
 0xa9d   : > { %v11544_v22 = vunpack.i.h.bf16 %v11542_v33  ;;  %v11543_v50 = vunpack.i.l.bf16 %v11542_v33  ;;  %v5072_v44 = vsel %vm1700_vm15, %v15964_v42, %v11548_v10  ;;  %v5073_v5 = vsel %vm1700_vm15, %v15960_v18, %v11549_v48  ;;  %v19364_v10 = vld [vmem:[#allocation37_spill] sm:$0xff] }
 0xa9e   : > { %5452 = vmatmul.mubr.bf16.gmra.mrb[108].mxu1 %v5179_v46  ;;  %5549 = vmatmul.mubr.bf16.gmra.mrb[116].mxu0 %v5181_v23  ;;  %v11552_v28 = vpop.permute.xlu0 %11551  ;;  %v5187_v25 = vpack.c.bf16 %v5073_v5, %v5072_v44  ;;  %v19356_v46 = vld [vmem:[#allocation15_spill] sm:$0xff]  ;;  %v19366_v1 = vpack.c.bf16 %v19364_v10, %v19365_v16 }
 0xa9f   : > { %5459 = vmatprep.mubr.bf16.mxu1 %v5184_v38  ;;  %10086 = vmatprep.mubr.msk.bf16.mxu0 %vm1700_vm15, %v19353_v52  ;;  %v11554_v54 = vunpack.i.h.bf16 %v11552_v28  ;;  %v11553_v35 = vunpack.i.l.bf16 %v11552_v28  ;;  %v5088_v34 = vsel %vm1700_vm15, %v19354_v4, %v11543_v50  ;;  %v5089_v42 = vsel %vm1700_vm15, %v19355_v29, %v11544_v22  ;;  %v19359_v38 = vld [vmem:[#allocation36_spill] sm:$0xff] }
 0xaa0   : > { %v11557_v49 = vpop.permute.xlu1 %11556  ;;  %v5188_v18 = vpack.c.bf16 %v5089_v42, %v5088_v34  ;;  %vm19357_vm7 = vcmp.lt.s32.totalorder %v19356_v46, 1  ;;  %v4769_v6 = vsel %vm19361_vm9, 0.0, %v19359_v38  ;;  %v19367_v22 = vld [vmem:[#allocation52_spill] sm:$0xff]  ;;  %vm19368_vm9 = vcmp.ge.s32.totalorder %v12690_v13, 31  ;;  %v12053_v38 = vld [vmem:[#allocation2 + $0x388] sm:$0xff]  }
 0xaa1   : > { %v4722_v39 = vsel %vm19357_vm7, 0.0, %v15984_v31  ;;  %v11559_v45 = vunpack.i.h.bf16 %v11557_v49  ;;  %v11558_v41 = vunpack.i.l.bf16 %v11557_v49  ;;  %v5091_v32 = vsel %vm1700_vm15, %v19358_v57, %v11554_v54  ;;  %v19369_v34 = vld [vmem:[#allocation56_spill] sm:$0xff] }
 0xaa2   : > { %v5090_v37 = vsel %vm1700_vm15, %v4722_v39, %v11553_v35  ;;  %v11567_v19 = vpop.permute.xlu0 %11566  ;;  %vm19363_vm7 = vcmp.lt.s32.totalorder %v19356_v46, 3  ;;  %v19376_v57 = vmov 0.0  }
 0xaa3   : > { %v5192_v24 = vpack.c.bf16 %v5091_v32, %v5090_v37  ;;  %v11569_v30 = vunpack.i.h.bf16 %v11567_v19  ;;  %v11568_v0 = vunpack.i.l.bf16 %v11567_v19  ;;  %v5104_v23 = vsel %vm1700_vm15, %v19362_v21, %v11558_v41  ;;  %v12049_v41 = vld [vmem:[#allocation2 + $0x3d0] sm:$0xff]   ;;  %v12050_v37 = vld [vmem:[#allocation2 + $0x3d8] sm:$0xff]   ;;  %v12051_v32 = vld [vmem:[#allocation2 + $0x380] sm:$0xff]  }
 0xaa4   : > { %v5105_v31 = vsel %vm1700_vm15, %v4769_v6, %v11559_v45  ;;  %v11562_v7 = vpop.permute.xlu1 %11561  ;;  %v4626_v12 = vsel %vm19363_vm7, 0.0, %v16010_v43  ;;  %v12048_v45 = vld [vmem:[#allocation2 + $0x3c8] sm:$0xff]   ;;  %v12052_v19 = vld [vmem:[#allocation2 + $0x340] sm:$0xff]   ;;  %10475 = vmatprep.subr.bf16.mxu1 %v12051_v32  ;;  %vm19378_vm7 = vcmp.ge.s32.totalorder %v19307_v56, 31 }
 0xaa5   : > { %v5189_v26 = vpack.c.bf16 %v5105_v31, %v5104_v23  ;;  %v11564_v59 = vunpack.i.h.bf16 %v11562_v7  ;;  %v11563_v15 = vunpack.i.l.bf16 %v11562_v7  ;;  %v5106_v11 = vsel %vm1700_vm15, %v16014_v9, %v11568_v0  ;;  %10476 = vmatpush3.bf16.msra.mxu1 %v12052_v19  ;;  %v16220_v21 = vld [vmem:[%s18924_s2 + $0x7] ss:$0 sm:$0xff]  ;;  %v19377_v19 = vld [vmem:[#allocation8_spill] sm:$0xff] }
 0xaa6   : > { %v5107_v40 = vsel %vm1700_vm15, %v16020_v17, %v11569_v30  ;;  %5460 = vmatmul.mubr.bf16.gmra.mrb[112].mxu1 %v5183_v8  ;;  %5557 = vmatmul.mubr.bf16.gmra.mrb[120].mxu0 %v5185_v47  ;;  %v11577_v63 = vpop.permute.xlu0 %11576 }
 0xaa7   : > { %v5193_v48 = vpack.c.bf16 %v5107_v40, %v5106_v11  ;;  %5467 = vmatprep.mubr.bf16.mxu1 %v5188_v18  ;;  %10087 = vmatprep.mubr.msk.bf16.mxu0 %vm1700_vm15, %v19366_v1  ;;  %v11579_v62 = vunpack.i.h.bf16 %v11577_v63  ;;  %v11578_v33 = vunpack.i.l.bf16 %v11577_v63  ;;  %v5074_v9 = vsel %vm1700_vm15, %v4626_v12, %v11563_v15  ;;  %v19374_v18 = vld [vmem:[#allocation31_spill] sm:$0xff] }
 0xaa8   : > { %v5075_v17 = vsel %vm1700_vm15, %v19367_v22, %v11564_v59  ;;  %v11572_v47 = vpop.permute.xlu1 %11571  ;;  %10477 = vmatprep.subr.bf16.mxu1 %v12053_v38 }
 0xaa9   : > { %v5191_v8 = vpack.c.bf16 %v5075_v17, %v5074_v9  ;;  %v11574_v50 = vunpack.i.h.bf16 %v11572_v47  ;;  %v11573_v44 = vunpack.i.l.bf16 %v11572_v47  ;;  %v5076_v43 = vsel %vm1700_vm15, %v16056_v20, %v11578_v33  ;;  %v12054_v47 = vld [vmem:[#allocation2 + $0x348] sm:$0xff]  }
 0xaaa   : > { %v5077_v5 = vsel %vm1700_vm15, %v16052_v58, %v11579_v62  ;;  %v4773_v20 = vsel %vm19368_vm9, 0.0, %v16066_v53  ;;  %v19370_v58 = vld [vmem:[#allocation27_spill] sm:$0xff]  ;;  %v12047_v53 = vld [vmem:[#allocation2 + $0x3c0] sm:$0xff]   ;;  %10478 = vmatpush3.bf16.msra.mxu1 %v12054_v47  ;;  %v12058_v47 = vld [vmem:[#allocation2 + $0x358] sm:$0xff]   ;;  %vm19379_vm9 = vcmp.ge.s32.totalorder %v19360_v51, 30 }
 0xaab   : > { %v5195_v28 = vpack.c.bf16 %v5077_v5, %v5076_v43  ;;  %v5092_v2 = vsel %vm1700_vm15, %v16030_v36, %v11573_v44  ;;  %v5093_v61 = vsel %vm1700_vm15, %v16026_v60, %v11574_v50  ;;  %v19371_v29 = vpack.c.bf16 %v19369_v34, %v19370_v58  ;;  %v19372_v36 = vld [vmem:[#allocation40_spill] sm:$0xff]  ;;  %10770 = vmatprep.subr.bf16.mxu0 %v12047_v53 }
 0xaac   : > { %v11582_v52 = vpop.permute.xlu1 %11581  ;;  %v5196_v54 = vpack.c.bf16 %v5093_v61, %v5092_v2  ;;  %10771 = vmatpush3.bf16.msra.mxu0 %v12047_v53 }
 0xaad   : > { %v11584_v35 = vunpack.i.h.bf16 %v11582_v52  ;;  %v11583_v4 = vunpack.i.l.bf16 %v11582_v52  ;;  %10772 = vmatprep.subr.bf16.mxu0 %v12048_v45 }
 0xaae   : > { %5468 = vmatmul.mubr.bf16.gmra.mrb[116].mxu1 %v5187_v25  ;;  %5565 = vmatmul.mubr.bf16.gmra.mrb[124].mxu0 %v5189_v26  ;;  %v19373_v25 = vld [vmem:[#allocation34_spill] sm:$0xff] }
 0xaaf   : > { %5475 = vmatprep.mubr.bf16.mxu1 %v5192_v24  ;;  %10088 = vmatprep.mubr.msk.bf16.mxu0 %vm1700_vm15, %v19371_v29  ;;  %v5108_v42 = vsel %vm1700_vm15, %v19372_v36, %v11583_v4  ;;  %v5109_v60 = vsel %vm1700_vm15, %v4773_v20, %v11584_v35  ;;  %v19375_v39 = vpack.c.bf16 %v19373_v25, %v19374_v18  ;;  %v12055_v4 = vld [vmem:[#allocation2 + $0x390] sm:$0xff]  }
 0xab0   : > { %v5197_v49 = vpack.c.bf16 %v5109_v60, %v5108_v42  ;;  %10773 = vmatpush3.bf16.msra.mxu0 %v12048_v45  ;;  %v12056_v20 = vld [vmem:[#allocation2 + $0x350] sm:$0xff]   ;;  %10479 = vmatprep.subr.bf16.mxu1 %v12055_v4 }
 0xab1   : > { %10774 = vmatprep.subr.bf16.mxu0 %v12049_v41  ;;  %10480 = vmatpush3.bf16.msra.mxu1 %v12056_v20 }
 0xab4   : > { %10775 = vmatpush3.bf16.msra.mxu0 %v12049_v41  ;;  %v12057_v41 = vld [vmem:[#allocation2 + $0x398] sm:$0xff]  }
 0xab5   : > { %10776 = vmatprep.subr.bf16.mxu0 %v12050_v37  ;;  %10481 = vmatprep.subr.bf16.mxu1 %v12057_v41 }
 0xab6   : > { %5476 = vmatmul.mubr.bf16.gmra.mrb[120].mxu1 %v5191_v8  ;;  %5573 = vmatmul.mubr.bf16.gmra.mrb[128].mxu0 %v5193_v48 }
 0xab7   : > { %5483 = vmatprep.mubr.bf16.mxu1 %v5196_v54  ;;  %10089 = vmatprep.mubr.msk.bf16.mxu0 %vm1700_vm15, %v19375_v39 }
 0xab8   : > { %10777 = vmatpush3.bf16.msra.mxu0 %v12050_v37  ;;  %10482 = vmatpush3.bf16.msra.mxu1 %v12058_v47 }
 0xab9   : > { %10794 = vmatprep.subr.bf16.mxu0 %v19376_v57 }
 0xabe   : > { %5484 = vmatmul.mubr.bf16.gmra.mrb[124].mxu1 %v5195_v28  ;;  %5581 = vmatmul.mubr.bf16.gmra.mrb[132].mxu0 %v5197_v49 }
 0xb57   : > { %v5526_v6 = vpop.f32.mrb[104].mxu0 }
 0xb58   : > { %v5528_v24 = vpop.f32.mrb[105].mxu0 }
 0xb59   : > { %v10427_v30 = vpop.f32.mrb[96].mxu1  ;;  %v5529_v0 = vpop.f32.mrb[106].mxu0 }
 0xb5a   : > { %v10428_v23 = vpop.f32.mrb[97].mxu1  ;;  %v5531_v31 = vpop.f32.mrb[107].mxu0 }
 0xb5b   : > { %v10429_v7 = vadd.f32 %v10428_v23, %v10427_v30  ;;  %v10430_v26 = vpop.f32.mrb[98].mxu1 }
 0xb5c   : > { %v10431_v59 = vpop.f32.mrb[99].mxu1 }
 0xb5d   : > { %v5430_v15 = vadd.f32 %v10429_v7, %v16220_v21  ;;  %v10432_v11 = vadd.f32 %v10431_v59, %v10430_v26 }
 0xb5f   : > { %v16223_v40 = vadd.f32 %v5526_v6, %v5430_v15  ;;  %v5433_v63 = vadd.f32 %v10432_v11, %v16220_v21 }
 0xb61   : > { %v16226_v12 = vadd.f32 %v5529_v0, %v5433_v63  ;;  %v10433_v48 = vpop.f32.mrb[100].mxu1  ;;  %v5534_v10 = vpop.f32.mrb[108].mxu0  ;;  %v16233_v43 = vmax.f32 %v16223_v40, 0.0 }
 0xb62   : > { %v10434_v16 = vpop.f32.mrb[101].mxu1  ;;  %v5536_v1 = vpop.f32.mrb[109].mxu0 }
 0xb63   : > { %v10435_v62 = vadd.f32 %v10434_v16, %v10433_v48  ;;  %v10436_v33 = vpop.f32.mrb[102].mxu1  ;;  %v5537_v9 = vpop.f32.mrb[110].mxu0  ;;  %v16229_v8 = vmax.f32 %v16226_v12, 0.0  ;;  %v5749_v49 = vrot.slane %v16233_v43, 2  ;;  %v19034_v45 = vrot.slane %v16233_v43, 1 }
 0xb64   : > { %v10437_v22 = vpop.f32.mrb[103].mxu1  ;;  %v5539_v17 = vpop.f32.mrb[111].mxu0 }
 0xb65   : > { %v5438_v50 = vadd.f32 %v10435_v62, %v16220_v21  ;;  %v10438_v44 = vadd.f32 %v10437_v22, %v10436_v33  ;;  %v5750_v35 = vrot.slane %v16229_v8, 2  ;;  %v5702_v29 = vrot.slane %v16229_v8, 1 }
 0xb67   : > { %v16235_v5 = vadd.f32 %v5534_v10, %v5438_v50  ;;  %v5441_v28 = vadd.f32 %v10438_v44, %v16220_v21  ;;  %v5779_v6 = vsel %vm671_vm2, %v5749_v49, %v5750_v35  ;;  %v5731_v23 = vsel %vm622_vm1, %v19034_v45, %v5702_v29 }
 0xb69   : > { %v16239_v2 = vmax.f32 %v16235_v5, 0.0  ;;  %v16241_v61 = vadd.f32 %v5537_v9, %v5441_v28  ;;  %v10439_v52 = vpop.f32.mrb[104].mxu1  ;;  %v5542_v54 = vpop.f32.mrb[112].mxu0 }
 0xb6a   : > { %v10440_v34 = vpop.f32.mrb[105].mxu1  ;;  %v5544_v58 = vpop.f32.mrb[113].mxu0 }
 0xb6b   : > { %v10441_v36 = vadd.f32 %v10440_v34, %v10439_v52  ;;  %v10442_v42 = vpop.f32.mrb[106].mxu1  ;;  %v5545_v60 = vpop.f32.mrb[114].mxu0  ;;  %v5751_v25 = vrot.slane %v16239_v2, 2  ;;  %v5703_v18 = vrot.slane %v16239_v2, 1  ;;  %v16257_v24 = vmax.f32 %v16241_v61, 0.0  ;;  %v12059_v52 = vld [vmem:[#allocation2 + $0x3a0] sm:$0xff]  }
 0xb6c   : > { %v10443_v39 = vpop.f32.mrb[107].mxu1  ;;  %v5547_v53 = vpop.f32.mrb[115].mxu0  ;;  %10483 = vmatprep.subr.bf16.mxu1 %v12059_v52 }
 0xb6d   : > { %v5446_v37 = vadd.f32 %v10441_v36, %v16220_v21  ;;  %v10444_v32 = vadd.f32 %v10443_v39, %v10442_v42  ;;  %v5778_v38 = vsel %vm671_vm2, %v5750_v35, %v5751_v25  ;;  %v5730_v0 = vsel %vm622_vm1, %v5702_v29, %v5703_v18  ;;  %v12060_v42 = vld [vmem:[#allocation2 + $0x360] sm:$0xff]  }
 0xb6e   : > { %v6000_v30 = vpack.c.bf16 %v5778_v38, %v5779_v6  ;;  %v11585_v26 = vpack.i.bf16 %v5730_v0, %v5731_v23  ;;  %v5752_v48 = vrot.slane %v16257_v24, 2  ;;  %v5704_v1 = vrot.slane %v16257_v24, 1  ;;  %10484 = vmatpush3.bf16.msra.mxu1 %v12060_v42 }
 0xb6f   : > { %v16265_v31 = vadd.f32 %v5542_v54, %v5446_v37  ;;  %v5449_v7 = vadd.f32 %v10444_v32, %v16220_v21 }
 0xb70   : > { %10778 = vmatprep.mubr.msk.bf16.mxu0 %vm1700_vm15, %v6000_v30  ;;  %11586 = vrot.lane.b32.xlu0 %v11585_v26, %s12267_s6  ;;  %v5777_v34 = vsel %vm671_vm2, %v5751_v25, %v5752_v48  ;;  %v5729_v29 = vsel %vm622_vm1, %v5703_v18, %v5704_v1 }
 0xb71   : > { %v16270_v59 = vmax.f32 %v16265_v31, 0.0  ;;  %v16272_v15 = vadd.f32 %v5545_v60, %v5449_v7  ;;  %v10445_v11 = vpop.f32.mrb[108].mxu1  ;;  %v5550_v63 = vpop.f32.mrb[116].mxu0 }
 0xb72   : > { %v10446_v10 = vpop.f32.mrb[109].mxu1  ;;  %v5552_v16 = vpop.f32.mrb[117].mxu0 }
 0xb73   : > { %v5753_v62 = vrot.slane %v16270_v59, 2  ;;  %v10447_v33 = vadd.f32 %v10446_v10, %v10445_v11  ;;  %v10448_v9 = vpop.f32.mrb[110].mxu1  ;;  %v5553_v22 = vpop.f32.mrb[118].mxu0  ;;  %v5705_v17 = vrot.slane %v16270_v59, 1  ;;  %v16280_v50 = vmax.f32 %v16272_v15, 0.0 }
 0xb74   : > { %v10449_v44 = vpop.f32.mrb[111].mxu1  ;;  %v5555_v28 = vpop.f32.mrb[119].mxu0  ;;  %v5657_v45 = vrot.slane %v16270_v59, 7 }
 0xb75   : > { %v5454_v54 = vadd.f32 %v10447_v33, %v16220_v21  ;;  %v10450_v35 = vadd.f32 %v10449_v44, %v10448_v9  ;;  %v5776_v4 = vsel %vm671_vm2, %v5752_v48, %v5753_v62  ;;  %v5728_v20 = vsel %vm622_vm1, %v5704_v1, %v5705_v17  ;;  %v12061_v33 = vld [vmem:[#allocation2 + $0x3a8] sm:$0xff]  }
 0xb76   : > { %v5784_v58 = vsel %vm415_vm5, 0.0, %v5776_v4  ;;  %v5736_v36 = vsel %vm431_vm4, 0.0, %v5728_v20  ;;  %v5754_v37 = vrot.slane %v16280_v50, 2  ;;  %v5706_v25 = vrot.slane %v16280_v50, 1  ;;  %10485 = vmatprep.subr.bf16.mxu1 %v12061_v33 }
 0xb77   : > { %v16295_v60 = vadd.f32 %v5550_v63, %v5454_v54  ;;  %v5457_v39 = vadd.f32 %v10450_v35, %v16220_v21  ;;  %v6003_v53 = vpack.c.bf16 %v5784_v58, %v5777_v34  ;;  %v11595_v41 = vpack.i.bf16 %v5736_v36, %v5729_v29 }
 0xb78   : > { %v5775_v16 = vsel %vm671_vm2, %v5753_v62, %v5754_v37  ;;  %v5727_v1 = vsel %vm622_vm1, %v5705_v17, %v5706_v25 }
 0xb79   : > { %v16301_v32 = vmax.f32 %v16295_v60, 0.0  ;;  %v16303_v38 = vadd.f32 %v5553_v22, %v5457_v39  ;;  %v10451_v18 = vpop.f32.mrb[112].mxu1  ;;  %v5558_v6 = vpop.f32.mrb[120].mxu0  ;;  %10779 = vmatmul.mubr.msk.bf16.vlgmr.msra.gmra.mrb[136].mxu0 %vm1700_vm15, %v6003_v53  ;;  %11596 = vrot.lane.b32.xlu0 %v11595_v41, %s12267_s6 }
 0xb7a   : > { %v10452_v30 = vpop.f32.mrb[113].mxu1  ;;  %v5560_v0 = vpop.f32.mrb[121].mxu0 }
 0xb7b   : > { %v10453_v23 = vadd.f32 %v10452_v30, %v10451_v18  ;;  %v10454_v7 = vpop.f32.mrb[114].mxu1  ;;  %v5561_v26 = vpop.f32.mrb[122].mxu0  ;;  %v5755_v11 = vrot.slane %v16301_v32, 2  ;;  %v5707_v63 = vrot.slane %v16301_v32, 1  ;;  %v16319_v28 = vmax.f32 %v16303_v38, 0.0  ;;  %v12062_v18 = vld [vmem:[#allocation2 + $0x368] sm:$0xff]  }
 0xb7c   : > { %v10455_v48 = vpop.f32.mrb[115].mxu1  ;;  %v5563_v10 = vpop.f32.mrb[123].mxu0  ;;  %10486 = vmatpush3.bf16.msra.mxu1 %v12062_v18 }
 0xb7d   : > { %v5462_v9 = vadd.f32 %v10453_v23, %v16220_v21  ;;  %v10456_v22 = vadd.f32 %v10455_v48, %v10454_v7  ;;  %v5774_v47 = vsel %vm671_vm2, %v5754_v37, %v5755_v11  ;;  %v5726_v44 = vsel %vm622_vm1, %v5706_v25, %v5707_v63  ;;  %v12063_v23 = vld [vmem:[#allocation2 + $0x3b0] sm:$0xff]  }
 0xb7e   : > { %v6006_v52 = vpack.c.bf16 %v5774_v47, %v5775_v16  ;;  %v11605_v54 = vpack.i.bf16 %v5726_v44, %v5727_v1  ;;  %v5756_v36 = vrot.slane %v16319_v28, 2  ;;  %v5708_v42 = vrot.slane %v16319_v28, 1  ;;  %10487 = vmatprep.subr.bf16.mxu1 %v12063_v23 }
 0xb7f   : > { %v16321_v62 = vadd.f32 %v5558_v6, %v5462_v9  ;;  %v5465_v17 = vadd.f32 %v10456_v22, %v16220_v21  ;;  %v12064_v22 = vld [vmem:[#allocation2 + $0x370] sm:$0xff]  }
 0xb80   : > { %10782 = vmatprep.mubr.msk.bf16.mxu0 %vm1700_vm15, %v6006_v52  ;;  %11606 = vrot.lane.b32.xlu0 %v11605_v54, %s12267_s6  ;;  %v5773_v16 = vsel %vm671_vm2, %v5755_v11, %v5756_v36  ;;  %v5725_v33 = vsel %vm622_vm1, %v5707_v63, %v5708_v42 }
 0xb81   : > { %v16327_v35 = vmax.f32 %v16321_v62, 0.0  ;;  %v16329_v4 = vadd.f32 %v5561_v26, %v5465_v17  ;;  %v10457_v20 = vpop.f32.mrb[116].mxu1  ;;  %v5566_v34 = vpop.f32.mrb[124].mxu0  ;;  %10488 = vmatpush3.bf16.msra.mxu1 %v12064_v22 }
 0xb82   : > { %v10458_v58 = vpop.f32.mrb[117].mxu1  ;;  %v5568_v29 = vpop.f32.mrb[125].mxu0 }
 0xb83   : > { %v10459_v39 = vadd.f32 %v10458_v58, %v10457_v20  ;;  %v10460_v53 = vpop.f32.mrb[118].mxu1  ;;  %v5569_v41 = vpop.f32.mrb[126].mxu0  ;;  %v5757_v37 = vrot.slane %v16327_v35, 2  ;;  %v5709_v25 = vrot.slane %v16327_v35, 1  ;;  %v16336_v6 = vmax.f32 %v16329_v4, 0.0 }
 0xb84   : > { %v10461_v30 = vpop.f32.mrb[119].mxu1  ;;  %v5571_v0 = vpop.f32.mrb[127].mxu0 }
 0xb85   : > { %v5470_v7 = vadd.f32 %v10459_v39, %v16220_v21  ;;  %v10462_v26 = vadd.f32 %v10461_v30, %v10460_v53  ;;  %v5772_v48 = vsel %vm671_vm2, %v5756_v36, %v5757_v37  ;;  %v5724_v10 = vsel %vm622_vm1, %v5708_v42, %v5709_v25 }
 0xb86   : > { %v5788_v1 = vsel %vm419_vm8, 0.0, %v5772_v48  ;;  %v5740_v9 = vsel %vm19378_vm7, 0.0, %v5724_v10  ;;  %v5758_v17 = vrot.slane %v16336_v6, 2  ;;  %v5710_v11 = vrot.slane %v16336_v6, 1 }
 0xb87   : > { %v16351_v47 = vadd.f32 %v5566_v34, %v5470_v7  ;;  %v5473_v44 = vadd.f32 %v10462_v26, %v16220_v21  ;;  %v6009_v52 = vpack.c.bf16 %v5788_v1, %v5773_v16  ;;  %v11615_v54 = vpack.i.bf16 %v5740_v9, %v5725_v33  ;;  %v12065_v26 = vld [vmem:[#allocation2 + $0x3b8] sm:$0xff]  }
 0xb88   : > { %v5723_v7 = vsel %vm622_vm1, %v5709_v25, %v5710_v11  ;;  %10489 = vmatprep.subr.bf16.mxu1 %v12065_v26  ;;  %vm19380_vm7 = vcmp.ge.s32.totalorder %v19360_v51, 31 }
 0xb89   : > { %v16357_v20 = vmax.f32 %v16351_v47, 0.0  ;;  %v16359_v58 = vadd.f32 %v5569_v41, %v5473_v44  ;;  %v10463_v63 = vpop.f32.mrb[120].mxu1  ;;  %v5574_v29 = vpop.f32.mrb[128].mxu0  ;;  %10783 = vmatmul.mubr.msk.bf16.gmra.mrb[140].mxu0 %vm1700_vm15, %v6009_v52  ;;  %11616 = vrot.lane.b32.xlu0 %v11615_v54, %s12267_s6  ;;  %v5771_v41 = vsel %vm671_vm2, %v5757_v37, %v5758_v17 }
 0xb8a   : > { %v10464_v34 = vpop.f32.mrb[121].mxu1  ;;  %v5576_v36 = vpop.f32.mrb[129].mxu0 }
 0xb8b   : > { %v10465_v42 = vadd.f32 %v10464_v34, %v10463_v63  ;;  %v10466_v39 = vpop.f32.mrb[122].mxu1  ;;  %v5577_v53 = vpop.f32.mrb[130].mxu0  ;;  %v5759_v18 = vrot.slane %v16357_v20, 2  ;;  %v5711_v30 = vrot.slane %v16357_v20, 1  ;;  %v16375_v33 = vmax.f32 %v16359_v58, 0.0 }
 0xb8c   : > { %v10467_v0 = vpop.f32.mrb[123].mxu1  ;;  %v5579_v23 = vpop.f32.mrb[131].mxu0 }
 0xb8d   : > { %v5478_v48 = vadd.f32 %v10465_v42, %v16220_v21  ;;  %v10468_v10 = vadd.f32 %v10467_v0, %v10466_v39  ;;  %v5770_v16 = vsel %vm671_vm2, %v5758_v17, %v5759_v18  ;;  %v5722_v1 = vsel %vm622_vm1, %v5710_v11, %v5711_v30 }
 0xb8e   : > { %v6012_v9 = vpack.c.bf16 %v5770_v16, %v5771_v41  ;;  %v11625_v22 = vpack.i.bf16 %v5722_v1, %v5723_v7  ;;  %v5760_v34 = vrot.slane %v16375_v33, 2  ;;  %v12066_v41 = vld [vmem:[#allocation2 + $0x378] sm:$0xff]  }
 0xb8f   : > { %v16377_v37 = vadd.f32 %v5574_v29, %v5478_v48  ;;  %v5481_v25 = vadd.f32 %v10468_v10, %v16220_v21  ;;  %v5712_v29 = vrot.slane %v16375_v33, 1  ;;  %10490 = vmatpush3.bf16.msra.mxu1 %v12066_v41 }
 0xb90   : > { %10786 = vmatprep.mubr.msk.bf16.mxu0 %vm1700_vm15, %v6012_v9  ;;  %11626 = vrot.lane.b32.xlu0 %v11625_v22, %s12267_s6  ;;  %v5769_v9 = vsel %vm671_vm2, %v5759_v18, %v5760_v34 }
 0xb91   : > { %v16383_v44 = vmax.f32 %v16377_v37, 0.0  ;;  %v16385_v52 = vadd.f32 %v5577_v53, %v5481_v25  ;;  %v10469_v54 = vpop.f32.mrb[124].mxu1  ;;  %v5582_v17 = vpop.f32.mrb[132].mxu0  ;;  %v5721_v25 = vsel %vm622_vm1, %v5711_v30, %v5712_v29 }
 0xb92   : > { %v10470_v11 = vpop.f32.mrb[125].mxu1  ;;  %v5584_v63 = vpop.f32.mrb[133].mxu0 }
 0xb93   : > { %v10471_v36 = vadd.f32 %v10470_v11, %v10469_v54  ;;  %v10472_v42 = vpop.f32.mrb[126].mxu1  ;;  %v5585_v39 = vpop.f32.mrb[134].mxu0  ;;  %v5761_v0 = vrot.slane %v16383_v44, 2  ;;  %v5713_v23 = vrot.slane %v16383_v44, 1  ;;  %v16392_v7 = vmax.f32 %v16385_v52, 0.0 }
 0xb94   : > { %v10473_v53 = vpop.f32.mrb[127].mxu1  ;;  %v5587_v26 = vpop.f32.mrb[135].mxu0  ;;  %v19381_v11 = vmov 0  }
 0xb95   : > { %v5486_v48 = vadd.f32 %v10471_v36, %v16220_v21  ;;  %v10474_v10 = vadd.f32 %v10473_v53, %v10472_v42  ;;  %v5768_v16 = vsel %vm671_vm2, %v5760_v34, %v5761_v0  ;;  %v5720_v1 = vsel %vm622_vm1, %v5712_v29, %v5713_v23  ;;  %6697 = vmatprep.subr.bf16.mxu1 %v19381_v11 }
 0xb96   : > { %v5792_v22 = vsel %vm19379_vm9, 0.0, %v5768_v16  ;;  %v5744_v54 = vsel %vm19380_vm7, 0.0, %v5720_v1  ;;  %v5762_v53 = vrot.slane %v16392_v7, 2  ;;  %v5714_v18 = vrot.slane %v16392_v7, 1 }
 0xb97   : > { %v16408_v63 = vadd.f32 %v5582_v17, %v5486_v48  ;;  %v5489_v36 = vadd.f32 %v10474_v10, %v16220_v21  ;;  %v6015_v42 = vpack.c.bf16 %v5792_v22, %v5769_v9  ;;  %v11635_v41 = vpack.i.bf16 %v5744_v54, %v5721_v25 }
 0xb98   : > { %v5654_v34 = vrot.slane %v16229_v8, 7  ;;  %v5653_v17 = vrot.slane %v16233_v43, 7  ;;  %v5767_v10 = vsel %vm671_vm2, %v5761_v0, %v5762_v53  ;;  %v5655_v1 = vrot.slane %v16239_v2, 7 }
 0xb99   : > { %v16415_v26 = vmax.f32 %v16408_v63, 0.0  ;;  %v16417_v30 = vadd.f32 %v5585_v39, %v5489_v36  ;;  %10787 = vmatmul.mubr.msk.bf16.gmra.mrb[144].mxu0 %vm1700_vm15, %v6015_v42  ;;  %11636 = vrot.lane.b32.xlu0 %v11635_v41, %s12267_s6  ;;  %v5719_v39 = vsel %vm622_vm1, %v5713_v23, %v5714_v18  ;;  %v5656_v23 = vrot.slane %v16257_v24, 7 }
 0xb9a   : > { %v5683_v16 = vsel %vm573_vm0, %v5653_v17, %v5654_v34  ;;  %vm19382_vm9 = vcmp.ge.s32.totalorder %v12690_v13, 30  ;;  %vm19383_vm7 = vcmp.lt.s32.totalorder %v12382_v3, 1 }
 0xb9b   : > { %v16423_v21 = vmax.f32 %v16417_v30, 0.0  ;;  %v5763_v29 = vrot.slane %v16415_v26, 2  ;;  %v5715_v48 = vrot.slane %v16415_v26, 1 }
 0xb9d   : > { %v5766_v9 = vsel %vm671_vm2, %v5762_v53, %v5763_v29  ;;  %v5718_v22 = vsel %vm622_vm1, %v5714_v18, %v5715_v48  ;;  %v5764_v25 = vrot.slane %v16423_v21, 2  ;;  %v5668_v54 = vrot.slane %v16423_v21, 7 }
 0xb9e   : > { %v6018_v36 = vpack.c.bf16 %v5766_v9, %v5767_v10  ;;  %v11645_v0 = vpack.i.bf16 %v5718_v22, %v5719_v39  ;;  %v5716_v42 = vrot.slane %v16423_v21, 1 }
 0xb9f   : > { %v5765_v41 = vsel %vm671_vm2, %v5763_v29, %v5764_v25  ;;  %v5780_v53 = vsel %vm671_vm2, %v5764_v25, %v5749_v49  ;;  %v5684_v18 = vsel %vm573_vm0, %v5668_v54, %v5653_v17  ;;  %v19384_v49 = vrot.slane %v16233_v43, 1 }
 0xba0   : > { %10790 = vmatprep.mubr.msk.bf16.mxu0 %vm1700_vm15, %v6018_v36  ;;  %11646 = vrot.lane.b32.xlu0 %v11645_v0, %s12267_s6  ;;  %v5796_v10 = vsel %vm19382_vm9, 0.0, %v5780_v53  ;;  %v5685_v29 = vsel %vm19383_vm7, 0.0, %v5684_v18  ;;  %v5717_v39 = vsel %vm622_vm1, %v5715_v48, %v5716_v42  ;;  %v5681_v0 = vsel %vm573_vm0, %v5655_v1, %v5656_v23 }
 0xba1   : > { %v5732_v17 = vsel %vm622_vm1, %v5716_v42, %v19384_v49  ;;  %v6021_v9 = vpack.c.bf16 %v5796_v10, %v5765_v41  ;;  %v11590_v22 = vpack.i.bf16 %v5683_v16, %v5685_v29  ;;  %v5658_v53 = vrot.slane %v16280_v50, 7 }
 0xba2   : > { %v5748_v25 = vsel %vm19385_vm3, 0.0, %v5732_v17  ;;  %v5680_v48 = vsel %vm573_vm0, %v5656_v23, %v5657_v45  ;;  %v5682_v16 = vsel %vm573_vm0, %v5654_v34, %v5655_v1  ;;  %v5660_v10 = vrot.slane %v16319_v28, 7 }
 0xba3   : > { %v11655_v36 = vpack.i.bf16 %v5748_v25, %v5717_v39  ;;  %10791 = vmatmul.mubr.msk.bf16.gmra.mrb[148].mxu0 %vm1700_vm15, %v6021_v9  ;;  %11591 = vrot.lane.b32.xlu1 %v11590_v22, %s12267_s6  ;;  %v11600_v42 = vpack.i.bf16 %v5681_v0, %v5682_v16  ;;  %v5679_v41 = vsel %vm573_vm0, %v5657_v45, %v5658_v53  ;;  %v5689_v18 = vsel %vm448_vm6, 0.0, %v5680_v48 }
 0xba4   : > { %10802 = vmatprep.mubr.msk.bf16.mxu0 %vm12272_vm12, %v19376_v57  ;;  %v5661_v23 = vrot.slane %v16327_v35, 7  ;;  %v5659_v29 = vrot.slane %v16301_v32, 7  ;;  %v11610_v39 = vpack.i.bf16 %v5679_v41, %v5689_v18  ;;  %v5662_v1 = vrot.slane %v16336_v6, 7 }
 0xba5   : > { %11656 = vrot.lane.b32.xlu0 %v11655_v36, %s12267_s6  ;;  %vm19386_vm3 = vcmp.lt.s32.totalorder %v19292_v14, 1  ;;  %v5664_v25 = vrot.slane %v16375_v33, 7  ;;  %v5665_v36 = vrot.slane %v16383_v44, 7  ;;  %v5663_v0 = vrot.slane %v16357_v20, 7 }
 0xba6   : > { %v5677_v34 = vsel %vm573_vm0, %v5659_v29, %v5660_v10  ;;  %v5676_v45 = vsel %vm573_vm0, %v5660_v10, %v5661_v23  ;;  %v5678_v49 = vsel %vm573_vm0, %v5658_v53, %v5659_v29  ;;  %v5675_v9 = vsel %vm573_vm0, %v5661_v23, %v5662_v1 }
 0xba7   : > { %11601 = vrot.lane.b32.xlu1 %v11600_v42, %s12267_s6  ;;  %v11620_v17 = vpack.i.bf16 %v5677_v34, %v5678_v49  ;;  %v5693_v22 = vsel %vm19386_vm3, 0.0, %v5676_v45  ;;  %v5673_v16 = vsel %vm573_vm0, %v5663_v0, %v5664_v25  ;;  %v5666_v53 = vrot.slane %v16392_v7, 7 }
 0xba8   : > { %v11630_v48 = vpack.i.bf16 %v5675_v9, %v5693_v22  ;;  %v5672_v42 = vsel %vm573_vm0, %v5664_v25, %v5665_v36  ;;  %v5674_v41 = vsel %vm573_vm0, %v5662_v1, %v5663_v0  ;;  %vm19387_vm9 = vcmp.lt.s32.totalorder %v19356_v46, 1 }
 0xba9   : > { %v11640_v18 = vpack.i.bf16 %v5673_v16, %v5674_v41  ;;  %v5671_v10 = vsel %vm573_vm0, %v5665_v36, %v5666_v53  ;;  %v5697_v23 = vsel %vm19387_vm9, 0.0, %v5672_v42  ;;  %v5667_v29 = vrot.slane %v16415_v26, 7 }
 0xbaa   : > { %v5620_v0 = vrot.slane %v16423_v21, 6  ;;  %v5606_v42 = vrot.slane %v16229_v8, 6  ;;  %vm19388_vm7 = vcmp.lt.s32.totalorder %v12382_v3, 2  ;;  %vm19389_vm3 = vcmp.lt.s32.totalorder %v19213_v27, 2 }
 0xbab   : > { %11611 = vrot.lane.b32.xlu1 %v11610_v39, %s12267_s6  ;;  %v11650_v39 = vpack.i.bf16 %v5671_v10, %v5697_v23  ;;  %v5669_v34 = vsel %vm573_vm0, %v5667_v29, %v5668_v54  ;;  %v5670_v1 = vsel %vm573_vm0, %v5666_v53, %v5667_v29  ;;  %vm19390_vm9 = vcmp.lt.s32.totalorder %v19292_v14, 2 }
 0xbac   : > { %v11660_v45 = vpack.i.bf16 %v5669_v34, %v5670_v1 }
 0xbaf   : > { %11621 = vrot.lane.b32.xlu1 %v11620_v17, %s12267_s6 }
 0xbb3   : > { %11631 = vrot.lane.b32.xlu1 %v11630_v48, %s12267_s6  ;;  %v5605_v48 = vrot.slane %v16233_v43, 6 }
 0xbb5   : > { %v5636_v41 = vsel %vm524_vm13, %v5620_v0, %v5605_v48  ;;  %v5635_v29 = vsel %vm524_vm13, %v5605_v48, %v5606_v42 }
 0xbb7   : > { %11641 = vrot.lane.b32.xlu1 %v11640_v18, %s12267_s6 }
 0xbbb   : > { %11651 = vrot.lane.b32.xlu1 %v11650_v39, %s12267_s6  ;;  %v5637_v39 = vsel %vm19388_vm7, 0.0, %v5636_v41  ;;  %vm19391_vm7 = vcmp.lt.s32.totalorder %v19356_v46, 2 }
 0xbbf   : > { %11661 = vrot.lane.b32.xlu1 %v11660_v45, %s12267_s6 }
 0xbe2   : > { %v11587_v49 = vpop.permute.xlu0 %11586 }
 0xbe3   : > { %v11589_v17 = vunpack.i.h.bf16 %v11587_v49  ;;  %v11588_v9 = vunpack.i.l.bf16 %v11587_v49 }
 0xbe5   : > { %v5941_v22 = vsel %vm1700_vm15, %v16233_v43, %v11588_v9  ;;  %v5942_v25 = vsel %vm1700_vm15, %v16229_v8, %v11589_v17  ;;  %v5607_v9 = vrot.slane %v16239_v2, 6 }
 0xbe6   : > { %v5999_v36 = vpack.c.bf16 %v5942_v25, %v5941_v22  ;;  %v5608_v22 = vrot.slane %v16257_v24, 6 }
 0xbe8   : > { %6202 = vmatprep.mubr.bf16.mxu1 %v5999_v36 }
 0xbeb   : > { %v11597_v54 = vpop.permute.xlu0 %11596 }
 0xbec   : > { %v11599_v16 = vunpack.i.h.bf16 %v11597_v54  ;;  %v11598_v53 = vunpack.i.l.bf16 %v11597_v54 }
 0xbee   : > { %v5943_v43 = vsel %vm1700_vm15, %v16239_v2, %v11598_v53  ;;  %v5944_v8 = vsel %vm1700_vm15, %v16257_v24, %v11599_v16  ;;  %v5633_v16 = vsel %vm524_vm13, %v5607_v9, %v5608_v22  ;;  %v5634_v53 = vsel %vm524_vm13, %v5606_v42, %v5607_v9 }
 0xbef   : > { %v6002_v54 = vpack.c.bf16 %v5944_v8, %v5943_v43  ;;  %v5609_v2 = vrot.slane %v16270_v59, 6  ;;  %v5610_v8 = vrot.slane %v16280_v50, 6 }
 0xbf2   : > { %v11607_v34 = vpop.permute.xlu0 %11606 }
 0xbf3   : > { %v11609_v48 = vunpack.i.h.bf16 %v11607_v34  ;;  %v11608_v41 = vunpack.i.l.bf16 %v11607_v34 }
 0xc15   : > { %v11592_v18 = vpop.permute.xlu1 %11591 }
 0xc16   : > { %v11594_v10 = vunpack.i.h.bf16 %v11592_v18  ;;  %v11593_v23 = vunpack.i.l.bf16 %v11592_v18 }
 0xc18   : > { %v5925_v1 = vsel %vm1700_vm15, %v5637_v39, %v11593_v23  ;;  %v5926_v45 = vsel %vm1700_vm15, %v5635_v29, %v11594_v10  ;;  %v5945_v23 = vsel %vm1700_vm15, %v16270_v59, %v11608_v41  ;;  %v5946_v29 = vsel %vm1700_vm15, %v16280_v50, %v11609_v48  ;;  %v11617_v39 = vpop.permute.xlu0 %11616 }
 0xc19   : > { %v5998_v49 = vpack.c.bf16 %v5926_v45, %v5925_v1  ;;  %v11602_v17 = vpop.permute.xlu1 %11601  ;;  %v6005_v42 = vpack.c.bf16 %v5946_v29, %v5945_v23  ;;  %v5632_v45 = vsel %vm524_vm13, %v5608_v22, %v5609_v2  ;;  %v5631_v59 = vsel %vm524_vm13, %v5609_v2, %v5610_v8 }
 0xc1a   : > { %v11604_v25 = vunpack.i.h.bf16 %v11602_v17  ;;  %v11603_v36 = vunpack.i.l.bf16 %v11602_v17  ;;  %v11618_v17 = vunpack.i.l.bf16 %v11617_v39  ;;  %v5641_v9 = vsel %vm19389_vm3, 0.0, %v5632_v45 }
 0xc1b   : > { %6203 = vmatmul.mubr.bf16.vlgmr.msra.gmra.mrb[128].mxu1 %v5998_v49  ;;  %v11619_v49 = vunpack.i.h.bf16 %v11617_v39  ;;  %vm19392_vm3 = vcmp.ge.s32.totalorder %v19307_v56, 31 }
 0xc1c   : > { %6210 = vmatprep.mubr.bf16.mxu1 %v6002_v54  ;;  %v5927_v18 = vsel %vm1700_vm15, %v5634_v53, %v11603_v36  ;;  %v5928_v10 = vsel %vm1700_vm15, %v5633_v16, %v11604_v25  ;;  %v5947_v54 = vsel %vm1700_vm15, %v16301_v32, %v11618_v17  ;;  %v11627_v48 = vpop.permute.xlu0 %11626  ;;  %v5611_v16 = vrot.slane %v16301_v32, 6 }
 0xc1d   : > { %v11612_v24 = vpop.permute.xlu1 %11611  ;;  %v6001_v43 = vpack.c.bf16 %v5928_v10, %v5927_v18  ;;  %v5948_v22 = vsel %vm1700_vm15, %v16319_v28, %v11619_v49  ;;  %v5612_v53 = vrot.slane %v16319_v28, 6  ;;  %v11628_v23 = vunpack.i.l.bf16 %v11627_v48 }
 0xc1e   : > { %v11614_v34 = vunpack.i.h.bf16 %v11612_v24  ;;  %v11613_v1 = vunpack.i.l.bf16 %v11612_v24  ;;  %v6008_v2 = vpack.c.bf16 %v5948_v22, %v5947_v54  ;;  %v11629_v24 = vunpack.i.h.bf16 %v11627_v48 }
 0xc1f   : > { %v5629_v29 = vsel %vm524_vm13, %v5611_v16, %v5612_v53  ;;  %v5630_v39 = vsel %vm524_vm13, %v5610_v8, %v5611_v16  ;;  %v5613_v32 = vrot.slane %v16327_v35, 6  ;;  %v5614_v17 = vrot.slane %v16336_v6, 6 }
 0xc20   : > { %v5929_v25 = vsel %vm1700_vm15, %v5641_v9, %v11613_v1  ;;  %v5930_v50 = vsel %vm1700_vm15, %v5631_v59, %v11614_v34  ;;  %v5949_v1 = vsel %vm1700_vm15, %v16327_v35, %v11628_v23  ;;  %v11637_v45 = vpop.permute.xlu0 %11636 }
 0xc21   : > { %v11622_v36 = vpop.permute.xlu1 %11621  ;;  %v6004_v41 = vpack.c.bf16 %v5930_v50, %v5929_v25  ;;  %v5628_v25 = vsel %vm524_vm13, %v5612_v53, %v5613_v32  ;;  %v11639_v50 = vunpack.i.h.bf16 %v11637_v45  ;;  %v5627_v35 = vsel %vm524_vm13, %v5613_v32, %v5614_v17 }
 0xc22   : > { %v11624_v18 = vunpack.i.h.bf16 %v11622_v36  ;;  %v11623_v10 = vunpack.i.l.bf16 %v11622_v36  ;;  %v11638_v36 = vunpack.i.l.bf16 %v11637_v45  ;;  %v5645_v54 = vsel %vm19390_vm9, 0.0, %v5628_v25 }
 0xc23   : > { %6211 = vmatmul.mubr.bf16.gmra.mrb[132].mxu1 %v6001_v43  ;;  %v5952_v16 = vsel %vm1700_vm15, %v16375_v33, %v11639_v50  ;;  %vm19395_vm9 = vcmp.ge.s32.totalorder %v19360_v51, 31 }
 0xc24   : > { %6218 = vmatprep.mubr.bf16.mxu1 %v6005_v42  ;;  %v5931_v43 = vsel %vm1700_vm15, %v5630_v39, %v11623_v10  ;;  %v5932_v34 = vsel %vm1700_vm15, %v5629_v29, %v11624_v18  ;;  %v5950_v42 = vsel %vm1700_vm15, %v16336_v6, %v11629_v24  ;;  %v11647_v53 = vpop.permute.xlu0 %11646  ;;  %v5615_v10 = vrot.slane %v16357_v20, 6 }
 0xc25   : > { %v11632_v28 = vpop.permute.xlu1 %11631  ;;  %v6007_v49 = vpack.c.bf16 %v5932_v34, %v5931_v43  ;;  %v6011_v8 = vpack.c.bf16 %v5950_v42, %v5949_v1  ;;  %v11649_v39 = vunpack.i.h.bf16 %v11647_v53  ;;  %v11648_v43 = vunpack.i.l.bf16 %v11647_v53 }
 0xc26   : > { %v11634_v59 = vunpack.i.h.bf16 %v11632_v28  ;;  %v11633_v9 = vunpack.i.l.bf16 %v11632_v28  ;;  %v5626_v32 = vsel %vm524_vm13, %v5614_v17, %v5615_v10  ;;  %v5619_v53 = vrot.slane %v16415_v26, 6 }
 0xc27   : > { %v5953_v42 = vsel %vm1700_vm15, %v16383_v44, %v11648_v43  ;;  %v5954_v45 = vsel %vm1700_vm15, %v16392_v7, %v11649_v39 }
 0xc28   : > { %v5933_v22 = vsel %vm1700_vm15, %v5645_v54, %v11633_v9  ;;  %v5934_v6 = vsel %vm1700_vm15, %v5627_v35, %v11634_v59  ;;  %v5618_v9 = vrot.slane %v16392_v7, 6  ;;  %v6017_v17 = vpack.c.bf16 %v5954_v45, %v5953_v42 }
 0xc29   : > { %v11642_v48 = vpop.permute.xlu1 %11641  ;;  %v6010_v18 = vpack.c.bf16 %v5934_v6, %v5933_v22 }
 0xc2a   : > { %v11644_v24 = vunpack.i.h.bf16 %v11642_v48  ;;  %v11643_v23 = vunpack.i.l.bf16 %v11642_v48  ;;  %v5622_v39 = vsel %vm524_vm13, %v5618_v9, %v5619_v53 }
 0xc2b   : > { %6219 = vmatmul.mubr.bf16.gmra.mrb[136].mxu1 %v6004_v41  ;;  %v5951_v41 = vsel %vm1700_vm15, %v16357_v20, %v11638_v36  ;;  %v5617_v20 = vrot.slane %v16383_v44, 6 }
 0xc2c   : > { %6226 = vmatprep.mubr.bf16.mxu1 %v6008_v2  ;;  %v5616_v2 = vrot.slane %v16375_v33, 6  ;;  %v6014_v29 = vpack.c.bf16 %v5952_v16, %v5951_v41  ;;  %v5935_v28 = vsel %vm1700_vm15, %v5626_v32, %v11643_v23 }
 0xc2d   : > { %v11652_v33 = vpop.permute.xlu1 %11651  ;;  %v5623_v44 = vsel %vm524_vm13, %v5617_v20, %v5618_v9 }
 0xc2e   : > { %v5625_v34 = vsel %vm524_vm13, %v5615_v10, %v5616_v2  ;;  %v11653_v25 = vunpack.i.l.bf16 %v11652_v33  ;;  %v5624_v50 = vsel %vm524_vm13, %v5616_v2, %v5617_v20 }
 0xc2f   : > { %v5936_v1 = vsel %vm1700_vm15, %v5625_v34, %v11644_v24  ;;  %v5649_v54 = vsel %vm19391_vm7, 0.0, %v5624_v50  ;;  %v12068_v50 = vld [vmem:[#allocation2 + $0x3e8] sm:$0xff]   ;;  %vm19398_vm7 = vcmp.ge.s32.totalorder %v12690_v13, 31 }
 0xc30   : > { %v6013_v59 = vpack.c.bf16 %v5936_v1, %v5935_v28  ;;  %v5937_v22 = vsel %vm1700_vm15, %v5649_v54, %v11653_v25  ;;  %v12072_v54 = vld [vmem:[#allocation2 + $0x408] sm:$0xff]  }
 0xc31   : > { %v11662_v6 = vpop.permute.xlu1 %11661 }
 0xc32   : > { %v11663_v10 = vunpack.i.l.bf16 %v11662_v6 }
 0xc33   : > { %6227 = vmatmul.mubr.bf16.gmra.mrb[140].mxu1 %v6007_v49  ;;  %v11657_v49 = vpop.permute.xlu0 %11656 }
 0xc34   : > { %6234 = vmatprep.mubr.bf16.mxu1 %v6011_v8  ;;  %v11654_v8 = vunpack.i.h.bf16 %v11652_v33  ;;  %v11659_v36 = vunpack.i.h.bf16 %v11657_v49  ;;  %v11658_v35 = vunpack.i.l.bf16 %v11657_v49 }
 0xc36   : > { %v5938_v7 = vsel %vm1700_vm15, %v5623_v44, %v11654_v8  ;;  %v5955_v48 = vsel %vm1700_vm15, %v16415_v26, %v11658_v35  ;;  %v5956_v41 = vsel %vm1700_vm15, %v16423_v21, %v11659_v36  ;;  %v5939_v26 = vsel %vm1700_vm15, %v5622_v39, %v11663_v10  ;;  %v12069_v36 = vld [vmem:[#allocation2 + $0x3f0] sm:$0xff]   ;;  %v12070_v35 = vld [vmem:[#allocation2 + $0x3f8] sm:$0xff]   ;;  %v12071_v44 = vld [vmem:[#allocation2 + $0x400] sm:$0xff]  }
 0xc37   : > { %v6016_v16 = vpack.c.bf16 %v5938_v7, %v5937_v22  ;;  %v6020_v2 = vpack.c.bf16 %v5956_v41, %v5955_v48  ;;  %v12073_v22 = vld [vmem:[#allocation2 + $0x410] sm:$0xff]   ;;  %v12074_v7 = vld [vmem:[#allocation2 + $0x418] sm:$0xff]   ;;  %v12076_v48 = vld [vmem:[#allocation2 + $0x428] sm:$0xff]  }
 0xc38   : > { %v12077_v41 = vld [vmem:[#allocation2 + $0x430] sm:$0xff]  }
 0xc3b   : > { %6235 = vmatmul.mubr.bf16.gmra.mrb[144].mxu1 %v6010_v18  ;;  %v11664_v18 = vunpack.i.h.bf16 %v11662_v6  ;;  %v12075_v6 = vld [vmem:[#allocation2 + $0x420] sm:$0xff]  }
 0xc3c   : > { %6242 = vmatprep.mubr.bf16.mxu1 %v6014_v29  ;;  %v5621_v29 = vsel %vm524_vm13, %v5619_v53, %v5620_v0  ;;  %v16673_v53 = vld [vmem:[%s18924_s2 + $0x8] ss:$0 sm:$0xff] }
 0xc3d   : > { %v5940_v34 = vsel %vm1700_vm15, %v5621_v29, %v11664_v18 }
 0xc3e   : > { %v6019_v28 = vpack.c.bf16 %v5940_v34, %v5939_v26  ;;  %v12078_v34 = vld [vmem:[#allocation2 + $0x438] sm:$0xff]  }
 0xc43   : > { %6243 = vmatmul.mubr.bf16.gmra.mrb[148].mxu1 %v6013_v59 }
 0xc44   : > { %6250 = vmatprep.mubr.bf16.mxu1 %v6017_v17  ;;  %v12067_v17 = vld [vmem:[#allocation2 + $0x3e0] sm:$0xff]  }
 0xc45   : > { %6698 = vmatpush1.bf16.msra.mxu1 %v12067_v17 }
 0xc46   : > { %6699 = vmatprep.subr.bf16.mxu1 %v19381_v11 }
 0xc49   : > { %6700 = vmatpush1.bf16.msra.mxu1 %v12068_v50 }
 0xc4a   : > { %6701 = vmatprep.subr.bf16.mxu1 %v19381_v11 }
 0xc4b   : > { %6251 = vmatmul.mubr.bf16.gmra.mrb[152].mxu1 %v6016_v16 }
 0xc4c   : > { %6258 = vmatprep.mubr.bf16.mxu1 %v6020_v2  ;;  %v16621_v24 = vpop.f32.mrb[136].mxu0 }
 0xc4d   : > { %v16623_v23 = vpop.f32.mrb[137].mxu0  ;;  %6702 = vmatpush1.bf16.msra.mxu1 %v12069_v36 }
 0xc4e   : > { %v16631_v43 = vpop.f32.mrb[138].mxu0  ;;  %6703 = vmatprep.subr.bf16.mxu1 %v19381_v11 }
 0xc4f   : > { %v6304_v32 = vpop.f32.mrb[139].mxu0 }
 0xc51   : > { %6704 = vmatpush1.bf16.msra.mxu1 %v12070_v35 }
 0xc52   : > { %6705 = vmatprep.subr.bf16.mxu1 %v19381_v11 }
 0xc53   : > { %6259 = vmatmul.mubr.bf16.gmra.mrb[156].mxu1 %v6019_v28 }
 0xc55   : > { %6706 = vmatpush1.bf16.msra.mxu1 %v12071_v44 }
 0xc56   : > { %6707 = vmatprep.subr.bf16.mxu1 %v19381_v11 }
 0xc59   : > { %6708 = vmatpush1.bf16.msra.mxu1 %v12072_v54 }
 0xc5a   : > { %6709 = vmatprep.subr.bf16.mxu1 %v19381_v11 }
 0xc5c   : > { %v16635_v1 = vpop.f32.mrb[140].mxu0 }
 0xc5d   : > { %v16637_v20 = vpop.f32.mrb[141].mxu0  ;;  %6710 = vmatpush1.bf16.msra.mxu1 %v12073_v22 }
 0xc5e   : > { %v16639_v21 = vpop.f32.mrb[142].mxu0  ;;  %6711 = vmatprep.subr.bf16.mxu1 %v19381_v11 }
 0xc5f   : > { %v16641_v33 = vpop.f32.mrb[143].mxu0 }
 0xc61   : > { %6712 = vmatpush1.bf16.msra.mxu1 %v12074_v7 }
 0xc62   : > { %6713 = vmatprep.subr.bf16.mxu1 %v19381_v11 }
 0xc65   : > { %6714 = vmatpush1.bf16.msra.mxu1 %v12075_v6 }
 0xc66   : > { %6715 = vmatprep.subr.bf16.mxu1 %v19381_v11 }
 0xc69   : > { %6716 = vmatpush1.bf16.msra.mxu1 %v12076_v48 }
 0xc6a   : > { %6717 = vmatprep.subr.bf16.mxu1 %v19381_v11 }
 0xc6c   : > { %v16643_v0 = vpop.f32.mrb[144].mxu0 }
 0xc6d   : > { %v16645_v42 = vpop.f32.mrb[145].mxu0  ;;  %6718 = vmatpush1.bf16.msra.mxu1 %v12077_v41 }
 0xc6e   : > { %v16647_v45 = vpop.f32.mrb[146].mxu0  ;;  %6719 = vmatprep.subr.bf16.mxu1 %v19381_v11 }
 0xc6f   : > { %v16649_v49 = vpop.f32.mrb[147].mxu0 }
 0xc71   : > { %6720 = vmatpush1.bf16.msra.mxu1 %v12078_v34 }
 0xc72   : > { %8048 = vmatprep.subr.bf16.mxu1 %v19381_v11 }
 0xc76   : > { %v16651_v59 = vpop.f32.mrb[148].mxu0 }
 0xc77   : > { %v16653_v9 = vpop.f32.mrb[149].mxu0 }
 0xc78   : > { %v16655_v8 = vpop.f32.mrb[150].mxu0 }
 0xc79   : > { %v16657_v25 = vpop.f32.mrb[151].mxu0 }
 0xcee   : > { %v10491_v16 = vpop.f32.mrb[128].mxu1 }
 0xcef   : > { %v10492_v18 = vpop.f32.mrb[129].mxu1 }
 0xcf0   : > { %v10493_v10 = vadd.f32 %v10492_v18, %v10491_v16  ;;  %v10494_v2 = vpop.f32.mrb[130].mxu1 }
 0xcf1   : > { %v10495_v29 = vpop.f32.mrb[131].mxu1 }
 0xcf2   : > { %v6205_v39 = vadd.f32 %v10493_v10, %v16673_v53  ;;  %v10496_v26 = vadd.f32 %v10495_v29, %v10494_v2 }
 0xcf4   : > { %v6302_v28 = vadd.f32 %v16623_v23, %v6205_v39  ;;  %v6208_v17 = vadd.f32 %v10496_v26, %v16673_v53 }
 0xcf6   : > { %v16678_v50 = vmax.f32 %v6302_v28, 0.0  ;;  %v6305_v36 = vadd.f32 %v6304_v32, %v6208_v17  ;;  %v10497_v35 = vpop.f32.mrb[132].mxu1 }
 0xcf7   : > { %v10498_v44 = vpop.f32.mrb[133].mxu1 }
 0xcf8   : > { %v6365_v54 = vmax.f32 %v6305_v36, 0.0  ;;  %v10499_v22 = vadd.f32 %v10498_v44, %v10497_v35  ;;  %v10500_v7 = vpop.f32.mrb[134].mxu1  ;;  %v19037_v6 = vrot.slane %v16678_v50, 7  ;;  %v19036_v48 = vrot.slane %v16678_v50, 1 }
 0xcf9   : > { %v10501_v41 = vpop.f32.mrb[135].mxu1 }
 0xcfa   : > { %v6381_v16 = vrot.slane %v6365_v54, 7  ;;  %v6429_v23 = vrot.slane %v6365_v54, 1  ;;  %v6213_v18 = vadd.f32 %v10499_v22, %v16673_v53  ;;  %v10502_v10 = vadd.f32 %v10501_v41, %v10500_v7 }
 0xcfb   : > { %v11665_v2 = vpack.i.bf16 %v6365_v54, %v16678_v50 }
 0xcfc   : > { %v6310_v32 = vadd.f32 %v16621_v24, %v6213_v18  ;;  %v6216_v29 = vadd.f32 %v10502_v10, %v16673_v53  ;;  %v6458_v39 = vsel %vm622_vm1, %v19036_v48, %v6429_v23  ;;  %v16695_v26 = vsel %vm573_vm0, %v19037_v6, %v6381_v16 }
 0xcfd   : > { %11666 = vrot.lane.b32.xlu0 %v11665_v2, %s12267_s6 }
 0xcfe   : > { %v6366_v34 = vmax.f32 %v6310_v32, 0.0  ;;  %v6313_v28 = vadd.f32 %v16631_v43, %v6216_v29  ;;  %v10503_v17 = vpop.f32.mrb[136].mxu1 }
 0xcff   : > { %v10504_v24 = vpop.f32.mrb[137].mxu1 }
 0xd00   : > { %v6382_v36 = vrot.slane %v6366_v34, 7  ;;  %v6430_v35 = vrot.slane %v6366_v34, 1  ;;  %v6367_v44 = vmax.f32 %v6313_v28, 0.0  ;;  %v10505_v54 = vadd.f32 %v10504_v24, %v10503_v17  ;;  %v10506_v22 = vpop.f32.mrb[138].mxu1 }
 0xd01   : > { %v10507_v7 = vpop.f32.mrb[139].mxu1 }
 0xd02   : > { %v6383_v41 = vrot.slane %v6367_v44, 7  ;;  %v6431_v18 = vrot.slane %v6367_v44, 1  ;;  %v6221_v10 = vadd.f32 %v10505_v54, %v16673_v53  ;;  %v10508_v48 = vadd.f32 %v10507_v7, %v10506_v22 }
 0xd03   : > { %v11670_v6 = vpack.i.bf16 %v6367_v44, %v6366_v34  ;;  %v6457_v2 = vsel %vm622_vm1, %v6429_v23, %v6430_v35  ;;  %v16704_v43 = vsel %vm573_vm0, %v6381_v16, %v6382_v36 }
 0xd04   : > { %v6318_v32 = vadd.f32 %v16637_v20, %v6221_v10  ;;  %v6224_v29 = vadd.f32 %v10508_v48, %v16673_v53  ;;  %v6582_v28 = vpack.c.bf16 %v6457_v2, %v6458_v39  ;;  %v16710_v17 = vsel %vm622_vm1, %v6430_v35, %v6431_v18 }
 0xd05   : > { %11671 = vrot.lane.b32.xlu1 %v11670_v6, %s12267_s6  ;;  %v16715_v34 = vsel %vm573_vm0, %v6382_v36, %v6383_v41 }
 0xd06   : > { %v6368_v23 = vmax.f32 %v6318_v32, 0.0  ;;  %v6321_v24 = vadd.f32 %v16641_v33, %v6224_v29  ;;  %10132 = vmatprep.mubr.msk.bf16.mxu1 %vm1700_vm15, %v6582_v28  ;;  %v10509_v16 = vpop.f32.mrb[140].mxu1 }
 0xd07   : > { %v10510_v20 = vpop.f32.mrb[141].mxu1 }
 0xd08   : > { %v6384_v44 = vrot.slane %v6368_v23, 7  ;;  %v6432_v48 = vrot.slane %v6368_v23, 1  ;;  %v6369_v39 = vmax.f32 %v6321_v24, 0.0  ;;  %v10511_v54 = vadd.f32 %v10510_v20, %v10509_v16  ;;  %v10512_v22 = vpop.f32.mrb[142].mxu1 }
 0xd09   : > { %v10513_v35 = vpop.f32.mrb[143].mxu1 }
 0xd0a   : > { %v6385_v7 = vrot.slane %v6369_v39, 7  ;;  %v6433_v10 = vrot.slane %v6369_v39, 1  ;;  %v6229_v6 = vadd.f32 %v10511_v54, %v16673_v53  ;;  %v10514_v2 = vadd.f32 %v10513_v35, %v10512_v22 }
 0xd0b   : > { %v11675_v36 = vpack.i.bf16 %v6369_v39, %v6368_v23  ;;  %v6455_v32 = vsel %vm622_vm1, %v6431_v18, %v6432_v48  ;;  %v16724_v33 = vsel %vm573_vm0, %v6383_v41, %v6384_v44 }
 0xd0c   : > { %v6326_v29 = vadd.f32 %v16635_v1, %v6229_v6  ;;  %v6232_v28 = vadd.f32 %v10514_v2, %v16673_v53  ;;  %v16730_v24 = vsel %vm431_vm4, 0.0, %v6455_v32  ;;  %v16734_v16 = vsel %vm622_vm1, %v6432_v48, %v6433_v10 }
 0xd0d   : > { %11676 = vrot.lane.b32.xlu0 %v11675_v36, %s12267_s6  ;;  %v16741_v41 = vsel %vm573_vm0, %v6384_v44, %v6385_v7 }
 0xd0e   : > { %v6370_v1 = vmax.f32 %v6326_v29, 0.0  ;;  %v6329_v23 = vadd.f32 %v16639_v21, %v6232_v28  ;;  %v10515_v20 = vpop.f32.mrb[144].mxu1 }
 0xd0f   : > { %v10516_v39 = vpop.f32.mrb[145].mxu1 }
 0xd10   : > { %v6386_v54 = vrot.slane %v6370_v1, 7  ;;  %v6434_v22 = vrot.slane %v6370_v1, 1  ;;  %v6371_v35 = vmax.f32 %v6329_v23, 0.0  ;;  %v10517_v6 = vadd.f32 %v10516_v39, %v10515_v20  ;;  %v10518_v48 = vpop.f32.mrb[146].mxu1 }
 0xd11   : > { %v10519_v2 = vpop.f32.mrb[147].mxu1 }
 0xd12   : > { %v6387_v32 = vrot.slane %v6371_v35, 7  ;;  %v6435_v36 = vrot.slane %v6371_v35, 1  ;;  %v6237_v55 = vadd.f32 %v10517_v6, %v16673_v53  ;;  %v10520_v18 = vadd.f32 %v10519_v2, %v10518_v48 }
 0xd13   : > { %v11680_v11 = vpack.i.bf16 %v6371_v35, %v6370_v1  ;;  %v16747_v44 = vsel %vm622_vm1, %v6433_v10, %v6434_v22  ;;  %v16751_v21 = vsel %vm573_vm0, %v6385_v7, %v6386_v54 }
 0xd14   : > { %v6334_v29 = vadd.f32 %v16645_v42, %v6237_v55  ;;  %v6240_v28 = vadd.f32 %v10520_v18, %v16673_v53  ;;  %v16759_v20 = vsel %vm622_vm1, %v6434_v22, %v6435_v36  ;;  %v16764_v10 = vsel %vm573_vm0, %v6386_v54, %v6387_v32 }
 0xd15   : > { %11681 = vrot.lane.b32.xlu1 %v11680_v11, %s12267_s6 }
 0xd16   : > { %v6372_v1 = vmax.f32 %v6334_v29, 0.0  ;;  %v6337_v7 = vadd.f32 %v16649_v49, %v6240_v28  ;;  %v10521_v39 = vpop.f32.mrb[148].mxu1 }
 0xd17   : > { %v10522_v55 = vpop.f32.mrb[149].mxu1 }
 0xd18   : > { %v6388_v42 = vrot.slane %v6372_v1, 7  ;;  %v6436_v18 = vrot.slane %v6372_v1, 1  ;;  %v6373_v35 = vmax.f32 %v6337_v7, 0.0  ;;  %v10523_v6 = vadd.f32 %v10522_v55, %v10521_v39  ;;  %v10524_v48 = vpop.f32.mrb[150].mxu1 }
 0xd19   : > { %v10525_v2 = vpop.f32.mrb[151].mxu1 }
 0xd1a   : > { %v6389_v23 = vrot.slane %v6373_v35, 7  ;;  %v6437_v22 = vrot.slane %v6373_v35, 1  ;;  %v6245_v57 = vadd.f32 %v10523_v6, %v16673_v53  ;;  %v10526_v11 = vadd.f32 %v10525_v2, %v10524_v48 }
 0xd1b   : > { %v11685_v46 = vpack.i.bf16 %v6373_v35, %v6372_v1  ;;  %v6451_v54 = vsel %vm622_vm1, %v6435_v36, %v6436_v18  ;;  %v16772_v49 = vsel %vm573_vm0, %v6387_v32, %v6388_v42 }
 0xd1c   : > { %v6342_v29 = vadd.f32 %v16643_v0, %v6245_v57  ;;  %v6248_v28 = vadd.f32 %v10526_v11, %v16673_v53  ;;  %v16778_v7 = vsel %vm19392_vm3, 0.0, %v6451_v54  ;;  %v16782_v39 = vsel %vm622_vm1, %v6436_v18, %v6437_v22 }
 0xd1d   : > { %11686 = vrot.lane.b32.xlu0 %v11685_v46, %s12267_s6  ;;  %v16789_v32 = vsel %vm573_vm0, %v6388_v42, %v6389_v23  ;;  %vm19399_vm3 = vcmp.lt.s32.totalorder %v12382_v3, 1 }
 0xd1e   : > { %19393 = vst [vmem:[#allocation42_spill] sm:$0xff] %v16789_v32  ;;  %v6374_v57 = vmax.f32 %v6342_v29, 0.0  ;;  %v6345_v0 = vadd.f32 %v16647_v45, %v6248_v28  ;;  %v10527_v1 = vpop.f32.mrb[152].mxu1 }
 0xd1f   : > { %v10528_v55 = vpop.f32.mrb[153].mxu1 }
 0xd20   : > { %v6390_v35 = vrot.slane %v6374_v57, 7  ;;  %v6438_v6 = vrot.slane %v6374_v57, 1  ;;  %v6375_v48 = vmax.f32 %v6345_v0, 0.0  ;;  %v10529_v2 = vadd.f32 %v10528_v55, %v10527_v1  ;;  %v10530_v18 = vpop.f32.mrb[154].mxu1 }
 0xd21   : > { %v10531_v11 = vpop.f32.mrb[155].mxu1 }
 0xd22   : > { %v6391_v54 = vrot.slane %v6375_v48, 7  ;;  %v6439_v46 = vrot.slane %v6375_v48, 1  ;;  %v6253_v56 = vadd.f32 %v10529_v2, %v16673_v53  ;;  %v10532_v36 = vadd.f32 %v10531_v11, %v10530_v18 }
 0xd23   : > { %v11690_v14 = vpack.i.bf16 %v6375_v48, %v6374_v57  ;;  %v16795_v42 = vsel %vm622_vm1, %v6437_v22, %v6438_v6  ;;  %v16799_v45 = vsel %vm573_vm0, %v6389_v23, %v6390_v35 }
 0xd24   : > { %19394 = vst [vmem:[#allocation45_spill] sm:$0xff] %v16799_v45  ;;  %v6350_v29 = vadd.f32 %v16653_v9, %v6253_v56  ;;  %v6256_v28 = vadd.f32 %v10532_v36, %v16673_v53  ;;  %v16807_v1 = vsel %vm622_vm1, %v6438_v6, %v6439_v46  ;;  %v16812_v22 = vsel %vm573_vm0, %v6390_v35, %v6391_v54 }
 0xd25   : > { %11691 = vrot.lane.b32.xlu1 %v11690_v14, %s12267_s6 }
 0xd26   : > { %v6376_v57 = vmax.f32 %v6350_v29, 0.0  ;;  %v6353_v23 = vadd.f32 %v16657_v25, %v6256_v28  ;;  %v10533_v55 = vpop.f32.mrb[156].mxu1 }
 0xd27   : > { %v10534_v56 = vpop.f32.mrb[157].mxu1 }
 0xd28   : > { %v6392_v9 = vrot.slane %v6376_v57, 7  ;;  %v6440_v36 = vrot.slane %v6376_v57, 1  ;;  %v6377_v48 = vmax.f32 %v6353_v23, 0.0  ;;  %v10535_v2 = vadd.f32 %v10534_v56, %v10533_v55  ;;  %v10536_v18 = vpop.f32.mrb[158].mxu1 }
 0xd29   : > { %v10537_v11 = vpop.f32.mrb[159].mxu1 }
 0xd2a   : > { %v6393_v0 = vrot.slane %v6377_v48, 7  ;;  %v6441_v6 = vrot.slane %v6377_v48, 1  ;;  %v6261_v45 = vadd.f32 %v10535_v2, %v16673_v53  ;;  %v10538_v14 = vadd.f32 %v10537_v11, %v10536_v18 }
 0xd2b   : > { %v11695_v32 = vpack.i.bf16 %v6377_v48, %v6376_v57  ;;  %v6447_v35 = vsel %vm622_vm1, %v6439_v46, %v6440_v36  ;;  %v16820_v25 = vsel %vm573_vm0, %v6391_v54, %v6392_v9 }
 0xd2c   : > { %v6358_v29 = vadd.f32 %v16651_v59, %v6261_v45  ;;  %v6264_v28 = vadd.f32 %v10538_v14, %v16673_v53  ;;  %v16826_v23 = vsel %vm19395_vm9, 0.0, %v6447_v35  ;;  %v16830_v55 = vsel %vm622_vm1, %v6440_v36, %v6441_v6 }
 0xd2d   : > { %11696 = vrot.lane.b32.xlu0 %v11695_v32, %s12267_s6  ;;  %v6592_v46 = vpack.c.bf16 %v16826_v23, %v16807_v1  ;;  %v16837_v54 = vsel %vm573_vm0, %v6392_v9, %v6393_v0 }
 0xd2e   : > { %v6378_v59 = vmax.f32 %v6358_v29, 0.0  ;;  %v6361_v53 = vadd.f32 %v16655_v8, %v6264_v28  ;;  %v19396_v8 = vrot.slane %v16678_v50, 7 }
 0xd30   : > { %v6394_v45 = vrot.slane %v6378_v59, 7  ;;  %v6442_v57 = vrot.slane %v6378_v59, 1  ;;  %v6379_v56 = vmax.f32 %v6361_v53, 0.0 }
 0xd31   : > { %7058 = vrot.lane.b32.xlu0 %v16223_v40, %s12267_s6 }
 0xd32   : > { %v6395_v36 = vrot.slane %v6379_v56, 7  ;;  %v6443_v48 = vrot.slane %v6379_v56, 1  ;;  %v11700_v2 = vpack.i.bf16 %v6379_v56, %v6378_v59  ;;  %v16844_v32 = vsel %vm622_vm1, %v6441_v6, %v6442_v57 }
 0xd33   : > { %v6594_v9 = vpack.c.bf16 %v16844_v32, %v16830_v55  ;;  %v16850_v18 = vsel %vm573_vm0, %v6393_v0, %v6394_v45  ;;  %v19397_v6 = vrot.slane %v16678_v50, 1  ;;  %v19402_v59 = vpack.c.bf16 %v16778_v7, %v16759_v20 }
 0xd34   : > { %11701 = vrot.lane.b32.xlu1 %v11700_v2, %s12267_s6  ;;  %v6411_v40 = vsel %vm573_vm0, %v6395_v36, %v19396_v8  ;;  %v16859_v11 = vsel %vm622_vm1, %v6442_v57, %v6443_v48  ;;  %v16867_v0 = vsel %vm573_vm0, %v6394_v45, %v6395_v36  ;;  %v19404_v36 = vld [vmem:[#allocation13_spill] sm:$0xff] }
 0xd35   : > { %v6459_v14 = vsel %vm622_vm1, %v6443_v48, %v19397_v6  ;;  %7060 = vrot.lane.b32.xlu0 %v16226_v12, %s12267_s6  ;;  %vm19405_vm9 = vcmp.lt.s32.totalorder %v19404_v36, 1  ;;  %v19407_v6 = vld [vmem:[#allocation45_spill] sm:$0xff] }
 0xd36   : > { %v16873_v35 = vsel %vm19398_vm7, 0.0, %v6459_v14  ;;  %v6420_v48 = vsel %vm19405_vm9, 0.0, %v16772_v49  ;;  %vm19412_vm9 = vcmask 1042432  }
 0xd37   : > { %v6596_v29 = vpack.c.bf16 %v16873_v35, %v16859_v11  ;;  %v12081_v11 = vld [vmem:[#allocation2 + $0x450] sm:$0xff]   ;;  %v12082_v35 = vld [vmem:[#allocation2 + $0x458] sm:$0xff]  }
 0xd38   : > { %7088 = vrot.lane.b32.xlu1 %v16417_v30, %s12267_s6  ;;  %v19401_v30 = vpack.c.bf16 %v16747_v44, %v16734_v16 }
 0xd39   : > { %7064 = vrot.lane.b32.xlu0 %v16241_v61, %s12267_s6 }
 0xd3c   : > { %7062 = vrot.lane.b32.xlu1 %v16235_v5, %s12267_s6 }
 0xd3d   : > { %7068 = vrot.lane.b32.xlu0 %v16272_v15, %s12267_s6 }
 0xd40   : > { %7066 = vrot.lane.b32.xlu1 %v16265_v31, %s12267_s6  ;;  %v6412_v31 = vsel %vm19399_vm3, 0.0, %v6411_v40  ;;  %vm19411_vm3 = vcmask 1041408  }
 0xd41   : > { %7072 = vrot.lane.b32.xlu0 %v16303_v38, %s12267_s6 }
 0xd44   : > { %7070 = vrot.lane.b32.xlu1 %v16295_v60, %s12267_s6 }
 0xd45   : > { %7076 = vrot.lane.b32.xlu0 %v16329_v4, %s12267_s6 }
 0xd48   : > { %7074 = vrot.lane.b32.xlu1 %v16321_v62, %s12267_s6  ;;  %v19400_v62 = vpack.c.bf16 %v16730_v24, %v16710_v17  ;;  %v6416_v24 = vsel %vm448_vm6, 0.0, %v16724_v33 }
 0xd49   : > { %7080 = vrot.lane.b32.xlu0 %v16359_v58, %s12267_s6 }
 0xd4c   : > { %7078 = vrot.lane.b32.xlu1 %v16351_v47, %s12267_s6 }
 0xd4d   : > { %7084 = vrot.lane.b32.xlu0 %v16385_v52, %s12267_s6 }
 0xd50   : > { %7082 = vrot.lane.b32.xlu1 %v16377_v37, %s12267_s6 }
 0xd54   : > { %7086 = vrot.lane.b32.xlu1 %v16408_v63, %s12267_s6 }
 0xd6f   : > { %v11667_v12 = vpop.permute.xlu0 %11666 }
 0xd70   : > { %v11669_v5 = vunpack.i.h.bf16 %v11667_v12  ;;  %v11668_v61 = vunpack.i.l.bf16 %v11667_v12 }
 0xd72   : > { %v6540_v15 = vsel %vm1700_vm15, %v6412_v31, %v11668_v61  ;;  %v6541_v60 = vsel %vm1700_vm15, %v16695_v26, %v11669_v5 }
 0xd73   : > { %v6581_v38 = vpack.c.bf16 %v6541_v60, %v6540_v15 }
 0xd75   : > { %6730 = vmatmul.mubr.bf16.vlgmr.msra.gmra.mrb[160].mxu1 %v6581_v38 }
 0xd76   : > { %10133 = vmatprep.mubr.msk.bf16.mxu1 %vm1700_vm15, %v19400_v62  ;;  %v12079_v62 = vld [vmem:[#allocation2 + $0x440] sm:$0xff]  }
 0xd77   : > { %v11672_v4 = vpop.permute.xlu1 %11671  ;;  %10795 = vmatpush3.bf16.msra.mxu0 %v12079_v62 }
 0xd78   : > { %v11674_v47 = vunpack.i.h.bf16 %v11672_v4  ;;  %v11673_v58 = vunpack.i.l.bf16 %v11672_v4  ;;  %v12080_v4 = vld [vmem:[#allocation2 + $0x448] sm:$0xff]  }
 0xd7a   : > { %v6542_v37 = vsel %vm1700_vm15, %v16704_v43, %v11673_v58  ;;  %v6543_v52 = vsel %vm1700_vm15, %v16715_v34, %v11674_v47 }
 0xd7b   : > { %v6583_v63 = vpack.c.bf16 %v6543_v52, %v6542_v37 }
 0xd7d   : > { %6738 = vmatmul.mubr.bf16.gmra.mrb[164].mxu1 %v6583_v63 }
 0xd7e   : > { %10134 = vmatprep.mubr.msk.bf16.mxu1 %vm1700_vm15, %v19401_v30 }
 0xd7f   : > { %v11677_v50 = vpop.permute.xlu0 %11676 }
 0xd80   : > { %v11679_v26 = vunpack.i.h.bf16 %v11677_v50  ;;  %v11678_v17 = vunpack.i.l.bf16 %v11677_v50 }
 0xd82   : > { %v6544_v28 = vsel %vm1700_vm15, %v6416_v24, %v11678_v17  ;;  %v6545_v43 = vsel %vm1700_vm15, %v16741_v41, %v11679_v26  ;;  %v19403_v41 = vpack.c.bf16 %v16795_v42, %v16782_v39 }
 0xd83   : > { %v6585_v34 = vpack.c.bf16 %v6545_v43, %v6544_v28 }
 0xd85   : > { %6746 = vmatmul.mubr.bf16.gmra.mrb[168].mxu1 %v6585_v34 }
 0xd86   : > { %10135 = vmatprep.mubr.msk.bf16.mxu1 %vm1700_vm15, %v19402_v59  ;;  %v16979_v59 = vld [vmem:[%s18924_s2 + $0x9] ss:$0 sm:$0xff] }
 0xd87   : > { %v11682_v16 = vpop.permute.xlu1 %11681 }
 0xd88   : > { %v11684_v44 = vunpack.i.h.bf16 %v11682_v16  ;;  %v11683_v53 = vunpack.i.l.bf16 %v11682_v16 }
 0xd8a   : > { %v6546_v45 = vsel %vm1700_vm15, %v16751_v21, %v11683_v53  ;;  %v6547_v33 = vsel %vm1700_vm15, %v16764_v10, %v11684_v44  ;;  %v19406_v21 = vld [vmem:[#allocation42_spill] sm:$0xff] }
 0xd8b   : > { %v6587_v57 = vpack.c.bf16 %v6547_v33, %v6546_v45 }
 0xd8d   : > { %6754 = vmatmul.mubr.bf16.gmra.mrb[172].mxu1 %v6587_v57 }
 0xd8e   : > { %10136 = vmatprep.mubr.msk.bf16.mxu1 %vm1700_vm15, %v19403_v41 }
 0xd8f   : > { %v11687_v56 = vpop.permute.xlu0 %11686 }
 0xd90   : > { %v11689_v20 = vunpack.i.h.bf16 %v11687_v56  ;;  %v11688_v7 = vunpack.i.l.bf16 %v11687_v56 }
 0xd92   : > { %v6548_v2 = vsel %vm1700_vm15, %v6420_v48, %v11688_v7  ;;  %v6549_v8 = vsel %vm1700_vm15, %v19406_v21, %v11689_v20 }
 0xd93   : > { %v6589_v10 = vpack.c.bf16 %v6549_v8, %v6548_v2 }
 0xd95   : > { %6762 = vmatmul.mubr.bf16.gmra.mrb[176].mxu1 %v6589_v10 }
 0xd96   : > { %10137 = vmatprep.mubr.msk.bf16.mxu1 %vm1700_vm15, %v6592_v46  ;;  %v19408_v46 = vld [vmem:[#allocation15_spill] sm:$0xff] }
 0xd97   : > { %v11692_v39 = vpop.permute.xlu1 %11691  ;;  %vm19409_vm7 = vcmp.lt.s32.totalorder %v19408_v46, 1 }
 0xd98   : > { %v11694_v42 = vunpack.i.h.bf16 %v11692_v39  ;;  %v11693_v40 = vunpack.i.l.bf16 %v11692_v39  ;;  %v6424_v61 = vsel %vm19409_vm7, 0.0, %v16820_v25  ;;  %vm19413_vm7 = vcmask 64512  }
 0xd9a   : > { %v6550_v14 = vsel %vm1700_vm15, %v19407_v6, %v11693_v40  ;;  %v6551_v49 = vsel %vm1700_vm15, %v16812_v22, %v11694_v42 }
 0xd9b   : > { %v6591_v12 = vpack.c.bf16 %v6551_v49, %v6550_v14 }
 0xd9d   : > { %6770 = vmatmul.mubr.bf16.gmra.mrb[180].mxu1 %v6591_v12 }
 0xd9e   : > { %10138 = vmatprep.mubr.msk.bf16.mxu1 %vm1700_vm15, %v6594_v9 }
 0xd9f   : > { %v11697_v5 = vpop.permute.xlu0 %11696 }
 0xda0   : > { %v11699_v1 = vunpack.i.h.bf16 %v11697_v5  ;;  %v11698_v23 = vunpack.i.l.bf16 %v11697_v5 }
 0xda2   : > { %v6552_v31 = vsel %vm1700_vm15, %v6424_v61, %v11698_v23  ;;  %v6553_v15 = vsel %vm1700_vm15, %v16837_v54, %v11699_v1  ;;  %v19410_v54 = vmov 0.0  }
 0xda3   : > { %v6593_v22 = vpack.c.bf16 %v6553_v15, %v6552_v31  ;;  %10796 = vmatprep.subr.bf16.mxu0 %v19410_v54 }
 0xda4   : > { %10797 = vmatpush3.bf16.msra.mxu0 %v12080_v4 }
 0xda5   : > { %6778 = vmatmul.mubr.bf16.gmra.mrb[184].mxu1 %v6593_v22  ;;  %10798 = vmatprep.subr.bf16.mxu0 %v19410_v54 }
 0xda6   : > { %10139 = vmatprep.mubr.msk.bf16.mxu1 %vm1700_vm15, %v6596_v29  ;;  %v11702_v55 = vpop.permute.xlu1 %11701 }
 0xda7   : > { %v11704_v32 = vunpack.i.h.bf16 %v11702_v55  ;;  %v11703_v9 = vunpack.i.l.bf16 %v11702_v55 }
 0xda8   : > { %10799 = vmatpush3.bf16.msra.mxu0 %v12081_v11 }
 0xda9   : > { %v6554_v60 = vsel %vm1700_vm15, %v16850_v18, %v11703_v9  ;;  %v6555_v25 = vsel %vm1700_vm15, %v16867_v0, %v11704_v32  ;;  %10800 = vmatprep.subr.bf16.mxu0 %v19410_v54 }
 0xdaa   : > { %v6595_v38 = vpack.c.bf16 %v6555_v25, %v6554_v60 }
 0xdac   : > { %10801 = vmatpush3.bf16.msra.mxu0 %v12082_v35 }
 0xdad   : > { %6786 = vmatmul.mubr.bf16.gmra.mrb[188].mxu1 %v6595_v38  ;;  %10806 = vmatprep.subr.bf16.mxu0 %v19410_v54 }
 0xe48   : > { %v6731_v18 = vpop.f32.mrb[160].mxu1 }
 0xe49   : > { %v6733_v0 = vpop.f32.mrb[161].mxu1  ;;  %v16994_v33 = vadd.f32 %v16979_v59, %v6731_v18 }
 0xe4a   : > { %v6734_v29 = vpop.f32.mrb[162].mxu1 }
 0xe4b   : > { %v6736_v47 = vpop.f32.mrb[163].mxu1  ;;  %v16985_v44 = vadd.f32 %v16979_v59, %v6734_v29  ;;  %v6794_v40 = vmax.f32 %v16994_v33, 0.0 }
 0xe4d   : > { %v6795_v7 = vmax.f32 %v16985_v44, 0.0  ;;  %v6810_v15 = vsel %vm1700_vm15, %v6794_v40, 0.0 }
 0xe4f   : > { %v6811_v5 = vsel %vm1700_vm15, %v6795_v7, 0.0 }
 0xe50   : > { %v6739_v58 = vpop.f32.mrb[164].mxu1  ;;  %v6812_v62 = vadd.f32 %v6811_v5, %v6810_v15 }
 0xe51   : > { %v6741_v37 = vpop.f32.mrb[165].mxu1  ;;  %v16997_v41 = vadd.f32 %v16979_v59, %v6739_v58 }
 0xe52   : > { %v6742_v52 = vpop.f32.mrb[166].mxu1 }
 0xe53   : > { %v6744_v63 = vpop.f32.mrb[167].mxu1  ;;  %v6796_v6 = vmax.f32 %v16997_v41, 0.0  ;;  %v17015_v14 = vadd.f32 %v16979_v59, %v6742_v52 }
 0xe55   : > { %v6813_v32 = vsel %vm1700_vm15, %v6796_v6, 0.0  ;;  %v6797_v9 = vmax.f32 %v17015_v14, 0.0 }
 0xe56   : > { %v6814_v58 = vadd.f32 %v6813_v32, %v6812_v62 }
 0xe57   : > { %v6815_v52 = vsel %vm1700_vm15, %v6797_v9, 0.0 }
 0xe58   : > { %v6747_v30 = vpop.f32.mrb[168].mxu1 }
 0xe59   : > { %v6749_v50 = vpop.f32.mrb[169].mxu1  ;;  %v16988_v53 = vadd.f32 %v16979_v59, %v6747_v30 }
 0xe5a   : > { %v6750_v26 = vpop.f32.mrb[170].mxu1 }
 0xe5b   : > { %v6752_v17 = vpop.f32.mrb[171].mxu1  ;;  %v16982_v16 = vadd.f32 %v16979_v59, %v6750_v26  ;;  %v6798_v48 = vmax.f32 %v16988_v53, 0.0 }
 0xe5d   : > { %v6799_v56 = vmax.f32 %v16982_v16, 0.0  ;;  %v6824_v1 = vsel %vm1700_vm15, %v6798_v48, 0.0 }
 0xe5f   : > { %v6825_v49 = vsel %vm1700_vm15, %v6799_v56, 0.0 }
 0xe60   : > { %v6755_v24 = vpop.f32.mrb[172].mxu1  ;;  %v6826_v22 = vadd.f32 %v6825_v49, %v6824_v1 }
 0xe61   : > { %v6757_v28 = vpop.f32.mrb[173].mxu1  ;;  %v16991_v45 = vadd.f32 %v16979_v59, %v6755_v24  ;;  %v6816_v24 = vadd.f32 %v6815_v52, %v6814_v58 }
 0xe62   : > { %v6758_v43 = vpop.f32.mrb[174].mxu1 }
 0xe63   : > { %v6760_v34 = vpop.f32.mrb[175].mxu1  ;;  %v6800_v21 = vmax.f32 %v16991_v45, 0.0  ;;  %v17004_v8 = vadd.f32 %v16979_v59, %v6758_v43  ;;  %v6817_v1 = vrot.slane %v6816_v24, 4  ;;  %v12108_v45 = vld [vmem:[#allocation2 + $0x4e0] sm:$0xff]  }
 0xe65   : > { %v6827_v23 = vsel %vm1700_vm15, %v6800_v21, 0.0  ;;  %v6801_v61 = vmax.f32 %v17004_v8, 0.0  ;;  %v6818_v32 = vadd.f32 %v6817_v1, %v6816_v24 }
 0xe66   : > { %v6828_v4 = vadd.f32 %v6827_v23, %v6826_v22 }
 0xe67   : > { %v6829_v35 = vsel %vm1700_vm15, %v6801_v61, 0.0 }
 0xe68   : > { %v6763_v57 = vpop.f32.mrb[176].mxu1  ;;  %v6830_v50 = vadd.f32 %v6829_v35, %v6828_v4 }
 0xe69   : > { %v6765_v20 = vpop.f32.mrb[177].mxu1  ;;  %v17007_v10 = vadd.f32 %v16979_v59, %v6763_v57 }
 0xe6a   : > { %v6766_v2 = vpop.f32.mrb[178].mxu1  ;;  %v6831_v57 = vrot.slane %v6830_v50, 4 }
 0xe6b   : > { %v17010_v39 = vadd.f32 %v16979_v59, %v6766_v2  ;;  %v6768_v42 = vpop.f32.mrb[179].mxu1  ;;  %v6802_v31 = vmax.f32 %v17007_v10, 0.0 }
 0xe6c   : > { %v6832_v15 = vadd.f32 %v6831_v57, %v6830_v50 }
 0xe6d   : > { %v6803_v12 = vmax.f32 %v17010_v39, 0.0  ;;  %v6838_v18 = vsel %vm1700_vm15, %v6802_v31, 0.0 }
 0xe6f   : > { %v6839_v60 = vsel %vm1700_vm15, %v6803_v12, 0.0 }
 0xe70   : > { %v6771_v55 = vpop.f32.mrb[180].mxu1  ;;  %v6840_v37 = vadd.f32 %v6839_v60, %v6838_v18 }
 0xe71   : > { %v17043_v25 = vadd.f32 %v16979_v59, %v6771_v55  ;;  %v6773_v38 = vpop.f32.mrb[181].mxu1 }
 0xe72   : > { %v6774_v11 = vpop.f32.mrb[182].mxu1 }
 0xe73   : > { %v6804_v0 = vmax.f32 %v17043_v25, 0.0  ;;  %v17053_v29 = vadd.f32 %v16979_v59, %v6774_v11  ;;  %v6776_v47 = vpop.f32.mrb[183].mxu1  ;;  %v6833_v11 = vrot.slane %v6832_v15, 2 }
 0xe75   : > { %v6841_v63 = vsel %vm1700_vm15, %v6804_v0, 0.0  ;;  %v6805_v30 = vmax.f32 %v17053_v29, 0.0  ;;  %v6834_v24 = vadd.f32 %v6833_v11, %v6832_v15 }
 0xe76   : > { %v6842_v26 = vadd.f32 %v6841_v63, %v6840_v37  ;;  %v6819_v63 = vrot.slane %v6818_v32, 2 }
 0xe77   : > { %v6843_v17 = vsel %vm1700_vm15, %v6805_v30, 0.0 }
 0xe78   : > { %v6844_v28 = vadd.f32 %v6843_v17, %v6842_v26  ;;  %v6779_v43 = vpop.f32.mrb[184].mxu1  ;;  %v6820_v57 = vadd.f32 %v6819_v63, %v6818_v32  ;;  %v6951_v32 = vld [vmem:[#allocation2 + $0x460] sm:$0xf] }
 0xe79   : > { %v6781_v34 = vpop.f32.mrb[185].mxu1  ;;  %v17066_v42 = vadd.f32 %v16979_v59, %v6779_v43 }
 0xe7a   : > { %v6782_v20 = vpop.f32.mrb[186].mxu1  ;;  %v6845_v2 = vrot.slane %v6844_v28, 4  ;;  %v6821_v1 = vrot.slane %v6820_v57, 1 }
 0xe7b   : > { %v17069_v49 = vadd.f32 %v16979_v59, %v6782_v20  ;;  %v6784_v5 = vpop.f32.mrb[187].mxu1  ;;  %v6806_v55 = vmax.f32 %v17066_v42, 0.0 }
 0xe7c   : > { %v6846_v22 = vadd.f32 %v6845_v2, %v6844_v28 }
 0xe7d   : > { %v6807_v23 = vmax.f32 %v17069_v49, 0.0  ;;  %v6852_v47 = vsel %vm1700_vm15, %v6806_v55, 0.0 }
 0xe7e   : > { %v6847_v18 = vrot.slane %v6846_v22, 2 }
 0xe7f   : > { %v6853_v38 = vsel %vm1700_vm15, %v6807_v23, 0.0 }
 0xe80   : > { %v6787_v60 = vpop.f32.mrb[188].mxu1  ;;  %v6854_v50 = vadd.f32 %v6853_v38, %v6852_v47  ;;  %v6848_v43 = vadd.f32 %v6847_v18, %v6846_v22  ;;  %v6822_v47 = vadd.f32 %v6821_v1, %v6820_v57 }
 0xe81   : > { %v17077_v62 = vadd.f32 %v16979_v59, %v6787_v60  ;;  %v6789_v4 = vpop.f32.mrb[189].mxu1 }
 0xe82   : > { %v6790_v35 = vpop.f32.mrb[190].mxu1  ;;  %v6849_v5 = vrot.slane %v6848_v43, 1  ;;  %v6823_v22 = vmul.f32 0.03125, %v6822_v47  ;;  %v12091_v47 = vld [vmem:[#allocation2 + $0x4b0] sm:$0xff]  }
 0xe83   : > { %v19044_v58 = vmax.f32 %v17077_v62, 0.0  ;;  %v17084_v37 = vadd.f32 %v16979_v59, %v6790_v35  ;;  %v6792_v52 = vpop.f32.mrb[191].mxu1  ;;  %v6835_v59 = vrot.slane %v6834_v24, 1 }
 0xe84   : > { %v6850_v35 = vadd.f32 %v6849_v5, %v6848_v43  ;;  %v10140_v43 = vld [vmem:[%s18924_s2 + $0xa] ss:$0 sm:$0xff] }
 0xe85   : > { %v6855_v26 = vsel %vm1700_vm15, %v19044_v58, 0.0  ;;  %v6809_v17 = vmax.f32 %v17084_v37, 0.0  ;;  %v6836_v38 = vadd.f32 %v6835_v59, %v6834_v24  ;;  %v6962_v24 = vsel %vm4404_vm14, %v6951_v32, 0  ;;  %v12098_v32 = vld [vmem:[#allocation2 + $0x480] sm:$0xff]  }
 0xe86   : > { %v6856_v28 = vadd.f32 %v6855_v26, %v6854_v50  ;;  %v6851_v11 = vmul.f32 0.03125, %v6850_v35  ;;  %v12090_v35 = vld [vmem:[#allocation2 + $0x468] sm:$0xff]  }
 0xe87   : > { %v6857_v34 = vsel %vm1700_vm15, %v6809_v17, 0.0  ;;  %v6837_v58 = vmul.f32 0.03125, %v6836_v38  ;;  %v12088_v38 = vld [vmem:[#allocation2 + $0x4a8] sm:$0xff]  }
 0xe88   : > { %v6858_v20 = vadd.f32 %v6857_v34, %v6856_v28 }
 0xe89   : > { %v6866_v50 = vsel %vm4307_vm10, %v6823_v22, %v6837_v58  ;;  %v12085_v22 = vld [vmem:[#allocation2 + $0x4f8] sm:$0xff]  }
 0xe8a   : > { %v6859_v2 = vrot.slane %v6858_v20, 4  ;;  %v6867_v63 = vsel %vm19411_vm3, %v6866_v50, %v6851_v11  ;;  %v12094_v11 = vld [vmem:[#allocation2 + $0x4b8] sm:$0xff]   ;;  %v12097_v50 = vld [vmem:[#allocation2 + $0x4c0] sm:$0xff]   ;;  %vm19418_vm3 = vcmp.lt.s32.totalorder %v12382_v3, 2 }
 0xe8c   : > { %v6860_v60 = vadd.f32 %v6859_v2, %v6858_v20 }
 0xe8e   : > { %v6861_v4 = vrot.slane %v6860_v60, 2 }
 0xe90   : > { %v6862_v52 = vadd.f32 %v6861_v4, %v6860_v60  ;;  %v12083_v60 = vld [vmem:[#allocation2 + $0x4e8] sm:$0xff]   ;;  %v12084_v4 = vld [vmem:[#allocation2 + $0x4f0] sm:$0xff]  }
 0xe91   : > { %8049 = vmatpush1.bf16.msra.mxu1 %v12083_v60 }
 0xe92   : > { %v6863_v15 = vrot.slane %v6862_v52, 1 }
 0xe94   : > { %v6864_v18 = vadd.f32 %v6863_v15, %v6862_v52  ;;  %v19414_v52 = vmov 0   ;;  %v12092_v15 = vld [vmem:[#allocation2 + $0x470] sm:$0xff]  }
 0xe95   : > { %8050 = vmatprep.subr.bf16.mxu1 %v19414_v52 }
 0xe96   : > { %v6865_v26 = vmul.f32 0.03125, %v6864_v18  ;;  %8051 = vmatpush1.bf16.msra.mxu1 %v12084_v4  ;;  %v12095_v18 = vld [vmem:[#allocation2 + $0x478] sm:$0xff]  }
 0xe97   : > { %8052 = vmatprep.subr.bf16.mxu1 %v19414_v52 }
 0xe98   : > { %v6868_v28 = vsel %vm19412_vm9, %v6867_v63, %v6865_v26  ;;  %v12086_v26 = vld [vmem:[#allocation2 + $0x500] sm:$0xff]   ;;  %v12099_v63 = vld [vmem:[#allocation2 + $0x4c8] sm:$0xff]   ;;  %vm19421_vm9 = vcmp.lt.s32.totalorder %v19213_v27, 2 }
 0xe99   : > { %v6878_v34 = vpack.c.bf16 %v6868_v28, %v6868_v28  ;;  %v12087_v28 = vld [vmem:[#allocation2 + $0x508] sm:$0xff]  }
 0xe9a   : > { %8053 = vmatpush1.bf16.msra.mxu1 %v12085_v22  ;;  %v7089_v22 = vpop.permute.xlu1 %7088 }
 0xe9b   : > { %10803 = vmatmul.mubr.msk.bf16.vlgmr.msra.gmra.mrb[152].mxu0 %vm1700_vm15, %v6878_v34  ;;  %8054 = vmatprep.subr.bf16.mxu1 %v19414_v52  ;;  %v12101_v34 = vld [vmem:[#allocation2 + $0x488] sm:$0xff]  }
 0xe9c   : > { %10807 = vmatpush3.bf16.msra.mxu0 %v6962_v24  ;;  %10808 = vmatprep.mubr.msk.bf16.mxu0 %vm12272_vm12, %v19410_v54  ;;  %v12102_v24 = vld [vmem:[#allocation2 + $0x4d0] sm:$0xff]  }
 0xe9d   : > { %10558 = vmatprep.subr.bf16.mxu0 %v12088_v38 }
 0xe9e   : > { %8055 = vmatpush1.bf16.msra.mxu1 %v12086_v26  ;;  %v7063_v26 = vpop.permute.xlu1 %7062 }
 0xe9f   : > { %8056 = vmatprep.subr.bf16.mxu1 %v19414_v52 }
 0xea2   : > { %8057 = vmatpush1.bf16.msra.mxu1 %v12087_v28  ;;  %v12106_v28 = vld [vmem:[#allocation2 + $0x498] sm:$0xff]  }
 0xea3   : > { %8058 = vmatprep.subr.bf16.mxu1 %v19414_v52 }
 0xf6e   : > { %v6944_v58 = vpop.f32.mrb[152].mxu0 }
 0xf6f   : > { %v6945_v57 = vadd.f32 %v10140_v43, %v6944_v58  ;;  %v10804_v20 = vpop.f32.mrb[153].mxu0  ;;  %v12089_v43 = vld [vmem:[#allocation2 + $0x510] sm:$0xff]  }
 0xf70   : > { %v6947_v59 = vpop.f32.mrb[154].mxu0  ;;  %v12103_v58 = vld [vmem:[#allocation2 + $0x490] sm:$0xff]   ;;  %8059 = vmatpush1.bf16.msra.mxu1 %v12089_v43  ;;  %v12096_v20 = vld [vmem:[#allocation2 + $0x520] sm:$0xff]  }
 0xf71   : > { %v6950_v2 = vmax.f32 %v6945_v57, 0.0  ;;  %v10805_v5 = vpop.f32.mrb[155].mxu0  ;;  %v12093_v57 = vld [vmem:[#allocation2 + $0x518] sm:$0xff]   ;;  %8060 = vmatprep.subr.bf16.mxu1 %v19414_v52  ;;  %v12100_v59 = vld [vmem:[#allocation2 + $0x528] sm:$0xff]  }
 0xf72   : > { %v10146_v5 = vld [vmem:[%s18924_s2 + $0xb] ss:$0 sm:$0xff] }
 0xf73   : > { %v6953_v1 = vpack.c.bf16 %v6950_v2, %v6950_v2  ;;  %v12104_v2 = vld [vmem:[#allocation2 + $0x530] sm:$0xff]  }
 0xf74   : > { %8061 = vmatpush1.bf16.msra.mxu1 %v12093_v57 }
 0xf75   : > { %10809 = vmatmul.mubr.msk.bf16.vlgmr.msra.gmra.mrb[156].mxu0 %vm19413_vm7, %v6953_v1  ;;  %8062 = vmatprep.subr.bf16.mxu1 %v19414_v52  ;;  %vm19423_vm7 = vcmp.lt.s32.totalorder %v19404_v36, 2 }
 0xf76   : > { %10559 = vmatpush3.bf16.msra.mxu0 %v12090_v35 }
 0xf77   : > { %10560 = vmatprep.subr.bf16.mxu0 %v12091_v47 }
 0xf78   : > { %8063 = vmatpush1.bf16.msra.mxu1 %v12096_v20  ;;  %v19416_v20 = vld [vmem:[#allocation32_spill] sm:$0xff] }
 0xf79   : > { %8064 = vmatprep.subr.bf16.mxu1 %v19414_v52 }
 0xf7a   : > { %10561 = vmatpush3.bf16.msra.mxu0 %v12092_v15  ;;  %v7059_v15 = vpop.permute.xlu0 %7058 }
 0xf7b   : > { %10562 = vmatprep.subr.bf16.mxu0 %v12094_v11 }
 0xf7c   : > { %8065 = vmatpush1.bf16.msra.mxu1 %v12100_v59 }
 0xf7d   : > { %8066 = vmatprep.subr.bf16.mxu1 %v19414_v52 }
 0xf7e   : > { %10563 = vmatpush3.bf16.msra.mxu0 %v12095_v18 }
 0xf7f   : > { %10564 = vmatprep.subr.bf16.mxu0 %v12097_v50  ;;  %v7061_v50 = vpop.permute.xlu0 %7060 }
 0xf80   : > { %8067 = vmatpush1.bf16.msra.mxu1 %v12104_v2  ;;  %v19417_v2 = vld [vmem:[#allocation38_spill] sm:$0xff] }
 0xf81   : > { %8068 = vmatprep.subr.bf16.mxu1 %v19414_v52 }
 0xf82   : > { %10565 = vmatpush3.bf16.msra.mxu0 %v12098_v32 }
 0xf83   : > { %10566 = vmatprep.subr.bf16.mxu0 %v12099_v63  ;;  %v7065_v32 = vpop.permute.xlu0 %7064  ;;  %v12105_v63 = vld [vmem:[#allocation2 + $0x4d8] sm:$0xff]  }
 0xf86   : > { %10567 = vmatpush3.bf16.msra.mxu0 %v12101_v34  ;;  %v12107_v34 = vld [vmem:[#allocation2 + $0x538] sm:$0xff]  }
 0xf87   : > { %10568 = vmatprep.subr.bf16.mxu0 %v12102_v24  ;;  %v7067_v24 = vpop.permute.xlu1 %7066  ;;  %8069 = vmatpush1.bf16.msra.mxu1 %v12107_v34 }
 0xf88   : > { %8070 = vmatprep.subr.bf16.mxu1 %v19414_v52 }
 0xf8a   : > { %10569 = vmatpush3.bf16.msra.mxu0 %v12103_v58  ;;  %v19415_v58 = vld [vmem:[#allocation30_spill] sm:$0xff] }
 0xf8b   : > { %10570 = vmatprep.subr.bf16.mxu0 %v12105_v63  ;;  %v7071_v41 = vpop.permute.xlu1 %7070  ;;  %v12109_v63 = vld [vmem:[#allocation2 + $0x4a0] sm:$0xff]  }
 0xf8e   : > { %10571 = vmatpush3.bf16.msra.mxu0 %v12106_v28 }
 0xf8f   : > { %10572 = vmatprep.subr.bf16.mxu0 %v12108_v45 }
 0xf92   : > { %10573 = vmatpush3.bf16.msra.mxu0 %v12109_v63 }
0x1048   : > { %v6998_v1 = vpop.f32.mrb[156].mxu0 }
0x1049   : > { %v6999_v60 = vadd.f32 %v10146_v5, %v6998_v1  ;;  %v10810_v38 = vpop.f32.mrb[157].mxu0  ;;  %v7069_v1 = vpop.permute.xlu0 %7068 }
0x104a   : > { %v7001_v4 = vpop.f32.mrb[158].mxu0 }
0x104b   : > { %v10148_v35 = vmul.f32 -1.442695, %v6999_v60  ;;  %v10811_v47 = vpop.f32.mrb[159].mxu0 }
0x104d   : > { %12155 = vpow2.f32 %v10148_v35 }
0x1057   : > { %v12156_v11 = vpop.eup %12155 }
0x1058   : > { %v7007_v18 = vadd.f32 1.0, %v12156_v11 }
0x105a   : > { %12157 = vrcp.f32 %v7007_v18 }
0x1064   : > { %v17117_v43 = vpop.eup %12157 }
0x1065   : > { %v17121_v57 = vrot.slane %v17117_v43, %v19415_v58  ;;  %v7013_v59 = vrot.slane %v17117_v43, %v19416_v20  ;;  %v17127_v5 = vrot.slane %v17117_v43, %v19417_v2 }
0x1067   : > { %v7026_v60 = vmul.f32 %v7013_v59, %v6794_v40  ;;  %v7027_v38 = vmul.f32 %v7013_v59, %v6795_v7  ;;  %v7028_v4 = vmul.f32 %v7013_v59, %v6796_v6  ;;  %v7041_v35 = vmul.f32 %v17121_v57, %v6809_v17 }
0x1068   : > { %v7029_v47 = vmul.f32 %v7013_v59, %v6797_v9  ;;  %v7030_v11 = vmul.f32 %v17127_v5, %v6798_v48  ;;  %v7031_v33 = vmul.f32 %v17127_v5, %v6799_v56  ;;  %v7032_v44 = vmul.f32 %v17127_v5, %v6800_v21  ;;  %v7073_v21 = vpop.permute.xlu0 %7072 }
0x1069   : > { %v7106_v7 = vadd.f32 %v7059_v15, %v7026_v60  ;;  %v7107_v40 = vadd.f32 %v7061_v50, %v7027_v38  ;;  %v7108_v6 = vadd.f32 %v7063_v26, %v7028_v4  ;;  %v7121_v37 = vadd.f32 %v7089_v22, %v7041_v35  ;;  %v12110_v26 = vld [vmem:[#allocation2 + $0x540] sm:$0xff]  }
0x106a   : > { %v7109_v17 = vadd.f32 %v7065_v32, %v7029_v47  ;;  %v7110_v14 = vadd.f32 %v7067_v24, %v7030_v11  ;;  %v7111_v9 = vadd.f32 %v7069_v1, %v7031_v33  ;;  %v7112_v18 = vadd.f32 %v7071_v41, %v7032_v44  ;;  %8071 = vmatpush1.bf16.msra.mxu1 %v12110_v26  ;;  %v19419_v26 = vld [vmem:[#allocation39_spill] sm:$0xff] }
0x106b   : > { %v17150_v53 = vmax.f32 %v7106_v7, 0.0  ;;  %v17152_v48 = vmax.f32 %v7107_v40, 0.0  ;;  %v17154_v16 = vmax.f32 %v7108_v6, 0.0  ;;  %v17156_v56 = vmax.f32 %v7121_v37, 0.0 }
0x106c   : > { %v17158_v28 = vmax.f32 %v7109_v17, 0.0  ;;  %v17160_v15 = vmax.f32 %v7110_v14, 0.0  ;;  %v17162_v22 = vmax.f32 %v7111_v9, 0.0  ;;  %v17164_v50 = vmax.f32 %v7112_v18, 0.0  ;;  %v7077_v9 = vpop.permute.xlu0 %7076  ;;  %v7075_v18 = vpop.permute.xlu1 %7074 }
0x106d   : > { %v11705_v32 = vpack.i.bf16 %v17152_v48, %v17150_v53  ;;  %v19045_v34 = vrot.slane %v17150_v53, 3  ;;  %v7379_v24 = vrot.slane %v17152_v48, 3  ;;  %v7380_v59 = vrot.slane %v17154_v16, 3 }
0x106e   : > { %v7330_v1 = vrot.slane %v17150_v53, 2  ;;  %v7331_v60 = vrot.slane %v17152_v48, 2  ;;  %v7332_v38 = vrot.slane %v17154_v16, 2  ;;  %v7186_v4 = vrot.slane %v17150_v53, 6 }
0x106f   : > { %11706 = vrot.lane.b32.xlu0 %v11705_v32, %s12267_s6  ;;  %v7407_v35 = vsel %vm2245_vm11, %v7379_v24, %v7380_v59  ;;  %v7408_v47 = vsel %vm2245_vm11, %v19045_v34, %v7379_v24  ;;  %v7187_v11 = vrot.slane %v17152_v48, 6  ;;  %v7201_v33 = vrot.slane %v17156_v56, 6 }
0x1070   : > { %v7726_v44 = vpack.c.bf16 %v7407_v35, %v7408_v47  ;;  %v7359_v41 = vsel %vm671_vm2, %v7331_v60, %v7332_v38  ;;  %v7360_v7 = vsel %vm671_vm2, %v7330_v1, %v7331_v60  ;;  %v7188_v40 = vrot.slane %v17154_v16, 6 }
0x1071   : > { %v11715_v6 = vpack.i.bf16 %v7359_v41, %v7360_v7  ;;  %v7216_v37 = vsel %vm524_vm13, %v7186_v4, %v7187_v11  ;;  %v7217_v17 = vsel %vm524_vm13, %v7201_v33, %v7186_v4  ;;  %v7189_v14 = vrot.slane %v17158_v28, 6 }
0x1072   : > { %10178 = vmatprep.mubr.msk.bf16.mxu1 %vm1700_vm15, %v7726_v44  ;;  %v7218_v45 = vsel %vm19418_vm3, 0.0, %v7217_v17  ;;  %v7215_v63 = vsel %vm524_vm13, %v7187_v11, %v7188_v40  ;;  %v7021_v32 = vrot.slane %v17117_v43, %v19419_v26  ;;  %v7333_v4 = vrot.slane %v17158_v28, 2  ;;  %v19420_v17 = vld [vmem:[#allocation10_spill] sm:$0xff] }
0x1073   : > { %11716 = vrot.lane.b32.xlu0 %v11715_v6, %s12267_s6  ;;  %v11710_v24 = vpack.i.bf16 %v7216_v37, %v7218_v45  ;;  %v7214_v60 = vsel %vm524_vm13, %v7188_v40, %v7189_v14  ;;  %v7334_v35 = vrot.slane %v17160_v15, 2  ;;  %v7335_v44 = vrot.slane %v17162_v22, 2 }
0x1074   : > { %v11725_v47 = vpack.i.bf16 %v7214_v60, %v7215_v63  ;;  %v7336_v41 = vrot.slane %v17164_v50, 2  ;;  %v7190_v11 = vrot.slane %v17160_v15, 6  ;;  %v7358_v7 = vsel %vm671_vm2, %v7332_v38, %v7333_v4 }
0x1075   : > { %11711 = vrot.lane.b32.xlu1 %v11710_v24, %s12267_s6  ;;  %v7357_v43 = vsel %vm671_vm2, %v7333_v4, %v7334_v35  ;;  %v7191_v40 = vrot.slane %v17162_v22, 6  ;;  %v7033_v6 = vmul.f32 %v17127_v5, %v6801_v61  ;;  %v11720_v37 = vpack.i.bf16 %v17158_v28, %v17154_v16  ;;  %v7081_v61 = vpop.permute.xlu0 %7080  ;;  %v7079_v5 = vpop.permute.xlu1 %7078 }
0x1076   : > { %v7365_v45 = vsel %vm415_vm5, 0.0, %v7357_v43  ;;  %v11730_v63 = vpack.i.bf16 %v17162_v22, %v17160_v15  ;;  %v7355_v38 = vsel %vm671_vm2, %v7335_v44, %v7336_v41  ;;  %v7356_v24 = vsel %vm671_vm2, %v7334_v35, %v7335_v44 }
0x1077   : > { %11726 = vrot.lane.b32.xlu0 %v11725_v47, %s12267_s6  ;;  %v7213_v8 = vsel %vm524_vm13, %v7189_v14, %v7190_v11  ;;  %v11735_v60 = vpack.i.bf16 %v7365_v45, %v7358_v7  ;;  %v7212_v4 = vsel %vm524_vm13, %v7190_v11, %v7191_v40  ;;  %v7113_v43 = vadd.f32 %v7073_v21, %v7033_v6 }
0x1078   : > { %v7034_v47 = vmul.f32 %v7021_v32, %v6802_v31  ;;  %v7192_v34 = vrot.slane %v17164_v50, 6  ;;  %v7035_v35 = vmul.f32 %v7021_v32, %v6803_v12  ;;  %v7036_v14 = vmul.f32 %v7021_v32, %v6804_v0 }
0x1079   : > { %11721 = vrot.lane.b32.xlu1 %v11720_v37, %s12267_s6  ;;  %v7037_v44 = vmul.f32 %v7021_v32, %v6805_v30  ;;  %v7222_v11 = vsel %vm19421_vm9, 0.0, %v7213_v8  ;;  %v17251_v21 = vmax.f32 %v7113_v43, 0.0  ;;  %v7038_v31 = vmul.f32 %v17121_v57, %v6806_v55  ;;  %v7085_v49 = vpop.permute.xlu0 %7084  ;;  %v7083_v6 = vpop.permute.xlu1 %7082 }
0x107a   : > { %v7114_v10 = vadd.f32 %v7075_v18, %v7034_v47  ;;  %v7115_v39 = vadd.f32 %v7077_v9, %v7035_v35  ;;  %v7116_v12 = vadd.f32 %v7079_v5, %v7036_v14  ;;  %v7039_v25 = vmul.f32 %v17121_v57, %v6807_v23  ;;  %v19422_v14 = vld [vmem:[#allocation12_spill] sm:$0xff] }
0x107b   : > { %11731 = vrot.lane.b32.xlu0 %v11730_v63, %s12267_s6  ;;  %v7117_v7 = vadd.f32 %v7081_v61, %v7037_v44  ;;  %v11745_v0 = vpack.i.bf16 %v7355_v38, %v7356_v24  ;;  %v7193_v29 = vrot.slane %v17251_v21, 6  ;;  %v7337_v18 = vrot.slane %v17251_v21, 2 }
0x107c   : > { %v17261_v30 = vmax.f32 %v7114_v10, 0.0  ;;  %v11740_v42 = vpack.i.bf16 %v7212_v4, %v7222_v11  ;;  %v7211_v55 = vsel %vm524_vm13, %v7191_v40, %v7192_v34  ;;  %v17267_v9 = vmax.f32 %v7115_v39, 0.0 }
0x107d   : > { %11736 = vrot.lane.b32.xlu1 %v11735_v60, %s12267_s6  ;;  %v17269_v32 = vmax.f32 %v7116_v12, 0.0  ;;  %v7210_v23 = vsel %vm524_vm13, %v7192_v34, %v7193_v29  ;;  %v17275_v63 = vmax.f32 %v7117_v7, 0.0  ;;  %v7118_v24 = vadd.f32 %v7083_v6, %v7038_v31 }
0x107e   : > { %v7338_v37 = vrot.slane %v17261_v30, 2  ;;  %v7194_v45 = vrot.slane %v17261_v30, 6  ;;  %v7339_v38 = vrot.slane %v17267_v9, 2  ;;  %v7119_v8 = vadd.f32 %v7085_v49, %v7039_v25 }
0x107f   : > { %11746 = vrot.lane.b32.xlu0 %v11745_v0, %s12267_s6  ;;  %v7340_v40 = vrot.slane %v17269_v32, 2  ;;  %v7195_v5 = vrot.slane %v17267_v9, 6  ;;  %v7196_v60 = vrot.slane %v17269_v32, 6  ;;  %v11755_v4 = vpack.i.bf16 %v7210_v23, %v7211_v55 }
0x1080   : > { %v7353_v61 = vsel %vm671_vm2, %v7337_v18, %v7338_v37  ;;  %v7209_v34 = vsel %vm524_vm13, %v7193_v29, %v7194_v45  ;;  %v11750_v43 = vpack.i.bf16 %v17251_v21, %v17164_v50  ;;  %v7354_v47 = vsel %vm671_vm2, %v7336_v41, %v7337_v18 }
0x1081   : > { %11741 = vrot.lane.b32.xlu1 %v11740_v42, %s12267_s6  ;;  %v11760_v35 = vpack.i.bf16 %v17267_v9, %v17261_v30  ;;  %v7369_v44 = vsel %vm419_vm8, 0.0, %v7353_v61  ;;  %v7351_v11 = vsel %vm671_vm2, %v7339_v38, %v7340_v40  ;;  %v7197_v10 = vrot.slane %v17275_v63, 6  ;;  %v7087_v42 = vpop.permute.xlu1 %7086 }
0x1082   : > { %v7352_v31 = vsel %vm671_vm2, %v7338_v37, %v7339_v38  ;;  %v7208_v39 = vsel %vm524_vm13, %v7194_v45, %v7195_v5  ;;  %v7226_v41 = vsel %vm19423_vm7, 0.0, %v7209_v34  ;;  %v17305_v12 = vmax.f32 %v7118_v24, 0.0 }
0x1083   : > { %11756 = vrot.lane.b32.xlu0 %v11755_v4, %s12267_s6  ;;  %v7207_v7 = vsel %vm524_vm13, %v7195_v5, %v7196_v60  ;;  %v17309_v25 = vmax.f32 %v7119_v8, 0.0  ;;  %v7341_v0 = vrot.slane %v17275_v63, 2  ;;  %v19424_v29 = vmax.f32 %v17077_v62, 0.0 }
0x1084   : > { %v7206_v55 = vsel %vm524_vm13, %v7196_v60, %v7197_v10  ;;  %v7342_v49 = vrot.slane %v17305_v12, 2  ;;  %v7198_v6 = vrot.slane %v17305_v12, 6  ;;  %v7345_v23 = vrot.slane %v17156_v56, 2 }
0x1085   : > { %v7040_v18 = vmul.f32 %v17121_v57, %v19424_v29  ;;  %11751 = vrot.lane.b32.xlu1 %v11750_v43, %s12267_s6  ;;  %v11765_v37 = vpack.i.bf16 %v7369_v44, %v7354_v47  ;;  %v11775_v45 = vpack.i.bf16 %v7351_v11, %v7352_v31  ;;  %v7343_v57 = vrot.slane %v17309_v25, 2 }
0x1086   : > { %v7349_v62 = vsel %vm671_vm2, %v7341_v0, %v7342_v49  ;;  %v7199_v24 = vrot.slane %v17309_v25, 6  ;;  %v7205_v8 = vsel %vm524_vm13, %v7197_v10, %v7198_v6  ;;  %v11770_v61 = vpack.i.bf16 %v7208_v39, %v7226_v41 }
0x1087   : > { %v7120_v38 = vadd.f32 %v7087_v42, %v7040_v18  ;;  %11761 = vrot.lane.b32.xlu0 %v11760_v35, %s12267_s6  ;;  %v11785_v5 = vpack.i.bf16 %v7206_v55, %v7207_v7  ;;  %v11780_v34 = vpack.i.bf16 %v17275_v63, %v17269_v32  ;;  %v7350_v4 = vsel %vm671_vm2, %v7340_v40, %v7341_v0 }
0x1088   : > { %vm19425_vm3 = vcmp.ge.s32.totalorder %v19360_v51, 30  ;;  %v7361_v47 = vsel %vm671_vm2, %v7345_v23, %v7330_v1  ;;  %v7283_v35 = vrot.slane %v17152_v48, 1  ;;  %v17347_v11 = vsel %vm524_vm13, %v7198_v6, %v7199_v24 }
0x1089   : > { %v17330_v60 = vmax.f32 %v7120_v38, 0.0  ;;  %11766 = vrot.lane.b32.xlu1 %v11765_v37, %s12267_s6  ;;  %v7373_v43 = vsel %vm19425_vm3, 0.0, %v7349_v62  ;;  %vm19426_vm9 = vcmp.lt.s32.totalorder %v19408_v46, 2  ;;  %v11790_v31 = vpack.i.bf16 %v17309_v25, %v17305_v12 }
0x108a   : > { %v17351_v40 = vsel %vm19426_vm9, 0.0, %v7205_v8  ;;  %v7348_v1 = vsel %vm671_vm2, %v7342_v49, %v7343_v57  ;;  %v7284_v39 = vrot.slane %v17154_v16, 1  ;;  %v19046_v41 = vrot.slane %v17150_v53, 1 }
0x108b   : > { %v19049_v44 = vrot.slane %v17330_v60, 2  ;;  %v7200_v10 = vrot.slane %v17330_v60, 6  ;;  %11776 = vrot.lane.b32.xlu0 %v11775_v45, %s12267_s6  ;;  %v11795_v7 = vpack.i.bf16 %v7373_v43, %v7350_v4  ;;  %vm19427_vm7 = vcmp.ge.s32.totalorder %v12690_v13, 30 }
0x108c   : > { %v17363_v0 = vsel %vm19427_vm7, 0.0, %v7361_v47  ;;  %v7139_v29 = vrot.slane %v17152_v48, 5  ;;  %v19047_v18 = vrot.slane %v17156_v56, 5  ;;  %v11800_v55 = vpack.i.bf16 %v17347_v11, %v17351_v40 }
0x108d   : > { %11771 = vrot.lane.b32.xlu1 %v11770_v61, %s12267_s6  ;;  %v7347_v42 = vsel %vm671_vm2, %v7343_v57, %v19049_v44  ;;  %v7202_v49 = vsel %vm524_vm13, %v7200_v10, %v7201_v33  ;;  %v17380_v6 = vsel %vm622_vm1, %v7283_v35, %v7284_v39  ;;  %v17386_v37 = vsel %vm622_vm1, %v19046_v41, %v7283_v35 }
0x108e   : > { %v7138_v45 = vrot.slane %v17150_v53, 5  ;;  %v7234_v38 = vrot.slane %v17150_v53, 7  ;;  %v7235_v62 = vrot.slane %v17152_v48, 7  ;;  %v19048_v33 = vrot.slane %v17156_v56, 7 }
0x108f   : > { %11786 = vrot.lane.b32.xlu0 %v11785_v5, %s12267_s6  ;;  %v7381_v57 = vrot.slane %v17158_v28, 3  ;;  %v7382_v8 = vrot.slane %v17160_v15, 3  ;;  %v7236_v61 = vrot.slane %v17154_v16, 7  ;;  %vm19428_vm3 = vcmp.lt.s32.totalorder %v19377_v19, 3 }
0x1090   : > { %v17398_v4 = vsel %vm19428_vm3, %v7138_v45, %v7139_v29  ;;  %vm19429_vm9 = vmmov %vm19428_vm3  ;;  %v17408_v48 = vsel %vm573_vm0, %v7234_v38, %v7235_v62  ;;  %v7237_v5 = vrot.slane %v17158_v28, 7  ;;  %v7203_v47 = vsel %vm524_vm13, %v7199_v24, %v7200_v10 }
0x1091   : > { %v17404_v43 = vsel %vm19429_vm9, %v19047_v18, %v7138_v45  ;;  %11781 = vrot.lane.b32.xlu1 %v11780_v34, %s12267_s6  ;;  %v17418_v35 = vsel %vm573_vm0, %v19048_v33, %v7234_v38  ;;  %v7405_v11 = vsel %vm2245_vm11, %v7381_v57, %v7382_v8  ;;  %v17426_v40 = vsel %vm2245_vm11, %v7380_v59, %v7381_v57  ;;  %vm19431_vm9 = vmmov %vm19428_vm3 }
0x1092   : > { %v11805_v45 = vpack.i.bf16 %v7347_v42, %v7348_v1  ;;  %vm19430_vm7 = vcmp.ge.s32.totalorder %v19420_v17, 29  ;;  %v17434_v24 = vsel %vm573_vm0, %v7236_v61, %v7237_v5  ;;  %v17438_v10 = vsel %vm573_vm0, %v7235_v62, %v7236_v61 }
0x1093   : > { %v17430_v34 = vsel %vm19430_vm7, 0.0, %v7405_v11  ;;  %11791 = vrot.lane.b32.xlu0 %v11790_v31, %s12267_s6  ;;  %v7140_v59 = vrot.slane %v17154_v16, 5  ;;  %v7141_v1 = vrot.slane %v17158_v28, 5  ;;  %v7285_v42 = vrot.slane %v17158_v28, 1  ;;  %vm19432_vm7 = vmmov %vm19428_vm3 }
0x1094   : > { %v7286_v57 = vrot.slane %v17160_v15, 1  ;;  %v7238_v11 = vrot.slane %v17160_v15, 7  ;;  %v7239_v41 = vrot.slane %v17162_v22, 7  ;;  %v7383_v62 = vrot.slane %v17162_v22, 3 }
0x1095   : > { %11796 = vrot.lane.b32.xlu1 %v11795_v7, %s12267_s6  ;;  %v17453_v31 = vsel %vm19428_vm3, %v7140_v59, %v7141_v1  ;;  %v17457_v16 = vsel %vm19431_vm9, %v7139_v29, %v7140_v59  ;;  %v17461_v28 = vsel %vm622_vm1, %v7284_v39, %v7285_v42  ;;  %v7384_v61 = vrot.slane %v17164_v50, 3 }
0x1096   : > { %v17466_v38 = vsel %vm622_vm1, %v7285_v42, %v7286_v57  ;;  %v17470_v7 = vsel %vm573_vm0, %v7238_v11, %v7239_v41  ;;  %v17474_v18 = vsel %vm573_vm0, %v7237_v5, %v7238_v11  ;;  %v17478_v29 = vsel %vm2245_vm11, %v7382_v8, %v7383_v62 }
0x1097   : > { %11806 = vrot.lane.b32.xlu0 %v11805_v45, %s12267_s6  ;;  %v11815_v39 = vpack.i.bf16 %v7202_v49, %v7203_v47  ;;  %v11810_v59 = vpack.i.bf16 %v17156_v56, %v17330_v60  ;;  %v17485_v42 = vsel %vm2245_vm11, %v7383_v62, %v7384_v61  ;;  %v7142_v33 = vrot.slane %v17160_v15, 5 }
0x1098   : > { %v7143_v11 = vrot.slane %v17162_v22, 5  ;;  %v7287_v8 = vrot.slane %v17162_v22, 1  ;;  %v7288_v44 = vrot.slane %v17164_v50, 1  ;;  %v7240_v47 = vrot.slane %v17164_v50, 7 }
0x1099   : > { %11801 = vrot.lane.b32.xlu1 %v11800_v55, %s12267_s6  ;;  %v17496_v49 = vsel %vm19432_vm7, %v7141_v1, %v7142_v33  ;;  %v7241_v45 = vrot.slane %v17251_v21, 7  ;;  %v7385_v15 = vrot.slane %v17251_v21, 3  ;;  %v19433_v62 = vrot.slane %v17330_v60, 2  ;;  %vm19435_vm7 = vmmov %vm19428_vm3 }
0x109a   : > { %v17509_v55 = vsel %vm19428_vm3, %v7142_v33, %v7143_v11  ;;  %v17513_v1 = vsel %vm622_vm1, %v7287_v8, %v7288_v44  ;;  %v17517_v5 = vsel %vm622_vm1, %v7286_v57, %v7287_v8  ;;  %v7386_v33 = vrot.slane %v17261_v30, 3 }
0x109b   : > { %v7346_v22 = vsel %vm671_vm2, %v19433_v62, %v7345_v23  ;;  %11816 = vrot.lane.b32.xlu0 %v11815_v39, %s12267_s6  ;;  %v17522_v58 = vsel %vm573_vm0, %v7240_v47, %v7241_v45  ;;  %v17526_v23 = vsel %vm573_vm0, %v7239_v41, %v7240_v47  ;;  %v17531_v62 = vsel %vm2245_vm11, %v7384_v61, %v7385_v15 }
0x109c   : > { %v7144_v26 = vrot.slane %v17164_v50, 5  ;;  %v7145_v57 = vrot.slane %v17251_v21, 5  ;;  %v7289_v39 = vrot.slane %v17251_v21, 1  ;;  %v7290_v8 = vrot.slane %v17261_v30, 1 }
0x109d   : > { %11811 = vrot.lane.b32.xlu1 %v11810_v59, %s12267_s6  ;;  %v7401_v41 = vsel %vm2245_vm11, %v7385_v15, %v7386_v33  ;;  %v7242_v47 = vrot.slane %v17261_v30, 7  ;;  %v7243_v2 = vrot.slane %v17267_v9, 7  ;;  %v7387_v61 = vrot.slane %v17267_v9, 3 }
0x109e   : > { %vm19434_vm9 = vcmp.ge.s32.totalorder %v19422_v14, 29  ;;  %v17549_v21 = vsel %vm19435_vm7, %v7144_v26, %v7145_v57  ;;  %v17553_v59 = vsel %vm19428_vm3, %v7143_v11, %v7144_v26  ;;  %v17557_v15 = vsel %vm622_vm1, %v7289_v39, %v7290_v8  ;;  %vm19440_vm7 = vmmov %vm19428_vm3 }
0x109f   : > { %v17545_v50 = vsel %vm19434_vm9, 0.0, %v7401_v41  ;;  %v11820_v20 = vpack.i.bf16 %v17363_v0, %v7346_v22  ;;  %v17564_v41 = vsel %vm622_vm1, %v7288_v44, %v7289_v39  ;;  %v17568_v52 = vsel %vm573_vm0, %v7242_v47, %v7243_v2  ;;  %vm19438_vm9 = vmmov %vm19428_vm3 }
0x10a0   : > { %v17572_v26 = vsel %vm573_vm0, %v7241_v45, %v7242_v47  ;;  %v7388_v11 = vrot.slane %v17269_v32, 3  ;;  %v17577_v0 = vsel %vm2245_vm11, %v7386_v33, %v7387_v61  ;;  %v7146_v22 = vrot.slane %v17261_v30, 5 }
0x10a1   : > { %19436 = vst [vmem:[#allocation49_spill] sm:$0xff] %v17577_v0  ;;  %11821 = vrot.lane.b32.xlu1 %v11820_v20, %s12267_s6  ;;  %v7147_v44 = vrot.slane %v17267_v9, 5  ;;  %v7291_v39 = vrot.slane %v17267_v9, 1  ;;  %v7292_v54 = vrot.slane %v17269_v32, 1  ;;  %v7244_v33 = vrot.slane %v17269_v32, 7 }
0x10a2   : > { %v17586_v45 = vsel %vm2245_vm11, %v7387_v61, %v7388_v11  ;;  %v17590_v47 = vsel %vm19438_vm9, %v7145_v57, %v7146_v22  ;;  %v7245_v30 = vrot.slane %v17275_v63, 7  ;;  %v7389_v20 = vrot.slane %v17275_v63, 3  ;;  %vm19446_vm9 = vmmov %vm19428_vm3 }
0x10a3   : > { %19437 = vst [vmem:[#allocation55_spill] sm:$0xff] %v17586_v45  ;;  %19439 = vst [vmem:[#allocation57_spill] sm:$0xff] %v17590_v47  ;;  %v17598_v9 = vsel %vm19440_vm7, %v7146_v22, %v7147_v44  ;;  %v17602_v46 = vsel %vm622_vm1, %v7291_v39, %v7292_v54  ;;  %v17606_v61 = vsel %vm622_vm1, %v7290_v8, %v7291_v39  ;;  %v7390_v22 = vrot.slane %v17305_v12, 3 }
0x10a4   : > { %19441 = vst [vmem:[#allocation58_spill] sm:$0xff] %v17598_v9  ;;  %19442 = vst [vmem:[#allocation26_spill] sm:$0xff] %v17602_v46  ;;  %v17610_v57 = vsel %vm573_vm0, %v7244_v33, %v7245_v30  ;;  %v17614_v47 = vsel %vm573_vm0, %v7243_v2, %v7244_v33  ;;  %v7148_v0 = vrot.slane %v17269_v32, 5  ;;  %v7149_v45 = vrot.slane %v17275_v63, 5 }
0x10a5   : > { %19443 = vst [vmem:[#allocation29_spill] sm:$0xff] %v17610_v57  ;;  %19444 = vst [vmem:[#allocation46_spill] sm:$0xff] %v17614_v47  ;;  %v7293_v9 = vrot.slane %v17275_v63, 1  ;;  %v17623_v8 = vsel %vm2245_vm11, %v7388_v11, %v7389_v20  ;;  %v7294_v39 = vrot.slane %v17305_v12, 1  ;;  %v7246_v57 = vrot.slane %v17305_v12, 7 }
0x10a6   : > { %19445 = vst [vmem:[#allocation48_spill] sm:$0xff] %v17623_v8  ;;  %v7247_v2 = vrot.slane %v17309_v25, 7  ;;  %v7397_v33 = vsel %vm2245_vm11, %v7389_v20, %v7390_v22  ;;  %v17632_v32 = vsel %vm19428_vm3, %v7148_v0, %v7149_v45  ;;  %v17636_v63 = vsel %vm19446_vm9, %v7147_v44, %v7148_v0  ;;  %vm19455_vm9 = vmmov %vm19428_vm3 }
0x10a7   : > { %v17640_v11 = vsel %vm622_vm1, %v7292_v54, %v7293_v9  ;;  %vm19448_vm7 = vcmp.ge.s32.totalorder %v19360_v51, 29  ;;  %v17648_v46 = vsel %vm622_vm1, %v7293_v9, %v7294_v39  ;;  %v17656_v0 = vsel %vm573_vm0, %v7245_v30, %v7246_v57 }
0x10a8   : > { %19447 = vst [vmem:[#allocation18_spill] sm:$0xff] %v17640_v11  ;;  %v17644_v47 = vsel %vm19448_vm7, 0.0, %v7397_v33  ;;  %19450 = vst [vmem:[#allocation28_spill] sm:$0xff] %v17648_v46  ;;  %v17652_v20 = vsel %vm573_vm0, %v7246_v57, %v7247_v2  ;;  %v7391_v44 = vrot.slane %v17309_v25, 3  ;;  %v7392_v33 = vrot.slane %v17330_v60, 3 }
0x10a9   : > { %19449 = vst [vmem:[#allocation20_spill] sm:$0xff] %v17644_v47  ;;  %19451 = vst [vmem:[#allocation23_spill] sm:$0xff] %v17652_v20  ;;  %v7150_v11 = vrot.slane %v17305_v12, 5  ;;  %v7151_v9 = vrot.slane %v17309_v25, 5  ;;  %v7295_v51 = vrot.slane %v17309_v25, 1  ;;  %v7296_v30 = vrot.slane %v17330_v60, 1 }
0x10aa   : > { %v17667_v46 = vsel %vm2245_vm11, %v7390_v22, %v7391_v44  ;;  %v7248_v57 = vrot.slane %v17330_v60, 7  ;;  %v7393_v54 = vrot.slane %v17156_v56, 3  ;;  %v17674_v8 = vsel %vm2245_vm11, %v7391_v44, %v7392_v33 }
0x10ab   : > { %19452 = vst [vmem:[#allocation35_spill] sm:$0xff] %v17667_v46  ;;  %19453 = vst [vmem:[#allocation33_spill] sm:$0xff] %v17674_v8  ;;  %v17678_v12 = vsel %vm19428_vm3, %v7150_v11, %v7151_v9  ;;  %v17682_v25 = vsel %vm19455_vm9, %v7149_v45, %v7150_v11  ;;  %v17686_v22 = vsel %vm622_vm1, %v7294_v39, %v7295_v51  ;;  %v19456_v44 = vrot.slane %v17156_v56, 7 }
0x10ac   : > { %19454 = vst [vmem:[#allocation43_spill] sm:$0xff] %v17678_v12  ;;  %v17692_v20 = vsel %vm622_vm1, %v7295_v51, %v7296_v30  ;;  %v17702_v45 = vsel %vm573_vm0, %v7247_v2, %v7248_v57  ;;  %v17706_v39 = vsel %vm2245_vm11, %v7392_v33, %v7393_v54  ;;  %v19458_v11 = vrot.slane %v17150_v53, 3  ;;  %vm19462_vm9 = vmmov %vm19428_vm3 }
0x10ad   : > { %v17698_v12 = vsel %vm573_vm0, %v7248_v57, %v19456_v44  ;;  %19457 = vst [vmem:[#allocation41_spill] sm:$0xff] %v17706_v39  ;;  %v7152_v47 = vrot.slane %v17330_v60, 5  ;;  %vm19459_vm7 = vcmp.ge.s32.totalorder %v12690_v13, 29  ;;  %v7297_v44 = vrot.slane %v17156_v56, 1 }
0x10ae   : > { %v7409_v51 = vsel %vm2245_vm11, %v7393_v54, %v19458_v11  ;;  %v19461_v57 = vrot.slane %v17156_v56, 5  ;;  %v19464_v11 = vrot.slane %v17150_v53, 1  ;;  %vm19465_vm11 = vcmp.lt.s32.totalorder %v12382_v3, 1 }
0x10af   : > { %v17715_v46 = vsel %vm19459_vm7, 0.0, %v7409_v51  ;;  %v17728_v54 = vsel %vm19462_vm9, %v7151_v9, %v7152_v47  ;;  %v17732_v60 = vsel %vm622_vm1, %v7296_v30, %v7297_v44  ;;  %vm19466_vm7 = vcmp.lt.s32.totalorder %v12382_v3, 3 }
0x10b0   : > { %19460 = vst [vmem:[#allocation50_spill] sm:$0xff] %v17715_v46  ;;  %v17724_v33 = vsel %vm19428_vm3, %v7152_v47, %v19461_v57  ;;  %19463 = vst [vmem:[#allocation51_spill] sm:$0xff] %v17732_v60  ;;  %v17738_v51 = vsel %vm622_vm1, %v7297_v44, %v19464_v11  ;;  %v7266_v57 = vsel %vm19465_vm11, 0.0, %v17418_v35  ;;  %vm19468_vm3 = vcmp.lt.s32.totalorder %v19213_v27, 3 }
0x10b1   : > { %vm19470_vm9 = vcmp.lt.s32.totalorder %v19404_v36, 1  ;;  %vm19471_vm11 = vcmp.ge.s32.totalorder %v19422_v14, 31 }
0x10e1   : > { %v11707_v2 = vpop.permute.xlu0 %11706 }
0x10e2   : > { %v11709_v56 = vunpack.i.h.bf16 %v11707_v2  ;;  %v11708_v39 = vunpack.i.l.bf16 %v11707_v2 }
0x10e4   : > { %v7634_v47 = vsel %vm1700_vm15, %v7266_v57, %v11708_v39  ;;  %v7635_v9 = vsel %vm1700_vm15, %v17408_v48, %v11709_v56  ;;  %v7170_v39 = vsel %vm19466_vm7, 0.0, %v17404_v43  ;;  %vm19475_vm7 = vcmp.lt.s32.totalorder %v19404_v36, 3 }
0x10e5   : > { %v11717_v30 = vpop.permute.xlu0 %11716  ;;  %v7724_v46 = vpack.c.bf16 %v7635_v9, %v7634_v47 }
0x10e6   : > { %v11719_v60 = vunpack.i.h.bf16 %v11717_v30  ;;  %v11718_v53 = vunpack.i.l.bf16 %v11717_v30 }
0x10e7   : > { %v11712_v8 = vpop.permute.xlu1 %11711  ;;  %7983 = vmatprep.mubr.bf16.mxu0 %v7724_v46 }
0x10e8   : > { %v7651_v44 = vsel %vm1700_vm15, %v17380_v6, %v11719_v60  ;;  %v7650_v2 = vsel %vm1700_vm15, %v17386_v37, %v11718_v53  ;;  %v11714_v11 = vunpack.i.h.bf16 %v11712_v8  ;;  %v11713_v19 = vunpack.i.l.bf16 %v11712_v8 }
0x10e9   : > { %v7725_v35 = vpack.c.bf16 %v7651_v44, %v7650_v2  ;;  %v11727_v48 = vpop.permute.xlu0 %11726  ;;  %v19467_v8 = vpack.c.bf16 %v17430_v34, %v17426_v40 }
0x10ea   : > { %v7618_v56 = vsel %vm1700_vm15, %v7170_v39, %v11713_v19  ;;  %v7619_v57 = vsel %vm1700_vm15, %v17398_v4, %v11714_v11  ;;  %v11729_v46 = vunpack.i.h.bf16 %v11727_v48  ;;  %v11728_v47 = vunpack.i.l.bf16 %v11727_v48 }
0x10eb   : > { %v7723_v9 = vpack.c.bf16 %v7619_v57, %v7618_v56  ;;  %v11722_v6 = vpop.permute.xlu1 %11721  ;;  %8081 = vmatmul.mubr.bf16.vlgmr.msra.gmra.mrb[192].mxu1 %v7725_v35 }
0x10ec   : > { %v11724_v60 = vunpack.i.h.bf16 %v11722_v6  ;;  %v11723_v37 = vunpack.i.l.bf16 %v11722_v6  ;;  %10179 = vmatprep.mubr.msk.bf16.mxu1 %vm1700_vm15, %v19467_v8  ;;  %v7620_v43 = vsel %vm1700_vm15, %v17457_v16, %v11728_v47  ;;  %v7621_v19 = vsel %vm1700_vm15, %v17453_v31, %v11729_v46 }
0x10ed   : > { %7984 = vmatmul.mubr.bf16.vlgmr.msra.gmra.mrb[160].mxu0 %v7723_v9  ;;  %v11732_v4 = vpop.permute.xlu0 %11731  ;;  %v7727_v30 = vpack.c.bf16 %v7621_v19, %v7620_v43  ;;  %v7270_v16 = vsel %vm448_vm6, 0.0, %v17474_v18  ;;  %v7174_v43 = vsel %vm19468_vm3, 0.0, %v17496_v49  ;;  %v19469_v19 = vpack.c.bf16 %v17485_v42, %v17478_v29 }
0x10ee   : > { %v11734_v53 = vunpack.i.h.bf16 %v11732_v4  ;;  %v11733_v44 = vunpack.i.l.bf16 %v11732_v4  ;;  %v7636_v2 = vsel %vm1700_vm15, %v17438_v10, %v11723_v37  ;;  %v7637_v11 = vsel %vm1700_vm15, %v17434_v24, %v11724_v60 }
0x10ef   : > { %v11737_v40 = vpop.permute.xlu1 %11736  ;;  %v7728_v34 = vpack.c.bf16 %v7637_v11, %v7636_v2  ;;  %v7317_v10 = vsel %vm431_vm4, 0.0, %v17466_v38 }
0x10f0   : > { %v11739_v35 = vunpack.i.h.bf16 %v11737_v40  ;;  %v11738_v39 = vunpack.i.l.bf16 %v11737_v40  ;;  %v7638_v31 = vsel %vm1700_vm15, %v7270_v16, %v11733_v44  ;;  %v7639_v48 = vsel %vm1700_vm15, %v17470_v7, %v11734_v53 }
0x10f1   : > { %7991 = vmatprep.mubr.bf16.mxu0 %v7728_v34  ;;  %v11747_v56 = vpop.permute.xlu0 %11746  ;;  %v7732_v24 = vpack.c.bf16 %v7639_v48, %v7638_v31  ;;  %v7274_v48 = vsel %vm19470_vm9, 0.0, %v17572_v26 }
0x10f2   : > { %v11749_v57 = vunpack.i.h.bf16 %v11747_v56  ;;  %v11748_v46 = vunpack.i.l.bf16 %v11747_v56  ;;  %v7652_v47 = vsel %vm1700_vm15, %v17461_v28, %v11738_v39  ;;  %v7653_v18 = vsel %vm1700_vm15, %v7317_v10, %v11739_v35 }
0x10f3   : > { %v11742_v9 = vpop.permute.xlu1 %11741  ;;  %v7729_v6 = vpack.c.bf16 %v7653_v18, %v7652_v47 }
0x10f4   : > { %v11744_v60 = vunpack.i.h.bf16 %v11742_v9  ;;  %v11743_v37 = vunpack.i.l.bf16 %v11742_v9  ;;  %v7654_v7 = vsel %vm1700_vm15, %v17517_v5, %v11748_v46  ;;  %v7655_v8 = vsel %vm1700_vm15, %v17513_v1, %v11749_v57 }
0x10f5   : > { %7992 = vmatmul.mubr.bf16.gmra.mrb[164].mxu0 %v7727_v30  ;;  %8089 = vmatmul.mubr.bf16.gmra.mrb[196].mxu1 %v7729_v6  ;;  %v11757_v38 = vpop.permute.xlu0 %11756  ;;  %v7733_v28 = vpack.c.bf16 %v7655_v8, %v7654_v7  ;;  %v19472_v57 = vpack.c.bf16 %v17545_v50, %v17531_v62  ;;  %v19474_v50 = vld [vmem:[#allocation57_spill] sm:$0xff] }
0x10f6   : > { %7999 = vmatprep.mubr.bf16.mxu0 %v7732_v24  ;;  %10180 = vmatprep.mubr.msk.bf16.mxu1 %vm1700_vm15, %v19469_v19  ;;  %v11759_v4 = vunpack.i.h.bf16 %v11757_v38  ;;  %v11758_v53 = vunpack.i.l.bf16 %v11757_v38  ;;  %v7622_v5 = vsel %vm1700_vm15, %v7174_v43, %v11743_v37  ;;  %v7623_v1 = vsel %vm1700_vm15, %v17509_v55, %v11744_v60  ;;  %v19473_v37 = vld [vmem:[#allocation26_spill] sm:$0xff] }
0x10f7   : > { %v11752_v30 = vpop.permute.xlu1 %11751  ;;  %v7731_v44 = vpack.c.bf16 %v7623_v1, %v7622_v5  ;;  %v7178_v8 = vsel %vm19475_vm7, 0.0, %v19474_v50  ;;  %v19476_v19 = vld [vmem:[#allocation58_spill] sm:$0xff]  ;;  %vm19494_vm7 = vcmp.ge.s32.totalorder %v12690_v13, 31 }
0x10f8   : > { %v11754_v2 = vunpack.i.h.bf16 %v11752_v30  ;;  %v11753_v11 = vunpack.i.l.bf16 %v11752_v30  ;;  %v7624_v49 = vsel %vm1700_vm15, %v17553_v59, %v11758_v53  ;;  %v7625_v40 = vsel %vm1700_vm15, %v17549_v21, %v11759_v4 }
0x10f9   : > { %v11762_v29 = vpop.permute.xlu0 %11761  ;;  %v7735_v42 = vpack.c.bf16 %v7625_v40, %v7624_v49  ;;  %v19477_v49 = vld [vmem:[#allocation55_spill] sm:$0xff]  ;;  %v19478_v40 = vld [vmem:[#allocation49_spill] sm:$0xff] }
0x10fa   : > { %v11764_v34 = vunpack.i.h.bf16 %v11762_v29  ;;  %v11763_v16 = vunpack.i.l.bf16 %v11762_v29  ;;  %v7640_v35 = vsel %vm1700_vm15, %v17526_v23, %v11753_v11  ;;  %v7641_v55 = vsel %vm1700_vm15, %v17522_v58, %v11754_v2 }
0x10fb   : > { %v11767_v39 = vpop.permute.xlu1 %11766  ;;  %v7736_v31 = vpack.c.bf16 %v7641_v55, %v7640_v35  ;;  %v7321_v58 = vsel %vm19471_vm11, 0.0, %v17557_v15  ;;  %v19479_v29 = vpack.c.bf16 %v19477_v49, %v19478_v40  ;;  %v19480_v35 = vld [vmem:[#allocation46_spill] sm:$0xff] }
0x10fc   : > { %v11769_v59 = vunpack.i.h.bf16 %v11767_v39  ;;  %v11768_v56 = vunpack.i.l.bf16 %v11767_v39  ;;  %v7642_v21 = vsel %vm1700_vm15, %v7274_v48, %v11763_v16  ;;  %v7643_v10 = vsel %vm1700_vm15, %v17568_v52, %v11764_v34  ;;  %v19481_v39 = vld [vmem:[#allocation29_spill] sm:$0xff] }
0x10fd   : > { %8000 = vmatmul.mubr.bf16.gmra.mrb[168].mxu0 %v7731_v44  ;;  %8097 = vmatmul.mubr.bf16.gmra.mrb[200].mxu1 %v7733_v28  ;;  %v11777_v24 = vpop.permute.xlu0 %11776  ;;  %v7740_v23 = vpack.c.bf16 %v7643_v10, %v7642_v21  ;;  %v19484_v10 = vld [vmem:[#allocation23_spill] sm:$0xff] }
0x10fe   : > { %8007 = vmatprep.mubr.bf16.mxu0 %v7736_v31  ;;  %10181 = vmatprep.mubr.msk.bf16.mxu1 %vm1700_vm15, %v19472_v57  ;;  %v11779_v26 = vunpack.i.h.bf16 %v11777_v24  ;;  %v11778_v46 = vunpack.i.l.bf16 %v11777_v24  ;;  %v7656_v47 = vsel %vm1700_vm15, %v17564_v41, %v11768_v56  ;;  %v7657_v52 = vsel %vm1700_vm15, %v7321_v58, %v11769_v59  ;;  %v19486_v57 = vld [vmem:[#allocation14_spill] sm:$0xff] }
0x10ff   : > { %v11772_v18 = vpop.permute.xlu1 %11771  ;;  %v7737_v9 = vpack.c.bf16 %v7657_v52, %v7656_v47  ;;  %vm19487_vm9 = vcmp.ge.s32.totalorder %v19486_v57, 31 }
0x1100   : > { %v11774_v6 = vunpack.i.h.bf16 %v11772_v18  ;;  %v11773_v60 = vunpack.i.l.bf16 %v11772_v18  ;;  %v7658_v15 = vsel %vm1700_vm15, %v17606_v61, %v11778_v46  ;;  %v7659_v7 = vsel %vm1700_vm15, %v19473_v37, %v11779_v26  ;;  %v19488_v18 = vld [vmem:[#allocation18_spill] sm:$0xff] }
0x1101   : > { %v11787_v62 = vpop.permute.xlu0 %11786  ;;  %v7741_v38 = vpack.c.bf16 %v7659_v7, %v7658_v15 }
0x1102   : > { %v11789_v43 = vunpack.i.h.bf16 %v11787_v62  ;;  %v11788_v41 = vunpack.i.l.bf16 %v11787_v62  ;;  %v7626_v28 = vsel %vm1700_vm15, %v7178_v8, %v11773_v60  ;;  %v7627_v4 = vsel %vm1700_vm15, %v19476_v19, %v11774_v6 }
0x1103   : > { %v11782_v53 = vpop.permute.xlu1 %11781  ;;  %v7739_v5 = vpack.c.bf16 %v7627_v4, %v7626_v28  ;;  %v19491_v28 = vld [vmem:[#allocation48_spill] sm:$0xff] }
0x1104   : > { %v11784_v1 = vunpack.i.h.bf16 %v11782_v53  ;;  %v11783_v61 = vunpack.i.l.bf16 %v11782_v53  ;;  %v7628_v30 = vsel %vm1700_vm15, %v17636_v63, %v11788_v41  ;;  %v7629_v44 = vsel %vm1700_vm15, %v17632_v32, %v11789_v43  ;;  %v19490_v41 = vld [vmem:[#allocation20_spill] sm:$0xff] }
0x1105   : > { %8008 = vmatmul.mubr.bf16.gmra.mrb[172].mxu0 %v7735_v42  ;;  %8105 = vmatmul.mubr.bf16.gmra.mrb[204].mxu1 %v7737_v9  ;;  %v11792_v2 = vpop.permute.xlu0 %11791  ;;  %v7743_v11 = vpack.c.bf16 %v7629_v44, %v7628_v30  ;;  %v19482_v42 = vld [vmem:[#allocation15_spill] sm:$0xff]  ;;  %v19492_v19 = vpack.c.bf16 %v19490_v41, %v19491_v28 }
0x1106   : > { %8015 = vmatprep.mubr.bf16.mxu0 %v7740_v23  ;;  %10182 = vmatprep.mubr.msk.bf16.mxu1 %vm1700_vm15, %v19479_v29  ;;  %v11794_v34 = vunpack.i.h.bf16 %v11792_v2  ;;  %v11793_v16 = vunpack.i.l.bf16 %v11792_v2  ;;  %v7644_v55 = vsel %vm1700_vm15, %v19480_v35, %v11783_v61  ;;  %v7645_v63 = vsel %vm1700_vm15, %v19481_v39, %v11784_v1  ;;  %v19485_v23 = vld [vmem:[#allocation28_spill] sm:$0xff]  ;;  %v19493_v1 = vld [vmem:[#allocation43_spill] sm:$0xff] }
0x1107   : > { %v11797_v31 = vpop.permute.xlu1 %11796  ;;  %v7744_v32 = vpack.c.bf16 %v7645_v63, %v7644_v55  ;;  %vm19483_vm3 = vcmp.lt.s32.totalorder %v19482_v42, 1  ;;  %v7325_v26 = vsel %vm19487_vm9, 0.0, %v19485_v23  ;;  %vm19489_vm11 = vcmp.lt.s32.totalorder %v19482_v42, 3  ;;  %v19495_v55 = vld [vmem:[#allocation33_spill] sm:$0xff]  ;;  %vm19506_vm9 = vmmov %vm19494_vm7 }
0x1108   : > { %v7278_v48 = vsel %vm19483_vm3, 0.0, %v17656_v0  ;;  %v11799_v59 = vunpack.i.h.bf16 %v11797_v31  ;;  %v11798_v56 = vunpack.i.l.bf16 %v11797_v31  ;;  %v7647_v24 = vsel %vm1700_vm15, %v19484_v10, %v11794_v34  ;;  %v12115_v10 = vld [vmem:[#allocation2 + $0x598] sm:$0xff]   ;;  %v12118_v23 = vld [vmem:[#allocation2 + $0x560] sm:$0xff]  }
0x1109   : > { %v7646_v21 = vsel %vm1700_vm15, %v7278_v48, %v11793_v16  ;;  %v11807_v58 = vpop.permute.xlu0 %11806  ;;  %v7182_v8 = vsel %vm19489_vm11, 0.0, %v17682_v25  ;;  %vm19507_vm11 = vcmp.lt.s32.totalorder %v12382_v3, 1 }
0x110a   : > { %v7748_v46 = vpack.c.bf16 %v7647_v24, %v7646_v21  ;;  %v11809_v47 = vunpack.i.h.bf16 %v11807_v58  ;;  %v11808_v52 = vunpack.i.l.bf16 %v11807_v58  ;;  %v7660_v9 = vsel %vm1700_vm15, %v19488_v18, %v11798_v56  ;;  %v12113_v56 = vld [vmem:[#allocation2 + $0x590] sm:$0xff]   ;;  %v12116_v24 = vld [vmem:[#allocation2 + $0x558] sm:$0xff]   ;;  %v12117_v58 = vld [vmem:[#allocation2 + $0x5a0] sm:$0xff]  }
0x110b   : > { %v7661_v0 = vsel %vm1700_vm15, %v7325_v26, %v11799_v59  ;;  %v11802_v6 = vpop.permute.xlu1 %11801  ;;  %v12112_v59 = vld [vmem:[#allocation2 + $0x548] sm:$0xff]   ;;  %v12114_v21 = vld [vmem:[#allocation2 + $0x550] sm:$0xff]   ;;  %v12123_v18 = vld [vmem:[#allocation2 + $0x5b8] sm:$0xff]  }
0x110c   : > { %v7745_v60 = vpack.c.bf16 %v7661_v0, %v7660_v9  ;;  %v11804_v15 = vunpack.i.h.bf16 %v11802_v6  ;;  %v11803_v37 = vunpack.i.l.bf16 %v11802_v6  ;;  %v7662_v7 = vsel %vm1700_vm15, %v17686_v22, %v11808_v52  ;;  %v12119_v26 = vld [vmem:[#allocation2 + $0x5a8] sm:$0xff]   ;;  %v12122_v52 = vld [vmem:[#allocation2 + $0x570] sm:$0xff]   ;;  %v12124_v9 = vld [vmem:[#allocation2 + $0x578] sm:$0xff]  }
0x110d   : > { %v7663_v62 = vsel %vm1700_vm15, %v17692_v20, %v11809_v47  ;;  %8016 = vmatmul.mubr.bf16.gmra.mrb[176].mxu0 %v7739_v5  ;;  %8113 = vmatmul.mubr.bf16.gmra.mrb[208].mxu1 %v7741_v38  ;;  %v11817_v50 = vpop.permute.xlu0 %11816  ;;  %v12121_v47 = vld [vmem:[#allocation2 + $0x5b0] sm:$0xff]  }
0x110e   : > { %v7749_v43 = vpack.c.bf16 %v7663_v62, %v7662_v7  ;;  %8023 = vmatprep.mubr.bf16.mxu0 %v7744_v32  ;;  %10183 = vmatprep.mubr.msk.bf16.mxu1 %vm1700_vm15, %v19492_v19  ;;  %v11819_v4 = vunpack.i.h.bf16 %v11817_v50  ;;  %v11818_v53 = vunpack.i.l.bf16 %v11817_v50  ;;  %v7630_v22 = vsel %vm1700_vm15, %v7182_v8, %v11803_v37  ;;  %v19500_v32 = vld [vmem:[#allocation41_spill] sm:$0xff]  ;;  %v17891_v37 = vld [vmem:[%s18924_s2 + $0xc] ss:$0 sm:$0xff] }
0x110f   : > { %v7631_v20 = vsel %vm1700_vm15, %v19493_v1, %v11804_v15  ;;  %v11812_v38 = vpop.permute.xlu1 %11811 }
0x1110   : > { %v7747_v5 = vpack.c.bf16 %v7631_v20, %v7630_v22  ;;  %v11814_v61 = vunpack.i.h.bf16 %v11812_v38  ;;  %v11813_v30 = vunpack.i.l.bf16 %v11812_v38  ;;  %v7632_v25 = vsel %vm1700_vm15, %v17728_v54, %v11818_v53 }
0x1111   : > { %v7633_v44 = vsel %vm1700_vm15, %v17724_v33, %v11819_v4  ;;  %v7329_v54 = vsel %vm19494_vm7, 0.0, %v17738_v51  ;;  %v19496_v33 = vld [vmem:[#allocation35_spill] sm:$0xff]  ;;  %v12111_v51 = vld [vmem:[#allocation2 + $0x588] sm:$0xff]   ;;  %vm19508_vm7 = vcmp.ge.s32.totalorder %v19422_v14, 31 }
0x1112   : > { %v7751_v2 = vpack.c.bf16 %v7633_v44, %v7632_v25  ;;  %v7648_v49 = vsel %vm1700_vm15, %v17702_v45, %v11813_v30  ;;  %v7649_v40 = vsel %vm1700_vm15, %v17698_v12, %v11814_v61  ;;  %v19497_v39 = vpack.c.bf16 %v19495_v55, %v19496_v33  ;;  %v19498_v45 = vld [vmem:[#allocation51_spill] sm:$0xff]  ;;  %10866 = vmatprep.subr.bf16.mxu1 %v12111_v51 }
0x1113   : > { %v11822_v29 = vpop.permute.xlu1 %11821  ;;  %v7752_v34 = vpack.c.bf16 %v7649_v40, %v7648_v49  ;;  %10622 = vmatprep.subr.bf16.mxu0 %v12111_v51  ;;  %10874 = vmatpush3.bf16.msra.mxu1 %v12112_v59 }
0x1114   : > { %v11824_v16 = vunpack.i.h.bf16 %v11822_v29  ;;  %v11823_v35 = vunpack.i.l.bf16 %v11822_v29  ;;  %10623 = vmatpush3.bf16.msra.mxu0 %v12112_v59  ;;  %10867 = vmatprep.subr.bf16.mxu1 %v12113_v56 }
0x1115   : > { %8024 = vmatmul.mubr.bf16.gmra.mrb[180].mxu0 %v7743_v11  ;;  %8121 = vmatmul.mubr.bf16.gmra.mrb[212].mxu1 %v7745_v60  ;;  %v19499_v11 = vld [vmem:[#allocation50_spill] sm:$0xff] }
0x1116   : > { %8031 = vmatprep.mubr.bf16.mxu0 %v7748_v46  ;;  %10184 = vmatprep.mubr.msk.bf16.mxu1 %vm1700_vm15, %v19497_v39  ;;  %v7664_v63 = vsel %vm1700_vm15, %v19498_v45, %v11823_v35  ;;  %v7665_v12 = vsel %vm1700_vm15, %v7329_v54, %v11824_v16  ;;  %v19501_v48 = vpack.c.bf16 %v19499_v11, %v19500_v32  ;;  %v12120_v46 = vld [vmem:[#allocation2 + $0x568] sm:$0xff]  }
0x1117   : > { %v7753_v31 = vpack.c.bf16 %v7665_v12, %v7664_v63  ;;  %10624 = vmatprep.subr.bf16.mxu0 %v12113_v56  ;;  %10875 = vmatpush3.bf16.msra.mxu1 %v12114_v21 }
0x1118   : > { %10625 = vmatpush3.bf16.msra.mxu0 %v12114_v21  ;;  %10868 = vmatprep.subr.bf16.mxu1 %v12115_v10 }
0x1119   : > { %10626 = vmatprep.subr.bf16.mxu0 %v12115_v10 }
0x111b   : > { %10876 = vmatpush3.bf16.msra.mxu1 %v12116_v24 }
0x111c   : > { %10627 = vmatpush3.bf16.msra.mxu0 %v12116_v24  ;;  %10869 = vmatprep.subr.bf16.mxu1 %v12117_v58 }
0x111d   : > { %8032 = vmatmul.mubr.bf16.gmra.mrb[184].mxu0 %v7747_v5  ;;  %8129 = vmatmul.mubr.bf16.gmra.mrb[216].mxu1 %v7749_v43 }
0x111e   : > { %8039 = vmatprep.mubr.bf16.mxu0 %v7752_v34  ;;  %10185 = vmatprep.mubr.msk.bf16.mxu1 %vm1700_vm15, %v19501_v48 }
0x111f   : > { %10628 = vmatprep.subr.bf16.mxu0 %v12117_v58  ;;  %10877 = vmatpush3.bf16.msra.mxu1 %v12118_v23 }
0x1120   : > { %10629 = vmatpush3.bf16.msra.mxu0 %v12118_v23  ;;  %10870 = vmatprep.subr.bf16.mxu1 %v12119_v26 }
0x1121   : > { %10630 = vmatprep.subr.bf16.mxu0 %v12119_v26 }
0x1123   : > { %10878 = vmatpush3.bf16.msra.mxu1 %v12120_v46 }
0x1124   : > { %10631 = vmatpush3.bf16.msra.mxu0 %v12120_v46  ;;  %10871 = vmatprep.subr.bf16.mxu1 %v12121_v47 }
0x1125   : > { %8040 = vmatmul.mubr.bf16.gmra.mrb[188].mxu0 %v7751_v2  ;;  %8137 = vmatmul.mubr.bf16.gmra.mrb[220].mxu1 %v7753_v31 }
0x1126   : > { %10632 = vmatprep.subr.bf16.mxu0 %v12121_v47 }
0x1127   : > { %10879 = vmatpush3.bf16.msra.mxu1 %v12122_v52 }
0x1128   : > { %10633 = vmatpush3.bf16.msra.mxu0 %v12122_v52  ;;  %10872 = vmatprep.subr.bf16.mxu1 %v12123_v18 }
0x1129   : > { %10634 = vmatprep.subr.bf16.mxu0 %v12123_v18 }
0x112b   : > { %10880 = vmatpush3.bf16.msra.mxu1 %v12124_v9 }
0x112c   : > { %10635 = vmatpush3.bf16.msra.mxu0 %v12124_v9 }
0x11be   : > { %v8082_v0 = vpop.f32.mrb[192].mxu1 }
0x11bf   : > { %v8084_v6 = vpop.f32.mrb[193].mxu1 }
0x11c0   : > { %v10574_v60 = vpop.f32.mrb[160].mxu0  ;;  %v8085_v15 = vpop.f32.mrb[194].mxu1 }
0x11c1   : > { %v10575_v7 = vpop.f32.mrb[161].mxu0  ;;  %v8087_v62 = vpop.f32.mrb[195].mxu1 }
0x11c2   : > { %v10576_v50 = vadd.f32 %v10575_v7, %v10574_v60  ;;  %v10577_v8 = vpop.f32.mrb[162].mxu0 }
0x11c3   : > { %v10578_v43 = vpop.f32.mrb[163].mxu0 }
0x11c4   : > { %v7986_v41 = vadd.f32 %v10576_v50, %v17891_v37  ;;  %v10579_v28 = vadd.f32 %v10578_v43, %v10577_v8 }
0x11c6   : > { %v17894_v19 = vadd.f32 %v8082_v0, %v7986_v41  ;;  %v7989_v4 = vadd.f32 %v10579_v28, %v17891_v37 }
0x11c8   : > { %v17897_v53 = vadd.f32 %v8085_v15, %v7989_v4  ;;  %v10580_v22 = vpop.f32.mrb[164].mxu0  ;;  %v8090_v1 = vpop.f32.mrb[196].mxu1 }
0x11c9   : > { %v10581_v20 = vpop.f32.mrb[165].mxu0  ;;  %v8092_v38 = vpop.f32.mrb[197].mxu1 }
0x11ca   : > { %v10582_v5 = vadd.f32 %v10581_v20, %v10580_v22  ;;  %v10583_v61 = vpop.f32.mrb[166].mxu0  ;;  %v8093_v30 = vpop.f32.mrb[198].mxu1 }
0x11cb   : > { %v10584_v25 = vpop.f32.mrb[167].mxu0  ;;  %v8095_v44 = vpop.f32.mrb[199].mxu1 }
0x11cc   : > { %v7994_v2 = vadd.f32 %v10582_v5, %v17891_v37  ;;  %v10585_v49 = vadd.f32 %v10584_v25, %v10583_v61 }
0x11ce   : > { %v17900_v40 = vadd.f32 %v8090_v1, %v7994_v2  ;;  %v7997_v29 = vadd.f32 %v10585_v49, %v17891_v37 }
0x11d0   : > { %v17903_v34 = vadd.f32 %v8093_v30, %v7997_v29  ;;  %v10586_v16 = vpop.f32.mrb[168].mxu0  ;;  %v8098_v35 = vpop.f32.mrb[200].mxu1 }
0x11d1   : > { %v10587_v54 = vpop.f32.mrb[169].mxu0  ;;  %v8100_v55 = vpop.f32.mrb[201].mxu1 }
0x11d2   : > { %v10588_v33 = vadd.f32 %v10587_v54, %v10586_v16  ;;  %v10589_v39 = vpop.f32.mrb[170].mxu0  ;;  %v8101_v45 = vpop.f32.mrb[202].mxu1 }
0x11d3   : > { %v10590_v63 = vpop.f32.mrb[171].mxu0  ;;  %v8103_v12 = vpop.f32.mrb[203].mxu1 }
0x11d4   : > { %v8002_v31 = vadd.f32 %v10588_v33, %v17891_v37  ;;  %v10591_v11 = vadd.f32 %v10590_v63, %v10589_v39 }
0x11d6   : > { %v17906_v32 = vadd.f32 %v8098_v35, %v8002_v31  ;;  %v8005_v48 = vadd.f32 %v10591_v11, %v17891_v37 }
0x11d8   : > { %v17909_v51 = vadd.f32 %v8101_v45, %v8005_v48  ;;  %v10592_v59 = vpop.f32.mrb[172].mxu0  ;;  %v8106_v56 = vpop.f32.mrb[204].mxu1 }
0x11d9   : > { %v10593_v21 = vpop.f32.mrb[173].mxu0  ;;  %v8108_v10 = vpop.f32.mrb[205].mxu1 }
0x11da   : > { %v10594_v24 = vadd.f32 %v10593_v21, %v10592_v59  ;;  %v10595_v58 = vpop.f32.mrb[174].mxu0  ;;  %v8109_v23 = vpop.f32.mrb[206].mxu1 }
0x11db   : > { %v10596_v26 = vpop.f32.mrb[175].mxu0  ;;  %v8111_v46 = vpop.f32.mrb[207].mxu1 }
0x11dc   : > { %v8010_v47 = vadd.f32 %v10594_v24, %v17891_v37  ;;  %v10597_v52 = vadd.f32 %v10596_v26, %v10595_v58  ;;  %v12125_v26 = vld [vmem:[#allocation2 + $0x5c0] sm:$0xff]  }
0x11dd   : > { %v12126_v46 = vld [vmem:[#allocation2 + $0x580] sm:$0xff]   ;;  %10873 = vmatprep.subr.bf16.mxu1 %v12125_v26  ;;  %10636 = vmatprep.subr.bf16.mxu0 %v12125_v26 }
0x11de   : > { %v17912_v18 = vadd.f32 %v8106_v56, %v8010_v47  ;;  %v8013_v9 = vadd.f32 %v10597_v52, %v17891_v37  ;;  %10881 = vmatpush3.bf16.msra.mxu1 %v12126_v46  ;;  %10637 = vmatpush3.bf16.msra.mxu0 %v12126_v46 }
0x11e0   : > { %v17915_v0 = vadd.f32 %v8109_v23, %v8013_v9  ;;  %v10598_v6 = vpop.f32.mrb[176].mxu0  ;;  %v8114_v60 = vpop.f32.mrb[208].mxu1 }
0x11e1   : > { %v10599_v15 = vpop.f32.mrb[177].mxu0  ;;  %v8116_v7 = vpop.f32.mrb[209].mxu1 }
0x11e2   : > { %v10600_v62 = vadd.f32 %v10599_v15, %v10598_v6  ;;  %v10601_v50 = vpop.f32.mrb[178].mxu0  ;;  %v8117_v8 = vpop.f32.mrb[210].mxu1 }
0x11e3   : > { %v10602_v43 = vpop.f32.mrb[179].mxu0  ;;  %v8119_v41 = vpop.f32.mrb[211].mxu1 }
0x11e4   : > { %v8018_v28 = vadd.f32 %v10600_v62, %v17891_v37  ;;  %v10603_v4 = vadd.f32 %v10602_v43, %v10601_v50 }
0x11e6   : > { %v17918_v22 = vadd.f32 %v8114_v60, %v8018_v28  ;;  %v8021_v1 = vadd.f32 %v10603_v4, %v17891_v37 }
0x11e8   : > { %v17921_v20 = vadd.f32 %v8117_v8, %v8021_v1  ;;  %v10604_v38 = vpop.f32.mrb[180].mxu0  ;;  %v8122_v5 = vpop.f32.mrb[212].mxu1  ;;  %v19502_v1 = vmov 0  }
0x11e9   : > { %v10605_v61 = vpop.f32.mrb[181].mxu0  ;;  %v8124_v30 = vpop.f32.mrb[213].mxu1  ;;  %9253 = vmatprep.subr.bf16.mxu0 %v19502_v1 }
0x11ea   : > { %v10606_v25 = vadd.f32 %v10605_v61, %v10604_v38  ;;  %v10607_v44 = vpop.f32.mrb[182].mxu0  ;;  %v8125_v2 = vpop.f32.mrb[214].mxu1 }
0x11eb   : > { %v10608_v49 = vpop.f32.mrb[183].mxu0  ;;  %v8127_v29 = vpop.f32.mrb[215].mxu1 }
0x11ec   : > { %v8026_v16 = vadd.f32 %v10606_v25, %v17891_v37  ;;  %v10609_v35 = vadd.f32 %v10608_v49, %v10607_v44 }
0x11ee   : > { %v17924_v54 = vadd.f32 %v8122_v5, %v8026_v16  ;;  %v8029_v55 = vadd.f32 %v10609_v35, %v17891_v37  ;;  %v17961_v16 = vmax.f32 %v17894_v19, 0.0 }
0x11f0   : > { %v17927_v33 = vadd.f32 %v8125_v2, %v8029_v55  ;;  %v10610_v39 = vpop.f32.mrb[184].mxu0  ;;  %v8130_v45 = vpop.f32.mrb[216].mxu1  ;;  %v17963_v55 = vld [vmem:[#allocation2 + $0x5c8] sm:$0xff]  }
0x11f1   : > { %v10611_v63 = vpop.f32.mrb[185].mxu0  ;;  %v8132_v12 = vpop.f32.mrb[217].mxu1  ;;  %10812 = vmatprep.subr.bf16.mxu1 %v17963_v55 }
0x11f2   : > { %v10612_v31 = vadd.f32 %v10611_v63, %v10610_v39  ;;  %v10613_v11 = vpop.f32.mrb[186].mxu0  ;;  %v8133_v48 = vpop.f32.mrb[218].mxu1  ;;  %v17931_v24 = vmax.f32 %v17927_v33, 0.0  ;;  %v17972_v12 = vmax.f32 %v17897_v53, 0.0 }
0x11f3   : > { %v10614_v59 = vpop.f32.mrb[187].mxu0  ;;  %v8135_v56 = vpop.f32.mrb[219].mxu1 }
0x11f4   : > { %v8034_v21 = vadd.f32 %v10612_v31, %v17891_v37  ;;  %v10615_v10 = vadd.f32 %v10614_v59, %v10613_v11  ;;  %v19063_v43 = vrot.slane %v17931_v24, 7  ;;  %v17986_v56 = vmax.f32 %v17903_v34, 0.0 }
0x11f6   : > { %v17933_v58 = vadd.f32 %v8130_v45, %v8034_v21  ;;  %v8037_v23 = vadd.f32 %v10615_v10, %v17891_v37  ;;  %v17989_v21 = vmax.f32 %v17906_v32, 0.0  ;;  %v8257_v10 = vrot.slane %v17961_v16, 1 }
0x11f8   : > { %v17937_v47 = vmax.f32 %v17933_v58, 0.0  ;;  %v17939_v52 = vadd.f32 %v8133_v48, %v8037_v23  ;;  %v10616_v9 = vpop.f32.mrb[188].mxu0  ;;  %v8138_v6 = vpop.f32.mrb[220].mxu1  ;;  %v8209_v23 = vrot.slane %v17961_v16, 7 }
0x11f9   : > { %v10617_v60 = vpop.f32.mrb[189].mxu0  ;;  %v8140_v15 = vpop.f32.mrb[221].mxu1 }
0x11fa   : > { %v17942_v7 = vmax.f32 %v17939_v52, 0.0  ;;  %v10618_v62 = vadd.f32 %v10617_v60, %v10616_v9  ;;  %v10619_v50 = vpop.f32.mrb[190].mxu0  ;;  %v8141_v8 = vpop.f32.mrb[222].mxu1  ;;  %v8221_v41 = vrot.slane %v17937_v47, 7  ;;  %v8269_v11 = vrot.slane %v17937_v47, 1 }
0x11fb   : > { %v10620_v28 = vpop.f32.mrb[191].mxu0  ;;  %v8143_v4 = vpop.f32.mrb[223].mxu1 }
0x11fc   : > { %v8042_v38 = vadd.f32 %v10618_v62, %v17891_v37  ;;  %v10621_v5 = vadd.f32 %v10620_v28, %v10619_v50  ;;  %v8222_v61 = vrot.slane %v17942_v7, 7  ;;  %v8228_v25 = vsel %vm573_vm0, %v19063_v43, %v8221_v41 }
0x11fd   : > { %v8253_v44 = vsel %vm19483_vm3, 0.0, %v8228_v25  ;;  %v8270_v63 = vrot.slane %v17942_v7, 1  ;;  %v8210_v62 = vrot.slane %v17972_v12, 7  ;;  %v8261_v25 = vrot.slane %v17989_v21, 1 }
0x11fe   : > { %v17955_v2 = vadd.f32 %v8138_v6, %v8042_v38  ;;  %v8045_v49 = vadd.f32 %v10621_v5, %v17891_v37  ;;  %v8227_v29 = vsel %vm573_vm0, %v8221_v41, %v8222_v61  ;;  %v17975_v37 = vmax.f32 %v17900_v40, 0.0 }
0x11ff   : > { %v11830_v35 = vpack.i.bf16 %v8227_v29, %v8253_v44  ;;  %v8275_v46 = vsel %vm622_vm1, %v8269_v11, %v8270_v63  ;;  %v18019_v44 = vmax.f32 %v17909_v51, 0.0  ;;  %vm19509_vm3 = vcmp.lt.s32.totalorder %v19404_v36, 1 }
0x1200   : > { %19504 = vst [vmem:[#allocation11_spill] sm:$0xff] %v17955_v2  ;;  %v17966_v39 = vmax.f32 %v17955_v2, 0.0  ;;  %v17968_v45 = vadd.f32 %v8141_v8, %v8045_v49  ;;  %v8259_v50 = vrot.slane %v17975_v37, 1 }
0x1201   : > { %11831 = vrot.lane.b32.xlu1 %v11830_v35, %s12267_s6  ;;  %v8212_v35 = vrot.slane %v17986_v56, 7 }
0x1202   : > { %19505 = vst [vmem:[#allocation24_spill] sm:$0xff] %v17968_v45  ;;  %v17980_v31 = vmax.f32 %v17968_v45, 0.0  ;;  %v8271_v48 = vrot.slane %v17966_v39, 1  ;;  %v8223_v59 = vrot.slane %v17966_v39, 7 }
0x1204   : > { %v8274_v26 = vsel %vm622_vm1, %v8270_v63, %v8271_v48  ;;  %v8224_v9 = vrot.slane %v17980_v31, 7  ;;  %v8272_v6 = vrot.slane %v17980_v31, 1  ;;  %v8226_v15 = vsel %vm573_vm0, %v8222_v61, %v8223_v59 }
0x1205   : > { %v11825_v60 = vpack.i.bf16 %v8274_v26, %v8275_v46  ;;  %v8258_v61 = vrot.slane %v17972_v12, 1  ;;  %v8260_v63 = vrot.slane %v17986_v56, 1  ;;  %v8239_v26 = vsel %vm573_vm0, %v8209_v23, %v8210_v62 }
0x1206   : > { %v8225_v8 = vsel %vm573_vm0, %v8223_v59, %v8224_v9  ;;  %v8273_v41 = vsel %vm622_vm1, %v8271_v48, %v8272_v6  ;;  %v8288_v28 = vsel %vm622_vm1, %v8272_v6, %v8257_v10  ;;  %v8240_v4 = vsel %vm573_vm0, %v8224_v9, %v8209_v23 }
0x1207   : > { %11826 = vrot.lane.b32.xlu0 %v11825_v60, %s12267_s6  ;;  %v11835_v38 = vpack.i.bf16 %v8225_v8, %v8226_v15  ;;  %v8304_v5 = vsel %vm19506_vm9, 0.0, %v8288_v28  ;;  %v8241_v29 = vsel %vm19507_vm11, 0.0, %v8240_v4  ;;  %v8213_v48 = vrot.slane %v17989_v21, 7 }
0x1208   : > { %v11840_v49 = vpack.i.bf16 %v8304_v5, %v8273_v41  ;;  %v18028_v59 = vmax.f32 %v17912_v18, 0.0  ;;  %v8286_v46 = vsel %vm622_vm1, %v8258_v61, %v8259_v50  ;;  %v8211_v9 = vrot.slane %v17975_v37, 7 }
0x1209   : > { %11836 = vrot.lane.b32.xlu1 %v11835_v38, %s12267_s6  ;;  %v18036_v6 = vmax.f32 %v17918_v22, 0.0  ;;  %v11850_v60 = vpack.i.bf16 %v8239_v26, %v8241_v29  ;;  %v8284_v15 = vsel %vm622_vm1, %v8260_v63, %v8261_v25  ;;  %v18042_v8 = vmax.f32 %v17915_v0, 0.0 }
0x120a   : > { %v8287_v23 = vsel %vm622_vm1, %v8257_v10, %v8258_v61  ;;  %v8237_v41 = vsel %vm573_vm0, %v8211_v9, %v8212_v35  ;;  %v8214_v28 = vrot.slane %v18019_v44, 7  ;;  %v8236_v38 = vsel %vm573_vm0, %v8212_v35, %v8213_v48 }
0x120b   : > { %11841 = vrot.lane.b32.xlu0 %v11840_v49, %s12267_s6  ;;  %v11845_v4 = vpack.i.bf16 %v8286_v46, %v8287_v23  ;;  %v8238_v5 = vsel %vm573_vm0, %v8210_v62, %v8211_v9  ;;  %v8292_v49 = vsel %vm431_vm4, 0.0, %v8284_v15  ;;  %v8263_v29 = vrot.slane %v18028_v59, 1 }
0x120c   : > { %v11860_v10 = vpack.i.bf16 %v8237_v41, %v8238_v5  ;;  %v8285_v61 = vsel %vm622_vm1, %v8259_v50, %v8260_v63  ;;  %v8262_v26 = vrot.slane %v18019_v44, 1  ;;  %v8265_v46 = vrot.slane %v18036_v6, 1 }
0x120d   : > { %11851 = vrot.lane.b32.xlu1 %v11850_v60, %s12267_s6  ;;  %v18063_v35 = vmax.f32 %v17921_v20, 0.0  ;;  %v8235_v62 = vsel %vm573_vm0, %v8213_v48, %v8214_v28  ;;  %v8245_v9 = vsel %vm448_vm6, 0.0, %v8236_v38  ;;  %v8216_v60 = vrot.slane %v18042_v8, 7 }
0x120e   : > { %v11855_v15 = vpack.i.bf16 %v8292_v49, %v8285_v61  ;;  %v8264_v50 = vrot.slane %v18042_v8, 1  ;;  %v8217_v63 = vrot.slane %v18036_v6, 7  ;;  %v18074_v23 = vmax.f32 %v17924_v54, 0.0 }
0x120f   : > { %11846 = vrot.lane.b32.xlu0 %v11845_v4, %s12267_s6  ;;  %v8282_v41 = vsel %vm622_vm1, %v8262_v26, %v8263_v29  ;;  %v8215_v48 = vrot.slane %v18028_v59, 7  ;;  %v11870_v4 = vpack.i.bf16 %v8235_v62, %v8245_v9  ;;  %v8283_v5 = vsel %vm622_vm1, %v8261_v25, %v8262_v26 }
0x1210   : > { %v8280_v38 = vsel %vm622_vm1, %v8264_v50, %v8265_v46  ;;  %v11865_v61 = vpack.i.bf16 %v8282_v41, %v8283_v5  ;;  %v8232_v43 = vsel %vm573_vm0, %v8216_v60, %v8217_v63  ;;  %v8281_v26 = vsel %vm622_vm1, %v8263_v29, %v8264_v50 }
0x1211   : > { %11861 = vrot.lane.b32.xlu1 %v11860_v10, %s12267_s6  ;;  %v8233_v49 = vsel %vm573_vm0, %v8215_v48, %v8216_v60  ;;  %v8218_v10 = vrot.slane %v18063_v35, 7  ;;  %v8234_v62 = vsel %vm573_vm0, %v8214_v28, %v8215_v48  ;;  %v8296_v9 = vsel %vm19508_vm7, 0.0, %v8280_v38 }
0x1212   : > { %v11880_v25 = vpack.i.bf16 %v8233_v49, %v8234_v62  ;;  %v8249_v60 = vsel %vm19509_vm3, 0.0, %v8232_v43  ;;  %v11875_v28 = vpack.i.bf16 %v8296_v9, %v8281_v26  ;;  %v8268_v48 = vrot.slane %v17931_v24, 1 }
0x1213   : > { %11856 = vrot.lane.b32.xlu0 %v11855_v15, %s12267_s6  ;;  %v8267_v15 = vrot.slane %v18074_v23, 1  ;;  %v8231_v41 = vsel %vm573_vm0, %v8217_v63, %v8218_v10  ;;  %v8219_v5 = vrot.slane %v18074_v23, 7  ;;  %v19510_v63 = vrot.slane %v17931_v24, 7 }
0x1214   : > { %v11890_v29 = vpack.i.bf16 %v8231_v41, %v8249_v60  ;;  %v8276_v43 = vsel %vm622_vm1, %v8268_v48, %v8269_v11  ;;  %vm19511_vm9 = vcmp.ge.s32.totalorder %v19486_v57, 31  ;;  %v8173_v26 = vrot.slane %v17937_v47, 6 }
0x1215   : > { %11871 = vrot.lane.b32.xlu1 %v11870_v4, %s12267_s6  ;;  %v8266_v4 = vrot.slane %v18063_v35, 1  ;;  %v8229_v49 = vsel %vm573_vm0, %v8219_v5, %v19510_v63  ;;  %v8230_v62 = vsel %vm573_vm0, %v8218_v10, %v8219_v5  ;;  %v8300_v9 = vsel %vm19511_vm9, 0.0, %v8276_v43 }
0x1216   : > { %v11900_v11 = vpack.i.bf16 %v8229_v49, %v8230_v62  ;;  %v19064_v60 = vrot.slane %v17931_v24, 6  ;;  %v8174_v10 = vrot.slane %v17942_v7, 6  ;;  %vm19512_vm11 = vcmp.lt.s32.totalorder %v19482_v42, 2 }
0x1217   : > { %11866 = vrot.lane.b32.xlu0 %v11865_v61, %s12267_s6  ;;  %v8278_v38 = vsel %vm622_vm1, %v8266_v4, %v8267_v15  ;;  %v8279_v50 = vsel %vm622_vm1, %v8265_v46, %v8266_v4  ;;  %v8277_v46 = vsel %vm622_vm1, %v8267_v15, %v8268_v48  ;;  %vm19514_vm7 = vcmp.lt.s32.totalorder %v12382_v3, 2 }
0x1218   : > { %v11885_v61 = vpack.i.bf16 %v8278_v38, %v8279_v50  ;;  %v8180_v38 = vsel %vm524_vm13, %v19064_v60, %v8173_v26  ;;  %v8179_v48 = vsel %vm524_vm13, %v8173_v26, %v8174_v10  ;;  %vm19525_vm3 = vcmp.lt.s32.totalorder %v19404_v36, 2 }
0x1219   : > { %11881 = vrot.lane.b32.xlu1 %v11880_v25, %s12267_s6  ;;  %v11895_v25 = vpack.i.bf16 %v8300_v9, %v8277_v46  ;;  %v8205_v5 = vsel %vm19512_vm11, 0.0, %v8180_v38  ;;  %vm19526_vm9 = vcmp.ge.s32.totalorder %v12690_v13, 30  ;;  %vm19549_vm11 = vcmask 1041408  }
0x121b   : > { %11876 = vrot.lane.b32.xlu0 %v11875_v28, %s12267_s6 }
0x121d   : > { %11891 = vrot.lane.b32.xlu1 %v11890_v29, %s12267_s6 }
0x121f   : > { %11886 = vrot.lane.b32.xlu0 %v11885_v61, %s12267_s6  ;;  %v8176_v61 = vrot.slane %v17980_v31, 6 }
0x1221   : > { %11901 = vrot.lane.b32.xlu1 %v11900_v11, %s12267_s6  ;;  %v8161_v11 = vrot.slane %v17961_v16, 6 }
0x1223   : > { %11896 = vrot.lane.b32.xlu0 %v11895_v25, %s12267_s6  ;;  %v8192_v42 = vsel %vm524_vm13, %v8176_v61, %v8161_v11 }
0x1273   : > { %v11832_v41 = vpop.permute.xlu1 %11831 }
0x1274   : > { %v11834_v4 = vunpack.i.h.bf16 %v11832_v41  ;;  %v11833_v28 = vunpack.i.l.bf16 %v11832_v41  ;;  %v8175_v41 = vrot.slane %v17966_v39, 6 }
0x1276   : > { %v8494_v50 = vsel %vm1700_vm15, %v8179_v48, %v11834_v4  ;;  %v8493_v63 = vsel %vm1700_vm15, %v8205_v5, %v11833_v28  ;;  %v12128_v48 = vld [vmem:[#allocation2 + $0x5d0] sm:$0xff]   ;;  %v8306_v5 = vrot.slane %v17972_v12, 2 }
0x1277   : > { %v8572_v28 = vpack.c.bf16 %v8494_v50, %v8493_v63 }
0x1279   : > { %v11827_v15 = vpop.permute.xlu0 %11826 }
0x127a   : > { %v11829_v29 = vunpack.i.h.bf16 %v11827_v15  ;;  %v11828_v43 = vunpack.i.l.bf16 %v11827_v15 }
0x127b   : > { %v11837_v49 = vpop.permute.xlu1 %11836 }
0x127c   : > { %v8509_v62 = vsel %vm1700_vm15, %v17937_v47, %v11828_v43  ;;  %v8510_v9 = vsel %vm1700_vm15, %v17942_v7, %v11829_v29  ;;  %v11839_v43 = vunpack.i.h.bf16 %v11837_v49  ;;  %v11838_v60 = vunpack.i.l.bf16 %v11837_v49 }
0x127d   : > { %v11842_v46 = vpop.permute.xlu0 %11841  ;;  %v8573_v25 = vpack.c.bf16 %v8510_v9, %v8509_v62  ;;  %v19513_v49 = vrot.slane %v17972_v12, 6 }
0x127e   : > { %v11844_v38 = vunpack.i.h.bf16 %v11842_v46  ;;  %v11843_v15 = vunpack.i.l.bf16 %v11842_v46  ;;  %v8177_v46 = vsel %vm524_vm13, %v8175_v41, %v8176_v61 }
0x127f   : > { %8806 = vmatprep.mubr.bf16.mxu1 %v8573_v25  ;;  %v11852_v29 = vpop.permute.xlu1 %11851  ;;  %v8191_v25 = vsel %vm524_vm13, %v8161_v11, %v19513_v49 }
0x1280   : > { %v11854_v9 = vunpack.i.h.bf16 %v11852_v29  ;;  %v11853_v26 = vunpack.i.l.bf16 %v11852_v29  ;;  %8807 = vmatmul.mubr.bf16.vlgmr.msra.gmra.mrb[224].mxu1 %v8572_v28  ;;  %v8511_v50 = vsel %vm1700_vm15, %v17966_v39, %v11843_v15  ;;  %v8512_v63 = vsel %vm1700_vm15, %v17980_v31, %v11844_v38  ;;  %v12129_v38 = vld [vmem:[#allocation2 + $0x5d8] sm:$0xff]  }
0x1281   : > { %10813 = vmatpush3.bf16.msra.mxu1 %v17963_v55  ;;  %v11847_v4 = vpop.permute.xlu0 %11846  ;;  %v8576_v62 = vpack.c.bf16 %v8512_v63, %v8511_v50  ;;  %v8178_v28 = vsel %vm524_vm13, %v8174_v10, %v8175_v41  ;;  %v8193_v15 = vsel %vm19514_vm7, 0.0, %v8192_v42  ;;  %v8496_v50 = vsel %vm1700_vm15, %v8177_v46, %v11839_v43 }
0x1282   : > { %v11849_v29 = vunpack.i.h.bf16 %v11847_v4  ;;  %v11848_v45 = vunpack.i.l.bf16 %v11847_v4  ;;  %10814 = vmatprep.subr.bf16.mxu1 %v12128_v48  ;;  %v8481_v2 = vsel %vm1700_vm15, %v8193_v15, %v11853_v26  ;;  %v8482_v11 = vsel %vm1700_vm15, %v8191_v25, %v11854_v9  ;;  %v12130_v15 = vld [vmem:[#allocation2 + $0x5e0] sm:$0xff]  }
0x1283   : > { %8814 = vmatprep.mubr.bf16.mxu1 %v8576_v62  ;;  %v8495_v55 = vsel %vm1700_vm15, %v8178_v28, %v11838_v60  ;;  %v11862_v10 = vpop.permute.xlu1 %11861  ;;  %v19515_v63 = vrot.slane %v17975_v37, 2  ;;  %v19516_v26 = vrot.slane %v17961_v16, 2  ;;  %v8308_v60 = vrot.slane %v17986_v56, 2 }
0x1284   : > { %v8497_v42 = vsel %vm1700_vm15, %v17961_v16, %v11848_v45  ;;  %v8498_v4 = vsel %vm1700_vm15, %v17972_v12, %v11849_v29  ;;  %v8163_v45 = vrot.slane %v17975_v37, 6  ;;  %v8164_v9 = vrot.slane %v17986_v56, 6 }
0x1285   : > { %v8334_v61 = vsel %vm671_vm2, %v8306_v5, %v19515_v63  ;;  %v8335_v41 = vsel %vm671_vm2, %v19516_v26, %v8306_v5  ;;  %10815 = vmatpush3.bf16.msra.mxu1 %v12128_v48  ;;  %v11857_v43 = vpop.permute.xlu0 %11856  ;;  %v8555_v62 = vpack.c.bf16 %v8498_v4, %v8497_v42  ;;  %v8554_v46 = vpack.c.bf16 %v8482_v11, %v8481_v2 }
0x1286   : > { %v11859_v49 = vunpack.i.h.bf16 %v11857_v43  ;;  %v11858_v25 = vunpack.i.l.bf16 %v11857_v43  ;;  %10816 = vmatprep.subr.bf16.mxu1 %v12129_v38  ;;  %v8575_v28 = vpack.c.bf16 %v8496_v50, %v8495_v55  ;;  %v11864_v29 = vunpack.i.h.bf16 %v11862_v10 }
0x1287   : > { %v11863_v63 = vunpack.i.l.bf16 %v11862_v10  ;;  %8758 = vmatprep.mubr.bf16.mxu0 %v8555_v62  ;;  %v8556_v3 = vpack.c.bf16 %v8334_v61, %v8335_v41  ;;  %v19517_v5 = vrot.slane %v17989_v21, 2  ;;  %v8311_v11 = vrot.slane %v18028_v59, 2 }
0x1288   : > { %8759 = vmatmul.mubr.bf16.vlgmr.msra.gmra.mrb[192].mxu0 %v8554_v46  ;;  %8815 = vmatmul.mubr.bf16.gmra.mrb[228].mxu1 %v8575_v28  ;;  %v8499_v42 = vsel %vm1700_vm15, %v17975_v37, %v11858_v25  ;;  %v8500_v2 = vsel %vm1700_vm15, %v17986_v56, %v11859_v49  ;;  %v8189_v10 = vsel %vm524_vm13, %v8163_v45, %v8164_v9  ;;  %v19518_v4 = vrot.slane %v17972_v12, 6  ;;  %v11872_v46 = vpop.permute.xlu1 %11871 }
0x1289   : > { %v8332_v48 = vsel %vm671_vm2, %v8308_v60, %v19517_v5  ;;  %10817 = vmatpush3.bf16.msra.mxu1 %v12129_v38  ;;  %10820 = vmatprep.mubr.msk.bf16.mxu1 %vm1700_vm15, %v8556_v3  ;;  %v11867_v55 = vpop.permute.xlu0 %11866  ;;  %v8558_v50 = vpack.c.bf16 %v8500_v2, %v8499_v42  ;;  %v8310_v26 = vrot.slane %v18019_v44, 2  ;;  %v8165_v3 = vrot.slane %v17989_v21, 6 }
0x128a   : > { %v8190_v61 = vsel %vm524_vm13, %v19518_v4, %v8163_v45  ;;  %v11869_v41 = vunpack.i.h.bf16 %v11867_v55  ;;  %v11868_v43 = vunpack.i.l.bf16 %v11867_v55  ;;  %10818 = vmatprep.subr.bf16.mxu1 %v12130_v15  ;;  %v8340_v56 = vsel %vm415_vm5, 0.0, %v8332_v48 }
0x128b   : > { %v19519_v38 = vrot.slane %v17975_v37, 2  ;;  %8766 = vmatprep.mubr.bf16.mxu0 %v8558_v50  ;;  %v8483_v12 = vsel %vm1700_vm15, %v8190_v61, %v11863_v63  ;;  %v8484_v45 = vsel %vm1700_vm15, %v8189_v10, %v11864_v29  ;;  %v8330_v49 = vsel %vm671_vm2, %v8310_v26, %v8311_v11 }
0x128c   : > { %v8501_v25 = vsel %vm1700_vm15, %v17989_v21, %v11868_v43  ;;  %v8502_v28 = vsel %vm1700_vm15, %v18019_v44, %v11869_v41  ;;  %v8313_v37 = vrot.slane %v18036_v6, 2  ;;  %v19520_v48 = vrot.slane %v17989_v21, 2 }
0x128d   : > { %v8333_v62 = vsel %vm671_vm2, %v19519_v38, %v8308_v60  ;;  %10819 = vmatpush3.bf16.msra.mxu1 %v12130_v15  ;;  %v11877_v5 = vpop.permute.xlu0 %11876  ;;  %v8557_v63 = vpack.c.bf16 %v8484_v45, %v8483_v12  ;;  %v8166_v42 = vrot.slane %v18019_v44, 6  ;;  %v8188_v2 = vsel %vm524_vm13, %v8164_v9, %v8165_v3  ;;  %v11882_v45 = vpop.permute.xlu1 %11881 }
0x128e   : > { %v8559_v60 = vpack.c.bf16 %v8340_v56, %v8333_v62  ;;  %v8331_v29 = vsel %vm671_vm2, %v19520_v48, %v8310_v26  ;;  %v8312_v55 = vrot.slane %v18042_v8, 2  ;;  %v19521_v50 = vmov 0.0  }
0x128f   : > { %10836 = vmatprep.subr.bf16.mxu1 %v19521_v50  ;;  %v11874_v10 = vunpack.i.h.bf16 %v11872_v46  ;;  %v11873_v4 = vunpack.i.l.bf16 %v11872_v46  ;;  %v8562_v15 = vpack.c.bf16 %v8330_v49, %v8331_v29  ;;  %v8561_v61 = vpack.c.bf16 %v8502_v28, %v8501_v25 }
0x1290   : > { %v11879_v41 = vunpack.i.h.bf16 %v11877_v5  ;;  %v11878_v43 = vunpack.i.l.bf16 %v11877_v5  ;;  %8767 = vmatmul.mubr.bf16.gmra.mrb[196].mxu0 %v8557_v63  ;;  %10821 = vmatmul.mubr.msk.bf16.vlgmr.msra.gmra.mrb[232].mxu1 %vm1700_vm15, %v8559_v60  ;;  %v8328_v21 = vsel %vm671_vm2, %v8312_v55, %v8313_v37  ;;  %v8315_v44 = vrot.slane %v18074_v23, 2 }
0x1291   : > { %10824 = vmatprep.mubr.msk.bf16.mxu1 %vm1700_vm15, %v8562_v15  ;;  %8774 = vmatprep.mubr.bf16.mxu0 %v8561_v61  ;;  %v8187_v9 = vsel %vm524_vm13, %v8165_v3, %v8166_v42  ;;  %vm19522_vm5 = vcmp.lt.s32.totalorder %v19213_v27, 2  ;;  %v8314_v56 = vrot.slane %v18063_v35, 2  ;;  %v8344_v12 = vsel %vm419_vm8, 0.0, %v8328_v21  ;;  %v11887_v28 = vpop.permute.xlu0 %11886 }
0x1292   : > { %v8197_v26 = vsel %vm19522_vm5, 0.0, %v8188_v2  ;;  %v8486_v62 = vsel %vm1700_vm15, %v8187_v9, %v11874_v10  ;;  %v8503_v46 = vsel %vm1700_vm15, %v18028_v59, %v11878_v43  ;;  %v8504_v49 = vsel %vm1700_vm15, %v18042_v8, %v11879_v41 }
0x1293   : > { %v8485_v38 = vsel %vm1700_vm15, %v8197_v26, %v11873_v4  ;;  %v8326_v3 = vsel %vm671_vm2, %v8314_v56, %v8315_v44  ;;  %v8317_v25 = vrot.slane %v17937_v47, 2  ;;  %v8329_v5 = vsel %vm671_vm2, %v8311_v11, %v8312_v55 }
0x1294   : > { %v8167_v60 = vrot.slane %v18028_v59, 6  ;;  %v8168_v48 = vrot.slane %v18042_v8, 6  ;;  %v8560_v29 = vpack.c.bf16 %v8486_v62, %v8485_v38  ;;  %v8565_v63 = vpack.c.bf16 %v8344_v12, %v8329_v5 }
0x1295   : > { %v8327_v2 = vsel %vm671_vm2, %v8313_v37, %v8314_v56  ;;  %v8316_v10 = vrot.slane %v17931_v24, 2  ;;  %v11884_v4 = vunpack.i.h.bf16 %v11882_v45  ;;  %v11883_v15 = vunpack.i.l.bf16 %v11882_v45  ;;  %v11892_v56 = vpop.permute.xlu1 %11891  ;;  %v11897_v12 = vpop.permute.xlu0 %11896 }
0x1296   : > { %v8564_v61 = vpack.c.bf16 %v8504_v49, %v8503_v46  ;;  %v8568_v41 = vpack.c.bf16 %v8326_v3, %v8327_v2  ;;  %v11889_v47 = vunpack.i.h.bf16 %v11887_v28  ;;  %v11888_v43 = vunpack.i.l.bf16 %v11887_v28 }
0x1297   : > { %v8324_v59 = vsel %vm671_vm2, %v8316_v10, %v8317_v25  ;;  %v8319_v8 = vrot.slane %v17966_v39, 2  ;;  %v8185_v11 = vsel %vm524_vm13, %v8167_v60, %v8168_v48  ;;  %v8186_v37 = vsel %vm524_vm13, %v8166_v42, %v8167_v60 }
0x1298   : > { %8775 = vmatmul.mubr.bf16.gmra.mrb[200].mxu0 %v8560_v29  ;;  %10825 = vmatmul.mubr.msk.bf16.gmra.mrb[236].mxu1 %vm1700_vm15, %v8565_v63  ;;  %v8318_v55 = vrot.slane %v17942_v7, 2  ;;  %v8169_v21 = vrot.slane %v18036_v6, 6  ;;  %v8487_v9 = vsel %vm1700_vm15, %v8186_v37, %v11883_v15  ;;  %v8488_v26 = vsel %vm1700_vm15, %v8185_v11, %v11884_v4 }
0x1299   : > { %8782 = vmatprep.mubr.bf16.mxu0 %v8564_v61  ;;  %10828 = vmatprep.mubr.msk.bf16.mxu1 %vm1700_vm15, %v8568_v41  ;;  %vm19523_vm8 = vcmp.ge.s32.totalorder %v19486_v57, 30  ;;  %v8505_v38 = vsel %vm1700_vm15, %v18036_v6, %v11888_v43  ;;  %v8506_v62 = vsel %vm1700_vm15, %v18063_v35, %v11889_v47  ;;  %v8320_v7 = vrot.slane %v17980_v31, 2  ;;  %v11902_v61 = vpop.permute.xlu1 %11901 }
0x129a   : > { %v8348_v39 = vsel %vm19523_vm8, 0.0, %v8324_v59  ;;  %v8322_v42 = vsel %vm671_vm2, %v8318_v55, %v8319_v8  ;;  %v8325_v45 = vsel %vm671_vm2, %v8315_v44, %v8316_v10  ;;  %v8170_v46 = vrot.slane %v18063_v35, 6 }
0x129b   : > { %v8563_v49 = vpack.c.bf16 %v8488_v26, %v8487_v9  ;;  %v8571_v3 = vpack.c.bf16 %v8348_v39, %v8325_v45  ;;  %v8323_v28 = vsel %vm671_vm2, %v8317_v25, %v8318_v55  ;;  %v8184_v6 = vsel %vm524_vm13, %v8168_v48, %v8169_v21  ;;  %v12137_v45 = vld [vmem:[#allocation2 + $0x618] sm:$0xff]  }
0x129c   : > { %v11894_v5 = vunpack.i.h.bf16 %v11892_v56  ;;  %v11893_v60 = vunpack.i.l.bf16 %v11892_v56  ;;  %v8567_v29 = vpack.c.bf16 %v8506_v62, %v8505_v38  ;;  %v8574_v63 = vpack.c.bf16 %v8322_v42, %v8323_v28  ;;  %v12131_v38 = vld [vmem:[#allocation2 + $0x5e8] sm:$0xff]   ;;  %v12132_v62 = vld [vmem:[#allocation2 + $0x5f0] sm:$0xff]   ;;  %v12133_v42 = vld [vmem:[#allocation2 + $0x5f8] sm:$0xff]  }
0x129d   : > { %v11899_v2 = vunpack.i.h.bf16 %v11897_v12  ;;  %v11898_v31 = vunpack.i.l.bf16 %v11897_v12  ;;  %v19524_v44 = vrot.slane %v17961_v16, 2  ;;  %v8183_v25 = vsel %vm524_vm13, %v8169_v21, %v8170_v46  ;;  %9254 = vmatpush1.bf16.msra.mxu0 %v12131_v38  ;;  %v12136_v12 = vld [vmem:[#allocation2 + $0x610] sm:$0xff]  }
0x129e   : > { %v8201_v48 = vsel %vm19525_vm3, 0.0, %v8184_v6  ;;  %v8490_v4 = vsel %vm1700_vm15, %v8183_v25, %v11894_v5  ;;  %v8321_v15 = vsel %vm671_vm2, %v8319_v8, %v8320_v7  ;;  %v8171_v11 = vrot.slane %v18074_v23, 6  ;;  %9255 = vmatprep.subr.bf16.mxu0 %v19502_v1  ;;  %v12140_v28 = vld [vmem:[#allocation2 + $0x630] sm:$0xff]  }
0x129f   : > { %v8336_v35 = vsel %vm671_vm2, %v8320_v7, %v19524_v44  ;;  %v8489_v10 = vsel %vm1700_vm15, %v8201_v48, %v11893_v60  ;;  %v8507_v41 = vsel %vm1700_vm15, %v18074_v23, %v11898_v31  ;;  %v8508_v47 = vsel %vm1700_vm15, %v17931_v24, %v11899_v2  ;;  %v12135_v7 = vld [vmem:[#allocation2 + $0x608] sm:$0xff]   ;;  %v12141_v2 = vld [vmem:[#allocation2 + $0x638] sm:$0xff]  }
0x12a0   : > { %8783 = vmatmul.mubr.bf16.gmra.mrb[204].mxu0 %v8563_v49  ;;  %10829 = vmatmul.mubr.msk.bf16.gmra.mrb[240].mxu1 %vm1700_vm15, %v8571_v3  ;;  %v8352_v16 = vsel %vm19526_vm9, 0.0, %v8336_v35  ;;  %v8566_v43 = vpack.c.bf16 %v8490_v4, %v8489_v10  ;;  %v11904_v37 = vunpack.i.h.bf16 %v11902_v61  ;;  %v11903_v55 = vunpack.i.l.bf16 %v11902_v61  ;;  %v12139_v49 = vld [vmem:[#allocation2 + $0x628] sm:$0xff]  }
0x12a1   : > { %8790 = vmatprep.mubr.bf16.mxu0 %v8567_v29  ;;  %10832 = vmatprep.mubr.msk.bf16.mxu1 %vm1700_vm15, %v8574_v63  ;;  %v8577_v59 = vpack.c.bf16 %v8352_v16, %v8321_v15  ;;  %v8570_v21 = vpack.c.bf16 %v8508_v47, %v8507_v41  ;;  %v19527_v8 = vrot.slane %v17931_v24, 6  ;;  %v8182_v26 = vsel %vm524_vm13, %v8170_v46, %v8171_v11  ;;  %v12134_v24 = vld [vmem:[#allocation2 + $0x600] sm:$0xff]  }
0x12a2   : > { %v8491_v23 = vsel %vm1700_vm15, %v8182_v26, %v11903_v55  ;;  %9256 = vmatpush1.bf16.msra.mxu0 %v12132_v62  ;;  %v12138_v46 = vld [vmem:[#allocation2 + $0x620] sm:$0xff]   ;;  %vm19529_vm2 = vcmp.ge.s32.totalorder %v19422_v14, 31  ;;  %vm19550_vm7 = vcmask 1042432  }
0x12a3   : > { %v8181_v9 = vsel %vm524_vm13, %v8171_v11, %v19527_v8  ;;  %9257 = vmatprep.subr.bf16.mxu0 %v19502_v1  ;;  %vm19535_vm13 = vcmp.ge.s32.totalorder %v19486_v57, 31  ;;  %v19537_v57 = vld [vmem:[#allocation11_spill] sm:$0xff]  ;;  %vm19557_vm5 = vmmov %vm19550_vm7 }
0x12a4   : > { %v8492_v39 = vsel %vm1700_vm15, %v8181_v9, %v11904_v37 }
0x12a5   : > { %v8569_v56 = vpack.c.bf16 %v8492_v39, %v8491_v23 }
0x12a6   : > { %9258 = vmatpush1.bf16.msra.mxu0 %v12133_v42 }
0x12a7   : > { %9259 = vmatprep.subr.bf16.mxu0 %v19502_v1 }
0x12a8   : > { %8791 = vmatmul.mubr.bf16.gmra.mrb[208].mxu0 %v8566_v43  ;;  %10833 = vmatmul.mubr.msk.bf16.gmra.mrb[244].mxu1 %vm1700_vm15, %v8577_v59  ;;  %v18343_v43 = vld [vmem:[%s18924_s2 + $0xd] ss:$0 sm:$0xff] }
0x12a9   : > { %8798 = vmatprep.mubr.bf16.mxu0 %v8570_v21  ;;  %10844 = vmatprep.mubr.msk.bf16.mxu1 %vm12272_vm12, %v19521_v50  ;;  %v12142_v21 = vld [vmem:[#allocation2 + $0x640] sm:$0xff]  }
0x12aa   : > { %9260 = vmatpush1.bf16.msra.mxu0 %v12134_v24 }
0x12ab   : > { %9261 = vmatprep.subr.bf16.mxu0 %v19502_v1 }
0x12ae   : > { %9262 = vmatpush1.bf16.msra.mxu0 %v12135_v7 }
0x12af   : > { %9263 = vmatprep.subr.bf16.mxu0 %v19502_v1 }
0x12b0   : > { %8799 = vmatmul.mubr.bf16.gmra.mrb[212].mxu0 %v8569_v56 }
0x12b2   : > { %9264 = vmatpush1.bf16.msra.mxu0 %v12136_v12 }
0x12b3   : > { %9265 = vmatprep.subr.bf16.mxu0 %v19502_v1 }
0x12b6   : > { %9266 = vmatpush1.bf16.msra.mxu0 %v12137_v45 }
0x12b7   : > { %9267 = vmatprep.subr.bf16.mxu0 %v19502_v1 }
0x12ba   : > { %9268 = vmatpush1.bf16.msra.mxu0 %v12138_v46 }
0x12bb   : > { %9269 = vmatprep.subr.bf16.mxu0 %v19502_v1 }
0x12be   : > { %9270 = vmatpush1.bf16.msra.mxu0 %v12139_v49 }
0x12bf   : > { %9271 = vmatprep.subr.bf16.mxu0 %v19502_v1 }
0x12c2   : > { %9272 = vmatpush1.bf16.msra.mxu0 %v12140_v28 }
0x12c3   : > { %9273 = vmatprep.subr.bf16.mxu0 %v19502_v1 }
0x12c6   : > { %9274 = vmatpush1.bf16.msra.mxu0 %v12141_v2 }
0x12c7   : > { %9275 = vmatprep.subr.bf16.mxu0 %v19502_v1 }
0x12ca   : > { %9276 = vmatpush1.bf16.msra.mxu0 %v12142_v21 }
0x1353   : > { %v10674_v3 = vpop.f32.mrb[224].mxu1 }
0x1354   : > { %v10675_v6 = vpop.f32.mrb[225].mxu1 }
0x1355   : > { %v18330_v5 = vadd.f32 %v10675_v6, %v10674_v3  ;;  %v10677_v60 = vpop.f32.mrb[226].mxu1 }
0x1356   : > { %v10678_v29 = vpop.f32.mrb[227].mxu1 }
0x1357   : > { %v18332_v63 = vadd.f32 %v10678_v29, %v10677_v60 }
0x135b   : > { %v10638_v31 = vpop.f32.mrb[192].mxu0  ;;  %v10680_v44 = vpop.f32.mrb[228].mxu1 }
0x135c   : > { %v10639_v35 = vpop.f32.mrb[193].mxu0  ;;  %v10681_v25 = vpop.f32.mrb[229].mxu1 }
0x135d   : > { %v10640_v48 = vadd.f32 %v10639_v35, %v10638_v31  ;;  %v18336_v10 = vadd.f32 %v10681_v25, %v10680_v44  ;;  %v10641_v4 = vpop.f32.mrb[194].mxu0  ;;  %v10683_v15 = vpop.f32.mrb[230].mxu1 }
0x135e   : > { %v10642_v16 = vpop.f32.mrb[195].mxu0  ;;  %v10684_v61 = vpop.f32.mrb[231].mxu1 }
0x135f   : > { %v10643_v41 = vadd.f32 %v10642_v16, %v10641_v4  ;;  %v18338_v47 = vadd.f32 %v10684_v61, %v10683_v15  ;;  %v8761_v37 = vadd.f32 %v10640_v48, %v18343_v43 }
0x1361   : > { %v8764_v39 = vadd.f32 %v10643_v41, %v18343_v43 }
0x1363   : > { %v10644_v59 = vpop.f32.mrb[196].mxu0  ;;  %v10822_v11 = vpop.f32.mrb[232].mxu1 }
0x1364   : > { %v10645_v1 = vpop.f32.mrb[197].mxu0  ;;  %v8857_v55 = vpop.f32.mrb[233].mxu1 }
0x1365   : > { %v10646_v8 = vadd.f32 %v10645_v1, %v10644_v59  ;;  %v8858_v9 = vadd.f32 %v8857_v55, %v8761_v37  ;;  %v10647_v26 = vpop.f32.mrb[198].mxu0  ;;  %v10823_v23 = vpop.f32.mrb[234].mxu1 }
0x1366   : > { %v10648_v56 = vpop.f32.mrb[199].mxu0  ;;  %v8860_v38 = vpop.f32.mrb[235].mxu1 }
0x1367   : > { %v8769_v62 = vadd.f32 %v10646_v8, %v18343_v43  ;;  %v18348_v42 = vmax.f32 %v8858_v9, 0.0  ;;  %v10649_v24 = vadd.f32 %v10648_v56, %v10647_v26  ;;  %v8861_v7 = vadd.f32 %v8860_v38, %v8764_v39 }
0x1369   : > { %v8866_v12 = vadd.f32 %v10822_v11, %v8769_v62  ;;  %v8772_v45 = vadd.f32 %v10649_v24, %v18343_v43  ;;  %v8921_v46 = vmax.f32 %v8861_v7, 0.0  ;;  %v8936_v3 = vrot.slane %v18348_v42, 7 }
0x136a   : > { %v19069_v29 = vrot.slane %v18348_v42, 1 }
0x136b   : > { %v8922_v49 = vmax.f32 %v8866_v12, 0.0  ;;  %v8869_v28 = vadd.f32 %v10823_v23, %v8772_v45  ;;  %v10650_v6 = vpop.f32.mrb[200].mxu0  ;;  %v10826_v60 = vpop.f32.mrb[236].mxu1  ;;  %v8937_v2 = vrot.slane %v8921_v46, 7  ;;  %v8985_v31 = vrot.slane %v8921_v46, 1 }
0x136c   : > { %v11905_v44 = vpack.i.bf16 %v8921_v46, %v18348_v42  ;;  %v10651_v35 = vpop.f32.mrb[201].mxu0  ;;  %v8873_v25 = vpop.f32.mrb[237].mxu1 }
0x136d   : > { %v8938_v48 = vrot.slane %v8922_v49, 7  ;;  %v8986_v4 = vrot.slane %v8922_v49, 1  ;;  %v8923_v15 = vmax.f32 %v8869_v28, 0.0  ;;  %v10652_v16 = vadd.f32 %v10651_v35, %v10650_v6  ;;  %v10653_v61 = vpop.f32.mrb[202].mxu0  ;;  %v10827_v41 = vpop.f32.mrb[238].mxu1 }
0x136e   : > { %11906 = vrot.lane.b32.xlu0 %v11905_v44, %s12267_s6  ;;  %v10654_v59 = vpop.f32.mrb[203].mxu0  ;;  %v8876_v11 = vpop.f32.mrb[239].mxu1  ;;  %v9014_v37 = vsel %vm622_vm1, %v19069_v29, %v8985_v31  ;;  %v18363_v1 = vsel %vm573_vm0, %v8936_v3, %v8937_v2 }
0x136f   : > { %v8939_v55 = vrot.slane %v8923_v15, 7  ;;  %v8987_v21 = vrot.slane %v8923_v15, 1  ;;  %v8777_v8 = vadd.f32 %v10652_v16, %v18343_v43  ;;  %v10655_v9 = vadd.f32 %v10654_v59, %v10653_v61 }
0x1370   : > { %v11910_v26 = vpack.i.bf16 %v8923_v15, %v8922_v49  ;;  %v9013_v23 = vsel %vm622_vm1, %v8985_v31, %v8986_v4  ;;  %v18370_v39 = vsel %vm573_vm0, %v8937_v2, %v8938_v48 }
0x1371   : > { %v8874_v56 = vadd.f32 %v8873_v25, %v8777_v8  ;;  %v8780_v38 = vadd.f32 %v10655_v9, %v18343_v43  ;;  %v9138_v62 = vpack.c.bf16 %v9013_v23, %v9014_v37  ;;  %v18375_v24 = vsel %vm622_vm1, %v8986_v4, %v8987_v21 }
0x1372   : > { %11911 = vrot.lane.b32.xlu1 %v11910_v26, %s12267_s6  ;;  %v18380_v7 = vsel %vm573_vm0, %v8938_v48, %v8939_v55 }
0x1373   : > { %v8924_v12 = vmax.f32 %v8874_v56, 0.0  ;;  %v8877_v45 = vadd.f32 %v8876_v11, %v8780_v38  ;;  %10228 = vmatprep.mubr.msk.bf16.mxu0 %vm1700_vm15, %v9138_v62  ;;  %v10656_v46 = vpop.f32.mrb[204].mxu0  ;;  %v18383_v49 = vpop.f32.mrb[240].mxu1 }
0x1374   : > { %v10657_v28 = vpop.f32.mrb[205].mxu0  ;;  %v8889_v6 = vpop.f32.mrb[241].mxu1 }
0x1375   : > { %v8940_v2 = vrot.slane %v8924_v12, 7  ;;  %v8988_v31 = vrot.slane %v8924_v12, 1  ;;  %v18385_v44 = vmax.f32 %v8877_v45, 0.0  ;;  %v10658_v35 = vadd.f32 %v10657_v28, %v10656_v46  ;;  %v10659_v25 = vpop.f32.mrb[206].mxu0  ;;  %v18387_v4 = vpop.f32.mrb[242].mxu1 }
0x1376   : > { %v10660_v15 = vpop.f32.mrb[207].mxu0  ;;  %v8892_v48 = vpop.f32.mrb[243].mxu1  ;;  %v8809_v45 = vadd.f32 %v18330_v5, %v18343_v43 }
0x1377   : > { %v19070_v16 = vrot.slane %v18385_v44, 7  ;;  %v8989_v61 = vrot.slane %v18385_v44, 1  ;;  %v11915_v59 = vpack.i.bf16 %v18385_v44, %v8924_v12  ;;  %v8785_v11 = vadd.f32 %v10658_v35, %v18343_v43 }
0x1378   : > { %v10661_v37 = vadd.f32 %v10660_v15, %v10659_v25  ;;  %v9011_v8 = vsel %vm622_vm1, %v8987_v21, %v8988_v31  ;;  %v18397_v9 = vsel %vm573_vm0, %v8939_v55, %v8940_v2  ;;  %v8820_v35 = vadd.f32 %v18338_v47, %v18343_v43 }
0x1379   : > { %v8882_v26 = vadd.f32 %v10826_v60, %v8785_v11  ;;  %11916 = vrot.lane.b32.xlu0 %v11915_v59, %s12267_s6  ;;  %v18402_v23 = vsel %vm431_vm4, 0.0, %v9011_v8  ;;  %v18406_v56 = vsel %vm622_vm1, %v8988_v31, %v8989_v61  ;;  %v18412_v21 = vsel %vm573_vm0, %v8940_v2, %v19070_v16 }
0x137a   : > { %19528 = vst [vmem:[#allocation22_spill] sm:$0xff] %v18406_v56  ;;  %v8788_v55 = vadd.f32 %v10661_v37, %v18343_v43  ;;  %v8817_v60 = vadd.f32 %v18336_v10, %v18343_v43  ;;  %v8812_v11 = vadd.f32 %v18332_v63, %v18343_v43  ;;  %vm19533_vm4 = vcmp.ge.s32.totalorder %v12690_v13, 31 }
0x137b   : > { %v18419_v38 = vmax.f32 %v8882_v26, 0.0  ;;  %v10662_v62 = vpop.f32.mrb[208].mxu0  ;;  %v10834_v12 = vpop.f32.mrb[244].mxu1 }
0x137c   : > { %v8885_v46 = vadd.f32 %v10827_v41, %v8788_v55  ;;  %v8914_v28 = vadd.f32 %v10834_v12, %v8817_v60  ;;  %v10663_v31 = vpop.f32.mrb[209].mxu0  ;;  %v8905_v2 = vpop.f32.mrb[245].mxu1 }
0x137d   : > { %v10664_v25 = vadd.f32 %v10663_v31, %v10662_v62  ;;  %v8906_v15 = vadd.f32 %v8905_v2, %v8809_v45  ;;  %v10665_v10 = vpop.f32.mrb[210].mxu0  ;;  %v10835_v59 = vpop.f32.mrb[246].mxu1  ;;  %v8990_v37 = vrot.slane %v18419_v38, 1  ;;  %v8942_v45 = vrot.slane %v18419_v38, 7 }
0x137e   : > { %v8927_v8 = vmax.f32 %v8885_v46, 0.0  ;;  %v18428_v26 = vmax.f32 %v8914_v28, 0.0  ;;  %v8917_v5 = vadd.f32 %v10835_v59, %v8820_v35  ;;  %v10666_v41 = vpop.f32.mrb[211].mxu0  ;;  %v8908_v55 = vpop.f32.mrb[247].mxu1 }
0x137f   : > { %v8793_v60 = vadd.f32 %v10664_v25, %v18343_v43  ;;  %v18431_v12 = vmax.f32 %v8906_v15, 0.0  ;;  %v10667_v47 = vadd.f32 %v10666_v41, %v10665_v10  ;;  %v8909_v62 = vadd.f32 %v8908_v55, %v8812_v11 }
0x1380   : > { %v8943_v31 = vrot.slane %v8927_v8, 7  ;;  %v8991_v2 = vrot.slane %v8927_v8, 1  ;;  %v8998_v63 = vrot.slane %v18428_v26, 1  ;;  %v18436_v28 = vmax.f32 %v8917_v5, 0.0 }
0x1381   : > { %v8890_v17 = vadd.f32 %v8889_v6, %v8793_v60  ;;  %v8796_v35 = vadd.f32 %v10667_v47, %v18343_v43  ;;  %v8933_v59 = vmax.f32 %v8909_v62, 0.0  ;;  %v11920_v25 = vpack.i.bf16 %v8927_v8, %v18419_v38 }
0x1382   : > { %v18442_v15 = vsel %vm622_vm1, %v8989_v61, %v8990_v37  ;;  %v8996_v11 = vrot.slane %v18431_v12, 1  ;;  %v8951_v41 = vrot.slane %v18436_v28, 7  ;;  %v8999_v5 = vrot.slane %v18436_v28, 1 }
0x1383   : > { %v8928_v10 = vmax.f32 %v8890_v17, 0.0  ;;  %v10668_v55 = vpop.f32.mrb[212].mxu0  ;;  %v8893_v60 = vadd.f32 %v8892_v48, %v8796_v35  ;;  %v8949_v47 = vrot.slane %v8933_v59, 7  ;;  %v11935_v62 = vpack.i.bf16 %v8933_v59, %v18431_v12  ;;  %11921 = vrot.lane.b32.xlu1 %v11920_v25, %s12267_s6 }
0x1384   : > { %v10669_v38 = vpop.f32.mrb[213].mxu0  ;;  %v8997_v8 = vrot.slane %v8933_v59, 1  ;;  %v18455_v46 = vsel %vm573_vm0, %v8951_v41, %v8936_v3  ;;  %v18461_v35 = vsel %vm622_vm1, %v8990_v37, %v8991_v2  ;;  %v18468_v3 = vsel %vm573_vm0, %v8942_v45, %v8943_v31 }
0x1385   : > { %v8992_v61 = vrot.slane %v8928_v10, 1  ;;  %v10670_v17 = vadd.f32 %v10669_v38, %v10668_v55  ;;  %v10671_v29 = vpop.f32.mrb[214].mxu0  ;;  %v8944_v6 = vrot.slane %v8928_v10, 7  ;;  %v8929_v16 = vmax.f32 %v8893_v60, 0.0 }
0x1386   : > { %v10672_v50 = vpop.f32.mrb[215].mxu0 }
0x1387   : > { %v8801_v59 = vadd.f32 %v10670_v17, %v18343_v43  ;;  %v10673_v25 = vadd.f32 %v10672_v50, %v10671_v29  ;;  %v9007_v55 = vsel %vm622_vm1, %v8991_v2, %v8992_v61  ;;  %v8945_v38 = vrot.slane %v8929_v16, 7 }
0x1388   : > { %v8993_v60 = vrot.slane %v8929_v16, 1  ;;  %v11925_v36 = vpack.i.bf16 %v8929_v16, %v8928_v10  ;;  %v18472_v48 = vsel %vm19529_vm2, 0.0, %v9007_v55  ;;  %v19530_v29 = vrot.slane %v18385_v44, 7 }
0x1389   : > { %v8898_v37 = vadd.f32 %v18383_v49, %v8801_v59  ;;  %v8804_v56 = vadd.f32 %v10673_v25, %v18343_v43  ;;  %v9144_v50 = vpack.c.bf16 %v18472_v48, %v18461_v35  ;;  %v18491_v49 = vsel %vm573_vm0, %v8944_v6, %v8945_v38 }
0x138a   : > { %v18482_v2 = vsel %vm573_vm0, %v19530_v29, %v8942_v45  ;;  %11926 = vrot.lane.b32.xlu0 %v11925_v36, %s12267_s6  ;;  %v18487_v14 = vsel %vm622_vm1, %v8992_v61, %v8993_v60  ;;  %v18495_v43 = vsel %vm573_vm0, %v8943_v31, %v8944_v6  ;;  %v18499_v44 = vsel %vm622_vm1, %v8997_v8, %v8998_v63 }
0x138b   : > { %v8950_v16 = vrot.slane %v18428_v26, 7  ;;  %v8930_v45 = vmax.f32 %v8898_v37, 0.0  ;;  %v8901_v36 = vadd.f32 %v18387_v4, %v8804_v56  ;;  %v18505_v10 = vsel %vm622_vm1, %v8996_v11, %v8997_v8 }
0x138c   : > { %v9150_v61 = vpack.c.bf16 %v18499_v44, %v18505_v10  ;;  %v19531_v17 = vrot.slane %v18431_v12, 7  ;;  %v18517_v6 = vsel %vm622_vm1, %v8998_v63, %v8999_v5  ;;  %v19532_v59 = vrot.slane %v18348_v42, 1  ;;  %v12146_v44 = vld [vmem:[#allocation2 + $0x660] sm:$0xff]  }
0x138d   : > { %v8946_v56 = vrot.slane %v8930_v45, 7  ;;  %v8994_v8 = vrot.slane %v8930_v45, 1  ;;  %v8931_v25 = vmax.f32 %v8901_v36, 0.0  ;;  %v18532_v63 = vsel %vm573_vm0, %v8950_v16, %v8951_v41 }
0x138e   : > { %v18513_v31 = vsel %vm573_vm0, %v19531_v17, %v8949_v47  ;;  %v9015_v4 = vsel %vm622_vm1, %v8999_v5, %v19532_v59  ;;  %11936 = vrot.lane.b32.xlu0 %v11935_v62, %s12267_s6  ;;  %v18536_v42 = vsel %vm573_vm0, %v8949_v47, %v8950_v16  ;;  %v19534_v16 = vrot.slane %v18431_v12, 7 }
0x138f   : > { %v18525_v55 = vsel %vm19533_vm4, 0.0, %v9015_v4  ;;  %v8947_v5 = vrot.slane %v8931_v25, 7  ;;  %v8995_v29 = vrot.slane %v8931_v25, 1  ;;  %v11930_v36 = vpack.i.bf16 %v8931_v25, %v8930_v45 }
0x1390   : > { %v9152_v37 = vpack.c.bf16 %v18525_v55, %v18517_v6  ;;  %v18540_v13 = vsel %vm622_vm1, %v8993_v60, %v8994_v8  ;;  %v18546_v17 = vsel %vm573_vm0, %v8945_v38, %v8946_v56  ;;  %v19536_v59 = vpack.i.bf16 %v18436_v28, %v18428_v26 }
0x1391   : > { %v9146_v62 = vpack.c.bf16 %v18540_v13, %v18487_v14  ;;  %11931 = vrot.lane.b32.xlu1 %v11930_v36, %s12267_s6  ;;  %v9003_v41 = vsel %vm622_vm1, %v8995_v29, %v8996_v11  ;;  %v18553_v47 = vsel %vm622_vm1, %v8994_v8, %v8995_v29  ;;  %v18557_v60 = vsel %vm573_vm0, %v8946_v56, %v8947_v5  ;;  %v19544_v36 = vld [vmem:[#allocation13_spill] sm:$0xff] }
0x1392   : > { %v18563_v45 = vsel %vm573_vm0, %v8947_v5, %v19534_v16  ;;  %9614 = vrot.lane.b32.xlu0 %v17894_v19, %s12267_s6  ;;  %v18569_v11 = vsel %vm19535_vm13, 0.0, %v9003_v41  ;;  %v19538_v19 = vld [vmem:[#allocation24_spill] sm:$0xff]  ;;  %v8972_v28 = vsel %vm448_vm6, 0.0, %v18397_v9  ;;  %vm19545_vm1 = vcmp.lt.s32.totalorder %v19544_v36, 1 }
0x1393   : > { %v9148_v38 = vpack.c.bf16 %v18569_v11, %v18553_v47  ;;  %v8976_v41 = vsel %vm19545_vm1, 0.0, %v18495_v43  ;;  %v12144_v47 = vld [vmem:[#allocation2 + $0x650] sm:$0xff]  }
0x1395   : > { %11941 = vrot.lane.b32.xlu1 %v19536_v59, %s12267_s6  ;;  %v19546_v59 = vld [vmem:[#allocation15_spill] sm:$0xff] }
0x1396   : > { %9622 = vrot.lane.b32.xlu0 %v17906_v32, %s12267_s6  ;;  %vm19547_vm6 = vcmp.lt.s32.totalorder %v19546_v59, 1 }
0x1399   : > { %9616 = vrot.lane.b32.xlu1 %v17897_v53, %s12267_s6 }
0x139a   : > { %9630 = vrot.lane.b32.xlu0 %v17918_v22, %s12267_s6 }
0x139d   : > { %9624 = vrot.lane.b32.xlu1 %v17909_v51, %s12267_s6  ;;  %v19539_v51 = vld [vmem:[#allocation9_spill] sm:$0xff] }
0x139e   : > { %9618 = vrot.lane.b32.xlu0 %v17900_v40, %s12267_s6  ;;  %vm19540_vm0 = vcmp.lt.s32.totalorder %v19539_v51, 1 }
0x13a1   : > { %9632 = vrot.lane.b32.xlu1 %v17921_v20, %s12267_s6 }
0x13a2   : > { %9638 = vrot.lane.b32.xlu0 %v17933_v58, %s12267_s6  ;;  %v19541_v58 = vpack.c.bf16 %v18402_v23, %v18375_v24  ;;  %v19542_v23 = vld [vmem:[#allocation22_spill] sm:$0xff] }
0x13a5   : > { %9626 = vrot.lane.b32.xlu1 %v17912_v18, %s12267_s6  ;;  %v8968_v18 = vsel %vm19540_vm0, 0.0, %v18455_v46 }
0x13a6   : > { %9634 = vrot.lane.b32.xlu0 %v17924_v54, %s12267_s6 }
0x13a9   : > { %9640 = vrot.lane.b32.xlu1 %v17939_v52, %s12267_s6 }
0x13aa   : > { %9628 = vrot.lane.b32.xlu0 %v17915_v0, %s12267_s6 }
0x13ad   : > { %9620 = vrot.lane.b32.xlu1 %v17903_v34, %s12267_s6 }
0x13ae   : > { %9636 = vrot.lane.b32.xlu0 %v17927_v33, %s12267_s6 }
0x13b1   : > { %9642 = vrot.lane.b32.xlu1 %v19537_v57, %s12267_s6  ;;  %v8980_v57 = vsel %vm19547_vm6, 0.0, %v18563_v45 }
0x13b5   : > { %9644 = vrot.lane.b32.xlu1 %v19538_v19, %s12267_s6  ;;  %s12195_s6 = sshll.u32 %s12273_s26, 4  ;;  %s12196_s6 = int_to_ptr.vmem [resolvable:$false] %s12195_s6 }
0x13b6   : > { %s12197_s27 = scalar_lea.vmem %s12196_s6, 128  ;;  %p12198_p2 = scmp.lt.s32.totalorder %s18882_s17, %s12196_s6 }
0x13b7   : > { %p12199_p3 = scmp.lt.s32.totalorder %s12197_s27, %s12191_s16 }
0x13b9   : > { %p12200_p4 = por %p12199_p3, %p12198_p2 }
0x13bb   : > { %p12201_p7 = pnand %p12200_p4, %p12194_p12 }
0x13e0   : > { %v11907_v53 = vpop.permute.xlu0 %11906 }
0x13e1   : > { %v11909_v40 = vunpack.i.h.bf16 %v11907_v53  ;;  %v11908_v32 = vunpack.i.l.bf16 %v11907_v53 }
0x13e3   : > { %v9096_v0 = vsel %vm1700_vm15, %v8968_v18, %v11908_v32  ;;  %v9097_v34 = vsel %vm1700_vm15, %v18363_v1, %v11909_v40 }
0x13e4   : > { %v9137_v22 = vpack.c.bf16 %v9097_v34, %v9096_v0  ;;  %v11912_v20 = vpop.permute.xlu1 %11911 }
0x13e5   : > { %v11914_v54 = vunpack.i.h.bf16 %v11912_v20  ;;  %v11913_v33 = vunpack.i.l.bf16 %v11912_v20 }
0x13e6   : > { %9286 = vmatmul.mubr.bf16.vlgmr.msra.gmra.mrb[216].mxu0 %v9137_v22 }
0x13e7   : > { %10229 = vmatprep.mubr.msk.bf16.mxu0 %vm1700_vm15, %v19541_v58  ;;  %v9098_v52 = vsel %vm1700_vm15, %v18370_v39, %v11913_v33  ;;  %v9099_v30 = vsel %vm1700_vm15, %v18380_v7, %v11914_v54  ;;  %v19543_v39 = vpack.c.bf16 %v18442_v15, %v19542_v23 }
0x13e8   : > { %v9139_v26 = vpack.c.bf16 %v9099_v30, %v9098_v52 }
0x13eb   : > { %v11917_v12 = vpop.permute.xlu0 %11916 }
0x13ec   : > { %v11919_v46 = vunpack.i.h.bf16 %v11917_v12  ;;  %v11918_v1 = vunpack.i.l.bf16 %v11917_v12  ;;  %v18682_v12 = vld [vmem:[%s18924_s2 + $0xe] ss:$0 sm:$0xff] }
0x13ee   : > { %9294 = vmatmul.mubr.bf16.gmra.mrb[220].mxu0 %v9139_v26  ;;  %v9100_v4 = vsel %vm1700_vm15, %v8972_v28, %v11918_v1  ;;  %v9101_v24 = vsel %vm1700_vm15, %v18412_v21, %v11919_v46 }
0x13ef   : > { %10230 = vmatprep.mubr.msk.bf16.mxu0 %vm1700_vm15, %v19543_v39  ;;  %v9141_v7 = vpack.c.bf16 %v9101_v24, %v9100_v4 }
0x13f5   : > { %v11922_v56 = vpop.permute.xlu1 %11921 }
0x13f6   : > { %9302 = vmatmul.mubr.bf16.gmra.mrb[224].mxu0 %v9141_v7  ;;  %v11924_v8 = vunpack.i.h.bf16 %v11922_v56  ;;  %v11923_v25 = vunpack.i.l.bf16 %v11922_v56 }
0x13f7   : > { %10231 = vmatprep.mubr.msk.bf16.mxu0 %vm1700_vm15, %v9144_v50 }
0x13f8   : > { %v9102_v27 = vsel %vm1700_vm15, %v18482_v2, %v11923_v25  ;;  %v9103_v9 = vsel %vm1700_vm15, %v18468_v3, %v11924_v8 }
0x13f9   : > { %v9143_v21 = vpack.c.bf16 %v9103_v9, %v9102_v27 }
0x13fc   : > { %v11927_v15 = vpop.permute.xlu0 %11926 }
0x13fd   : > { %v11929_v5 = vunpack.i.h.bf16 %v11927_v15  ;;  %v11928_v29 = vunpack.i.l.bf16 %v11927_v15 }
0x13fe   : > { %9310 = vmatmul.mubr.bf16.gmra.mrb[228].mxu0 %v9143_v21 }
0x13ff   : > { %10232 = vmatprep.mubr.msk.bf16.mxu0 %vm1700_vm15, %v9146_v62  ;;  %v9104_v48 = vsel %vm1700_vm15, %v8976_v41, %v11928_v29  ;;  %v9105_v35 = vsel %vm1700_vm15, %v18491_v49, %v11929_v5 }
0x1400   : > { %v11937_v3 = vpop.permute.xlu0 %11936  ;;  %v9145_v50 = vpack.c.bf16 %v9105_v35, %v9104_v48 }
0x1401   : > { %v11939_v2 = vunpack.i.h.bf16 %v11937_v3  ;;  %v11938_v16 = vunpack.i.l.bf16 %v11937_v3 }
0x1403   : > { %v11932_v19 = vpop.permute.xlu1 %11931  ;;  %v9108_v43 = vsel %vm1700_vm15, %v8980_v57, %v11938_v16  ;;  %v9109_v14 = vsel %vm1700_vm15, %v18513_v31, %v11939_v2 }
0x1404   : > { %v11934_v13 = vunpack.i.h.bf16 %v11932_v19  ;;  %v11933_v62 = vunpack.i.l.bf16 %v11932_v19  ;;  %v9149_v53 = vpack.c.bf16 %v9109_v14, %v9108_v43 }
0x1406   : > { %9318 = vmatmul.mubr.bf16.gmra.mrb[232].mxu0 %v9145_v50  ;;  %v9106_v49 = vsel %vm1700_vm15, %v18546_v17, %v11933_v62  ;;  %v9107_v40 = vsel %vm1700_vm15, %v18557_v60, %v11934_v13  ;;  %v12143_v17 = vld [vmem:[#allocation2 + $0x648] sm:$0xff]  }
0x1407   : > { %10233 = vmatprep.mubr.msk.bf16.mxu0 %vm1700_vm15, %v9148_v38  ;;  %v11942_v45 = vpop.permute.xlu1 %11941  ;;  %v9147_v32 = vpack.c.bf16 %v9107_v40, %v9106_v49  ;;  %10837 = vmatpush3.bf16.msra.mxu1 %v12143_v17 }
0x1408   : > { %v11944_v51 = vunpack.i.h.bf16 %v11942_v45  ;;  %v11943_v18 = vunpack.i.l.bf16 %v11942_v45 }
0x140a   : > { %v9110_v31 = vsel %vm1700_vm15, %v18536_v42, %v11943_v18  ;;  %v9111_v0 = vsel %vm1700_vm15, %v18532_v63, %v11944_v51  ;;  %v19548_v42 = vmov 0.0   ;;  %v12145_v63 = vld [vmem:[#allocation2 + $0x658] sm:$0xff]  }
0x140b   : > { %v9151_v34 = vpack.c.bf16 %v9111_v0, %v9110_v31  ;;  %10838 = vmatprep.subr.bf16.mxu1 %v19548_v42 }
0x140c   : > { %10839 = vmatpush3.bf16.msra.mxu1 %v12144_v47 }
0x140d   : > { %10840 = vmatprep.subr.bf16.mxu1 %v19548_v42 }
0x140e   : > { %9326 = vmatmul.mubr.bf16.gmra.mrb[236].mxu0 %v9147_v32 }
0x140f   : > { %10234 = vmatprep.mubr.msk.bf16.mxu0 %vm1700_vm15, %v9150_v61 }
0x1410   : > { %10841 = vmatpush3.bf16.msra.mxu1 %v12145_v63 }
0x1411   : > { %10842 = vmatprep.subr.bf16.mxu1 %v19548_v42 }
0x1414   : > { %10843 = vmatpush3.bf16.msra.mxu1 %v12146_v44 }
0x1415   : > { %10848 = vmatprep.subr.bf16.mxu1 %v19548_v42 }
0x1416   : > { %9334 = vmatmul.mubr.bf16.gmra.mrb[240].mxu0 %v9149_v53 }
0x1417   : > { %10235 = vmatprep.mubr.msk.bf16.mxu0 %vm1700_vm15, %v9152_v37 }
0x141e   : > { %9342 = vmatmul.mubr.bf16.gmra.mrb[244].mxu0 %v9151_v34 }
0x14b9   : > { %v9287_v10 = vpop.f32.mrb[216].mxu0 }
0x14ba   : > { %v9289_v61 = vpop.f32.mrb[217].mxu0  ;;  %v18697_v24 = vadd.f32 %v18682_v12, %v9287_v10 }
0x14bb   : > { %v9290_v6 = vpop.f32.mrb[218].mxu0 }
0x14bc   : > { %v9292_v55 = vpop.f32.mrb[219].mxu0  ;;  %v18688_v1 = vadd.f32 %v18682_v12, %v9290_v6  ;;  %v9350_v36 = vmax.f32 %v18697_v24, 0.0 }
0x14be   : > { %v9351_v8 = vmax.f32 %v18688_v1, 0.0  ;;  %v9366_v19 = vsel %vm1700_vm15, %v9350_v36, 0.0 }
0x14c0   : > { %v9367_v50 = vsel %vm1700_vm15, %v9351_v8, 0.0 }
0x14c1   : > { %v9295_v37 = vpop.f32.mrb[220].mxu0  ;;  %v9368_v45 = vadd.f32 %v9367_v50, %v9366_v19 }
0x14c2   : > { %v9297_v60 = vpop.f32.mrb[221].mxu0  ;;  %v18700_v39 = vadd.f32 %v18682_v12, %v9295_v37 }
0x14c3   : > { %v9298_v11 = vpop.f32.mrb[222].mxu0 }
0x14c4   : > { %v9300_v38 = vpop.f32.mrb[223].mxu0  ;;  %v9352_v41 = vmax.f32 %v18700_v39, 0.0  ;;  %v18718_v48 = vadd.f32 %v18682_v12, %v9298_v11 }
0x14c6   : > { %v9369_v13 = vsel %vm1700_vm15, %v9352_v41, 0.0  ;;  %v9353_v62 = vmax.f32 %v18718_v48, 0.0 }
0x14c7   : > { %v9370_v47 = vadd.f32 %v9369_v13, %v9368_v45 }
0x14c8   : > { %v9371_v44 = vsel %vm1700_vm15, %v9353_v62, 0.0 }
0x14c9   : > { %v9303_v22 = vpop.f32.mrb[224].mxu0  ;;  %v9372_v60 = vadd.f32 %v9371_v44, %v9370_v47 }
0x14ca   : > { %v9305_v20 = vpop.f32.mrb[225].mxu0  ;;  %v18691_v28 = vadd.f32 %v18682_v12, %v9303_v22 }
0x14cb   : > { %v9306_v54 = vpop.f32.mrb[226].mxu0 }
0x14cc   : > { %v9308_v33 = vpop.f32.mrb[227].mxu0  ;;  %v18685_v46 = vadd.f32 %v18682_v12, %v9306_v54  ;;  %v9354_v25 = vmax.f32 %v18691_v28, 0.0 }
0x14ce   : > { %v9355_v7 = vmax.f32 %v18685_v46, 0.0  ;;  %v9380_v2 = vsel %vm1700_vm15, %v9354_v25, 0.0 }
0x14d0   : > { %v9381_v35 = vsel %vm1700_vm15, %v9355_v7, 0.0 }
0x14d1   : > { %v9311_v58 = vpop.f32.mrb[228].mxu0  ;;  %v9382_v43 = vadd.f32 %v9381_v35, %v9380_v2 }
0x14d2   : > { %v9313_v52 = vpop.f32.mrb[229].mxu0  ;;  %v18694_v4 = vadd.f32 %v18682_v12, %v9311_v58 }
0x14d3   : > { %v9314_v30 = vpop.f32.mrb[230].mxu0 }
0x14d4   : > { %v9316_v26 = vpop.f32.mrb[231].mxu0  ;;  %v9356_v9 = vmax.f32 %v18694_v4, 0.0  ;;  %v18707_v21 = vadd.f32 %v18682_v12, %v9314_v30 }
0x14d5   : > { %v9373_v26 = vrot.slane %v9372_v60, 4 }
0x14d6   : > { %v9383_v16 = vsel %vm1700_vm15, %v9356_v9, 0.0  ;;  %v9357_v59 = vmax.f32 %v18707_v21, 0.0 }
0x14d7   : > { %v9384_v32 = vadd.f32 %v9383_v16, %v9382_v43  ;;  %v9374_v35 = vadd.f32 %v9373_v26, %v9372_v60 }
0x14d8   : > { %v9385_v18 = vsel %vm1700_vm15, %v9357_v59, 0.0 }
0x14d9   : > { %v9319_v23 = vpop.f32.mrb[232].mxu0  ;;  %v9386_v6 = vadd.f32 %v9385_v18, %v9384_v32 }
0x14da   : > { %v9321_v56 = vpop.f32.mrb[233].mxu0  ;;  %v18710_v15 = vadd.f32 %v18682_v12, %v9319_v23 }
0x14db   : > { %v9322_v27 = vpop.f32.mrb[234].mxu0  ;;  %v9387_v20 = vrot.slane %v9386_v6, 4 }
0x14dc   : > { %v18713_v5 = vadd.f32 %v18682_v12, %v9322_v27  ;;  %v9324_v29 = vpop.f32.mrb[235].mxu0  ;;  %v9358_v57 = vmax.f32 %v18710_v15, 0.0 }
0x14dd   : > { %v9388_v56 = vadd.f32 %v9387_v20, %v9386_v6 }
0x14de   : > { %v9359_v3 = vmax.f32 %v18713_v5, 0.0  ;;  %v9394_v31 = vsel %vm1700_vm15, %v9358_v57, 0.0 }
0x14df   : > { %v9389_v43 = vrot.slane %v9388_v56, 2 }
0x14e0   : > { %v9395_v53 = vsel %vm1700_vm15, %v9359_v3, 0.0 }
0x14e1   : > { %v9327_v14 = vpop.f32.mrb[236].mxu0  ;;  %v9396_v63 = vadd.f32 %v9395_v53, %v9394_v31  ;;  %v9390_v47 = vadd.f32 %v9389_v43, %v9388_v56 }
0x14e2   : > { %v18746_v49 = vadd.f32 %v18682_v12, %v9327_v14  ;;  %v9329_v40 = vpop.f32.mrb[237].mxu0 }
0x14e3   : > { %v9330_v51 = vpop.f32.mrb[238].mxu0 }
0x14e4   : > { %v9360_v0 = vmax.f32 %v18746_v49, 0.0  ;;  %v18756_v34 = vadd.f32 %v18682_v12, %v9330_v51  ;;  %v9332_v17 = vpop.f32.mrb[239].mxu0  ;;  %v9375_v51 = vrot.slane %v9374_v35, 2 }
0x14e6   : > { %v9397_v10 = vsel %vm1700_vm15, %v9360_v0, 0.0  ;;  %v9361_v61 = vmax.f32 %v18756_v34, 0.0  ;;  %v9376_v6 = vadd.f32 %v9375_v51, %v9374_v35  ;;  %v9507_v35 = vld [vmem:[#allocation2 + $0x668] sm:$0xf]  ;;  %v10236_v51 = vld [vmem:[%s18924_s2 + $0xf] ss:$0 sm:$0xff] }
0x14e7   : > { %v9398_v55 = vadd.f32 %v9397_v10, %v9396_v63 }
0x14e8   : > { %v9399_v37 = vsel %vm1700_vm15, %v9361_v61, 0.0 }
0x14e9   : > { %v9400_v11 = vadd.f32 %v9399_v37, %v9398_v55  ;;  %v9335_v38 = vpop.f32.mrb[240].mxu0 }
0x14ea   : > { %v9337_v22 = vpop.f32.mrb[241].mxu0  ;;  %v18769_v58 = vadd.f32 %v18682_v12, %v9335_v38 }
0x14eb   : > { %v9338_v54 = vpop.f32.mrb[242].mxu0  ;;  %v9401_v33 = vrot.slane %v9400_v11, 4 }
0x14ec   : > { %v18772_v52 = vadd.f32 %v18682_v12, %v9338_v54  ;;  %v9340_v30 = vpop.f32.mrb[243].mxu0  ;;  %v9362_v29 = vmax.f32 %v18769_v58, 0.0 }
0x14ed   : > { %v9402_v27 = vadd.f32 %v9401_v33, %v9400_v11  ;;  %v9377_v11 = vrot.slane %v9376_v6, 1 }
0x14ee   : > { %v9363_v23 = vmax.f32 %v18772_v52, 0.0  ;;  %v9408_v53 = vsel %vm1700_vm15, %v9362_v29, 0.0 }
0x14ef   : > { %v9403_v13 = vrot.slane %v9402_v27, 2  ;;  %v9378_v33 = vadd.f32 %v9377_v11, %v9376_v6  ;;  %v9615_v11 = vpop.permute.xlu0 %9614 }
0x14f0   : > { %v9409_v2 = vsel %vm1700_vm15, %v9363_v23, 0.0 }
0x14f1   : > { %v9343_v50 = vpop.f32.mrb[244].mxu0  ;;  %v9410_v18 = vadd.f32 %v9409_v2, %v9408_v53  ;;  %v9404_v44 = vadd.f32 %v9403_v13, %v9402_v27  ;;  %v9379_v27 = vmul.f32 0.03125, %v9378_v33 }
0x14f2   : > { %v18780_v16 = vadd.f32 %v18682_v12, %v9343_v50  ;;  %v9345_v19 = vpop.f32.mrb[245].mxu0 }
0x14f3   : > { %v9346_v14 = vpop.f32.mrb[246].mxu0  ;;  %v9405_v60 = vrot.slane %v9404_v44, 1 }
0x14f4   : > { %v9364_v40 = vmax.f32 %v18780_v16, 0.0  ;;  %v18787_v45 = vadd.f32 %v18682_v12, %v9346_v14  ;;  %v9348_v32 = vpop.f32.mrb[247].mxu0  ;;  %v9391_v12 = vrot.slane %v9390_v47, 1 }
0x14f5   : > { %v9406_v54 = vadd.f32 %v9405_v60, %v9404_v44  ;;  %v9518_v32 = vsel %vm4404_vm14, %v9507_v35, 0  ;;  %vm19551_vm14 = vcmask 64512   ;;  %v12150_v60 = vld [vmem:[#allocation2 + $0x688] sm:$0xff]  }
0x14f6   : > { %v9411_v31 = vsel %vm1700_vm15, %v9364_v40, 0.0  ;;  %v9365_v17 = vmax.f32 %v18787_v45, 0.0  ;;  %v9392_v22 = vadd.f32 %v9391_v12, %v9390_v47  ;;  %v12148_v12 = vld [vmem:[#allocation2 + $0x678] sm:$0xff]  }
0x14f7   : > { %v9412_v63 = vadd.f32 %v9411_v31, %v9410_v18  ;;  %v9407_v50 = vmul.f32 0.03125, %v9406_v54 }
0x14f8   : > { %v9413_v10 = vsel %vm1700_vm15, %v9365_v17, 0.0  ;;  %v9393_v26 = vmul.f32 0.03125, %v9392_v22  ;;  %v10242_v22 = vld [vmem:[%s18924_s2 + $0x10] ss:$0 sm:$0xff] }
0x14f9   : > { %v9414_v55 = vadd.f32 %v9413_v10, %v9412_v63 }
0x14fa   : > { %v9422_v19 = vsel %vm4307_vm10, %v9379_v27, %v9393_v26 }
0x14fb   : > { %v9415_v37 = vrot.slane %v9414_v55, 4  ;;  %v9423_v14 = vsel %vm19549_vm11, %v9422_v19, %v9407_v50 }
0x14fd   : > { %v9416_v38 = vadd.f32 %v9415_v37, %v9414_v55  ;;  %v12147_v55 = vld [vmem:[#allocation2 + $0x670] sm:$0xff]   ;;  %v12149_v37 = vld [vmem:[#allocation2 + $0x680] sm:$0xff]  }
0x14ff   : > { %v9417_v20 = vrot.slane %v9416_v38, 2 }
0x1501   : > { %v9418_v30 = vadd.f32 %v9417_v20, %v9416_v38  ;;  %v9617_v38 = vpop.permute.xlu1 %9616 }
0x1503   : > { %v9419_v56 = vrot.slane %v9418_v30, 1 }
0x1505   : > { %v9420_v2 = vadd.f32 %v9419_v56, %v9418_v30  ;;  %v9623_v30 = vpop.permute.xlu0 %9622  ;;  %v9625_v27 = vpop.permute.xlu1 %9624 }
0x1507   : > { %v9421_v43 = vmul.f32 0.03125, %v9420_v2 }
0x1509   : > { %v9424_v13 = vsel %vm19550_vm7, %v9423_v14, %v9421_v43  ;;  %v9631_v2 = vpop.permute.xlu0 %9630  ;;  %v9633_v19 = vpop.permute.xlu1 %9632 }
0x150a   : > { %v9434_v53 = vpack.c.bf16 %v9424_v13, %v9424_v13 }
0x150c   : > { %10845 = vmatmul.mubr.msk.bf16.vlgmr.msra.gmra.mrb[248].mxu1 %vm1700_vm15, %v9434_v53 }
0x150d   : > { %10849 = vmatpush3.bf16.msra.mxu1 %v9518_v32  ;;  %10850 = vmatprep.mubr.msk.bf16.mxu1 %vm12272_vm12, %v19548_v42  ;;  %v9619_v43 = vpop.permute.xlu0 %9618  ;;  %v9627_v35 = vpop.permute.xlu1 %9626 }
0x150e   : > { %10854 = vmatprep.subr.bf16.mxu1 %v19548_v42 }
0x1511   : > { %v9639_v13 = vpop.permute.xlu0 %9638  ;;  %v9641_v53 = vpop.permute.xlu1 %9640 }
0x1515   : > { %v9635_v32 = vpop.permute.xlu0 %9634 }
0x15df   : > { %v9500_v18 = vpop.f32.mrb[248].mxu1 }
0x15e0   : > { %v9501_v31 = vadd.f32 %v10236_v51, %v9500_v18  ;;  %v10846_v47 = vpop.f32.mrb[249].mxu1  ;;  %v9621_v18 = vpop.permute.xlu1 %9620 }
0x15e1   : > { %v9503_v63 = vpop.f32.mrb[250].mxu1 }
0x15e2   : > { %v9506_v44 = vmax.f32 %v9501_v31, 0.0  ;;  %v10847_v10 = vpop.f32.mrb[251].mxu1  ;;  %v19552_v31 = vld [vmem:[#allocation32_spill] sm:$0xff]  ;;  %v19553_v63 = vld [vmem:[#allocation38_spill] sm:$0xff] }
0x15e3   : > { %v19554_v10 = vld [vmem:[#allocation39_spill] sm:$0xff] }
0x15e4   : > { %v9509_v6 = vpack.c.bf16 %v9506_v44, %v9506_v44  ;;  %v9643_v28 = vpop.permute.xlu1 %9642 }
0x15e6   : > { %10851 = vmatmul.mubr.msk.bf16.vlgmr.msra.gmra.mrb[252].mxu1 %vm19551_vm14, %v9509_v6 }
0x15e7   : > { %10862 = vmatprep.mubr.msk.bf16.mxu1 %vm12272_vm12, %v19548_v42  ;;  %10855 = vmatpush3.bf16.msra.mxu1 %v12147_v55  ;;  %v19555_v55 = vld [vmem:[#allocation30_spill] sm:$0xff]  ;;  %vm19556_vm12 = vmmov %vm19549_vm11 }
0x15e8   : > { %10856 = vmatprep.subr.bf16.mxu1 %v19548_v42 }
0x15eb   : > { %10857 = vmatpush3.bf16.msra.mxu1 %v12148_v12 }
0x15ec   : > { %10858 = vmatprep.subr.bf16.mxu1 %v19548_v42 }
0x15ef   : > { %10859 = vmatpush3.bf16.msra.mxu1 %v12149_v37 }
0x15f0   : > { %10860 = vmatprep.subr.bf16.mxu1 %v19548_v42 }
0x15f3   : > { %10861 = vmatpush3.bf16.msra.mxu1 %v12150_v60 }
0x16b9   : > { %v9554_v20 = vpop.f32.mrb[252].mxu1 }
0x16ba   : > { %v9555_v54 = vadd.f32 %v10242_v22, %v9554_v20  ;;  %v10852_v33 = vpop.f32.mrb[253].mxu1  ;;  %v9629_v20 = vpop.permute.xlu0 %9628 }
0x16bb   : > { %v9557_v26 = vpop.f32.mrb[254].mxu1 }
0x16bc   : > { %v10244_v56 = vmul.f32 -1.442695, %v9555_v54  ;;  %v10853_v50 = vpop.f32.mrb[255].mxu1 }
0x16be   : > { %12159 = vpow2.f32 %v10244_v56  ;;  %v9637_v49 = vpop.permute.xlu0 %9636 }
0x16c8   : > { %v12160_v42 = vpop.eup %12159 }
0x16c9   : > { %v9563_v14 = vadd.f32 1.0, %v12160_v42 }
0x16cb   : > { %12161 = vrcp.f32 %v9563_v14 }
0x16d5   : > { %v12162_v51 = vpop.eup %12161 }
0x16d6   : > { %v9569_v47 = vrot.slane %v12162_v51, %v19552_v31  ;;  %v9573_v44 = vrot.slane %v12162_v51, %v19553_v63  ;;  %v9577_v6 = vrot.slane %v12162_v51, %v19554_v10  ;;  %v9581_v12 = vrot.slane %v12162_v51, %v19555_v55 }
0x16d8   : > { %v9582_v37 = vmul.f32 %v9569_v47, %v9350_v36  ;;  %v9583_v60 = vmul.f32 %v9569_v47, %v9351_v8  ;;  %v9584_v22 = vmul.f32 %v9569_v47, %v9352_v41  ;;  %v9586_v54 = vmul.f32 %v9573_v44, %v9354_v25 }
0x16d9   : > { %v9587_v33 = vmul.f32 %v9573_v44, %v9355_v7  ;;  %v9588_v26 = vmul.f32 %v9573_v44, %v9356_v9  ;;  %v9585_v24 = vmul.f32 %v9569_v47, %v9353_v62  ;;  %v9589_v1 = vmul.f32 %v9573_v44, %v9357_v59 }
0x16da   : > { %v9590_v39 = vmul.f32 %v9577_v6, %v9358_v57  ;;  %v9591_v8 = vmul.f32 %v9577_v6, %v9359_v3  ;;  %v9592_v46 = vmul.f32 %v9577_v6, %v9360_v0  ;;  %v9593_v4 = vmul.f32 %v9577_v6, %v9361_v61 }
0x16db   : > { %v9662_v7 = vadd.f32 %v9615_v11, %v9582_v37  ;;  %v9594_v25 = vmul.f32 %v9581_v12, %v9362_v29  ;;  %v9663_v9 = vadd.f32 %v9617_v38, %v9583_v60  ;;  %v9664_v21 = vadd.f32 %v9619_v43, %v9584_v22  ;;  %v9645_v38 = vpop.permute.xlu1 %9644 }
0x16dc   : > { %v9666_v36 = vadd.f32 %v9623_v30, %v9586_v54  ;;  %v9595_v15 = vmul.f32 %v9581_v12, %v9363_v23  ;;  %v9596_v5 = vmul.f32 %v9581_v12, %v9364_v40  ;;  %v9667_v41 = vadd.f32 %v9625_v27, %v9587_v33 }
0x16dd   : > { %v9668_v48 = vadd.f32 %v9627_v35, %v9588_v26  ;;  %v9665_v3 = vadd.f32 %v9621_v18, %v9585_v24  ;;  %v9669_v59 = vadd.f32 %v9629_v20, %v9589_v1  ;;  %v9670_v57 = vadd.f32 %v9631_v2, %v9590_v39 }
0x16de   : > { %v9671_v62 = vadd.f32 %v9633_v19, %v9591_v8  ;;  %v9672_v0 = vadd.f32 %v9635_v32, %v9592_v46  ;;  %v9678_v34 = vmax.f32 %v9662_v7, 0.0  ;;  %v9679_v61 = vmax.f32 %v9663_v9, 0.0 }
0x16df   : > { %v9680_v58 = vmax.f32 %v9664_v21, 0.0  ;;  %v9682_v29 = vmax.f32 %v9666_v36, 0.0  ;;  %v9683_v11 = vmax.f32 %v9667_v41, 0.0  ;;  %v9597_v52 = vmul.f32 %v9581_v12, %v9365_v17 }
0x16e0   : > { %v9673_v23 = vadd.f32 %v9637_v49, %v9593_v4  ;;  %v9684_v16 = vmax.f32 %v9668_v48, 0.0  ;;  %v9674_v40 = vadd.f32 %v9639_v13, %v9594_v25  ;;  %v9675_v30 = vadd.f32 %v9641_v53, %v9595_v15 }
0x16e1   : > { %v9676_v56 = vadd.f32 %v9643_v28, %v9596_v5  ;;  %v9686_v50 = vmax.f32 %v9670_v57, 0.0  ;;  %v9687_v27 = vmax.f32 %v9671_v62, 0.0  ;;  %v9677_v2 = vadd.f32 %v9645_v38, %v9597_v52 }
0x16e2   : > { %v9681_v19 = vmax.f32 %v9665_v3, 0.0  ;;  %v9685_v43 = vmax.f32 %v9669_v59, 0.0  ;;  %v9688_v42 = vmax.f32 %v9672_v0, 0.0  ;;  %v9689_v35 = vmax.f32 %v9673_v23, 0.0 }
0x16e3   : > { %v9694_v14 = vsel %vm1700_vm15, %v9678_v34, 0.0  ;;  %v9690_v32 = vmax.f32 %v9674_v40, 0.0  ;;  %v9691_v51 = vmax.f32 %v9675_v30, 0.0  ;;  %v9692_v18 = vmax.f32 %v9676_v56, 0.0 }
0x16e4   : > { %v9695_v45 = vsel %vm1700_vm15, %v9679_v61, 0.0  ;;  %v9693_v17 = vmax.f32 %v9677_v2, 0.0  ;;  %v9708_v13 = vsel %vm1700_vm15, %v9682_v29, 0.0  ;;  %v9709_v53 = vsel %vm1700_vm15, %v9683_v11, 0.0 }
0x16e5   : > { %v9696_v31 = vadd.f32 %v9695_v45, %v9694_v14  ;;  %v9697_v47 = vsel %vm1700_vm15, %v9680_v58, 0.0  ;;  %v9710_v63 = vadd.f32 %v9709_v53, %v9708_v13  ;;  %v9722_v44 = vsel %vm1700_vm15, %v9686_v50, 0.0  ;;  %v10245_v14 = vld [vmem:[%s18924_s2 + $0x11] ss:$0 sm:$0xff] }
0x16e6   : > { %v9723_v10 = vsel %vm1700_vm15, %v9687_v27, 0.0  ;;  %v9699_v55 = vsel %vm1700_vm15, %v9681_v19, 0.0  ;;  %v9711_v12 = vsel %vm1700_vm15, %v9684_v16, 0.0  ;;  %v9725_v22 = vsel %vm1700_vm15, %v9688_v42, 0.0 }
0x16e7   : > { %v9698_v6 = vadd.f32 %v9697_v47, %v9696_v31  ;;  %v9724_v37 = vadd.f32 %v9723_v10, %v9722_v44  ;;  %v9712_v60 = vadd.f32 %v9711_v12, %v9710_v63  ;;  %v9736_v20 = vsel %vm1700_vm15, %v9690_v32, 0.0 }
0x16e8   : > { %v9737_v54 = vsel %vm1700_vm15, %v9691_v51, 0.0  ;;  %v9713_v26 = vsel %vm1700_vm15, %v9685_v43, 0.0  ;;  %v9727_v8 = vsel %vm1700_vm15, %v9689_v35, 0.0  ;;  %v9739_v28 = vsel %vm1700_vm15, %v9692_v18, 0.0 }
0x16e9   : > { %v9700_v33 = vadd.f32 %v9699_v55, %v9698_v6  ;;  %v9726_v24 = vadd.f32 %v9725_v22, %v9724_v37  ;;  %v9738_v1 = vadd.f32 %v9737_v54, %v9736_v20  ;;  %v9714_v39 = vadd.f32 %v9713_v26, %v9712_v60 }
0x16ea   : > { %v9741_v9 = vsel %vm1700_vm15, %v9693_v17, 0.0 }
0x16eb   : > { %v9701_v46 = vrot.slane %v9700_v33, 4  ;;  %v9728_v4 = vadd.f32 %v9727_v8, %v9726_v24  ;;  %v9740_v7 = vadd.f32 %v9739_v28, %v9738_v1  ;;  %v9715_v25 = vrot.slane %v9714_v39, 4 }
0x16ed   : > { %v9702_v21 = vadd.f32 %v9701_v46, %v9700_v33  ;;  %v9729_v36 = vrot.slane %v9728_v4, 4  ;;  %v9742_v15 = vadd.f32 %v9741_v9, %v9740_v7  ;;  %v9716_v5 = vadd.f32 %v9715_v25, %v9714_v39 }
0x16ef   : > { %v9703_v41 = vrot.slane %v9702_v21, 2  ;;  %v9730_v48 = vadd.f32 %v9729_v36, %v9728_v4  ;;  %v9743_v3 = vrot.slane %v9742_v15, 4  ;;  %v9717_v59 = vrot.slane %v9716_v5, 2 }
0x16f1   : > { %v9704_v57 = vadd.f32 %v9703_v41, %v9702_v21  ;;  %v9731_v62 = vrot.slane %v9730_v48, 2  ;;  %v9744_v49 = vadd.f32 %v9743_v3, %v9742_v15  ;;  %v9718_v0 = vadd.f32 %v9717_v59, %v9716_v5 }
0x16f3   : > { %v9705_v34 = vrot.slane %v9704_v57, 1  ;;  %v9732_v61 = vadd.f32 %v9731_v62, %v9730_v48  ;;  %v9745_v58 = vrot.slane %v9744_v49, 2  ;;  %v9719_v29 = vrot.slane %v9718_v0, 1 }
0x16f5   : > { %v9706_v11 = vadd.f32 %v9705_v34, %v9704_v57  ;;  %v9733_v52 = vrot.slane %v9732_v61, 1  ;;  %v9746_v23 = vadd.f32 %v9745_v58, %v9744_v49  ;;  %v9720_v38 = vadd.f32 %v9719_v29, %v9718_v0 }
0x16f7   : > { %v9707_v16 = vmul.f32 0.03125, %v9706_v11  ;;  %v9734_v40 = vadd.f32 %v9733_v52, %v9732_v61  ;;  %v9747_v30 = vrot.slane %v9746_v23, 1  ;;  %v9721_v56 = vmul.f32 0.03125, %v9720_v38 }
0x16f9   : > { %v9735_v50 = vmul.f32 0.03125, %v9734_v40  ;;  %v9748_v27 = vadd.f32 %v9747_v30, %v9746_v23  ;;  %v9750_v2 = vsel %vm4307_vm10, %v9707_v16, %v9721_v56 }
0x16fb   : > { %v9749_v19 = vmul.f32 0.03125, %v9748_v27  ;;  %v9751_v43 = vsel %vm19556_vm12, %v9750_v2, %v9735_v50 }
0x16fd   : > { %v9752_v42 = vsel %vm19557_vm5, %v9751_v43, %v9749_v19 }
0x16fe   : > { %v9762_v35 = vpack.c.bf16 %v9752_v42, %v9752_v42 }
0x1700   : > { %10863 = vmatmul.mubr.msk.bf16.vlgmr.msra.gmra.mrb[0].mxu1 %vm1700_vm15, %v9762_v35 }
0x17d3   : > { %v9828_v32 = vpop.f32.mrb[0].mxu1 }
0x17d4   : > { %v9829_v51 = vadd.f32 %v10245_v14, %v9828_v32  ;;  %v10864_v18 = vpop.f32.mrb[1].mxu1 }
0x17d5   : > { %v9831_v45 = vpop.f32.mrb[2].mxu1 }
0x17d6   : > { %9834 = vst [vmem:[%s179_s11] sm:$0xf] %v9829_v51  ;;  %v10865_v17 = vpop.f32.mrb[3].mxu1 }
0x17d7   : > { %12204 = shalt.err (!%p12201_p7)
}
0x17d8   : > { %s12205_s28 = scalar_lea.hbm %s18880_s24, 64  ;;  %s12209_s4 = scalar_lea.hbm %s18925_s3, 128 }
0x17d9   : > { %p12206_p8 = scmp.ne.s32.totalorder %s18880_s24, %s12205_s28  ;;  %p12210_p1 = scmp.lt.u32.totalorder %s18880_s24, %s18925_s3 }
0x17da   : > { %p12211_p0 = scmp.lt.u32.totalorder %s12209_s4, %s12205_s28  ;;  %p12213_p6 = scmp.lt.u32.totalorder %s12205_s28, %s18880_s24 }
0x17db   : > { %p12207_p11 = pnand %p12206_p8, %p19558_p9 }
0x17dc   : > { %p12212_p5 = por %p12211_p0, %p12210_p1 }
0x17dd   : > { %p12208_p13 = pneg %p12207_p11 }
0x17de   : > { %p12214_p10 = por %p12213_p6, %p12212_p5 }
0x17e0   : > { %p12215_p12 = pnand %p12214_p10, %p12208_p13 }
0x17e2   : > { %12218 = shalt.err (!%p12215_p12)
}
0x17e3   : > { %10886 = dma.vmem_to_hbm [thread:$0]  (%p19558_p9), %s18882_s17, 64, %s18880_s24, %s9836_s25  }
0x17e4 PF: > { %p10898_p2 = scmp.ge.s32.totalorder %s12257_s15, 2  ;;  %s9861_s8 = sand.u32 1, %s12245_s12  }
0x17e5   : > { %p19559_p3 = scmp.ne.s32.totalorder %s19075_s23, 0  ;;  %s9862_s9 = scalar_lea.sflag [#allocation4], %s9861_s8 }
0x17e7   : > { %p10893_p4 = pnand %p10898_p2, %p19559_p3 }
0x17e9   : > { %12240 = dma.done.wait (!%p10893_p4), %s9862_s9, 64  }
0x17ea   : > { %12242 = vsyncadd (!%p10893_p4), %s9862_s9, 4294967232  ;;  %p14_p7 = scmp.ge.s32.totalorder %s12319_s18, 4   ;;  %s19560_s12 = smov %s12249_s13 }
0x17eb   : > { %s19561_s13 = smov %s12253_s14  ;;  %s19562_s14 = smov %s12330_s21 }
0x17ec   : > { %s19563_s15 = smov %s12319_s18  ;;  %16 = sbr.rel (!%p14_p7) target bundleno = 4 (0x4), region = 72 }
0x17f3   :  { %9867 = vsyncpa [#allocation3], 1 }
0x17f4   :  { %9869 = vsyncpa [#allocation3 + $0x1], 1 }
0x17f5   :  { %9870 = vsyncpa [#allocation4], 1 }
0x17f6   :  { %9872 = vsyncpa [#allocation4 + $0x1], 1 }

</bundles_post_ra>
